<compile_context>
chip_gen: v7x
topology: tpu7x:2x2x1
jax: 0.10.0
libtpu: 0.0.40
codegen_flags: <defaults>
</compile_context>

<pallas_src>
import jax
import jax.numpy as jnp
from jax import lax
from jax.experimental import pallas as pl
from jax.experimental.pallas import tpu as pltpu


# ----------------------------- parameter setup ------------------------------
def init_conv_bn(key, cin, cout, ksize, eps=1e-5):
    """Deterministic synthetic Conv2d(+bias) + BatchNorm2d (eval) parameters,
    folded into weight (HWIO) + per-channel scale/shift."""
    kw, kb, kg, kbe, km, kv = jax.random.split(key, 6)
    w = 0.2 * jax.random.normal(kw, (ksize, ksize, cin, cout), jnp.float32)
    bias = 0.1 * jax.random.normal(kb, (cout,), jnp.float32)
    gamma = 1.0 + 0.2 * jax.random.normal(kg, (cout,), jnp.float32)
    beta = 0.1 * jax.random.normal(kbe, (cout,), jnp.float32)
    mean = 0.1 * jax.random.normal(km, (cout,), jnp.float32)
    var = jax.random.uniform(kv, (cout,), jnp.float32, minval=0.5, maxval=1.5)
    scale = gamma / jnp.sqrt(var + eps)
    shift = (bias - mean) * scale + beta
    return {"w": w, "scale": scale, "shift": shift}


def init_inception_params(key, in_planes, n1, n3_reduce, n3, n5_reduce, n5,
                          pool_proj):
    ks = jax.random.split(key, 7)
    return {
        "b1":  init_conv_bn(ks[0], in_planes, n1, 1),
        "b2r": init_conv_bn(ks[1], in_planes, n3_reduce, 1),
        "b2":  init_conv_bn(ks[2], n3_reduce, n3, 3),
        "b3r": init_conv_bn(ks[3], in_planes, n5_reduce, 1),
        "b3a": init_conv_bn(ks[4], n5_reduce, n5, 3),
        "b3b": init_conv_bn(ks[5], n5, n5, 3),
        "b4":  init_conv_bn(ks[6], in_planes, pool_proj, 1),
    }


# ------------------------------ Pallas forward -------------------------------
def inception_forward(x_nchw, params, *, compute_dtype=jnp.float32,
                      vmem_limit_bytes=32 * 1024 * 1024):
    f32 = jnp.float32
    cd = compute_dtype
    x = jnp.transpose(x_nchw, (0, 2, 3, 1)).astype(f32)   # NCHW -> NHWC
    N, H, W, Cin = x.shape

    n1 = params["b1"]["w"].shape[-1]
    n3r = params["b2r"]["w"].shape[-1]
    n3 = params["b2"]["w"].shape[-1]
    n5r = params["b3r"]["w"].shape[-1]
    n5 = params["b3a"]["w"].shape[-1]
    npj = params["b4"]["w"].shape[-1]
    Cred = n1 + n3r + n5r
    Ctot = n1 + n3 + n5 + npj

    # ---- weight prep: no H-broadcast; 1x1 -> (Cin,Cout), 3x3 -> (9*Cin,Cout) ---
    # fuse the three 1x1 reduce convs that all consume x along Cout.
    w_red = jnp.concatenate([params["b1"]["w"][0, 0],
                             params["b2r"]["w"][0, 0],
                             params["b3r"]["w"][0, 0]], axis=1).astype(cd)
    s_red = jnp.concatenate([params["b1"]["scale"], params["b2r"]["scale"],
                             params["b3r"]["scale"]])[None, :]
    b_red = jnp.concatenate([params["b1"]["shift"], params["b2r"]["shift"],
                             params["b3r"]["shift"]])[None, :]

    def k3(p):   # 3x3 conv (HWIO) -> im2col weight (9*Cin, Cout)
        cin, cout = p["w"].shape[2], p["w"].shape[3]
        return (p["w"].reshape(9 * cin, cout).astype(cd),
                p["scale"][None, :], p["shift"][None, :])

    w2, s2, b2 = k3(params["b2"])
    w3a, s3a, b3a = k3(params["b3a"])
    w3b, s3b, b3b = k3(params["b3b"])
    w4 = params["b4"]["w"][0, 0].astype(cd)
    s4 = params["b4"]["scale"][None, :]
    b4 = params["b4"]["shift"][None, :]

    def full_spec(a):
        nd = a.ndim
        return pl.BlockSpec(a.shape, lambda n, _nd=nd: (0,) * _nd)

    # ------------------------------ fused kernel -----------------------------
    def inception_kernel(x_ref,
                         wr_ref, sr_ref, br_ref,
                         w2_ref, s2_ref, b2_ref,
                         w3a_ref, s3a_ref, b3a_ref,
                         w3b_ref, s3b_ref, b3b_ref,
                         w4_ref, s4_ref, b4_ref,
                         o_ref,
                         pad2, pad3a, pad3b, padp):

        def set_border(pad_ref, c, val):
            # refresh only the 1-pixel halo; the interior is rewritten each step
            pad_ref[0:1, :, :] = jnp.full((1, W + 2, c), val, f32)
            pad_ref[H + 1:H + 2, :, :] = jnp.full((1, W + 2, c), val, f32)
            pad_ref[:, 0:1, :] = jnp.full((H + 2, 1, c), val, f32)
            pad_ref[:, W + 1:W + 2, :] = jnp.full((H + 2, 1, c), val, f32)

        def conv3x3(pad_ref, r, cin, w_ref, s_ref, b_ref):
            # im2col: 9 shifted taps concatenated on lanes -> one MXU matmul
            set_border(pad_ref, cin, 0.0)
            pad_ref[1:H + 1, 1:W + 1, :] = r
            taps = [pad_ref[dy:dy + H, dx:dx + W, :].reshape(H * W, cin)
                    for dy in range(3) for dx in range(3)]
            col = jnp.concatenate(taps, axis=-1).astype(cd)   # (H*W, 9*cin)
            y = jnp.dot(col, w_ref[...], preferred_element_type=f32)
            return jnp.maximum(y * s_ref[...] + b_ref[...], 0.0)

        x_img = x_ref[0]                               # (H, W, Cin)
        xf = x_img.reshape(H * W, Cin)

        # fused 1x1 convs: branch1 + branch2-reduce + branch3-reduce
        red = jnp.dot(xf.astype(cd), wr_ref[...], preferred_element_type=f32)
        red = jnp.maximum(red * sr_ref[...] + br_ref[...], 0.0)
        y1 = red[:, 0:n1]                                        # (H*W, n1)
        r2 = red[:, n1:n1 + n3r].reshape(H, W, n3r)
        r3 = red[:, n1 + n3r:Cred].reshape(H, W, n5r)

        # branch 2: 3x3 conv
        y2 = conv3x3(pad2, r2, n3r, w2_ref, s2_ref, b2_ref)      # (H*W, n3)

        # branch 3: 3x3 -> 3x3
        mid = conv3x3(pad3a, r3, n5r, w3a_ref, s3a_ref, b3a_ref)
        y3 = conv3x3(pad3b, mid.reshape(H, W, n5), n5,
                     w3b_ref, s3b_ref, b3b_ref)                  # (H*W, n5)

        # branch 4: 3x3 maxpool (stride 1, pad 1) -> 1x1 conv
        set_border(padp, Cin, -jnp.inf)
        padp[1:H + 1, 1:W + 1, :] = x_img
        m = padp[0:H, 0:W, :]
        for k in range(1, 9):
            dy, dx = k // 3, k % 3
            m = jnp.maximum(m, padp[dy:dy + H, dx:dx + W, :])
        y4 = jnp.dot(m.reshape(H * W, Cin).astype(cd), w4_ref[...],
                     preferred_element_type=f32)
        y4 = jnp.maximum(y4 * s4_ref[...] + b4_ref[...], 0.0)    # (H*W, npj)

        # lane-dense concatenated store (== torch.cat(dim=1) in NCHW)
        out = jnp.concatenate([y1, y2, y3, y4], axis=-1)         # (H*W, Ctot)
        o_ref[0] = out.reshape(H, W, Ctot)

    args = (x, w_red, s_red, b_red, w2, s2, b2, w3a, s3a, b3a,
            w3b, s3b, b3b, w4, s4, b4)

    y = pl.pallas_call(
        inception_kernel,
        out_shape=jax.ShapeDtypeStruct((N, H, W, Ctot), f32),
        grid=(N,),
        in_specs=[pl.BlockSpec((1, H, W, Cin), lambda n: (n, 0, 0, 0))]
                 + [full_spec(a) for a in args[1:]],
        out_specs=pl.BlockSpec((1, H, W, Ctot), lambda n: (n, 0, 0, 0)),
        scratch_shapes=[pltpu.VMEM((H + 2, W + 2, n3r), f32),
                        pltpu.VMEM((H + 2, W + 2, n5r), f32),
                        pltpu.VMEM((H + 2, W + 2, n5), f32),
                        pltpu.VMEM((H + 2, W + 2, Cin), f32)],
        compiler_params=pltpu.CompilerParams(
            dimension_semantics=("parallel",),
            vmem_limit_bytes=vmem_limit_bytes),
    )(*args)

    return jnp.transpose(y, (0, 3, 1, 2))   # NHWC -> NCHW (module interface)


# -------------------------- pure-JAX reference -------------------------------
def _cbr_ref(x, p, padding):
    y = lax.conv_general_dilated(x, p["w"], (1, 1), padding,
                                 dimension_numbers=("NHWC", "HWIO", "NHWC"))
    return jnp.maximum(y * p["scale"] + p["shift"], 0.0)


def inception_reference(x_nchw, params):
    x = jnp.transpose(x_nchw, (0, 2, 3, 1)).astype(jnp.float32)
    same, valid = [(1, 1), (1, 1)], [(0, 0), (0, 0)]
    y1 = _cbr_ref(x, params["b1"], valid)
    y2 = _cbr_ref(_cbr_ref(x, params["b2r"], valid), params["b2"], same)
    y3 = _cbr_ref(_cbr_ref(_cbr_ref(x, params["b3r"], valid),
                           params["b3a"], same), params["b3b"], same)
    pooled = lax.reduce_window(x, -jnp.inf, lax.max, (1, 3, 3, 1),
                               (1, 1, 1, 1), [(0, 0), (1, 1), (1, 1), (0, 0)])
    y4 = _cbr_ref(pooled, params["b4"], valid)
    y = jnp.concatenate([y1, y2, y3, y4], axis=-1)
    return jnp.transpose(y, (0, 3, 1, 2))


if __name__ == "__main__":
    key = jax.random.PRNGKey(0)
    kx, kp = jax.random.split(key)
    in_planes, n1, n3_reduce, n3, n5_reduce, n5, pool_proj = 4, 8, 4, 8, 4, 8, 8
    x = jax.random.normal(kx, (2, in_planes, 16, 16), jnp.float32)   # NCHW
    params = init_inception_params(kp, in_planes, n1, n3_reduce, n3,
                                   n5_reduce, n5, pool_proj)

    out = jax.block_until_ready(inception_forward(x, params))
    ref = jax.block_until_ready(inception_reference(x, params))

    assert out.shape == (2, n1 + n3 + n5 + pool_proj, 16, 16), out.shape
    max_err = float(jnp.max(jnp.abs(out - ref)))
    assert jnp.allclose(out, ref, rtol=1e-4, atol=1e-4), max_err
    print("KERNEL_OK")
</pallas_src>

<mosaic_0001>
module attributes {stable_mosaic.version = 11 : i64} {
  func.func @inception_kernel(%arg0: i32, %arg1: memref<1x16x16x4xf32, #tpu.memory_space<vmem>>, %arg2: memref<4x16xf32, #tpu.memory_space<vmem>>, %arg3: memref<1x16xf32, #tpu.memory_space<vmem>>, %arg4: memref<1x16xf32, #tpu.memory_space<vmem>>, %arg5: memref<36x8xf32, #tpu.memory_space<vmem>>, %arg6: memref<1x8xf32, #tpu.memory_space<vmem>>, %arg7: memref<1x8xf32, #tpu.memory_space<vmem>>, %arg8: memref<36x8xf32, #tpu.memory_space<vmem>>, %arg9: memref<1x8xf32, #tpu.memory_space<vmem>>, %arg10: memref<1x8xf32, #tpu.memory_space<vmem>>, %arg11: memref<72x8xf32, #tpu.memory_space<vmem>>, %arg12: memref<1x8xf32, #tpu.memory_space<vmem>>, %arg13: memref<1x8xf32, #tpu.memory_space<vmem>>, %arg14: memref<4x8xf32, #tpu.memory_space<vmem>>, %arg15: memref<1x8xf32, #tpu.memory_space<vmem>>, %arg16: memref<1x8xf32, #tpu.memory_space<vmem>>, %arg17: memref<1x16x16x32xf32, #tpu.memory_space<vmem>>, %arg18: memref<18x18x4xf32, #tpu.memory_space<vmem>>, %arg19: memref<18x18x4xf32, #tpu.memory_space<vmem>>, %arg20: memref<18x18x8xf32, #tpu.memory_space<vmem>>, %arg21: memref<18x18x4xf32, #tpu.memory_space<vmem>>) attributes {dimension_semantics = [#tpu.dimension_semantics<parallel>], iteration_bounds = array<i64: 2>, scalar_prefetch = 0 : i64, scratch_operands = 4 : i64, tpu.core_type = #tpu.core_type<tc>, window_params = [{transform_indices = @transform_0, window_bounds = array<i64: 1, 16, 16, 4>}, {pipeline_mode = #tpu.pipeline_mode<synchronous>, transform_indices = @transform_1, window_bounds = array<i64: 4, 16>}, {pipeline_mode = #tpu.pipeline_mode<synchronous>, transform_indices = @transform_2, window_bounds = array<i64: 1, 16>}, {pipeline_mode = #tpu.pipeline_mode<synchronous>, transform_indices = @transform_3, window_bounds = array<i64: 1, 16>}, {pipeline_mode = #tpu.pipeline_mode<synchronous>, transform_indices = @transform_4, window_bounds = array<i64: 36, 8>}, {pipeline_mode = #tpu.pipeline_mode<synchronous>, transform_indices = @transform_5, window_bounds = array<i64: 1, 8>}, {pipeline_mode = #tpu.pipeline_mode<synchronous>, transform_indices = @transform_6, window_bounds = array<i64: 1, 8>}, {pipeline_mode = #tpu.pipeline_mode<synchronous>, transform_indices = @transform_7, window_bounds = array<i64: 36, 8>}, {pipeline_mode = #tpu.pipeline_mode<synchronous>, transform_indices = @transform_8, window_bounds = array<i64: 1, 8>}, {pipeline_mode = #tpu.pipeline_mode<synchronous>, transform_indices = @transform_9, window_bounds = array<i64: 1, 8>}, {pipeline_mode = #tpu.pipeline_mode<synchronous>, transform_indices = @transform_10, window_bounds = array<i64: 72, 8>}, {pipeline_mode = #tpu.pipeline_mode<synchronous>, transform_indices = @transform_11, window_bounds = array<i64: 1, 8>}, {pipeline_mode = #tpu.pipeline_mode<synchronous>, transform_indices = @transform_12, window_bounds = array<i64: 1, 8>}, {pipeline_mode = #tpu.pipeline_mode<synchronous>, transform_indices = @transform_13, window_bounds = array<i64: 4, 8>}, {pipeline_mode = #tpu.pipeline_mode<synchronous>, transform_indices = @transform_14, window_bounds = array<i64: 1, 8>}, {pipeline_mode = #tpu.pipeline_mode<synchronous>, transform_indices = @transform_15, window_bounds = array<i64: 1, 8>}, {transform_indices = @transform_16, window_bounds = array<i64: 1, 16, 16, 32>}]} {
    %c0 = arith.constant 0 : index
    %c0_0 = arith.constant 0 : index
    %c0_1 = arith.constant 0 : index
    %c0_2 = arith.constant 0 : index
    %0 = vector.load %arg1[%c0, %c0_0, %c0_1, %c0_2] : memref<1x16x16x4xf32, #tpu.memory_space<vmem>>, vector<1x16x16x4xf32>
    %1 = vector.shape_cast %0 : vector<1x16x16x4xf32> to vector<16x16x4xf32>
    %2 = vector.shape_cast %1 : vector<16x16x4xf32> to vector<256x4xf32>
    %c0_3 = arith.constant 0 : index
    %c0_4 = arith.constant 0 : index
    %3 = vector.load %arg2[%c0_3, %c0_4] : memref<4x16xf32, #tpu.memory_space<vmem>>, vector<4x16xf32>
    %cst = arith.constant dense<0.000000e+00> : vector<256x16xf32>
    %4 = tpu.matmul %2, %3, %cst {dimension_numbers = #tpu.dot_dimension_numbers<[1], [0], [0], [1], [0, 0, 1, 1], [], []>} : vector<256x4xf32>, vector<4x16xf32>, vector<256x16xf32> -> vector<256x16xf32>
    %c0_5 = arith.constant 0 : index
    %c0_6 = arith.constant 0 : index
    %5 = vector.load %arg3[%c0_5, %c0_6] : memref<1x16xf32, #tpu.memory_space<vmem>>, vector<1x16xf32>
    %6 = vector.broadcast %5 : vector<1x16xf32> to vector<256x16xf32>
    %7 = arith.mulf %4, %6 : vector<256x16xf32>
    %c0_7 = arith.constant 0 : index
    %c0_8 = arith.constant 0 : index
    %8 = vector.load %arg4[%c0_7, %c0_8] : memref<1x16xf32, #tpu.memory_space<vmem>>, vector<1x16xf32>
    %9 = vector.broadcast %8 : vector<1x16xf32> to vector<256x16xf32>
    %10 = arith.addf %7, %9 : vector<256x16xf32>
    %cst_9 = arith.constant 0.000000e+00 : f32
    %11 = vector.broadcast %cst_9 : f32 to vector<256x16xf32>
    %12 = arith.maximumf %10, %11 : vector<256x16xf32>
    %13 = vector.extract_strided_slice %12 {offsets = [0, 0], sizes = [256, 8], strides = [1, 1]} : vector<256x16xf32> to vector<256x8xf32>
    %14 = vector.extract_strided_slice %12 {offsets = [0, 8], sizes = [256, 4], strides = [1, 1]} : vector<256x16xf32> to vector<256x4xf32>
    %15 = vector.shape_cast %14 : vector<256x4xf32> to vector<16x16x4xf32>
    %16 = vector.extract_strided_slice %12 {offsets = [0, 12], sizes = [256, 4], strides = [1, 1]} : vector<256x16xf32> to vector<256x4xf32>
    %17 = vector.shape_cast %16 : vector<256x4xf32> to vector<16x16x4xf32>
    %cst_10 = arith.constant 0.000000e+00 : f32
    %18 = vector.broadcast %cst_10 : f32 to vector<1x18x4xf32>
    %c0_11 = arith.constant 0 : index
    %c0_12 = arith.constant 0 : index
    %c0_13 = arith.constant 0 : index
    %19 = vector.load %arg18[%c0_11, %c0_12, %c0_13] : memref<18x18x4xf32, #tpu.memory_space<vmem>>, vector<1x18x4xf32>
    tpu.vector_store %arg18[%c0_11, %c0_12, %c0_13], %18 {strides = array<i32>} : memref<18x18x4xf32, #tpu.memory_space<vmem>>, vector<1x18x4xf32>,
    %cst_14 = arith.constant 0.000000e+00 : f32
    %20 = vector.broadcast %cst_14 : f32 to vector<1x18x4xf32>
    %c17 = arith.constant 17 : index
    %c0_15 = arith.constant 0 : index
    %c0_16 = arith.constant 0 : index
    %21 = vector.load %arg18[%c17, %c0_15, %c0_16] : memref<18x18x4xf32, #tpu.memory_space<vmem>>, vector<1x18x4xf32>
    tpu.vector_store %arg18[%c17, %c0_15, %c0_16], %20 {strides = array<i32>} : memref<18x18x4xf32, #tpu.memory_space<vmem>>, vector<1x18x4xf32>,
    %cst_17 = arith.constant 0.000000e+00 : f32
    %22 = vector.broadcast %cst_17 : f32 to vector<18x1x4xf32>
    %c0_18 = arith.constant 0 : index
    %c0_19 = arith.constant 0 : index
    %c0_20 = arith.constant 0 : index
    %23 = vector.load %arg18[%c0_18, %c0_19, %c0_20] : memref<18x18x4xf32, #tpu.memory_space<vmem>>, vector<18x1x4xf32>
    tpu.vector_store %arg18[%c0_18, %c0_19, %c0_20], %22 {strides = array<i32>} : memref<18x18x4xf32, #tpu.memory_space<vmem>>, vector<18x1x4xf32>,
    %cst_21 = arith.constant 0.000000e+00 : f32
    %24 = vector.broadcast %cst_21 : f32 to vector<18x1x4xf32>
    %c0_22 = arith.constant 0 : index
    %c17_23 = arith.constant 17 : index
    %c0_24 = arith.constant 0 : index
    %25 = vector.load %arg18[%c0_22, %c17_23, %c0_24] : memref<18x18x4xf32, #tpu.memory_space<vmem>>, vector<18x1x4xf32>
    tpu.vector_store %arg18[%c0_22, %c17_23, %c0_24], %24 {strides = array<i32>} : memref<18x18x4xf32, #tpu.memory_space<vmem>>, vector<18x1x4xf32>,
    %c1 = arith.constant 1 : index
    %c1_25 = arith.constant 1 : index
    %c0_26 = arith.constant 0 : index
    %26 = vector.load %arg18[%c1, %c1_25, %c0_26] : memref<18x18x4xf32, #tpu.memory_space<vmem>>, vector<16x16x4xf32>
    tpu.vector_store %arg18[%c1, %c1_25, %c0_26], %15 {strides = array<i32>} : memref<18x18x4xf32, #tpu.memory_space<vmem>>, vector<16x16x4xf32>,
    %c0_27 = arith.constant 0 : index
    %c0_28 = arith.constant 0 : index
    %c0_29 = arith.constant 0 : index
    %27 = vector.load %arg18[%c0_27, %c0_28, %c0_29] : memref<18x18x4xf32, #tpu.memory_space<vmem>>, vector<16x16x4xf32>
    %28 = vector.shape_cast %27 : vector<16x16x4xf32> to vector<256x4xf32>
    %c0_30 = arith.constant 0 : index
    %c1_31 = arith.constant 1 : index
    %c0_32 = arith.constant 0 : index
    %29 = vector.load %arg18[%c0_30, %c1_31, %c0_32] : memref<18x18x4xf32, #tpu.memory_space<vmem>>, vector<16x16x4xf32>
    %30 = vector.shape_cast %29 : vector<16x16x4xf32> to vector<256x4xf32>
    %c0_33 = arith.constant 0 : index
    %c2 = arith.constant 2 : index
    %c0_34 = arith.constant 0 : index
    %31 = vector.load %arg18[%c0_33, %c2, %c0_34] : memref<18x18x4xf32, #tpu.memory_space<vmem>>, vector<16x16x4xf32>
    %32 = vector.shape_cast %31 : vector<16x16x4xf32> to vector<256x4xf32>
    %c1_35 = arith.constant 1 : index
    %c0_36 = arith.constant 0 : index
    %c0_37 = arith.constant 0 : index
    %33 = vector.load %arg18[%c1_35, %c0_36, %c0_37] : memref<18x18x4xf32, #tpu.memory_space<vmem>>, vector<16x16x4xf32>
    %34 = vector.shape_cast %33 : vector<16x16x4xf32> to vector<256x4xf32>
    %c1_38 = arith.constant 1 : index
    %c1_39 = arith.constant 1 : index
    %c0_40 = arith.constant 0 : index
    %35 = vector.load %arg18[%c1_38, %c1_39, %c0_40] : memref<18x18x4xf32, #tpu.memory_space<vmem>>, vector<16x16x4xf32>
    %36 = vector.shape_cast %35 : vector<16x16x4xf32> to vector<256x4xf32>
    %c1_41 = arith.constant 1 : index
    %c2_42 = arith.constant 2 : index
    %c0_43 = arith.constant 0 : index
    %37 = vector.load %arg18[%c1_41, %c2_42, %c0_43] : memref<18x18x4xf32, #tpu.memory_space<vmem>>, vector<16x16x4xf32>
    %38 = vector.shape_cast %37 : vector<16x16x4xf32> to vector<256x4xf32>
    %c2_44 = arith.constant 2 : index
    %c0_45 = arith.constant 0 : index
    %c0_46 = arith.constant 0 : index
    %39 = vector.load %arg18[%c2_44, %c0_45, %c0_46] : memref<18x18x4xf32, #tpu.memory_space<vmem>>, vector<16x16x4xf32>
    %40 = vector.shape_cast %39 : vector<16x16x4xf32> to vector<256x4xf32>
    %c2_47 = arith.constant 2 : index
    %c1_48 = arith.constant 1 : index
    %c0_49 = arith.constant 0 : index
    %41 = vector.load %arg18[%c2_47, %c1_48, %c0_49] : memref<18x18x4xf32, #tpu.memory_space<vmem>>, vector<16x16x4xf32>
    %42 = vector.shape_cast %41 : vector<16x16x4xf32> to vector<256x4xf32>
    %c2_50 = arith.constant 2 : index
    %c2_51 = arith.constant 2 : index
    %c0_52 = arith.constant 0 : index
    %43 = vector.load %arg18[%c2_50, %c2_51, %c0_52] : memref<18x18x4xf32, #tpu.memory_space<vmem>>, vector<16x16x4xf32>
    %44 = vector.shape_cast %43 : vector<16x16x4xf32> to vector<256x4xf32>
    %45 = tpu.concatenate %28, %30, %32, %34, %36, %38, %40, %42, %44 in 1 : vector<256x4xf32>, vector<256x4xf32>, vector<256x4xf32>, vector<256x4xf32>, vector<256x4xf32>, vector<256x4xf32>, vector<256x4xf32>, vector<256x4xf32>, vector<256x4xf32> -> vector<256x36xf32>
    %c0_53 = arith.constant 0 : index
    %c0_54 = arith.constant 0 : index
    %46 = vector.load %arg5[%c0_53, %c0_54] : memref<36x8xf32, #tpu.memory_space<vmem>>, vector<36x8xf32>
    %cst_55 = arith.constant dense<0.000000e+00> : vector<256x8xf32>
    %47 = tpu.matmul %45, %46, %cst_55 {dimension_numbers = #tpu.dot_dimension_numbers<[1], [0], [0], [1], [0, 0, 1, 1], [], []>} : vector<256x36xf32>, vector<36x8xf32>, vector<256x8xf32> -> vector<256x8xf32>
    %c0_56 = arith.constant 0 : index
    %c0_57 = arith.constant 0 : index
    %48 = vector.load %arg6[%c0_56, %c0_57] : memref<1x8xf32, #tpu.memory_space<vmem>>, vector<1x8xf32>
    %49 = vector.broadcast %48 : vector<1x8xf32> to vector<256x8xf32>
    %50 = arith.mulf %47, %49 : vector<256x8xf32>
    %c0_58 = arith.constant 0 : index
    %c0_59 = arith.constant 0 : index
    %51 = vector.load %arg7[%c0_58, %c0_59] : memref<1x8xf32, #tpu.memory_space<vmem>>, vector<1x8xf32>
    %52 = vector.broadcast %51 : vector<1x8xf32> to vector<256x8xf32>
    %53 = arith.addf %50, %52 : vector<256x8xf32>
    %cst_60 = arith.constant 0.000000e+00 : f32
    %54 = vector.broadcast %cst_60 : f32 to vector<256x8xf32>
    %55 = arith.maximumf %53, %54 : vector<256x8xf32>
    %cst_61 = arith.constant 0.000000e+00 : f32
    %56 = vector.broadcast %cst_61 : f32 to vector<1x18x4xf32>
    %c0_62 = arith.constant 0 : index
    %c0_63 = arith.constant 0 : index
    %c0_64 = arith.constant 0 : index
    %57 = vector.load %arg19[%c0_62, %c0_63, %c0_64] : memref<18x18x4xf32, #tpu.memory_space<vmem>>, vector<1x18x4xf32>
    tpu.vector_store %arg19[%c0_62, %c0_63, %c0_64], %56 {strides = array<i32>} : memref<18x18x4xf32, #tpu.memory_space<vmem>>, vector<1x18x4xf32>,
    %cst_65 = arith.constant 0.000000e+00 : f32
    %58 = vector.broadcast %cst_65 : f32 to vector<1x18x4xf32>
    %c17_66 = arith.constant 17 : index
    %c0_67 = arith.constant 0 : index
    %c0_68 = arith.constant 0 : index
    %59 = vector.load %arg19[%c17_66, %c0_67, %c0_68] : memref<18x18x4xf32, #tpu.memory_space<vmem>>, vector<1x18x4xf32>
    tpu.vector_store %arg19[%c17_66, %c0_67, %c0_68], %58 {strides = array<i32>} : memref<18x18x4xf32, #tpu.memory_space<vmem>>, vector<1x18x4xf32>,
    %cst_69 = arith.constant 0.000000e+00 : f32
    %60 = vector.broadcast %cst_69 : f32 to vector<18x1x4xf32>
    %c0_70 = arith.constant 0 : index
    %c0_71 = arith.constant 0 : index
    %c0_72 = arith.constant 0 : index
    %61 = vector.load %arg19[%c0_70, %c0_71, %c0_72] : memref<18x18x4xf32, #tpu.memory_space<vmem>>, vector<18x1x4xf32>
    tpu.vector_store %arg19[%c0_70, %c0_71, %c0_72], %60 {strides = array<i32>} : memref<18x18x4xf32, #tpu.memory_space<vmem>>, vector<18x1x4xf32>,
    %cst_73 = arith.constant 0.000000e+00 : f32
    %62 = vector.broadcast %cst_73 : f32 to vector<18x1x4xf32>
    %c0_74 = arith.constant 0 : index
    %c17_75 = arith.constant 17 : index
    %c0_76 = arith.constant 0 : index
    %63 = vector.load %arg19[%c0_74, %c17_75, %c0_76] : memref<18x18x4xf32, #tpu.memory_space<vmem>>, vector<18x1x4xf32>
    tpu.vector_store %arg19[%c0_74, %c17_75, %c0_76], %62 {strides = array<i32>} : memref<18x18x4xf32, #tpu.memory_space<vmem>>, vector<18x1x4xf32>,
    %c1_77 = arith.constant 1 : index
    %c1_78 = arith.constant 1 : index
    %c0_79 = arith.constant 0 : index
    %64 = vector.load %arg19[%c1_77, %c1_78, %c0_79] : memref<18x18x4xf32, #tpu.memory_space<vmem>>, vector<16x16x4xf32>
    tpu.vector_store %arg19[%c1_77, %c1_78, %c0_79], %17 {strides = array<i32>} : memref<18x18x4xf32, #tpu.memory_space<vmem>>, vector<16x16x4xf32>,
    %c0_80 = arith.constant 0 : index
    %c0_81 = arith.constant 0 : index
    %c0_82 = arith.constant 0 : index
    %65 = vector.load %arg19[%c0_80, %c0_81, %c0_82] : memref<18x18x4xf32, #tpu.memory_space<vmem>>, vector<16x16x4xf32>
    %66 = vector.shape_cast %65 : vector<16x16x4xf32> to vector<256x4xf32>
    %c0_83 = arith.constant 0 : index
    %c1_84 = arith.constant 1 : index
    %c0_85 = arith.constant 0 : index
    %67 = vector.load %arg19[%c0_83, %c1_84, %c0_85] : memref<18x18x4xf32, #tpu.memory_space<vmem>>, vector<16x16x4xf32>
    %68 = vector.shape_cast %67 : vector<16x16x4xf32> to vector<256x4xf32>
    %c0_86 = arith.constant 0 : index
    %c2_87 = arith.constant 2 : index
    %c0_88 = arith.constant 0 : index
    %69 = vector.load %arg19[%c0_86, %c2_87, %c0_88] : memref<18x18x4xf32, #tpu.memory_space<vmem>>, vector<16x16x4xf32>
    %70 = vector.shape_cast %69 : vector<16x16x4xf32> to vector<256x4xf32>
    %c1_89 = arith.constant 1 : index
    %c0_90 = arith.constant 0 : index
    %c0_91 = arith.constant 0 : index
    %71 = vector.load %arg19[%c1_89, %c0_90, %c0_91] : memref<18x18x4xf32, #tpu.memory_space<vmem>>, vector<16x16x4xf32>
    %72 = vector.shape_cast %71 : vector<16x16x4xf32> to vector<256x4xf32>
    %c1_92 = arith.constant 1 : index
    %c1_93 = arith.constant 1 : index
    %c0_94 = arith.constant 0 : index
    %73 = vector.load %arg19[%c1_92, %c1_93, %c0_94] : memref<18x18x4xf32, #tpu.memory_space<vmem>>, vector<16x16x4xf32>
    %74 = vector.shape_cast %73 : vector<16x16x4xf32> to vector<256x4xf32>
    %c1_95 = arith.constant 1 : index
    %c2_96 = arith.constant 2 : index
    %c0_97 = arith.constant 0 : index
    %75 = vector.load %arg19[%c1_95, %c2_96, %c0_97] : memref<18x18x4xf32, #tpu.memory_space<vmem>>, vector<16x16x4xf32>
    %76 = vector.shape_cast %75 : vector<16x16x4xf32> to vector<256x4xf32>
    %c2_98 = arith.constant 2 : index
    %c0_99 = arith.constant 0 : index
    %c0_100 = arith.constant 0 : index
    %77 = vector.load %arg19[%c2_98, %c0_99, %c0_100] : memref<18x18x4xf32, #tpu.memory_space<vmem>>, vector<16x16x4xf32>
    %78 = vector.shape_cast %77 : vector<16x16x4xf32> to vector<256x4xf32>
    %c2_101 = arith.constant 2 : index
    %c1_102 = arith.constant 1 : index
    %c0_103 = arith.constant 0 : index
    %79 = vector.load %arg19[%c2_101, %c1_102, %c0_103] : memref<18x18x4xf32, #tpu.memory_space<vmem>>, vector<16x16x4xf32>
    %80 = vector.shape_cast %79 : vector<16x16x4xf32> to vector<256x4xf32>
    %c2_104 = arith.constant 2 : index
    %c2_105 = arith.constant 2 : index
    %c0_106 = arith.constant 0 : index
    %81 = vector.load %arg19[%c2_104, %c2_105, %c0_106] : memref<18x18x4xf32, #tpu.memory_space<vmem>>, vector<16x16x4xf32>
    %82 = vector.shape_cast %81 : vector<16x16x4xf32> to vector<256x4xf32>
    %83 = tpu.concatenate %66, %68, %70, %72, %74, %76, %78, %80, %82 in 1 : vector<256x4xf32>, vector<256x4xf32>, vector<256x4xf32>, vector<256x4xf32>, vector<256x4xf32>, vector<256x4xf32>, vector<256x4xf32>, vector<256x4xf32>, vector<256x4xf32> -> vector<256x36xf32>
    %c0_107 = arith.constant 0 : index
    %c0_108 = arith.constant 0 : index
    %84 = vector.load %arg8[%c0_107, %c0_108] : memref<36x8xf32, #tpu.memory_space<vmem>>, vector<36x8xf32>
    %cst_109 = arith.constant dense<0.000000e+00> : vector<256x8xf32>
    %85 = tpu.matmul %83, %84, %cst_109 {dimension_numbers = #tpu.dot_dimension_numbers<[1], [0], [0], [1], [0, 0, 1, 1], [], []>} : vector<256x36xf32>, vector<36x8xf32>, vector<256x8xf32> -> vector<256x8xf32>
    %c0_110 = arith.constant 0 : index
    %c0_111 = arith.constant 0 : index
    %86 = vector.load %arg9[%c0_110, %c0_111] : memref<1x8xf32, #tpu.memory_space<vmem>>, vector<1x8xf32>
    %87 = vector.broadcast %86 : vector<1x8xf32> to vector<256x8xf32>
    %88 = arith.mulf %85, %87 : vector<256x8xf32>
    %c0_112 = arith.constant 0 : index
    %c0_113 = arith.constant 0 : index
    %89 = vector.load %arg10[%c0_112, %c0_113] : memref<1x8xf32, #tpu.memory_space<vmem>>, vector<1x8xf32>
    %90 = vector.broadcast %89 : vector<1x8xf32> to vector<256x8xf32>
    %91 = arith.addf %88, %90 : vector<256x8xf32>
    %cst_114 = arith.constant 0.000000e+00 : f32
    %92 = vector.broadcast %cst_114 : f32 to vector<256x8xf32>
    %93 = arith.maximumf %91, %92 : vector<256x8xf32>
    %94 = vector.shape_cast %93 : vector<256x8xf32> to vector<16x16x8xf32>
    %cst_115 = arith.constant 0.000000e+00 : f32
    %95 = vector.broadcast %cst_115 : f32 to vector<1x18x8xf32>
    %c0_116 = arith.constant 0 : index
    %c0_117 = arith.constant 0 : index
    %c0_118 = arith.constant 0 : index
    %96 = vector.load %arg20[%c0_116, %c0_117, %c0_118] : memref<18x18x8xf32, #tpu.memory_space<vmem>>, vector<1x18x8xf32>
    tpu.vector_store %arg20[%c0_116, %c0_117, %c0_118], %95 {strides = array<i32>} : memref<18x18x8xf32, #tpu.memory_space<vmem>>, vector<1x18x8xf32>,
    %cst_119 = arith.constant 0.000000e+00 : f32
    %97 = vector.broadcast %cst_119 : f32 to vector<1x18x8xf32>
    %c17_120 = arith.constant 17 : index
    %c0_121 = arith.constant 0 : index
    %c0_122 = arith.constant 0 : index
    %98 = vector.load %arg20[%c17_120, %c0_121, %c0_122] : memref<18x18x8xf32, #tpu.memory_space<vmem>>, vector<1x18x8xf32>
    tpu.vector_store %arg20[%c17_120, %c0_121, %c0_122], %97 {strides = array<i32>} : memref<18x18x8xf32, #tpu.memory_space<vmem>>, vector<1x18x8xf32>,
    %cst_123 = arith.constant 0.000000e+00 : f32
    %99 = vector.broadcast %cst_123 : f32 to vector<18x1x8xf32>
    %c0_124 = arith.constant 0 : index
    %c0_125 = arith.constant 0 : index
    %c0_126 = arith.constant 0 : index
    %100 = vector.load %arg20[%c0_124, %c0_125, %c0_126] : memref<18x18x8xf32, #tpu.memory_space<vmem>>, vector<18x1x8xf32>
    tpu.vector_store %arg20[%c0_124, %c0_125, %c0_126], %99 {strides = array<i32>} : memref<18x18x8xf32, #tpu.memory_space<vmem>>, vector<18x1x8xf32>,
    %cst_127 = arith.constant 0.000000e+00 : f32
    %101 = vector.broadcast %cst_127 : f32 to vector<18x1x8xf32>
    %c0_128 = arith.constant 0 : index
    %c17_129 = arith.constant 17 : index
    %c0_130 = arith.constant 0 : index
    %102 = vector.load %arg20[%c0_128, %c17_129, %c0_130] : memref<18x18x8xf32, #tpu.memory_space<vmem>>, vector<18x1x8xf32>
    tpu.vector_store %arg20[%c0_128, %c17_129, %c0_130], %101 {strides = array<i32>} : memref<18x18x8xf32, #tpu.memory_space<vmem>>, vector<18x1x8xf32>,
    %c1_131 = arith.constant 1 : index
    %c1_132 = arith.constant 1 : index
    %c0_133 = arith.constant 0 : index
    %103 = vector.load %arg20[%c1_131, %c1_132, %c0_133] : memref<18x18x8xf32, #tpu.memory_space<vmem>>, vector<16x16x8xf32>
    tpu.vector_store %arg20[%c1_131, %c1_132, %c0_133], %94 {strides = array<i32>} : memref<18x18x8xf32, #tpu.memory_space<vmem>>, vector<16x16x8xf32>,
    %c0_134 = arith.constant 0 : index
    %c0_135 = arith.constant 0 : index
    %c0_136 = arith.constant 0 : index
    %104 = vector.load %arg20[%c0_134, %c0_135, %c0_136] : memref<18x18x8xf32, #tpu.memory_space<vmem>>, vector<16x16x8xf32>
    %105 = vector.shape_cast %104 : vector<16x16x8xf32> to vector<256x8xf32>
    %c0_137 = arith.constant 0 : index
    %c1_138 = arith.constant 1 : index
    %c0_139 = arith.constant 0 : index
    %106 = vector.load %arg20[%c0_137, %c1_138, %c0_139] : memref<18x18x8xf32, #tpu.memory_space<vmem>>, vector<16x16x8xf32>
    %107 = vector.shape_cast %106 : vector<16x16x8xf32> to vector<256x8xf32>
    %c0_140 = arith.constant 0 : index
    %c2_141 = arith.constant 2 : index
    %c0_142 = arith.constant 0 : index
    %108 = vector.load %arg20[%c0_140, %c2_141, %c0_142] : memref<18x18x8xf32, #tpu.memory_space<vmem>>, vector<16x16x8xf32>
    %109 = vector.shape_cast %108 : vector<16x16x8xf32> to vector<256x8xf32>
    %c1_143 = arith.constant 1 : index
    %c0_144 = arith.constant 0 : index
    %c0_145 = arith.constant 0 : index
    %110 = vector.load %arg20[%c1_143, %c0_144, %c0_145] : memref<18x18x8xf32, #tpu.memory_space<vmem>>, vector<16x16x8xf32>
    %111 = vector.shape_cast %110 : vector<16x16x8xf32> to vector<256x8xf32>
    %c1_146 = arith.constant 1 : index
    %c1_147 = arith.constant 1 : index
    %c0_148 = arith.constant 0 : index
    %112 = vector.load %arg20[%c1_146, %c1_147, %c0_148] : memref<18x18x8xf32, #tpu.memory_space<vmem>>, vector<16x16x8xf32>
    %113 = vector.shape_cast %112 : vector<16x16x8xf32> to vector<256x8xf32>
    %c1_149 = arith.constant 1 : index
    %c2_150 = arith.constant 2 : index
    %c0_151 = arith.constant 0 : index
    %114 = vector.load %arg20[%c1_149, %c2_150, %c0_151] : memref<18x18x8xf32, #tpu.memory_space<vmem>>, vector<16x16x8xf32>
    %115 = vector.shape_cast %114 : vector<16x16x8xf32> to vector<256x8xf32>
    %c2_152 = arith.constant 2 : index
    %c0_153 = arith.constant 0 : index
    %c0_154 = arith.constant 0 : index
    %116 = vector.load %arg20[%c2_152, %c0_153, %c0_154] : memref<18x18x8xf32, #tpu.memory_space<vmem>>, vector<16x16x8xf32>
    %117 = vector.shape_cast %116 : vector<16x16x8xf32> to vector<256x8xf32>
    %c2_155 = arith.constant 2 : index
    %c1_156 = arith.constant 1 : index
    %c0_157 = arith.constant 0 : index
    %118 = vector.load %arg20[%c2_155, %c1_156, %c0_157] : memref<18x18x8xf32, #tpu.memory_space<vmem>>, vector<16x16x8xf32>
    %119 = vector.shape_cast %118 : vector<16x16x8xf32> to vector<256x8xf32>
    %c2_158 = arith.constant 2 : index
    %c2_159 = arith.constant 2 : index
    %c0_160 = arith.constant 0 : index
    %120 = vector.load %arg20[%c2_158, %c2_159, %c0_160] : memref<18x18x8xf32, #tpu.memory_space<vmem>>, vector<16x16x8xf32>
    %121 = vector.shape_cast %120 : vector<16x16x8xf32> to vector<256x8xf32>
    %122 = tpu.concatenate %105, %107, %109, %111, %113, %115, %117, %119, %121 in 1 : vector<256x8xf32>, vector<256x8xf32>, vector<256x8xf32>, vector<256x8xf32>, vector<256x8xf32>, vector<256x8xf32>, vector<256x8xf32>, vector<256x8xf32>, vector<256x8xf32> -> vector<256x72xf32>
    %c0_161 = arith.constant 0 : index
    %c0_162 = arith.constant 0 : index
    %123 = vector.load %arg11[%c0_161, %c0_162] : memref<72x8xf32, #tpu.memory_space<vmem>>, vector<72x8xf32>
    %cst_163 = arith.constant dense<0.000000e+00> : vector<256x8xf32>
    %124 = tpu.matmul %122, %123, %cst_163 {dimension_numbers = #tpu.dot_dimension_numbers<[1], [0], [0], [1], [0, 0, 1, 1], [], []>} : vector<256x72xf32>, vector<72x8xf32>, vector<256x8xf32> -> vector<256x8xf32>
    %c0_164 = arith.constant 0 : index
    %c0_165 = arith.constant 0 : index
    %125 = vector.load %arg12[%c0_164, %c0_165] : memref<1x8xf32, #tpu.memory_space<vmem>>, vector<1x8xf32>
    %126 = vector.broadcast %125 : vector<1x8xf32> to vector<256x8xf32>
    %127 = arith.mulf %124, %126 : vector<256x8xf32>
    %c0_166 = arith.constant 0 : index
    %c0_167 = arith.constant 0 : index
    %128 = vector.load %arg13[%c0_166, %c0_167] : memref<1x8xf32, #tpu.memory_space<vmem>>, vector<1x8xf32>
    %129 = vector.broadcast %128 : vector<1x8xf32> to vector<256x8xf32>
    %130 = arith.addf %127, %129 : vector<256x8xf32>
    %cst_168 = arith.constant 0.000000e+00 : f32
    %131 = vector.broadcast %cst_168 : f32 to vector<256x8xf32>
    %132 = arith.maximumf %130, %131 : vector<256x8xf32>
    %cst_169 = arith.constant 0xFF800000 : f32
    %133 = vector.broadcast %cst_169 : f32 to vector<1x18x4xf32>
    %c0_170 = arith.constant 0 : index
    %c0_171 = arith.constant 0 : index
    %c0_172 = arith.constant 0 : index
    %134 = vector.load %arg21[%c0_170, %c0_171, %c0_172] : memref<18x18x4xf32, #tpu.memory_space<vmem>>, vector<1x18x4xf32>
    tpu.vector_store %arg21[%c0_170, %c0_171, %c0_172], %133 {strides = array<i32>} : memref<18x18x4xf32, #tpu.memory_space<vmem>>, vector<1x18x4xf32>,
    %cst_173 = arith.constant 0xFF800000 : f32
    %135 = vector.broadcast %cst_173 : f32 to vector<1x18x4xf32>
    %c17_174 = arith.constant 17 : index
    %c0_175 = arith.constant 0 : index
    %c0_176 = arith.constant 0 : index
    %136 = vector.load %arg21[%c17_174, %c0_175, %c0_176] : memref<18x18x4xf32, #tpu.memory_space<vmem>>, vector<1x18x4xf32>
    tpu.vector_store %arg21[%c17_174, %c0_175, %c0_176], %135 {strides = array<i32>} : memref<18x18x4xf32, #tpu.memory_space<vmem>>, vector<1x18x4xf32>,
    %cst_177 = arith.constant 0xFF800000 : f32
    %137 = vector.broadcast %cst_177 : f32 to vector<18x1x4xf32>
    %c0_178 = arith.constant 0 : index
    %c0_179 = arith.constant 0 : index
    %c0_180 = arith.constant 0 : index
    %138 = vector.load %arg21[%c0_178, %c0_179, %c0_180] : memref<18x18x4xf32, #tpu.memory_space<vmem>>, vector<18x1x4xf32>
    tpu.vector_store %arg21[%c0_178, %c0_179, %c0_180], %137 {strides = array<i32>} : memref<18x18x4xf32, #tpu.memory_space<vmem>>, vector<18x1x4xf32>,
    %cst_181 = arith.constant 0xFF800000 : f32
    %139 = vector.broadcast %cst_181 : f32 to vector<18x1x4xf32>
    %c0_182 = arith.constant 0 : index
    %c17_183 = arith.constant 17 : index
    %c0_184 = arith.constant 0 : index
    %140 = vector.load %arg21[%c0_182, %c17_183, %c0_184] : memref<18x18x4xf32, #tpu.memory_space<vmem>>, vector<18x1x4xf32>
    tpu.vector_store %arg21[%c0_182, %c17_183, %c0_184], %139 {strides = array<i32>} : memref<18x18x4xf32, #tpu.memory_space<vmem>>, vector<18x1x4xf32>,
    %c1_185 = arith.constant 1 : index
    %c1_186 = arith.constant 1 : index
    %c0_187 = arith.constant 0 : index
    %141 = vector.load %arg21[%c1_185, %c1_186, %c0_187] : memref<18x18x4xf32, #tpu.memory_space<vmem>>, vector<16x16x4xf32>
    tpu.vector_store %arg21[%c1_185, %c1_186, %c0_187], %1 {strides = array<i32>} : memref<18x18x4xf32, #tpu.memory_space<vmem>>, vector<16x16x4xf32>,
    %c0_188 = arith.constant 0 : index
    %c0_189 = arith.constant 0 : index
    %c0_190 = arith.constant 0 : index
    %142 = vector.load %arg21[%c0_188, %c0_189, %c0_190] : memref<18x18x4xf32, #tpu.memory_space<vmem>>, vector<16x16x4xf32>
    %c0_191 = arith.constant 0 : index
    %c1_192 = arith.constant 1 : index
    %c0_193 = arith.constant 0 : index
    %143 = vector.load %arg21[%c0_191, %c1_192, %c0_193] : memref<18x18x4xf32, #tpu.memory_space<vmem>>, vector<16x16x4xf32>
    %144 = arith.maximumf %142, %143 : vector<16x16x4xf32>
    %c0_194 = arith.constant 0 : index
    %c2_195 = arith.constant 2 : index
    %c0_196 = arith.constant 0 : index
    %145 = vector.load %arg21[%c0_194, %c2_195, %c0_196] : memref<18x18x4xf32, #tpu.memory_space<vmem>>, vector<16x16x4xf32>
    %146 = arith.maximumf %144, %145 : vector<16x16x4xf32>
    %c1_197 = arith.constant 1 : index
    %c0_198 = arith.constant 0 : index
    %c0_199 = arith.constant 0 : index
    %147 = vector.load %arg21[%c1_197, %c0_198, %c0_199] : memref<18x18x4xf32, #tpu.memory_space<vmem>>, vector<16x16x4xf32>
    %148 = arith.maximumf %146, %147 : vector<16x16x4xf32>
    %c1_200 = arith.constant 1 : index
    %c1_201 = arith.constant 1 : index
    %c0_202 = arith.constant 0 : index
    %149 = vector.load %arg21[%c1_200, %c1_201, %c0_202] : memref<18x18x4xf32, #tpu.memory_space<vmem>>, vector<16x16x4xf32>
    %150 = arith.maximumf %148, %149 : vector<16x16x4xf32>
    %c1_203 = arith.constant 1 : index
    %c2_204 = arith.constant 2 : index
    %c0_205 = arith.constant 0 : index
    %151 = vector.load %arg21[%c1_203, %c2_204, %c0_205] : memref<18x18x4xf32, #tpu.memory_space<vmem>>, vector<16x16x4xf32>
    %152 = arith.maximumf %150, %151 : vector<16x16x4xf32>
    %c2_206 = arith.constant 2 : index
    %c0_207 = arith.constant 0 : index
    %c0_208 = arith.constant 0 : index
    %153 = vector.load %arg21[%c2_206, %c0_207, %c0_208] : memref<18x18x4xf32, #tpu.memory_space<vmem>>, vector<16x16x4xf32>
    %154 = arith.maximumf %152, %153 : vector<16x16x4xf32>
    %c2_209 = arith.constant 2 : index
    %c1_210 = arith.constant 1 : index
    %c0_211 = arith.constant 0 : index
    %155 = vector.load %arg21[%c2_209, %c1_210, %c0_211] : memref<18x18x4xf32, #tpu.memory_space<vmem>>, vector<16x16x4xf32>
    %156 = arith.maximumf %154, %155 : vector<16x16x4xf32>
    %c2_212 = arith.constant 2 : index
    %c2_213 = arith.constant 2 : index
    %c0_214 = arith.constant 0 : index
    %157 = vector.load %arg21[%c2_212, %c2_213, %c0_214] : memref<18x18x4xf32, #tpu.memory_space<vmem>>, vector<16x16x4xf32>
    %158 = arith.maximumf %156, %157 : vector<16x16x4xf32>
    %159 = vector.shape_cast %158 : vector<16x16x4xf32> to vector<256x4xf32>
    %c0_215 = arith.constant 0 : index
    %c0_216 = arith.constant 0 : index
    %160 = vector.load %arg14[%c0_215, %c0_216] : memref<4x8xf32, #tpu.memory_space<vmem>>, vector<4x8xf32>
    %cst_217 = arith.constant dense<0.000000e+00> : vector<256x8xf32>
    %161 = tpu.matmul %159, %160, %cst_217 {dimension_numbers = #tpu.dot_dimension_numbers<[1], [0], [0], [1], [0, 0, 1, 1], [], []>} : vector<256x4xf32>, vector<4x8xf32>, vector<256x8xf32> -> vector<256x8xf32>
    %c0_218 = arith.constant 0 : index
    %c0_219 = arith.constant 0 : index
    %162 = vector.load %arg15[%c0_218, %c0_219] : memref<1x8xf32, #tpu.memory_space<vmem>>, vector<1x8xf32>
    %163 = vector.broadcast %162 : vector<1x8xf32> to vector<256x8xf32>
    %164 = arith.mulf %161, %163 : vector<256x8xf32>
    %c0_220 = arith.constant 0 : index
    %c0_221 = arith.constant 0 : index
    %165 = vector.load %arg16[%c0_220, %c0_221] : memref<1x8xf32, #tpu.memory_space<vmem>>, vector<1x8xf32>
    %166 = vector.broadcast %165 : vector<1x8xf32> to vector<256x8xf32>
    %167 = arith.addf %164, %166 : vector<256x8xf32>
    %cst_222 = arith.constant 0.000000e+00 : f32
    %168 = vector.broadcast %cst_222 : f32 to vector<256x8xf32>
    %169 = arith.maximumf %167, %168 : vector<256x8xf32>
    %170 = tpu.concatenate %13, %55, %132, %169 in 1 : vector<256x8xf32>, vector<256x8xf32>, vector<256x8xf32>, vector<256x8xf32> -> vector<256x32xf32>
    %171 = vector.shape_cast %170 : vector<256x32xf32> to vector<16x16x32xf32>
    %c0_223 = arith.constant 0 : index
    %c0_224 = arith.constant 0 : index
    %c0_225 = arith.constant 0 : index
    %c0_226 = arith.constant 0 : index
    %172 = vector.load %arg17[%c0_223, %c0_224, %c0_225, %c0_226] : memref<1x16x16x32xf32, #tpu.memory_space<vmem>>, vector<1x16x16x32xf32>
    %173 = vector.shape_cast %172 : vector<1x16x16x32xf32> to vector<16x16x32xf32>
    %174 = vector.shape_cast %171 : vector<16x16x32xf32> to vector<1x16x16x32xf32>
    tpu.vector_store %arg17[%c0_223, %c0_224, %c0_225, %c0_226], %174 {strides = array<i32>} : memref<1x16x16x32xf32, #tpu.memory_space<vmem>>, vector<1x16x16x32xf32>,
    return
  }
  func.func @transform_0(%arg0: i32) -> (i32, i32, i32, i32) {
    %c0_i32 = arith.constant 0 : i32
    %c0_i32_0 = arith.constant 0 : i32
    %c0_i32_1 = arith.constant 0 : i32
    %c0_i32_2 = arith.constant 0 : i32
    return %arg0, %c0_i32, %c0_i32_0, %c0_i32_1 : i32, i32, i32, i32
  }
  func.func @transform_1(%arg0: i32) -> (i32, i32) {
    %c0_i32 = arith.constant 0 : i32
    %c0_i32_0 = arith.constant 0 : i32
    %c0_i32_1 = arith.constant 0 : i32
    return %c0_i32, %c0_i32_0 : i32, i32
  }
  func.func @transform_2(%arg0: i32) -> (i32, i32) {
    %c0_i32 = arith.constant 0 : i32
    %c0_i32_0 = arith.constant 0 : i32
    %c0_i32_1 = arith.constant 0 : i32
    return %c0_i32, %c0_i32_0 : i32, i32
  }
  func.func @transform_3(%arg0: i32) -> (i32, i32) {
    %c0_i32 = arith.constant 0 : i32
    %c0_i32_0 = arith.constant 0 : i32
    %c0_i32_1 = arith.constant 0 : i32
    return %c0_i32, %c0_i32_0 : i32, i32
  }
  func.func @transform_4(%arg0: i32) -> (i32, i32) {
    %c0_i32 = arith.constant 0 : i32
    %c0_i32_0 = arith.constant 0 : i32
    %c0_i32_1 = arith.constant 0 : i32
    return %c0_i32, %c0_i32_0 : i32, i32
  }
  func.func @transform_5(%arg0: i32) -> (i32, i32) {
    %c0_i32 = arith.constant 0 : i32
    %c0_i32_0 = arith.constant 0 : i32
    %c0_i32_1 = arith.constant 0 : i32
    return %c0_i32, %c0_i32_0 : i32, i32
  }
  func.func @transform_6(%arg0: i32) -> (i32, i32) {
    %c0_i32 = arith.constant 0 : i32
    %c0_i32_0 = arith.constant 0 : i32
    %c0_i32_1 = arith.constant 0 : i32
    return %c0_i32, %c0_i32_0 : i32, i32
  }
  func.func @transform_7(%arg0: i32) -> (i32, i32) {
    %c0_i32 = arith.constant 0 : i32
    %c0_i32_0 = arith.constant 0 : i32
    %c0_i32_1 = arith.constant 0 : i32
    return %c0_i32, %c0_i32_0 : i32, i32
  }
  func.func @transform_8(%arg0: i32) -> (i32, i32) {
    %c0_i32 = arith.constant 0 : i32
    %c0_i32_0 = arith.constant 0 : i32
    %c0_i32_1 = arith.constant 0 : i32
    return %c0_i32, %c0_i32_0 : i32, i32
  }
  func.func @transform_9(%arg0: i32) -> (i32, i32) {
    %c0_i32 = arith.constant 0 : i32
    %c0_i32_0 = arith.constant 0 : i32
    %c0_i32_1 = arith.constant 0 : i32
    return %c0_i32, %c0_i32_0 : i32, i32
  }
  func.func @transform_10(%arg0: i32) -> (i32, i32) {
    %c0_i32 = arith.constant 0 : i32
    %c0_i32_0 = arith.constant 0 : i32
    %c0_i32_1 = arith.constant 0 : i32
    return %c0_i32, %c0_i32_0 : i32, i32
  }
  func.func @transform_11(%arg0: i32) -> (i32, i32) {
    %c0_i32 = arith.constant 0 : i32
    %c0_i32_0 = arith.constant 0 : i32
    %c0_i32_1 = arith.constant 0 : i32
    return %c0_i32, %c0_i32_0 : i32, i32
  }
  func.func @transform_12(%arg0: i32) -> (i32, i32) {
    %c0_i32 = arith.constant 0 : i32
    %c0_i32_0 = arith.constant 0 : i32
    %c0_i32_1 = arith.constant 0 : i32
    return %c0_i32, %c0_i32_0 : i32, i32
  }
  func.func @transform_13(%arg0: i32) -> (i32, i32) {
    %c0_i32 = arith.constant 0 : i32
    %c0_i32_0 = arith.constant 0 : i32
    %c0_i32_1 = arith.constant 0 : i32
    return %c0_i32, %c0_i32_0 : i32, i32
  }
  func.func @transform_14(%arg0: i32) -> (i32, i32) {
    %c0_i32 = arith.constant 0 : i32
    %c0_i32_0 = arith.constant 0 : i32
    %c0_i32_1 = arith.constant 0 : i32
    return %c0_i32, %c0_i32_0 : i32, i32
  }
  func.func @transform_15(%arg0: i32) -> (i32, i32) {
    %c0_i32 = arith.constant 0 : i32
    %c0_i32_0 = arith.constant 0 : i32
    %c0_i32_1 = arith.constant 0 : i32
    return %c0_i32, %c0_i32_0 : i32, i32
  }
  func.func @transform_16(%arg0: i32) -> (i32, i32, i32, i32) {
    %c0_i32 = arith.constant 0 : i32
    %c0_i32_0 = arith.constant 0 : i32
    %c0_i32_1 = arith.constant 0 : i32
    %c0_i32_2 = arith.constant 0 : i32
    return %arg0, %c0_i32, %c0_i32_0, %c0_i32_1 : i32, i32, i32, i32
  }
}

</mosaic_0001>

<bundles_post_ra>
// kernel: tpu_custom_call.1
= control target key start
LH: loop header
LB: loop body
LE: loop exit
PB: predicated region body
PF: predicated region fallthrough
CT: control target
= control target key end

     0   :  { %s16549_s0 = inlined_call_operand.vmem [shape: f32[2,16,16,4], index: 0, kind: input, shape index: {}]   ;;  %s16550_s1 = inlined_call_operand.vmem [shape: f32[4,16], index: 1, kind: input, shape index: {}]   ;;  %s16551_s2 = inlined_call_operand.vmem [shape: f32[1,16], index: 2, kind: input, shape index: {}]   ;;  %s16552_s3 = inlined_call_operand.vmem [shape: f32[1,16], index: 3, kind: input, shape index: {}]   ;;  %s16553_s4 = inlined_call_operand.vmem [shape: f32[36,8], index: 4, kind: input, shape index: {}]   ;;  %s16554_s5 = inlined_call_operand.vmem [shape: f32[1,8], index: 5, kind: input, shape index: {}]   ;;  %s16555_s6 = inlined_call_operand.vmem [shape: f32[1,8], index: 6, kind: input, shape index: {}]   ;;  %s16556_s7 = inlined_call_operand.vmem [shape: f32[36,8], index: 7, kind: input, shape index: {}]   ;;  %s16557_s8 = inlined_call_operand.vmem [shape: f32[1,8], index: 8, kind: input, shape index: {}]   ;;  %s16558_s9 = inlined_call_operand.vmem [shape: f32[1,8], index: 9, kind: input, shape index: {}]   ;;  %s16559_s10 = inlined_call_operand.vmem [shape: f32[72,8], index: 10, kind: input, shape index: {}]   ;;  %s16560_s11 = inlined_call_operand.vmem [shape: f32[1,8], index: 11, kind: input, shape index: {}]   ;;  %s16561_s12 = inlined_call_operand.vmem [shape: f32[1,8], index: 12, kind: input, shape index: {}]   ;;  %s16562_s13 = inlined_call_operand.vmem [shape: f32[4,8], index: 13, kind: input, shape index: {}]   ;;  %s16563_s14 = inlined_call_operand.vmem [shape: f32[1,8], index: 14, kind: input, shape index: {}]   ;;  %s16564_s15 = inlined_call_operand.vmem [shape: f32[1,8], index: 15, kind: input, shape index: {}]   ;;  %s16565_s16 = inlined_call_operand.hbm [shape: f32[2,16,16,32], index: 16, kind: output, shape index: {}]  }
   0x1   :  { %16662 = sst [smem:[#allocation242_spill]] %s16549_s0 }
   0x2   :  { %16663 = sst [smem:[#allocation243_spill]] %s16550_s1 }
   0x3   :  { %16664 = sst [smem:[#allocation244_spill]] %s16551_s2 }
   0x4   :  { %16665 = sst [smem:[#allocation245_spill]] %s16552_s3 }
   0x5   :  { %16666 = sst [smem:[#allocation246_spill]] %s16553_s4 }
   0x6   :  { %16667 = sst [smem:[#allocation247_spill]] %s16554_s5 }
   0x7   :  { %21 = vsyncpa [#allocation7], 0 }
   0x8   :  { %23 = vsyncpa [#allocation7 + $0x1], 0  ;;  %s10116_s21 = smov 0   ;;  %s10118_s22 = smov 0  }
   0x9   :  { %s10120_s23 = smov 0   ;;  %s10122_s24 = smov 0  }
   0xa LB: > { %s10137_s25 = sadd.s32 4294967295, %s10011_s24   ;;  %s9127_s26 = sadd.s32 4294967294, %s10011_s24   ;;  %s10011_s24 = sphi %s10122_s24, %s17842_s24   ;;  %s10007_s23 = sphi %s10120_s23, %s17841_s23   ;;  %s10003_s22 = sphi %s10118_s22, %s17840_s22   ;;  %s9999_s21 = sphi %s10116_s21, %s17839_s21  }
   0xb   : > { %s10141_s27 = sadd.s32 1, %s10011_s24   ;;  %s377_s28 = sadd.s32 1, %s10007_s23 }
   0xc   : > { %s374_s29 = ssub.s32 %s10011_s24, %s10141_s27  ;;  %p387_p0 = scmp.ne.s32.totalorder %s10007_s23, %s10003_s22 }
   0xd   : > { %p375_p1 = scmp.eq.s32.totalorder %s374_s29, 0  ;;  %p388_p2 = scmp.eq.s32.totalorder %s10137_s25, 1 }
   0xe   : > { %p393_p3 = scmp.ne.s32.totalorder %s10003_s22, %s9999_s21  ;;  %p394_p4 = scmp.eq.s32.totalorder %s9127_s26, 1 }
   0xf   : > { %s10152_s30 = scalar_select %p375_p1, %s10007_s23, %s377_s28  }
  0x10   : > { %p10154_p5 = por %p388_p2, %p387_p0  ;;  %p10158_p6 = por %p394_p4, %p393_p3 }
  0x11   : > { %p9130_p7 = scmp.ge.s32.totalorder %s10011_s24, 1  ;;  %p465_p8 = scmp.lt.s32.totalorder %s10011_s24, 3 }
  0x13   : > { %p466_p9 = pnand %p9130_p7, %p465_p8 }
  0x15   : > { %469 = sbr.rel (%p466_p9) target bundleno = 2850 (0xb22), region = 84 }
  0x1c   : > { %s16670_s1 = sld [smem:[#allocation243_spill]]  ;;  %vm650_vm0 = vcmask 1043456   ;;  %p515_p10 = scmp.lt.s32.totalorder %s10137_s25, 1  ;;  %vm553_vm1 = vcmask 31744   ;;  %v16566_v1 = vmov 0.0   ;;  %vm991_vm2 = vcmask 25600  }
  0x1d   : > { %989 = vst.msk [vmem:[#allocation2] sm:$0xff] %vm553_vm1, %v16566_v1  ;;  %990 = vst.msk [vmem:[#allocation2 + $0x8] sm:$0xff] %vm553_vm1, %v16566_v1  ;;  %s16671_s18 = sld [smem:[#allocation242_spill]]  ;;  %vm997_vm3 = vcmask 24576   ;;  %v10016_v38 = vmov -inf   ;;  %vm2540_vm4 = vcmask 64512  }
  0x1e   : > { %994 = vst.msk [vmem:[#allocation2 + $0x198] sm:$0xff] %vm553_vm1, %v16566_v1  ;;  %995 = vst.msk [vmem:[#allocation2 + $0x1a0] sm:$0xff] %vm553_vm1, %v16566_v1  ;;  %s516_s20 = scalar_select %p515_p10, %s10137_s25, 1  ;;  %vm2573_vm5 = vcmask 97280   ;;  %vm2606_vm6 = vcmask 130048   ;;  %vm2639_vm7 = vcmask 162816  }
  0x1f   : > { %3211 = vst.msk [vmem:[#allocation3] sm:$0xff] %vm553_vm1, %v16566_v1  ;;  %3212 = vst.msk [vmem:[#allocation3 + $0x8] sm:$0xff] %vm553_vm1, %v16566_v1  ;;  %s16672_s2 = sld [smem:[#allocation244_spill]]  ;;  %s16673_s3 = sld [smem:[#allocation245_spill]]  ;;  %vm2672_vm8 = vcmask 195584   ;;  %vm2705_vm9 = vcmask 228352  }
  0x20   : > { %3215 = vst.msk [vmem:[#allocation3 + $0x198] sm:$0xff] %vm553_vm1, %v16566_v1  ;;  %3216 = vst.msk [vmem:[#allocation3 + $0x1a0] sm:$0xff] %vm553_vm1, %v16566_v1  ;;  %s9313_s26 = sshll.u32 %s516_s20, 8  ;;  %s16618_s20 = smov 4   ;;  %vm2738_vm10 = vcmask 261120   ;;  %vm2776_vm11 = vcmask 293888  }
  0x21   : > { %992 = vst.msk [vmem:[#allocation2 + $0x10] sm:$0x3] %vm991_vm2, %v16566_v1  ;;  %996 = vst.msk [vmem:[#allocation2 + $0x1a8] sm:$0x3] %vm991_vm2, %v16566_v1  ;;  %s10017_s28 = smov 120   ;;  %s16612_s29 = smov 16  }
  0x22   : > { %v552_v0 = vld [vmem:[%s16670_s1] sm:$0xf]  ;;  %3213 = vst.msk [vmem:[#allocation3 + $0x10] sm:$0x3] %vm991_vm2, %v16566_v1  ;;  %3217 = vst.msk [vmem:[#allocation3 + $0x1a8] sm:$0x3] %vm991_vm2, %v16566_v1 }
  0x23   : > { %9496 = vmatprep.subr.msk.mxu0 %vm650_vm0, %v552_v0  ;;  %9810 = vmatprep.subr.msk.mxu1 %vm650_vm0, %v552_v0  ;;  %s10194_s19 = scalar_lea.vmem %s16671_s18, %s9313_s26  ;;  %s16616_s26 = smov 8   ;;  %998 = vst.msk [vmem:[#allocation2] sm:$0x1] %vm997_vm3, %v16566_v1  ;;  %999 = vst.msk [vmem:[#allocation2 + $0x18] sm:$0x1] %vm997_vm3, %v16566_v1  ;;  %vm5393_vm12 = vcmask 58368  }
  0x24   : > { %9497 = vmatpush3.msk.msra.mxu0 %vm650_vm0, %v552_v0  ;;  %9811 = vmatpush3.msk.msra.mxu1 %vm650_vm0, %v552_v0  ;;  %v520_v2 = vld [vmem:[%s10194_s19] sm:$0xff]  ;;  %v521_v3 = vld [vmem:[%s10194_s19 + $0x8] sm:$0xff]  ;;  %v522_v6 = vld [vmem:[%s10194_s19 + $0x10] sm:$0xff]  ;;  %1000 = vst.msk [vmem:[#allocation2 + $0x30] sm:$0x1] %vm997_vm3, %v16566_v1  ;;  %s16614_s18 = smov 12  }
  0x25   : > { %v536_v4 = vld [vmem:[%s10194_s19 + $0x80] sm:$0xff]  ;;  %9498 = vmatprep.mubr.msk.f32.mxu0 %vm553_vm1, %v520_v2  ;;  %7527 = vst.msk [vmem:[#allocation5 + $0x19] sm:$0xff] %vm553_vm1, %v520_v2  ;;  %7528 = vst.msk [vmem:[#allocation5 + $0x21] sm:$0xff] %vm553_vm1, %v521_v3  ;;  %v537_v5 = vld [vmem:[%s10194_s19 + $0x88] sm:$0xff]  ;;  %s16848_s4 = sld [smem:[#allocation246_spill]]  ;;  %s17155_s1 = smov 16  }
  0x26   : > { %9522 = vmatprep.mubr.msk.f32.mxu1 %vm553_vm1, %v536_v4  ;;  %7543 = vst.msk [vmem:[#allocation5 + $0xd9] sm:$0xff] %vm553_vm1, %v536_v4  ;;  %v523_v7 = vld [vmem:[%s10194_s19 + $0x18] sm:$0xff]  ;;  %9499 = vmatmul.mubr.msk.f32.vlgmr.msra.gmra.mrb[0].mxu0 %vm553_vm1, %v521_v3  ;;  %7544 = vst.msk [vmem:[#allocation5 + $0xe1] sm:$0xff] %vm553_vm1, %v537_v5  ;;  %v538_v8 = vld [vmem:[%s10194_s19 + $0x90] sm:$0xff]  ;;  %vm5399_vm13 = vcmask 57344   ;;  %vm6910_vm14 = vcmask 326656  }
  0x27   : > { %9523 = vmatmul.mubr.msk.f32.vlgmr.msra.gmra.mrb[0].mxu1 %vm553_vm1, %v537_v5  ;;  %7529 = vst.msk [vmem:[#allocation5 + $0x31] sm:$0xff] %vm553_vm1, %v522_v6  ;;  %7530 = vst.msk [vmem:[#allocation5 + $0x39] sm:$0xff] %vm553_vm1, %v523_v7  ;;  %v539_v9 = vld [vmem:[%s10194_s19 + $0x98] sm:$0xff]  ;;  %v524_v10 = vld [vmem:[%s10194_s19 + $0x20] sm:$0xff]  ;;  %9501 = vmatprep.mubr.msk.f32.mxu0 %vm553_vm1, %v522_v6  ;;  %vm6943_vm15 = vcmask 392192   ;;  %s17626_s5 = sld [smem:[#allocation247_spill]] }
  0x28   : > { %9525 = vmatprep.mubr.msk.f32.mxu1 %vm553_vm1, %v538_v8  ;;  %7545 = vst.msk [vmem:[#allocation5 + $0xf1] sm:$0xff] %vm553_vm1, %v538_v8  ;;  %7546 = vst.msk [vmem:[#allocation5 + $0xf9] sm:$0xff] %vm553_vm1, %v539_v9  ;;  %v525_v11 = vld [vmem:[%s10194_s19 + $0x28] sm:$0xff]  ;;  %v540_v12 = vld [vmem:[%s10194_s19 + $0xa0] sm:$0xff] }
  0x29   : > { %7531 = vst.msk [vmem:[#allocation5 + $0x49] sm:$0xff] %vm553_vm1, %v524_v10  ;;  %v541_v13 = vld [vmem:[%s10194_s19 + $0xa8] sm:$0xff]  ;;  %7532 = vst.msk [vmem:[#allocation5 + $0x51] sm:$0xff] %vm553_vm1, %v525_v11  ;;  %v526_v14 = vld [vmem:[%s10194_s19 + $0x30] sm:$0xff] }
  0x2a   : > { %7547 = vst.msk [vmem:[#allocation5 + $0x109] sm:$0xff] %vm553_vm1, %v540_v12  ;;  %7548 = vst.msk [vmem:[#allocation5 + $0x111] sm:$0xff] %vm553_vm1, %v541_v13  ;;  %v527_v15 = vld [vmem:[%s10194_s19 + $0x38] sm:$0xff]  ;;  %v542_v16 = vld [vmem:[%s10194_s19 + $0xb0] sm:$0xff]  ;;  %9502 = vmatmul.mubr.msk.f32.gmra.mrb[2].mxu0 %vm553_vm1, %v523_v7 }
  0x2b   : > { %7533 = vst.msk [vmem:[#allocation5 + $0x61] sm:$0xff] %vm553_vm1, %v526_v14  ;;  %7534 = vst.msk [vmem:[#allocation5 + $0x69] sm:$0xff] %vm553_vm1, %v527_v15  ;;  %v543_v17 = vld [vmem:[%s10194_s19 + $0xb8] sm:$0xff]  ;;  %v528_v18 = vld [vmem:[%s10194_s19 + $0x40] sm:$0xff]  ;;  %9526 = vmatmul.mubr.msk.f32.gmra.mrb[2].mxu1 %vm553_vm1, %v539_v9  ;;  %9504 = vmatprep.mubr.msk.f32.mxu0 %vm553_vm1, %v524_v10 }
  0x2c   : > { %7549 = vst.msk [vmem:[#allocation5 + $0x121] sm:$0xff] %vm553_vm1, %v542_v16  ;;  %v529_v19 = vld [vmem:[%s10194_s19 + $0x48] sm:$0xff]  ;;  %7550 = vst.msk [vmem:[#allocation5 + $0x129] sm:$0xff] %vm553_vm1, %v543_v17  ;;  %v544_v20 = vld [vmem:[%s10194_s19 + $0xc0] sm:$0xff]  ;;  %9528 = vmatprep.mubr.msk.f32.mxu1 %vm553_vm1, %v540_v12 }
  0x2d   : > { %7535 = vst.msk [vmem:[#allocation5 + $0x79] sm:$0xff] %vm553_vm1, %v528_v18  ;;  %7536 = vst.msk [vmem:[#allocation5 + $0x81] sm:$0xff] %vm553_vm1, %v529_v19  ;;  %v545_v21 = vld [vmem:[%s10194_s19 + $0xc8] sm:$0xff]  ;;  %v530_v22 = vld [vmem:[%s10194_s19 + $0x50] sm:$0xff] }
  0x2e   : > { %7551 = vst.msk [vmem:[#allocation5 + $0x139] sm:$0xff] %vm553_vm1, %v544_v20  ;;  %7552 = vst.msk [vmem:[#allocation5 + $0x141] sm:$0xff] %vm553_vm1, %v545_v21  ;;  %v531_v23 = vld [vmem:[%s10194_s19 + $0x58] sm:$0xff]  ;;  %v546_v24 = vld [vmem:[%s10194_s19 + $0xd0] sm:$0xff]  ;;  %9505 = vmatmul.mubr.msk.f32.gmra.mrb[4].mxu0 %vm553_vm1, %v525_v11 }
  0x2f   : > { %7537 = vst.msk [vmem:[#allocation5 + $0x91] sm:$0xff] %vm553_vm1, %v530_v22  ;;  %v547_v25 = vld [vmem:[%s10194_s19 + $0xd8] sm:$0xff]  ;;  %7538 = vst.msk [vmem:[#allocation5 + $0x99] sm:$0xff] %vm553_vm1, %v531_v23  ;;  %v532_v26 = vld [vmem:[%s10194_s19 + $0x60] sm:$0xff]  ;;  %9529 = vmatmul.mubr.msk.f32.gmra.mrb[4].mxu1 %vm553_vm1, %v541_v13  ;;  %9507 = vmatprep.mubr.msk.f32.mxu0 %vm553_vm1, %v526_v14 }
  0x30   : > { %7553 = vst.msk [vmem:[#allocation5 + $0x151] sm:$0xff] %vm553_vm1, %v546_v24  ;;  %7554 = vst.msk [vmem:[#allocation5 + $0x159] sm:$0xff] %vm553_vm1, %v547_v25  ;;  %v533_v27 = vld [vmem:[%s10194_s19 + $0x68] sm:$0xff]  ;;  %v548_v28 = vld [vmem:[%s10194_s19 + $0xe0] sm:$0xff]  ;;  %9531 = vmatprep.mubr.msk.f32.mxu1 %vm553_vm1, %v542_v16 }
  0x31   : > { %7539 = vst.msk [vmem:[#allocation5 + $0xa9] sm:$0xff] %vm553_vm1, %v532_v26  ;;  %7540 = vst.msk [vmem:[#allocation5 + $0xb1] sm:$0xff] %vm553_vm1, %v533_v27  ;;  %v549_v29 = vld [vmem:[%s10194_s19 + $0xe8] sm:$0xff]  ;;  %v534_v30 = vld [vmem:[%s10194_s19 + $0x70] sm:$0xff] }
  0x32   : > { %7555 = vst.msk [vmem:[#allocation5 + $0x169] sm:$0xff] %vm553_vm1, %v548_v28  ;;  %v535_v31 = vld [vmem:[%s10194_s19 + $0x78] sm:$0xff]  ;;  %7556 = vst.msk [vmem:[#allocation5 + $0x171] sm:$0xff] %vm553_vm1, %v549_v29  ;;  %v550_v32 = vld [vmem:[%s10194_s19 + $0xf0] sm:$0xff]  ;;  %9508 = vmatmul.mubr.msk.f32.gmra.mrb[6].mxu0 %vm553_vm1, %v527_v15 }
  0x33   : > { %7541 = vst.msk [vmem:[#allocation5 + $0xc1] sm:$0xff] %vm553_vm1, %v534_v30  ;;  %7542 = vst.msk [vmem:[#allocation5 + $0xc9] sm:$0xff] %vm553_vm1, %v535_v31  ;;  %v551_v33 = vld [vmem:[%s10194_s19 + $0xf8] sm:$0xff]  ;;  %v1227_v34 = vld [vmem:[#allocation2 + $0x1] sm:$0xff]  ;;  %9532 = vmatmul.mubr.msk.f32.gmra.mrb[6].mxu1 %vm553_vm1, %v543_v17  ;;  %9510 = vmatprep.mubr.msk.f32.mxu0 %vm553_vm1, %v528_v18  ;;  %s16608_s19 = smov 20  }
  0x34   : > { %7557 = vst.msk [vmem:[#allocation5 + $0x181] sm:$0xff] %vm553_vm1, %v550_v32  ;;  %7558 = vst.msk [vmem:[#allocation5 + $0x189] sm:$0xff] %vm553_vm1, %v551_v33  ;;  %1516 = vrot.lane.b32.xlu0 %v1227_v34, %s16618_s20  ;;  %v1259_v35 = vld [vmem:[#allocation2 + $0x2] sm:$0xff]  ;;  %9534 = vmatprep.mubr.msk.f32.mxu1 %vm553_vm1, %v544_v20  ;;  %v10501_v39 = vld [vmem:[%s16672_s2] ss:$0 sm:$0xff] }
  0x35   : > { %1001 = vst.msk [vmem:[#allocation2 + $0x48] sm:$0x1] %vm997_vm3, %v16566_v1  ;;  %1002 = vst.msk [vmem:[#allocation2 + $0x60] sm:$0x1] %vm997_vm3, %v16566_v1  ;;  %v1228_v36 = vld [vmem:[#allocation2 + $0x9] sm:$0xff] }
  0x36   : > { %9511 = vmatmul.mubr.msk.f32.gmra.mrb[8].mxu0 %vm553_vm1, %v529_v19  ;;  %1003 = vst.msk [vmem:[#allocation2 + $0x78] sm:$0x1] %vm997_vm3, %v16566_v1  ;;  %1004 = vst.msk [vmem:[#allocation2 + $0x90] sm:$0x1] %vm997_vm3, %v16566_v1  ;;  %1518 = vrot.lane.b32.xlu1 %v1228_v36, %s16618_s20  ;;  %v10506_v41 = vld [vmem:[%s16673_s3] ss:$0 sm:$0xff] }
  0x37   : > { %9535 = vmatmul.mubr.msk.f32.gmra.mrb[8].mxu1 %vm553_vm1, %v545_v21  ;;  %9513 = vmatprep.mubr.msk.f32.mxu0 %vm553_vm1, %v530_v22  ;;  %1005 = vst.msk [vmem:[#allocation2 + $0xa8] sm:$0x1] %vm997_vm3, %v16566_v1  ;;  %1006 = vst.msk [vmem:[#allocation2 + $0xc0] sm:$0x1] %vm997_vm3, %v16566_v1  ;;  %s10027_s3 = smov 56  }
  0x38   : > { %1644 = vrot.lane.b32.xlu0 %v1259_v35, %s16616_s26  ;;  %9537 = vmatprep.mubr.msk.f32.mxu1 %vm553_vm1, %v546_v24  ;;  %1007 = vst.msk [vmem:[#allocation2 + $0xd8] sm:$0x1] %vm997_vm3, %v16566_v1  ;;  %1008 = vst.msk [vmem:[#allocation2 + $0xf0] sm:$0x1] %vm997_vm3, %v16566_v1 }
  0x39   : > { %1009 = vst.msk [vmem:[#allocation2 + $0x108] sm:$0x1] %vm997_vm3, %v16566_v1  ;;  %1010 = vst.msk [vmem:[#allocation2 + $0x120] sm:$0x1] %vm997_vm3, %v16566_v1 }
  0x3a   : > { %9514 = vmatmul.mubr.msk.f32.gmra.mrb[10].mxu0 %vm553_vm1, %v531_v23  ;;  %1011 = vst.msk [vmem:[#allocation2 + $0x138] sm:$0x1] %vm997_vm3, %v16566_v1  ;;  %1012 = vst.msk [vmem:[#allocation2 + $0x150] sm:$0x1] %vm997_vm3, %v16566_v1 }
  0x3b   : > { %9538 = vmatmul.mubr.msk.f32.gmra.mrb[10].mxu1 %vm553_vm1, %v547_v25  ;;  %9516 = vmatprep.mubr.msk.f32.mxu0 %vm553_vm1, %v532_v26  ;;  %1013 = vst.msk [vmem:[#allocation2 + $0x168] sm:$0x1] %vm997_vm3, %v16566_v1  ;;  %1014 = vst.msk [vmem:[#allocation2 + $0x180] sm:$0x1] %vm997_vm3, %v16566_v1 }
  0x3c   : > { %9540 = vmatprep.mubr.msk.f32.mxu1 %vm553_vm1, %v548_v28  ;;  %1015 = vst.msk [vmem:[#allocation2 + $0x198] sm:$0x1] %vm997_vm3, %v16566_v1  ;;  %1016 = vst.msk [vmem:[#allocation2 + $0x11] sm:$0x1] %vm997_vm3, %v16566_v1 }
  0x3d   : > { %1017 = vst.msk [vmem:[#allocation2 + $0x29] sm:$0x1] %vm997_vm3, %v16566_v1  ;;  %1018 = vst.msk [vmem:[#allocation2 + $0x41] sm:$0x1] %vm997_vm3, %v16566_v1 }
  0x3e   : > { %9517 = vmatmul.mubr.msk.f32.gmra.mrb[12].mxu0 %vm553_vm1, %v533_v27  ;;  %1019 = vst.msk [vmem:[#allocation2 + $0x59] sm:$0x1] %vm997_vm3, %v16566_v1  ;;  %1020 = vst.msk [vmem:[#allocation2 + $0x71] sm:$0x1] %vm997_vm3, %v16566_v1 }
  0x3f   : > { %9541 = vmatmul.mubr.msk.f32.gmra.mrb[12].mxu1 %vm553_vm1, %v549_v29  ;;  %9519 = vmatprep.mubr.msk.f32.mxu0 %vm553_vm1, %v534_v30  ;;  %1021 = vst.msk [vmem:[#allocation2 + $0x89] sm:$0x1] %vm997_vm3, %v16566_v1  ;;  %1022 = vst.msk [vmem:[#allocation2 + $0xa1] sm:$0x1] %vm997_vm3, %v16566_v1 }
  0x40   : > { %9543 = vmatprep.mubr.msk.f32.mxu1 %vm553_vm1, %v550_v32  ;;  %1023 = vst.msk [vmem:[#allocation2 + $0xb9] sm:$0x1] %vm997_vm3, %v16566_v1  ;;  %1024 = vst.msk [vmem:[#allocation2 + $0xd1] sm:$0x1] %vm997_vm3, %v16566_v1 }
  0x41   : > { %1025 = vst.msk [vmem:[#allocation2 + $0xe9] sm:$0x1] %vm997_vm3, %v16566_v1  ;;  %1026 = vst.msk [vmem:[#allocation2 + $0x101] sm:$0x1] %vm997_vm3, %v16566_v1 }
  0x42   : > { %9520 = vmatmul.mubr.msk.f32.gmra.mrb[14].mxu0 %vm553_vm1, %v535_v31  ;;  %1027 = vst.msk [vmem:[#allocation2 + $0x119] sm:$0x1] %vm997_vm3, %v16566_v1  ;;  %1028 = vst.msk [vmem:[#allocation2 + $0x131] sm:$0x1] %vm997_vm3, %v16566_v1 }
  0x43   : > { %9544 = vmatmul.mubr.msk.f32.gmra.mrb[14].mxu1 %vm553_vm1, %v551_v33  ;;  %1029 = vst.msk [vmem:[#allocation2 + $0x149] sm:$0x1] %vm997_vm3, %v16566_v1  ;;  %1030 = vst.msk [vmem:[#allocation2 + $0x161] sm:$0x1] %vm997_vm3, %v16566_v1  ;;  %v1260_v37 = vld [vmem:[#allocation2 + $0xa] sm:$0xff] }
  0x44   : > { %1031 = vst.msk [vmem:[#allocation2 + $0x179] sm:$0x1] %vm997_vm3, %v16566_v1  ;;  %1032 = vst.msk [vmem:[#allocation2 + $0x191] sm:$0x1] %vm997_vm3, %v16566_v1  ;;  %1646 = vrot.lane.b32.xlu1 %v1260_v37, %s16616_s26 }
  0x45   : > { %3218 = vst.msk [vmem:[#allocation3] sm:$0x1] %vm997_vm3, %v16566_v1  ;;  %3219 = vst.msk [vmem:[#allocation3 + $0x18] sm:$0x1] %vm997_vm3, %v16566_v1 }
  0x46   : > { %3220 = vst.msk [vmem:[#allocation3 + $0x30] sm:$0x1] %vm997_vm3, %v16566_v1  ;;  %3221 = vst.msk [vmem:[#allocation3 + $0x48] sm:$0x1] %vm997_vm3, %v16566_v1 }
  0x47   : > { %3222 = vst.msk [vmem:[#allocation3 + $0x60] sm:$0x1] %vm997_vm3, %v16566_v1  ;;  %3223 = vst.msk [vmem:[#allocation3 + $0x78] sm:$0x1] %vm997_vm3, %v16566_v1 }
  0x48   : > { %3224 = vst.msk [vmem:[#allocation3 + $0x90] sm:$0x1] %vm997_vm3, %v16566_v1  ;;  %3225 = vst.msk [vmem:[#allocation3 + $0xa8] sm:$0x1] %vm997_vm3, %v16566_v1 }
  0x49   : > { %3226 = vst.msk [vmem:[#allocation3 + $0xc0] sm:$0x1] %vm997_vm3, %v16566_v1  ;;  %3227 = vst.msk [vmem:[#allocation3 + $0xd8] sm:$0x1] %vm997_vm3, %v16566_v1 }
  0x4a   : > { %3228 = vst.msk [vmem:[#allocation3 + $0xf0] sm:$0x1] %vm997_vm3, %v16566_v1  ;;  %3229 = vst.msk [vmem:[#allocation3 + $0x108] sm:$0x1] %vm997_vm3, %v16566_v1 }
  0x4b   : > { %3230 = vst.msk [vmem:[#allocation3 + $0x120] sm:$0x1] %vm997_vm3, %v16566_v1  ;;  %3231 = vst.msk [vmem:[#allocation3 + $0x138] sm:$0x1] %vm997_vm3, %v16566_v1 }
  0x4c   : > { %3232 = vst.msk [vmem:[#allocation3 + $0x150] sm:$0x1] %vm997_vm3, %v16566_v1  ;;  %3233 = vst.msk [vmem:[#allocation3 + $0x168] sm:$0x1] %vm997_vm3, %v16566_v1 }
  0x4d   : > { %3234 = vst.msk [vmem:[#allocation3 + $0x180] sm:$0x1] %vm997_vm3, %v16566_v1  ;;  %3235 = vst.msk [vmem:[#allocation3 + $0x198] sm:$0x1] %vm997_vm3, %v16566_v1 }
  0x4e   : > { %3237 = vst.msk [vmem:[#allocation3 + $0x29] sm:$0x1] %vm997_vm3, %v16566_v1  ;;  %3238 = vst.msk [vmem:[#allocation3 + $0x41] sm:$0x1] %vm997_vm3, %v16566_v1 }
  0x4f   : > { %3239 = vst.msk [vmem:[#allocation3 + $0x59] sm:$0x1] %vm997_vm3, %v16566_v1  ;;  %3240 = vst.msk [vmem:[#allocation3 + $0x71] sm:$0x1] %vm997_vm3, %v16566_v1 }
  0x50   : > { %3241 = vst.msk [vmem:[#allocation3 + $0x89] sm:$0x1] %vm997_vm3, %v16566_v1  ;;  %3242 = vst.msk [vmem:[#allocation3 + $0xa1] sm:$0x1] %vm997_vm3, %v16566_v1 }
  0x51   : > { %3243 = vst.msk [vmem:[#allocation3 + $0xb9] sm:$0x1] %vm997_vm3, %v16566_v1  ;;  %3244 = vst.msk [vmem:[#allocation3 + $0xd1] sm:$0x1] %vm997_vm3, %v16566_v1 }
  0x52   : > { %3245 = vst.msk [vmem:[#allocation3 + $0xe9] sm:$0x1] %vm997_vm3, %v16566_v1  ;;  %3246 = vst.msk [vmem:[#allocation3 + $0x101] sm:$0x1] %vm997_vm3, %v16566_v1 }
  0x53   : > { %3247 = vst.msk [vmem:[#allocation3 + $0x119] sm:$0x1] %vm997_vm3, %v16566_v1  ;;  %3248 = vst.msk [vmem:[#allocation3 + $0x131] sm:$0x1] %vm997_vm3, %v16566_v1 }
  0x54   : > { %3249 = vst.msk [vmem:[#allocation3 + $0x149] sm:$0x1] %vm997_vm3, %v16566_v1  ;;  %3250 = vst.msk [vmem:[#allocation3 + $0x161] sm:$0x1] %vm997_vm3, %v16566_v1 }
  0x55   : > { %3251 = vst.msk [vmem:[#allocation3 + $0x179] sm:$0x1] %vm997_vm3, %v16566_v1  ;;  %3252 = vst.msk [vmem:[#allocation3 + $0x191] sm:$0x1] %vm997_vm3, %v16566_v1 }
  0x56   : > { %1033 = vst.msk [vmem:[#allocation2 + $0x1a9] sm:$0x1] %vm997_vm3, %v16566_v1  ;;  %3236 = vst.msk [vmem:[#allocation3 + $0x11] sm:$0x1] %vm997_vm3, %v16566_v1 }
  0x57   : > { %3253 = vst.msk [vmem:[#allocation3 + $0x1a9] sm:$0x1] %vm997_vm3, %v16566_v1  ;;  %7491 = vst.msk [vmem:[#allocation5 + $0x18] sm:$0x1] %vm997_vm3, %v10016_v38 }
  0x58   : > { %7485 = vst.msk [vmem:[#allocation5 + $0x10] sm:$0x3] %vm991_vm2, %v10016_v38  ;;  %7489 = vst.msk [vmem:[#allocation5 + $0x1a8] sm:$0x3] %vm991_vm2, %v10016_v38  ;;  %vm6976_vm2 = vcmask 457728  }
  0x59   : > { %7483 = vst.msk [vmem:[#allocation5] sm:$0xff] %vm553_vm1, %v10016_v38  ;;  %7484 = vst.msk [vmem:[#allocation5 + $0x8] sm:$0xff] %vm553_vm1, %v10016_v38 }
  0x5a   : > { %7487 = vst.msk [vmem:[#allocation5 + $0x198] sm:$0xff] %vm553_vm1, %v10016_v38  ;;  %7488 = vst.msk [vmem:[#allocation5 + $0x1a0] sm:$0xff] %vm553_vm1, %v10016_v38 }
  0x5b   : > { %7492 = vst.msk [vmem:[#allocation5 + $0x30] sm:$0x1] %vm997_vm3, %v10016_v38  ;;  %7493 = vst.msk [vmem:[#allocation5 + $0x48] sm:$0x1] %vm997_vm3, %v10016_v38 }
  0x5c   : > { %7494 = vst.msk [vmem:[#allocation5 + $0x60] sm:$0x1] %vm997_vm3, %v10016_v38  ;;  %7495 = vst.msk [vmem:[#allocation5 + $0x78] sm:$0x1] %vm997_vm3, %v10016_v38 }
  0x5d   : > { %7496 = vst.msk [vmem:[#allocation5 + $0x90] sm:$0x1] %vm997_vm3, %v10016_v38  ;;  %7497 = vst.msk [vmem:[#allocation5 + $0xa8] sm:$0x1] %vm997_vm3, %v10016_v38 }
  0x5e   : > { %7498 = vst.msk [vmem:[#allocation5 + $0xc0] sm:$0x1] %vm997_vm3, %v10016_v38  ;;  %7499 = vst.msk [vmem:[#allocation5 + $0xd8] sm:$0x1] %vm997_vm3, %v10016_v38 }
  0x5f   : > { %7500 = vst.msk [vmem:[#allocation5 + $0xf0] sm:$0x1] %vm997_vm3, %v10016_v38  ;;  %7501 = vst.msk [vmem:[#allocation5 + $0x108] sm:$0x1] %vm997_vm3, %v10016_v38 }
  0x60   : > { %7502 = vst.msk [vmem:[#allocation5 + $0x120] sm:$0x1] %vm997_vm3, %v10016_v38  ;;  %7503 = vst.msk [vmem:[#allocation5 + $0x138] sm:$0x1] %vm997_vm3, %v10016_v38 }
  0x61   : > { %7504 = vst.msk [vmem:[#allocation5 + $0x150] sm:$0x1] %vm997_vm3, %v10016_v38  ;;  %7505 = vst.msk [vmem:[#allocation5 + $0x168] sm:$0x1] %vm997_vm3, %v10016_v38 }
  0x62   : > { %7506 = vst.msk [vmem:[#allocation5 + $0x180] sm:$0x1] %vm997_vm3, %v10016_v38  ;;  %7509 = vst.msk [vmem:[#allocation5 + $0x29] sm:$0x1] %vm997_vm3, %v10016_v38 }
  0x63   : > { %7510 = vst.msk [vmem:[#allocation5 + $0x41] sm:$0x1] %vm997_vm3, %v10016_v38  ;;  %7511 = vst.msk [vmem:[#allocation5 + $0x59] sm:$0x1] %vm997_vm3, %v10016_v38 }
  0x64   : > { %7512 = vst.msk [vmem:[#allocation5 + $0x71] sm:$0x1] %vm997_vm3, %v10016_v38  ;;  %7513 = vst.msk [vmem:[#allocation5 + $0x89] sm:$0x1] %vm997_vm3, %v10016_v38 }
  0x65   : > { %7514 = vst.msk [vmem:[#allocation5 + $0xa1] sm:$0x1] %vm997_vm3, %v10016_v38  ;;  %7515 = vst.msk [vmem:[#allocation5 + $0xb9] sm:$0x1] %vm997_vm3, %v10016_v38 }
  0x66   : > { %7516 = vst.msk [vmem:[#allocation5 + $0xd1] sm:$0x1] %vm997_vm3, %v10016_v38  ;;  %7517 = vst.msk [vmem:[#allocation5 + $0xe9] sm:$0x1] %vm997_vm3, %v10016_v38 }
  0x67   : > { %7518 = vst.msk [vmem:[#allocation5 + $0x101] sm:$0x1] %vm997_vm3, %v10016_v38  ;;  %7519 = vst.msk [vmem:[#allocation5 + $0x119] sm:$0x1] %vm997_vm3, %v10016_v38 }
  0x68   : > { %7520 = vst.msk [vmem:[#allocation5 + $0x131] sm:$0x1] %vm997_vm3, %v10016_v38  ;;  %7521 = vst.msk [vmem:[#allocation5 + $0x149] sm:$0x1] %vm997_vm3, %v10016_v38 }
  0x69   : > { %7522 = vst.msk [vmem:[#allocation5 + $0x161] sm:$0x1] %vm997_vm3, %v10016_v38  ;;  %7523 = vst.msk [vmem:[#allocation5 + $0x179] sm:$0x1] %vm997_vm3, %v10016_v38 }
  0x6a   : > { %7524 = vst.msk [vmem:[#allocation5 + $0x191] sm:$0x1] %vm997_vm3, %v10016_v38  ;;  %7508 = vst.msk [vmem:[#allocation5 + $0x11] sm:$0x1] %vm997_vm3, %v10016_v38 }
  0x6b   : > { %7490 = vst.msk [vmem:[#allocation5] sm:$0x1] %vm997_vm3, %v10016_v38  ;;  %7507 = vst.msk [vmem:[#allocation5 + $0x198] sm:$0x1] %vm997_vm3, %v10016_v38 }
  0x6c   : > { %7525 = vst.msk [vmem:[#allocation5 + $0x1a9] sm:$0x1] %vm997_vm3, %v10016_v38  ;;  %vm7009_vm3 = vcmask 523264  }
  0x6d   : > { %5391 = vst.msk [vmem:[#allocation4] sm:$0xff] %vm2540_vm4, %v16566_v1  ;;  %5392 = vst.msk [vmem:[#allocation4 + $0x8] sm:$0xff] %vm2540_vm4, %v16566_v1 }
  0x6e   : > { %5396 = vst.msk [vmem:[#allocation4 + $0x198] sm:$0xff] %vm2540_vm4, %v16566_v1  ;;  %5397 = vst.msk [vmem:[#allocation4 + $0x1a0] sm:$0xff] %vm2540_vm4, %v16566_v1 }
  0xf9   : > { %v9500_v40 = vpop.f32.mrb[0].mxu0 }
  0xfa   : > { %v9524_v42 = vpop.f32.mrb[0].mxu1  ;;  %v887_v43 = vmul.f32 %v9500_v40, %v10501_v39  ;;  %v720_v44 = vpop.f32.mrb[1].mxu0 }
  0xfb   : > { %v903_v45 = vmul.f32 %v9524_v42, %v10501_v39  ;;  %v800_v46 = vpop.f32.mrb[1].mxu1  ;;  %v886_v47 = vmul.f32 %v10501_v39, %v720_v44 }
  0xfc   : > { %v902_v48 = vmul.f32 %v10501_v39, %v800_v46  ;;  %v926_v49 = vadd.f32 %v10506_v41, %v887_v43 }
  0xfd   : > { %v942_v50 = vadd.f32 %v10506_v41, %v903_v45  ;;  %v925_v51 = vadd.f32 %v10506_v41, %v886_v47  ;;  %v9503_v52 = vpop.f32.mrb[2].mxu0 }
  0xfe   : > { %v9527_v53 = vpop.f32.mrb[2].mxu1  ;;  %v10515_v54 = vmax.f32 %v926_v49, 0.0  ;;  %v889_v56 = vmul.f32 %v9503_v52, %v10501_v39  ;;  %v730_v58 = vpop.f32.mrb[3].mxu0  ;;  %v941_v60 = vadd.f32 %v10506_v41, %v902_v48 }
  0xff   : > { %v10517_v55 = vmax.f32 %v942_v50, 0.0  ;;  %v905_v57 = vmul.f32 %v9527_v53, %v10501_v39  ;;  %v810_v59 = vpop.f32.mrb[3].mxu1  ;;  %v888_v61 = vmul.f32 %v10501_v39, %v730_v58  ;;  %v10530_v4 = vmax.f32 %v925_v51, 0.0 }
 0x100   : > { %16674 = vst [vmem:[#allocation9_spill] sm:$0xff] %v10515_v54  ;;  %1068 = vrot.lane.b32.xlu0 %v10515_v54, %s10017_s28  ;;  %v928_v62 = vadd.f32 %v10506_v41, %v889_v56  ;;  %v904_v0 = vmul.f32 %v10501_v39, %v810_v59  ;;  %v10534_v8 = vmax.f32 %v941_v60, 0.0 }
 0x101   : > { %16675 = vst [vmem:[#allocation10_spill] sm:$0xff] %v10517_v55  ;;  %1100 = vrot.lane.b32.xlu1 %v10517_v55, %s10017_s28  ;;  %v944_v63 = vadd.f32 %v10506_v41, %v905_v57  ;;  %v9506_v2 = vpop.f32.mrb[4].mxu0  ;;  %16676 = vst [vmem:[#allocation11_spill] sm:$0xff] %v10530_v4  ;;  %v927_v9 = vadd.f32 %v10506_v41, %v888_v61 }
 0x102   : > { %v9530_v3 = vpop.f32.mrb[4].mxu1  ;;  %v10532_v5 = vmax.f32 %v928_v62, 0.0  ;;  %v740_v6 = vpop.f32.mrb[5].mxu0  ;;  %16678 = vst [vmem:[#allocation13_spill] sm:$0xff] %v10534_v8  ;;  %v943_v11 = vadd.f32 %v10506_v41, %v904_v0  ;;  %v891_v12 = vmul.f32 %v9506_v2, %v10501_v39 }
 0x103   : > { %v820_v7 = vpop.f32.mrb[5].mxu1  ;;  %v10539_v10 = vmax.f32 %v944_v63, 0.0  ;;  %v890_v13 = vmul.f32 %v10501_v39, %v740_v6  ;;  %v907_v18 = vmul.f32 %v9530_v3, %v10501_v39  ;;  %v10550_v20 = vmax.f32 %v927_v9, 0.0 }
 0x104   : > { %16677 = vst [vmem:[#allocation12_spill] sm:$0xff] %v10532_v5  ;;  %1066 = vrot.lane.b32.xlu0 %v10530_v4, %s10017_s28  ;;  %v906_v19 = vmul.f32 %v10501_v39, %v820_v7  ;;  %v10554_v21 = vmax.f32 %v943_v11, 0.0  ;;  %v930_v22 = vadd.f32 %v10506_v41, %v891_v12 }
 0x105   : > { %16679 = vst [vmem:[#allocation14_spill] sm:$0xff] %v10539_v10  ;;  %1072 = vrot.lane.b32.xlu1 %v10532_v5, %s10017_s28  ;;  %v9509_v14 = vpop.f32.mrb[6].mxu0  ;;  %16680 = vst [vmem:[#allocation15_spill] sm:$0xff] %v10550_v20  ;;  %v929_v23 = vadd.f32 %v10506_v41, %v890_v13  ;;  %v946_v28 = vadd.f32 %v10506_v41, %v907_v18 }
 0x106   : > { %v9533_v15 = vpop.f32.mrb[6].mxu1  ;;  %v750_v16 = vpop.f32.mrb[7].mxu0  ;;  %16681 = vst [vmem:[#allocation16_spill] sm:$0xff] %v10554_v21  ;;  %v945_v29 = vadd.f32 %v10506_v41, %v906_v19  ;;  %v10564_v30 = vmax.f32 %v930_v22, 0.0  ;;  %v893_v32 = vmul.f32 %v9509_v14, %v10501_v39 }
 0x107   : > { %v830_v17 = vpop.f32.mrb[7].mxu1  ;;  %v10566_v31 = vmax.f32 %v929_v23, 0.0  ;;  %v892_v33 = vmul.f32 %v10501_v39, %v750_v16  ;;  %v909_v38 = vmul.f32 %v9533_v15, %v10501_v39  ;;  %v10572_v42 = vmax.f32 %v946_v28, 0.0 }
 0x108   : > { %1098 = vrot.lane.b32.xlu0 %v10534_v8, %s10017_s28  ;;  %16682 = vst [vmem:[#allocation17_spill] sm:$0xff] %v10564_v30  ;;  %v908_v40 = vmul.f32 %v10501_v39, %v830_v17  ;;  %v10574_v43 = vmax.f32 %v945_v29, 0.0  ;;  %v932_v44 = vadd.f32 %v10506_v41, %v893_v32 }
 0x109   : > { %1104 = vrot.lane.b32.xlu1 %v10539_v10, %s10017_s28  ;;  %v9512_v24 = vpop.f32.mrb[8].mxu0  ;;  %16683 = vst [vmem:[#allocation18_spill] sm:$0xff] %v10566_v31  ;;  %16684 = vst [vmem:[#allocation19_spill] sm:$0xff] %v10572_v42  ;;  %v931_v45 = vadd.f32 %v10506_v41, %v892_v33  ;;  %v948_v50 = vadd.f32 %v10506_v41, %v909_v38 }
 0x10a   : > { %v9536_v25 = vpop.f32.mrb[8].mxu1  ;;  %v760_v26 = vpop.f32.mrb[9].mxu0  ;;  %16685 = vst [vmem:[#allocation20_spill] sm:$0xff] %v10574_v43  ;;  %v947_v51 = vadd.f32 %v10506_v41, %v908_v40  ;;  %v10584_v52 = vmax.f32 %v932_v44, 0.0  ;;  %v895_v56 = vmul.f32 %v9512_v24, %v10501_v39 }
 0x10b   : > { %v840_v27 = vpop.f32.mrb[9].mxu1  ;;  %v10588_v53 = vmax.f32 %v931_v45, 0.0  ;;  %v894_v57 = vmul.f32 %v10501_v39, %v760_v26  ;;  %v911_v62 = vmul.f32 %v9536_v25, %v10501_v39  ;;  %v10596_v0 = vmax.f32 %v948_v50, 0.0 }
 0x10c   : > { %1102 = vrot.lane.b32.xlu0 %v10554_v21, %s10017_s28  ;;  %16686 = vst [vmem:[#allocation21_spill] sm:$0xff] %v10584_v52  ;;  %v910_v63 = vmul.f32 %v10501_v39, %v840_v27  ;;  %v10598_v2 = vmax.f32 %v947_v51, 0.0  ;;  %v934_v3 = vadd.f32 %v10506_v41, %v895_v56 }
 0x10d   : > { %1070 = vrot.lane.b32.xlu1 %v10550_v20, %s10017_s28  ;;  %v9515_v34 = vpop.f32.mrb[10].mxu0  ;;  %16687 = vst [vmem:[#allocation22_spill] sm:$0xff] %v10588_v53  ;;  %16688 = vst [vmem:[#allocation23_spill] sm:$0xff] %v10596_v0  ;;  %v933_v6 = vadd.f32 %v10506_v41, %v894_v57  ;;  %v950_v7 = vadd.f32 %v10506_v41, %v911_v62 }
 0x10e   : > { %v9539_v35 = vpop.f32.mrb[10].mxu1  ;;  %v770_v36 = vpop.f32.mrb[11].mxu0  ;;  %16689 = vst [vmem:[#allocation24_spill] sm:$0xff] %v10598_v2  ;;  %v949_v9 = vadd.f32 %v10506_v41, %v910_v63  ;;  %v10608_v11 = vmax.f32 %v934_v3, 0.0  ;;  %v897_v13 = vmul.f32 %v9515_v34, %v10501_v39 }
 0x10f   : > { %v850_v37 = vpop.f32.mrb[11].mxu1  ;;  %v10612_v12 = vmax.f32 %v933_v6, 0.0  ;;  %v896_v14 = vmul.f32 %v10501_v39, %v770_v36  ;;  %v913_v15 = vmul.f32 %v9539_v35, %v10501_v39  ;;  %v10620_v17 = vmax.f32 %v950_v7, 0.0 }
 0x110   : > { %1074 = vrot.lane.b32.xlu0 %v10566_v31, %s10017_s28  ;;  %16690 = vst [vmem:[#allocation25_spill] sm:$0xff] %v10608_v11  ;;  %v912_v16 = vmul.f32 %v10501_v39, %v850_v37  ;;  %v10622_v18 = vmax.f32 %v949_v9, 0.0  ;;  %v936_v19 = vadd.f32 %v10506_v41, %v897_v13 }
 0x111   : > { %1076 = vrot.lane.b32.xlu1 %v10564_v30, %s10017_s28  ;;  %v9518_v46 = vpop.f32.mrb[12].mxu0  ;;  %16691 = vst [vmem:[#allocation26_spill] sm:$0xff] %v10612_v12  ;;  %16692 = vst [vmem:[#allocation27_spill] sm:$0xff] %v10620_v17  ;;  %v935_v22 = vadd.f32 %v10506_v41, %v896_v14  ;;  %v952_v23 = vadd.f32 %v10506_v41, %v913_v15 }
 0x112   : > { %v9542_v47 = vpop.f32.mrb[12].mxu1  ;;  %v780_v48 = vpop.f32.mrb[13].mxu0  ;;  %16693 = vst [vmem:[#allocation28_spill] sm:$0xff] %v10622_v18  ;;  %v951_v24 = vadd.f32 %v10506_v41, %v912_v16  ;;  %v10632_v25 = vmax.f32 %v936_v19, 0.0  ;;  %v899_v27 = vmul.f32 %v9518_v46, %v10501_v39 }
 0x113   : > { %v860_v49 = vpop.f32.mrb[13].mxu1  ;;  %v10636_v26 = vmax.f32 %v935_v22, 0.0  ;;  %v898_v28 = vmul.f32 %v10501_v39, %v780_v48  ;;  %v915_v29 = vmul.f32 %v9542_v47, %v10501_v39  ;;  %v10644_v33 = vmax.f32 %v952_v23, 0.0 }
 0x114   : > { %1106 = vrot.lane.b32.xlu0 %v10574_v43, %s10017_s28  ;;  %16694 = vst [vmem:[#allocation29_spill] sm:$0xff] %v10632_v25  ;;  %v914_v32 = vmul.f32 %v10501_v39, %v860_v49  ;;  %v10646_v34 = vmax.f32 %v951_v24, 0.0  ;;  %v938_v35 = vadd.f32 %v10506_v41, %v899_v27 }
 0x115   : > { %1108 = vrot.lane.b32.xlu1 %v10572_v42, %s10017_s28  ;;  %v9521_v58 = vpop.f32.mrb[14].mxu0  ;;  %16695 = vst [vmem:[#allocation30_spill] sm:$0xff] %v10636_v26  ;;  %16696 = vst [vmem:[#allocation31_spill] sm:$0xff] %v10644_v33  ;;  %v937_v36 = vadd.f32 %v10506_v41, %v898_v28  ;;  %v954_v37 = vadd.f32 %v10506_v41, %v915_v29 }
 0x116   : > { %v9545_v59 = vpop.f32.mrb[14].mxu1  ;;  %v790_v60 = vpop.f32.mrb[15].mxu0  ;;  %16697 = vst [vmem:[#allocation32_spill] sm:$0xff] %v10646_v34  ;;  %v953_v38 = vadd.f32 %v10506_v41, %v914_v32  ;;  %v10656_v40 = vmax.f32 %v938_v35, 0.0  ;;  %v901_v45 = vmul.f32 %v9521_v58, %v10501_v39 }
 0x117   : > { %v870_v61 = vpop.f32.mrb[15].mxu1  ;;  %v10660_v44 = vmax.f32 %v937_v36, 0.0  ;;  %v900_v46 = vmul.f32 %v10501_v39, %v790_v60  ;;  %v10666_v47 = vmax.f32 %v954_v37, 0.0  ;;  %v917_v48 = vmul.f32 %v9545_v59, %v10501_v39 }
 0x118   : > { %1078 = vrot.lane.b32.xlu0 %v10588_v53, %s10017_s28  ;;  %16698 = vst [vmem:[#allocation33_spill] sm:$0xff] %v10656_v40  ;;  %v10669_v49 = vmax.f32 %v953_v38, 0.0  ;;  %v940_v50 = vadd.f32 %v10506_v41, %v901_v45  ;;  %v916_v56 = vmul.f32 %v10501_v39, %v870_v61  ;;  %v10700_v39 = vpop.permute.xlu1 %1518  ;;  %v10702_v61 = vpop.permute.xlu0 %1516 }
 0x119   : > { %1080 = vrot.lane.b32.xlu1 %v10584_v52, %s10017_s28  ;;  %16699 = vst [vmem:[#allocation34_spill] sm:$0xff] %v10660_v44  ;;  %16700 = vst [vmem:[#allocation35_spill] sm:$0xff] %v10666_v47  ;;  %v939_v51 = vadd.f32 %v10506_v41, %v900_v46  ;;  %v956_v59 = vadd.f32 %v10506_v41, %v917_v48 }
 0x11a   : > { %16701 = vst [vmem:[#allocation36_spill] sm:$0xff] %v10669_v49  ;;  %v10678_v57 = vmax.f32 %v940_v50, 0.0  ;;  %v955_v60 = vadd.f32 %v10506_v41, %v916_v56  ;;  %16706 = vst [vmem:[#allocation41_spill] sm:$0xff] %v10700_v39 }
 0x11b   : > { %v10682_v58 = vmax.f32 %v939_v51, 0.0  ;;  %v10688_v62 = vmax.f32 %v956_v59, 0.0  ;;  %16707 = vst [vmem:[#allocation42_spill] sm:$0xff] %v10702_v61 }
 0x11c   : > { %1110 = vrot.lane.b32.xlu0 %v10598_v2, %s10017_s28  ;;  %16702 = vst [vmem:[#allocation37_spill] sm:$0xff] %v10678_v57  ;;  %v10690_v63 = vmax.f32 %v955_v60, 0.0  ;;  %v10704_v41 = vpop.permute.xlu1 %1646  ;;  %v10706_v3 = vpop.permute.xlu0 %1644 }
 0x11d   : > { %1112 = vrot.lane.b32.xlu1 %v10596_v0, %s10017_s28  ;;  %16703 = vst [vmem:[#allocation38_spill] sm:$0xff] %v10682_v58  ;;  %16704 = vst [vmem:[#allocation39_spill] sm:$0xff] %v10688_v62 }
 0x11e   : > { %16705 = vst [vmem:[#allocation40_spill] sm:$0xff] %v10690_v63  ;;  %16708 = vst [vmem:[#allocation43_spill] sm:$0xff] %v10704_v41 }
 0x11f   : > { %16709 = vst [vmem:[#allocation44_spill] sm:$0xff] %v10706_v3 }
 0x120   : > { %1082 = vrot.lane.b32.xlu0 %v10612_v12, %s10017_s28 }
 0x121   : > { %1084 = vrot.lane.b32.xlu1 %v10608_v11, %s10017_s28 }
 0x124   : > { %1114 = vrot.lane.b32.xlu0 %v10622_v18, %s10017_s28 }
 0x125   : > { %1116 = vrot.lane.b32.xlu1 %v10620_v17, %s10017_s28 }
 0x128   : > { %1086 = vrot.lane.b32.xlu0 %v10636_v26, %s10017_s28 }
 0x129   : > { %1088 = vrot.lane.b32.xlu1 %v10632_v25, %s10017_s28 }
 0x12c   : > { %1118 = vrot.lane.b32.xlu0 %v10646_v34, %s10017_s28 }
 0x12d   : > { %1120 = vrot.lane.b32.xlu1 %v10644_v33, %s10017_s28 }
 0x130   : > { %1090 = vrot.lane.b32.xlu0 %v10660_v44, %s10017_s28 }
 0x131   : > { %1092 = vrot.lane.b32.xlu1 %v10656_v40, %s10017_s28 }
 0x134   : > { %1122 = vrot.lane.b32.xlu0 %v10669_v49, %s10017_s28 }
 0x135   : > { %1124 = vrot.lane.b32.xlu1 %v10666_v47, %s10017_s28 }
 0x138   : > { %1094 = vrot.lane.b32.xlu0 %v10682_v58, %s10017_s28 }
 0x139   : > { %1096 = vrot.lane.b32.xlu1 %v10678_v57, %s10017_s28 }
 0x13c   : > { %1126 = vrot.lane.b32.xlu0 %v10690_v63, %s10017_s28 }
 0x13d   : > { %1128 = vrot.lane.b32.xlu1 %v10688_v62, %s10017_s28  ;;  %s16610_s28 = smov 24  }
 0x172   : > { %v1069_v6 = vpop.permute.xlu0 %1068 }
 0x173   : > { %v1101_v7 = vpop.permute.xlu1 %1100  ;;  %1164 = vst.msk [vmem:[#allocation2 + $0x21] sm:$0xff] %vm553_vm1, %v1069_v6 }
 0x174   : > { %1180 = vst.msk [vmem:[#allocation2 + $0xe1] sm:$0xff] %vm553_vm1, %v1101_v7 }
 0x176   : > { %v1067_v9 = vpop.permute.xlu0 %1066 }
 0x177   : > { %v1073_v13 = vpop.permute.xlu1 %1072  ;;  %1163 = vst.msk [vmem:[#allocation2 + $0x19] sm:$0xff] %vm553_vm1, %v1067_v9 }
 0x178   : > { %1166 = vst.msk [vmem:[#allocation2 + $0x39] sm:$0xff] %vm553_vm1, %v1073_v13 }
 0x17a   : > { %v1099_v14 = vpop.permute.xlu0 %1098  ;;  %v1230_v15 = vld [vmem:[#allocation2 + $0x21] sm:$0xff] }
 0x17b   : > { %v1105_v16 = vpop.permute.xlu1 %1104  ;;  %1179 = vst.msk [vmem:[#allocation2 + $0xd9] sm:$0xff] %vm553_vm1, %v1099_v14  ;;  %1522 = vrot.lane.b32.xlu1 %v1230_v15, %s16618_s20  ;;  %v1246_v19 = vld [vmem:[#allocation2 + $0xe1] sm:$0xff] }
 0x17c   : > { %1182 = vst.msk [vmem:[#allocation2 + $0xf9] sm:$0xff] %vm553_vm1, %v1105_v16  ;;  %v1262_v27 = vld [vmem:[#allocation2 + $0x22] sm:$0xff] }
 0x17d   : > { %v1278_v35 = vld [vmem:[#allocation2 + $0xe2] sm:$0xff] }
 0x17e   : > { %v1229_v22 = vld [vmem:[#allocation2 + $0x19] sm:$0xff]  ;;  %v1103_v24 = vpop.permute.xlu0 %1102 }
 0x17f   : > { %v1071_v23 = vpop.permute.xlu1 %1070  ;;  %1554 = vrot.lane.b32.xlu1 %v1246_v19, %s16618_s20  ;;  %1520 = vrot.lane.b32.xlu0 %v1229_v22, %s16618_s20  ;;  %1181 = vst.msk [vmem:[#allocation2 + $0xf1] sm:$0xff] %vm553_vm1, %v1103_v24  ;;  %v1261_v36 = vld [vmem:[#allocation2 + $0x1a] sm:$0xff] }
 0x180   : > { %1165 = vst.msk [vmem:[#allocation2 + $0x31] sm:$0xff] %vm553_vm1, %v1071_v23  ;;  %v1291_v50 = vld [vmem:[#allocation2 + $0x18] sm:$0xff]  ;;  %v1292_v13 = vld [vmem:[#allocation2 + $0x20] sm:$0xff] }
 0x182   : > { %v1245_v28 = vld [vmem:[#allocation2 + $0xd9] sm:$0xff]  ;;  %v1075_v32 = vpop.permute.xlu0 %1074 }
 0x183   : > { %v1077_v29 = vpop.permute.xlu1 %1076  ;;  %1650 = vrot.lane.b32.xlu1 %v1262_v27, %s16616_s26  ;;  %1552 = vrot.lane.b32.xlu0 %v1245_v28, %s16618_s20  ;;  %1167 = vst.msk [vmem:[#allocation2 + $0x49] sm:$0xff] %vm553_vm1, %v1075_v32  ;;  %v1277_v45 = vld [vmem:[#allocation2 + $0xda] sm:$0xff] }
 0x184   : > { %1168 = vst.msk [vmem:[#allocation2 + $0x51] sm:$0xff] %vm553_vm1, %v1077_v29  ;;  %v1307_v59 = vld [vmem:[#allocation2 + $0xd8] sm:$0xff]  ;;  %v1308_v16 = vld [vmem:[#allocation2 + $0xe0] sm:$0xff] }
 0x186   : > { %v1107_v38 = vpop.permute.xlu0 %1106 }
 0x187   : > { %v1109_v37 = vpop.permute.xlu1 %1108  ;;  %1682 = vrot.lane.b32.xlu1 %v1278_v35, %s16616_s26  ;;  %1648 = vrot.lane.b32.xlu0 %v1261_v36, %s16616_s26  ;;  %1183 = vst.msk [vmem:[#allocation2 + $0x109] sm:$0xff] %vm553_vm1, %v1107_v38  ;;  %v1231_v29 = vld [vmem:[#allocation2 + $0x31] sm:$0xff] }
 0x188   : > { %1184 = vst.msk [vmem:[#allocation2 + $0x111] sm:$0xff] %vm553_vm1, %v1109_v37  ;;  %v1247_v37 = vld [vmem:[#allocation2 + $0xf1] sm:$0xff] }
 0x189   : > { %v1388_v26 = vld [vmem:[#allocation2 + $0x30] sm:$0xff] }
 0x18a   : > { %v1079_v48 = vpop.permute.xlu0 %1078 }
 0x18b   : > { %v1081_v46 = vpop.permute.xlu1 %1080  ;;  %1902 = vrot.lane.b32.xlu1 %v1230_v15, %s16612_s29  ;;  %1680 = vrot.lane.b32.xlu0 %v1277_v45, %s16616_s26  ;;  %1169 = vst.msk [vmem:[#allocation2 + $0x61] sm:$0xff] %vm553_vm1, %v1079_v48  ;;  %v1263_v48 = vld [vmem:[#allocation2 + $0x32] sm:$0xff] }
 0x18c   : > { %1170 = vst.msk [vmem:[#allocation2 + $0x69] sm:$0xff] %vm553_vm1, %v1081_v46  ;;  %v1280_v46 = vld [vmem:[#allocation2 + $0xfa] sm:$0xff] }
 0x18e   : > { %v1111_v56 = vpop.permute.xlu0 %1110 }
 0x18f   : > { %v1113_v51 = vpop.permute.xlu1 %1112  ;;  %1934 = vrot.lane.b32.xlu1 %v1246_v19, %s16612_s29  ;;  %1772 = vrot.lane.b32.xlu0 %v1291_v50, %s16614_s18  ;;  %1185 = vst.msk [vmem:[#allocation2 + $0x121] sm:$0xff] %vm553_vm1, %v1111_v56  ;;  %v1279_v56 = vld [vmem:[#allocation2 + $0xf2] sm:$0xff] }
 0x190   : > { %1186 = vst.msk [vmem:[#allocation2 + $0x129] sm:$0xff] %vm553_vm1, %v1113_v51 }
 0x192   : > { %v1083_v6 = vpop.permute.xlu0 %1082 }
 0x193   : > { %v1085_v60 = vpop.permute.xlu1 %1084  ;;  %2030 = vrot.lane.b32.xlu1 %v1262_v27, %s16608_s19  ;;  %1804 = vrot.lane.b32.xlu0 %v1307_v59, %s16614_s18  ;;  %1171 = vst.msk [vmem:[#allocation2 + $0x79] sm:$0xff] %vm553_vm1, %v1083_v6  ;;  %v1293_v59 = vld [vmem:[#allocation2 + $0x30] sm:$0xff]  ;;  %v10775_v6 = vld [vmem:[#allocation2 + $0x38] sm:$0xff] }
 0x194   : > { %1172 = vst.msk [vmem:[#allocation2 + $0x81] sm:$0xff] %vm553_vm1, %v1085_v60  ;;  %v1309_v60 = vld [vmem:[#allocation2 + $0xf0] sm:$0xff] }
 0x196   : > { %v1115_v9 = vpop.permute.xlu0 %1114 }
 0x197   : > { %v1117_v7 = vpop.permute.xlu1 %1116  ;;  %2062 = vrot.lane.b32.xlu1 %v1278_v35, %s16608_s19  ;;  %1900 = vrot.lane.b32.xlu0 %v1229_v22, %s16612_s29  ;;  %1187 = vst.msk [vmem:[#allocation2 + $0x139] sm:$0xff] %vm553_vm1, %v1115_v9  ;;  %v1232_v22 = vld [vmem:[#allocation2 + $0x39] sm:$0xff]  ;;  %v1234_v9 = vld [vmem:[#allocation2 + $0x51] sm:$0xff] }
 0x198   : > { %1188 = vst.msk [vmem:[#allocation2 + $0x141] sm:$0xff] %vm553_vm1, %v1117_v7  ;;  %v1310_v7 = vld [vmem:[#allocation2 + $0xf8] sm:$0xff] }
 0x19a   : > { %v1087_v15 = vpop.permute.xlu0 %1086  ;;  %v10901_v63 = vld [vmem:[#allocation2 + $0x79] sm:$0xff] }
 0x19b   : > { %v1089_v14 = vpop.permute.xlu1 %1088  ;;  %1774 = vrot.lane.b32.xlu1 %v1292_v13, %s16614_s18  ;;  %1932 = vrot.lane.b32.xlu0 %v1245_v28, %s16612_s29  ;;  %1173 = vst.msk [vmem:[#allocation2 + $0x91] sm:$0xff] %vm553_vm1, %v1087_v15  ;;  %v1248_v28 = vld [vmem:[#allocation2 + $0xf9] sm:$0xff]  ;;  %v1250_v13 = vld [vmem:[#allocation2 + $0x111] sm:$0xff]  ;;  %v1270_v49 = vld [vmem:[#allocation2 + $0x82] sm:$0xff] }
 0x19c   : > { %1174 = vst.msk [vmem:[#allocation2 + $0x99] sm:$0xff] %vm553_vm1, %v1089_v14  ;;  %v1233_v14 = vld [vmem:[#allocation2 + $0x49] sm:$0xff]  ;;  %v1266_v15 = vld [vmem:[#allocation2 + $0x52] sm:$0xff]  ;;  %v1269_v47 = vld [vmem:[#allocation2 + $0x7a] sm:$0xff] }
 0x19e   : > { %v1119_v23 = vpop.permute.xlu0 %1118  ;;  %v1253_v62 = vld [vmem:[#allocation2 + $0x139] sm:$0xff] }
 0x19f   : > { %v1121_v19 = vpop.permute.xlu1 %1120  ;;  %1806 = vrot.lane.b32.xlu1 %v1308_v16, %s16614_s18  ;;  %2028 = vrot.lane.b32.xlu0 %v1261_v36, %s16608_s19  ;;  %1189 = vst.msk [vmem:[#allocation2 + $0x151] sm:$0xff] %vm553_vm1, %v1119_v23  ;;  %v1264_v36 = vld [vmem:[#allocation2 + $0x3a] sm:$0xff]  ;;  %v1249_v16 = vld [vmem:[#allocation2 + $0x109] sm:$0xff] }
 0x1a0   : > { %1190 = vst.msk [vmem:[#allocation2 + $0x159] sm:$0xff] %vm553_vm1, %v1121_v19  ;;  %v1282_v19 = vld [vmem:[#allocation2 + $0x112] sm:$0xff]  ;;  %v1265_v23 = vld [vmem:[#allocation2 + $0x4a] sm:$0xff]  ;;  %v1286_v34 = vld [vmem:[#allocation2 + $0x142] sm:$0xff] }
 0x1a1   : > { %v1285_v33 = vld [vmem:[#allocation2 + $0x13a] sm:$0xff] }
 0x1a2   : > { %v1091_v27 = vpop.permute.xlu0 %1090 }
 0x1a3   : > { %v1093_v24 = vpop.permute.xlu1 %1092  ;;  %1526 = vrot.lane.b32.xlu1 %v1232_v22, %s16618_s20  ;;  %2060 = vrot.lane.b32.xlu0 %v1277_v45, %s16608_s19  ;;  %1175 = vst.msk [vmem:[#allocation2 + $0xa9] sm:$0xff] %vm553_vm1, %v1091_v27  ;;  %v10797_v27 = vld [vmem:[#allocation2 + $0x108] sm:$0xff] }
 0x1a4   : > { %1176 = vst.msk [vmem:[#allocation2 + $0xb1] sm:$0xff] %vm553_vm1, %v1093_v24  ;;  %v10792_v24 = vld [vmem:[#allocation2 + $0x48] sm:$0xff] }
 0x1a6   : > { %v1123_v35 = vpop.permute.xlu0 %1122 }
 0x1a7   : > { %v1125_v32 = vpop.permute.xlu1 %1124  ;;  %1558 = vrot.lane.b32.xlu1 %v1248_v28, %s16618_s20  ;;  %1524 = vrot.lane.b32.xlu0 %v1231_v29, %s16618_s20  ;;  %1191 = vst.msk [vmem:[#allocation2 + $0x169] sm:$0xff] %vm553_vm1, %v1123_v35 }
 0x1a8   : > { %1192 = vst.msk [vmem:[#allocation2 + $0x171] sm:$0xff] %vm553_vm1, %v1125_v32  ;;  %v10811_v32 = vld [vmem:[#allocation2 + $0x110] sm:$0xff] }
 0x1aa   : > { %v1095_v45 = vpop.permute.xlu0 %1094  ;;  %v11071_v17 = vld [vmem:[#allocation2 + $0xa9] sm:$0xff] }
 0x1ab   : > { %v1097_v38 = vpop.permute.xlu1 %1096  ;;  %1654 = vrot.lane.b32.xlu1 %v1264_v36, %s16616_s26  ;;  %1556 = vrot.lane.b32.xlu0 %v1247_v37, %s16618_s20  ;;  %1177 = vst.msk [vmem:[#allocation2 + $0xc1] sm:$0xff] %vm553_vm1, %v1095_v45  ;;  %v11095_v3 = vld [vmem:[#allocation2 + $0xaa] sm:$0xff] }
 0x1ac   : > { %1178 = vst.msk [vmem:[#allocation2 + $0xc9] sm:$0xff] %vm553_vm1, %v1097_v38 }
 0x1ae   : > { %v1127_v51 = vpop.permute.xlu0 %1126 }
 0x1af   : > { %v1129_v50 = vpop.permute.xlu1 %1128  ;;  %1686 = vrot.lane.b32.xlu1 %v1280_v46, %s16616_s26  ;;  %1652 = vrot.lane.b32.xlu0 %v1263_v48, %s16616_s26  ;;  %1193 = vst.msk [vmem:[#allocation2 + $0x181] sm:$0xff] %vm553_vm1, %v1127_v51  ;;  %v11069_v2 = vld [vmem:[#allocation2 + $0x171] sm:$0xff] }
 0x1b0   : > { %1194 = vst.msk [vmem:[#allocation2 + $0x189] sm:$0xff] %vm553_vm1, %v1129_v50  ;;  %v11153_v61 = vld [vmem:[#allocation2 + $0x170] sm:$0xff] }
 0x1b2   : > { %v11175_v41 = vld [vmem:[#allocation2 + $0xc1] sm:$0xff] }
 0x1b3   : > { %1906 = vrot.lane.b32.xlu1 %v1232_v22, %s16612_s29  ;;  %1684 = vrot.lane.b32.xlu0 %v1279_v56, %s16616_s26  ;;  %v1281_v22 = vld [vmem:[#allocation2 + $0x10a] sm:$0xff]  ;;  %v11185_v39 = vld [vmem:[#allocation2 + $0xc2] sm:$0xff] }
 0x1b4   : > { %v11163_v43 = vld [vmem:[#allocation2 + $0xc9] sm:$0xff]  ;;  %v11197_v42 = vld [vmem:[#allocation2 + $0xc0] sm:$0xff] }
 0x1b5   : > { %v11173_v0 = vld [vmem:[#allocation2 + $0xca] sm:$0xff] }
 0x1b6   : > { %v11207_v8 = vld [vmem:[#allocation2 + $0x180] sm:$0xff]  ;;  %v11217_v10 = vld [vmem:[#allocation2 + $0xc8] sm:$0xff] }
 0x1b7   : > { %1938 = vrot.lane.b32.xlu1 %v1248_v28, %s16612_s29  ;;  %1776 = vrot.lane.b32.xlu0 %v1293_v59, %s16614_s18  ;;  %v10804_v28 = vld [vmem:[#allocation2 + $0x50] sm:$0xff]  ;;  %v1251_v59 = vld [vmem:[#allocation2 + $0x121] sm:$0xff]  ;;  %16803 = vst [vmem:[#allocation138_spill] sm:$0xff] %v11217_v10 }
 0x1b8   : > { %v11195_v21 = vld [vmem:[#allocation2 + $0x189] sm:$0xff]  ;;  %v11229_v55 = vld [vmem:[#allocation2 + $0x181] sm:$0xff] }
 0x1b9   : > { %v11227_v58 = vld [vmem:[#allocation2 + $0x188] sm:$0xff] }
 0x1ba   : > { %v11239_v44 = vld [vmem:[#allocation2 + $0x18a] sm:$0xff]  ;;  %v11249_v57 = vld [vmem:[#allocation2 + $0x182] sm:$0xff] }
 0x1bb   : > { %2034 = vrot.lane.b32.xlu1 %v1264_v36, %s16608_s19  ;;  %1808 = vrot.lane.b32.xlu0 %v1309_v60, %s16614_s18 }
 0x1bf   : > { %2066 = vrot.lane.b32.xlu1 %v1280_v46, %s16608_s19  ;;  %1904 = vrot.lane.b32.xlu0 %v1231_v29, %s16612_s29  ;;  %v1252_v46 = vld [vmem:[#allocation2 + $0x129] sm:$0xff] }
 0x1c3   : > { %1778 = vrot.lane.b32.xlu1 %v10775_v6, %s16614_s18  ;;  %1936 = vrot.lane.b32.xlu0 %v1247_v37, %s16612_s29  ;;  %v1236_v37 = vld [vmem:[#allocation2 + $0x69] sm:$0xff] }
 0x1c7   : > { %1810 = vrot.lane.b32.xlu1 %v1310_v7, %s16614_s18  ;;  %2032 = vrot.lane.b32.xlu0 %v1263_v48, %s16608_s19  ;;  %v1235_v48 = vld [vmem:[#allocation2 + $0x61] sm:$0xff] }
 0x1cb   : > { %1530 = vrot.lane.b32.xlu1 %v1234_v9, %s16618_s20  ;;  %2064 = vrot.lane.b32.xlu0 %v1279_v56, %s16608_s19  ;;  %v1268_v56 = vld [vmem:[#allocation2 + $0x6a] sm:$0xff] }
 0x1cf   : > { %1562 = vrot.lane.b32.xlu1 %v1250_v13, %s16618_s20  ;;  %1528 = vrot.lane.b32.xlu0 %v1233_v14, %s16618_s20 }
 0x1d3   : > { %1658 = vrot.lane.b32.xlu1 %v1266_v15, %s16616_s26  ;;  %1560 = vrot.lane.b32.xlu0 %v1249_v16, %s16618_s20 }
 0x1d7   : > { %1690 = vrot.lane.b32.xlu1 %v1282_v19, %s16616_s26  ;;  %1656 = vrot.lane.b32.xlu0 %v1265_v23, %s16616_s26 }
 0x1db   : > { %1910 = vrot.lane.b32.xlu1 %v1234_v9, %s16612_s29  ;;  %1688 = vrot.lane.b32.xlu0 %v1281_v22, %s16616_s26  ;;  %v1284_v9 = vld [vmem:[#allocation2 + $0x12a] sm:$0xff] }
 0x1df   : > { %1942 = vrot.lane.b32.xlu1 %v1250_v13, %s16612_s29  ;;  %1780 = vrot.lane.b32.xlu0 %v10792_v24, %s16614_s18  ;;  %v1267_v13 = vld [vmem:[#allocation2 + $0x62] sm:$0xff] }
 0x1e3   : > { %2038 = vrot.lane.b32.xlu1 %v1266_v15, %s16608_s19  ;;  %1812 = vrot.lane.b32.xlu0 %v10797_v27, %s16614_s18 }
 0x1e7   : > { %2070 = vrot.lane.b32.xlu1 %v1282_v19, %s16608_s19  ;;  %1908 = vrot.lane.b32.xlu0 %v1233_v14, %s16612_s29 }
 0x1eb   : > { %1782 = vrot.lane.b32.xlu1 %v10804_v28, %s16614_s18  ;;  %1940 = vrot.lane.b32.xlu0 %v1249_v16, %s16612_s29  ;;  %v1283_v16 = vld [vmem:[#allocation2 + $0x122] sm:$0xff] }
 0x1ed   : > { %v10809_v29 = vpop.permute.xlu1 %1522 }
 0x1ee   : > { %16710 = vst [vmem:[#allocation45_spill] sm:$0xff] %v10809_v29  ;;  %v11143_v29 = vld [vmem:[#allocation2 + $0xb0] sm:$0xff] }
 0x1ef   : > { %1814 = vrot.lane.b32.xlu1 %v10811_v32, %s16614_s18  ;;  %2036 = vrot.lane.b32.xlu0 %v1265_v23, %s16608_s19 }
 0x1f1   : > { %v10816_v35 = vpop.permute.xlu1 %1554  ;;  %v10818_v36 = vpop.permute.xlu0 %1520 }
 0x1f2   : > { %16711 = vst [vmem:[#allocation46_spill] sm:$0xff] %v10816_v35  ;;  %16712 = vst [vmem:[#allocation47_spill] sm:$0xff] %v10818_v36 }
 0x1f3   : > { %1534 = vrot.lane.b32.xlu1 %v1236_v37, %s16618_s20  ;;  %2068 = vrot.lane.b32.xlu0 %v1281_v22, %s16608_s19  ;;  %v10850_v22 = vld [vmem:[#allocation2 + $0x60] sm:$0xff] }
 0x1f5   : > { %v10822_v38 = vpop.permute.xlu1 %1650  ;;  %v10824_v45 = vpop.permute.xlu0 %1552 }
 0x1f6   : > { %16713 = vst [vmem:[#allocation48_spill] sm:$0xff] %v10822_v38  ;;  %16714 = vst [vmem:[#allocation49_spill] sm:$0xff] %v10824_v45  ;;  %v10859_v45 = vld [vmem:[#allocation2 + $0x120] sm:$0xff]  ;;  %v11115_v38 = vld [vmem:[#allocation2 + $0xa8] sm:$0xff] }
 0x1f7   : > { %1566 = vrot.lane.b32.xlu1 %v1252_v46, %s16618_s20  ;;  %1532 = vrot.lane.b32.xlu0 %v1235_v48, %s16618_s20 }
 0x1f9   : > { %v10828_v50 = vpop.permute.xlu1 %1682  ;;  %v10830_v51 = vpop.permute.xlu0 %1648 }
 0x1fa   : > { %16715 = vst [vmem:[#allocation50_spill] sm:$0xff] %v10828_v50  ;;  %16716 = vst [vmem:[#allocation51_spill] sm:$0xff] %v10830_v51  ;;  %v10874_v50 = vld [vmem:[#allocation2 + $0x68] sm:$0xff] }
 0x1fb   : > { %1662 = vrot.lane.b32.xlu1 %v1268_v56, %s16616_s26  ;;  %1564 = vrot.lane.b32.xlu0 %v1251_v59, %s16618_s20 }
 0x1fd   : > { %v10834_v60 = vpop.permute.xlu1 %1902  ;;  %v10836_v7 = vpop.permute.xlu0 %1680 }
 0x1fe   : > { %16717 = vst [vmem:[#allocation52_spill] sm:$0xff] %v10834_v60  ;;  %16718 = vst [vmem:[#allocation53_spill] sm:$0xff] %v10836_v7  ;;  %v11093_v60 = vld [vmem:[#allocation2 + $0x172] sm:$0xff] }
 0x1ff   : > { %1694 = vrot.lane.b32.xlu1 %v1284_v9, %s16616_s26  ;;  %1660 = vrot.lane.b32.xlu0 %v1267_v13, %s16616_s26 }
 0x201   : > { %v10840_v14 = vpop.permute.xlu1 %1934  ;;  %v10842_v15 = vpop.permute.xlu0 %1772 }
 0x202   : > { %16719 = vst [vmem:[#allocation54_spill] sm:$0xff] %v10840_v14  ;;  %16720 = vst [vmem:[#allocation55_spill] sm:$0xff] %v10842_v15  ;;  %v11025_v15 = vld [vmem:[#allocation2 + $0x150] sm:$0xff] }
 0x203   : > { %1914 = vrot.lane.b32.xlu1 %v1236_v37, %s16612_s29  ;;  %1692 = vrot.lane.b32.xlu0 %v1283_v16, %s16616_s26 }
 0x205   : > { %v10846_v19 = vpop.permute.xlu1 %2030  ;;  %v10848_v23 = vpop.permute.xlu0 %1804 }
 0x206   : > { %16721 = vst [vmem:[#allocation56_spill] sm:$0xff] %v10846_v19  ;;  %16722 = vst [vmem:[#allocation57_spill] sm:$0xff] %v10848_v23  ;;  %v1254_v23 = vld [vmem:[#allocation2 + $0x141] sm:$0xff] }
 0x207   : > { %1946 = vrot.lane.b32.xlu1 %v1252_v46, %s16612_s29  ;;  %1784 = vrot.lane.b32.xlu0 %v10850_v22, %s16614_s18 }
 0x209   : > { %v10855_v1 = vpop.permute.xlu1 %2062  ;;  %v10857_v7 = vpop.permute.xlu0 %1900 }
 0x20a   : > { %16723 = vst [vmem:[#allocation58_spill] sm:$0xff] %v10855_v1  ;;  %16724 = vst [vmem:[#allocation59_spill] sm:$0xff] %v10857_v7  ;;  %v1287_v7 = vld [vmem:[#allocation2 + $0x152] sm:$0xff] }
 0x20b   : > { %2042 = vrot.lane.b32.xlu1 %v1268_v56, %s16608_s19  ;;  %1816 = vrot.lane.b32.xlu0 %v10859_v45, %s16614_s18 }
 0x20d   : > { %v10864_v37 = vpop.permute.xlu1 %1774  ;;  %v10866_v14 = vpop.permute.xlu0 %1932 }
 0x20e   : > { %16725 = vst [vmem:[#allocation60_spill] sm:$0xff] %v10864_v37  ;;  %16726 = vst [vmem:[#allocation61_spill] sm:$0xff] %v10866_v14  ;;  %v10883_v14 = vld [vmem:[#allocation2 + $0x128] sm:$0xff] }
 0x20f   : > { %2074 = vrot.lane.b32.xlu1 %v1284_v9, %s16608_s19  ;;  %1912 = vrot.lane.b32.xlu0 %v1235_v48, %s16612_s29  ;;  %v11125_v37 = vld [vmem:[#allocation2 + $0x168] sm:$0xff] }
 0x211   : > { %v10870_v46 = vpop.permute.xlu1 %1806  ;;  %v10872_v1 = vpop.permute.xlu0 %2028 }
 0x212   : > { %16727 = vst [vmem:[#allocation62_spill] sm:$0xff] %v10870_v46  ;;  %16728 = vst [vmem:[#allocation63_spill] sm:$0xff] %v10872_v1  ;;  %v10892_v46 = vld [vmem:[#allocation2 + $0x81] sm:$0xff]  ;;  %v10983_v1 = vld [vmem:[#allocation2 + $0x91] sm:$0xff] }
 0x213   : > { %1786 = vrot.lane.b32.xlu1 %v10874_v50, %s16614_s18  ;;  %1944 = vrot.lane.b32.xlu0 %v1251_v59, %s16612_s29 }
 0x215   : > { %v10879_v56 = vpop.permute.xlu1 %1526  ;;  %v10881_v35 = vpop.permute.xlu0 %2060 }
 0x216   : > { %16729 = vst [vmem:[#allocation64_spill] sm:$0xff] %v10879_v56  ;;  %16730 = vst [vmem:[#allocation65_spill] sm:$0xff] %v10881_v35  ;;  %v1271_v56 = vld [vmem:[#allocation2 + $0x92] sm:$0xff] }
 0x217   : > { %1818 = vrot.lane.b32.xlu1 %v10883_v14, %s16614_s18  ;;  %2040 = vrot.lane.b32.xlu0 %v1267_v13, %s16608_s19 }
 0x219   : > { %v10888_v48 = vpop.permute.xlu1 %1558  ;;  %v10890_v9 = vpop.permute.xlu0 %1524 }
 0x21a   : > { %16731 = vst [vmem:[#allocation66_spill] sm:$0xff] %v10888_v48  ;;  %16732 = vst [vmem:[#allocation67_spill] sm:$0xff] %v10890_v9 }
 0x21b   : > { %1538 = vrot.lane.b32.xlu1 %v10892_v46, %s16618_s20  ;;  %2072 = vrot.lane.b32.xlu0 %v1283_v16, %s16608_s19 }
 0x21d   : > { %v10897_v59 = vpop.permute.xlu1 %1654  ;;  %v10899_v35 = vpop.permute.xlu0 %1556 }
 0x21e   : > { %16733 = vst [vmem:[#allocation68_spill] sm:$0xff] %v10897_v59  ;;  %16734 = vst [vmem:[#allocation69_spill] sm:$0xff] %v10899_v35  ;;  %v10938_v59 = vld [vmem:[#allocation2 + $0x138] sm:$0xff] }
 0x21f   : > { %1570 = vrot.lane.b32.xlu1 %v1254_v23, %s16618_s20  ;;  %1536 = vrot.lane.b32.xlu0 %v10901_v63, %s16618_s20 }
 0x221   : > { %v10906_v13 = vpop.permute.xlu1 %1686  ;;  %v10908_v48 = vpop.permute.xlu0 %1652 }
 0x222   : > { %16735 = vst [vmem:[#allocation70_spill] sm:$0xff] %v10906_v13  ;;  %16736 = vst [vmem:[#allocation71_spill] sm:$0xff] %v10908_v48 }
 0x223   : > { %1666 = vrot.lane.b32.xlu1 %v1270_v49, %s16616_s26  ;;  %1568 = vrot.lane.b32.xlu0 %v1253_v62, %s16618_s20 }
 0x225   : > { %v10912_v16 = vpop.permute.xlu1 %1906  ;;  %v10914_v35 = vpop.permute.xlu0 %1684 }
 0x226   : > { %16737 = vst [vmem:[#allocation72_spill] sm:$0xff] %v10912_v16  ;;  %16738 = vst [vmem:[#allocation73_spill] sm:$0xff] %v10914_v35  ;;  %v10929_v35 = vld [vmem:[#allocation2 + $0x78] sm:$0xff] }
 0x227   : > { %1698 = vrot.lane.b32.xlu1 %v1286_v34, %s16616_s26  ;;  %1664 = vrot.lane.b32.xlu0 %v1269_v47, %s16616_s26  ;;  %v1288_v16 = vld [vmem:[#allocation2 + $0x15a] sm:$0xff] }
 0x229   : > { %v10918_v18 = vpop.permute.xlu1 %1938  ;;  %v10920_v13 = vpop.permute.xlu0 %1776 }
 0x22a   : > { %16739 = vst [vmem:[#allocation74_spill] sm:$0xff] %v10918_v18  ;;  %16740 = vst [vmem:[#allocation75_spill] sm:$0xff] %v10920_v13 }
 0x22b   : > { %1918 = vrot.lane.b32.xlu1 %v10892_v46, %s16612_s29  ;;  %1696 = vrot.lane.b32.xlu0 %v1285_v33, %s16616_s26 }
 0x22d   : > { %v10925_v48 = vpop.permute.xlu1 %2034  ;;  %v10927_v19 = vpop.permute.xlu0 %1808 }
 0x22e   : > { %16741 = vst [vmem:[#allocation76_spill] sm:$0xff] %v10925_v48  ;;  %16742 = vst [vmem:[#allocation77_spill] sm:$0xff] %v10927_v19 }
 0x22f   : > { %1950 = vrot.lane.b32.xlu1 %v1254_v23, %s16612_s29  ;;  %1788 = vrot.lane.b32.xlu0 %v10929_v35, %s16614_s18 }
 0x231   : > { %v10934_v18 = vpop.permute.xlu1 %2066  ;;  %v10936_v13 = vpop.permute.xlu0 %1904 }
 0x232   : > { %16743 = vst [vmem:[#allocation78_spill] sm:$0xff] %v10934_v18  ;;  %16744 = vst [vmem:[#allocation79_spill] sm:$0xff] %v10936_v13  ;;  %v10954_v13 = vld [vmem:[#allocation2 + $0x80] sm:$0xff] }
 0x233   : > { %2046 = vrot.lane.b32.xlu1 %v1270_v49, %s16608_s19  ;;  %1820 = vrot.lane.b32.xlu0 %v10938_v59, %s16614_s18 }
 0x235   : > { %v10943_v48 = vpop.permute.xlu1 %1778  ;;  %v10945_v19 = vpop.permute.xlu0 %1936 }
 0x236   : > { %16745 = vst [vmem:[#allocation80_spill] sm:$0xff] %v10943_v48  ;;  %16746 = vst [vmem:[#allocation81_spill] sm:$0xff] %v10945_v19  ;;  %v10963_v19 = vld [vmem:[#allocation2 + $0x140] sm:$0xff]  ;;  %v11105_v48 = vld [vmem:[#allocation2 + $0x16a] sm:$0xff] }
 0x237   : > { %2078 = vrot.lane.b32.xlu1 %v1286_v34, %s16608_s19  ;;  %1916 = vrot.lane.b32.xlu0 %v10901_v63, %s16612_s29 }
 0x239   : > { %v10950_v23 = vpop.permute.xlu1 %1810  ;;  %v10952_v18 = vpop.permute.xlu0 %2032 }
 0x23a   : > { %16747 = vst [vmem:[#allocation82_spill] sm:$0xff] %v10950_v23  ;;  %16748 = vst [vmem:[#allocation83_spill] sm:$0xff] %v10952_v18  ;;  %v10972_v18 = vld [vmem:[#allocation2 + $0x99] sm:$0xff] }
 0x23b   : > { %1790 = vrot.lane.b32.xlu1 %v10954_v13, %s16614_s18  ;;  %1948 = vrot.lane.b32.xlu0 %v1253_v62, %s16612_s29 }
 0x23d   : > { %v10959_v49 = vpop.permute.xlu1 %1530  ;;  %v10961_v9 = vpop.permute.xlu0 %2064 }
 0x23e   : > { %16749 = vst [vmem:[#allocation84_spill] sm:$0xff] %v10959_v49  ;;  %16750 = vst [vmem:[#allocation85_spill] sm:$0xff] %v10961_v9  ;;  %v10981_v49 = vld [vmem:[#allocation2 + $0x159] sm:$0xff] }
 0x23f   : > { %1822 = vrot.lane.b32.xlu1 %v10963_v19, %s16614_s18  ;;  %2044 = vrot.lane.b32.xlu0 %v1269_v47, %s16608_s19 }
 0x241   : > { %v10968_v34 = vpop.permute.xlu1 %1562  ;;  %v10970_v23 = vpop.permute.xlu0 %1528 }
 0x242   : > { %16751 = vst [vmem:[#allocation86_spill] sm:$0xff] %v10968_v34  ;;  %16752 = vst [vmem:[#allocation87_spill] sm:$0xff] %v10970_v23  ;;  %v1272_v23 = vld [vmem:[#allocation2 + $0x9a] sm:$0xff] }
 0x243   : > { %1542 = vrot.lane.b32.xlu1 %v10972_v18, %s16618_s20  ;;  %2076 = vrot.lane.b32.xlu0 %v1285_v33, %s16608_s19  ;;  %v10993_v33 = vld [vmem:[#allocation2 + $0x151] sm:$0xff] }
 0x245   : > { %v10977_v62 = vpop.permute.xlu1 %1658  ;;  %v10979_v9 = vpop.permute.xlu0 %1560 }
 0x246   : > { %16753 = vst [vmem:[#allocation88_spill] sm:$0xff] %v10977_v62  ;;  %16754 = vst [vmem:[#allocation89_spill] sm:$0xff] %v10979_v9 }
 0x247   : > { %1574 = vrot.lane.b32.xlu1 %v10981_v49, %s16618_s20  ;;  %1540 = vrot.lane.b32.xlu0 %v10983_v1, %s16618_s20 }
 0x249   : > { %v10989_v47 = vpop.permute.xlu1 %1690  ;;  %v10991_v34 = vpop.permute.xlu0 %1656 }
 0x24a   : > { %16755 = vst [vmem:[#allocation90_spill] sm:$0xff] %v10989_v47  ;;  %16756 = vst [vmem:[#allocation91_spill] sm:$0xff] %v10991_v34 }
 0x24b   : > { %1670 = vrot.lane.b32.xlu1 %v1272_v23, %s16616_s26  ;;  %1572 = vrot.lane.b32.xlu0 %v10993_v33, %s16618_s20 }
 0x24d   : > { %v10998_v9 = vpop.permute.xlu1 %1910  ;;  %v11000_v62 = vpop.permute.xlu0 %1688 }
 0x24e   : > { %16757 = vst [vmem:[#allocation92_spill] sm:$0xff] %v10998_v9  ;;  %16758 = vst [vmem:[#allocation93_spill] sm:$0xff] %v11000_v62  ;;  %v11015_v62 = vld [vmem:[#allocation2 + $0x90] sm:$0xff] }
 0x24f   : > { %1702 = vrot.lane.b32.xlu1 %v1288_v16, %s16616_s26  ;;  %1668 = vrot.lane.b32.xlu0 %v1271_v56, %s16616_s26 }
 0x251   : > { %v11004_v47 = vpop.permute.xlu1 %1942  ;;  %v11006_v34 = vpop.permute.xlu0 %1780 }
 0x252   : > { %16759 = vst [vmem:[#allocation94_spill] sm:$0xff] %v11004_v47  ;;  %16760 = vst [vmem:[#allocation95_spill] sm:$0xff] %v11006_v34 }
 0x253   : > { %1922 = vrot.lane.b32.xlu1 %v10972_v18, %s16612_s29  ;;  %1700 = vrot.lane.b32.xlu0 %v1287_v7, %s16616_s26 }
 0x255   : > { %v11011_v51 = vpop.permute.xlu1 %2038  ;;  %v11013_v9 = vpop.permute.xlu0 %1812 }
 0x256   : > { %16761 = vst [vmem:[#allocation96_spill] sm:$0xff] %v11011_v51  ;;  %16762 = vst [vmem:[#allocation97_spill] sm:$0xff] %v11013_v9 }
 0x257   : > { %1954 = vrot.lane.b32.xlu1 %v10981_v49, %s16612_s29  ;;  %1792 = vrot.lane.b32.xlu0 %v11015_v62, %s16614_s18 }
 0x259   : > { %v11021_v47 = vpop.permute.xlu1 %2070  ;;  %v11023_v34 = vpop.permute.xlu0 %1908 }
 0x25a   : > { %16763 = vst [vmem:[#allocation98_spill] sm:$0xff] %v11021_v47  ;;  %16764 = vst [vmem:[#allocation99_spill] sm:$0xff] %v11023_v34  ;;  %v11041_v34 = vld [vmem:[#allocation2 + $0x98] sm:$0xff] }
 0x25b   : > { %2050 = vrot.lane.b32.xlu1 %v1272_v23, %s16608_s19  ;;  %1824 = vrot.lane.b32.xlu0 %v11025_v15, %s16614_s18 }
 0x25d   : > { %v11030_v9 = vpop.permute.xlu1 %1782  ;;  %v11032_v51 = vpop.permute.xlu0 %1940 }
 0x25e   : > { %16765 = vst [vmem:[#allocation100_spill] sm:$0xff] %v11030_v9  ;;  %16766 = vst [vmem:[#allocation101_spill] sm:$0xff] %v11032_v51  ;;  %v11060_v9 = vld [vmem:[#allocation2 + $0xb1] sm:$0xff] }
 0x25f   : > { %2082 = vrot.lane.b32.xlu1 %v1288_v16, %s16608_s19  ;;  %1920 = vrot.lane.b32.xlu0 %v10983_v1, %s16612_s29  ;;  %v11051_v16 = vld [vmem:[#allocation2 + $0x158] sm:$0xff] }
 0x261   : > { %v11037_v36 = vpop.permute.xlu1 %1814  ;;  %v11039_v47 = vpop.permute.xlu0 %2036 }
 0x262   : > { %16767 = vst [vmem:[#allocation102_spill] sm:$0xff] %v11037_v36  ;;  %16768 = vst [vmem:[#allocation103_spill] sm:$0xff] %v11039_v47 }
 0x263   : > { %1794 = vrot.lane.b32.xlu1 %v11041_v34, %s16614_s18  ;;  %1952 = vrot.lane.b32.xlu0 %v10993_v33, %s16612_s29 }
 0x265   : > { %v11047_v23 = vpop.permute.xlu1 %1534  ;;  %v11049_v51 = vpop.permute.xlu0 %2068 }
 0x266   : > { %16769 = vst [vmem:[#allocation104_spill] sm:$0xff] %v11047_v23  ;;  %16770 = vst [vmem:[#allocation105_spill] sm:$0xff] %v11049_v51 }
 0x267   : > { %1826 = vrot.lane.b32.xlu1 %v11051_v16, %s16614_s18  ;;  %2048 = vrot.lane.b32.xlu0 %v1271_v56, %s16608_s19 }
 0x269   : > { %v11056_v36 = vpop.permute.xlu1 %1566  ;;  %v11058_v47 = vpop.permute.xlu0 %1532 }
 0x26a   : > { %16771 = vst [vmem:[#allocation106_spill] sm:$0xff] %v11056_v36  ;;  %16772 = vst [vmem:[#allocation107_spill] sm:$0xff] %v11058_v47  ;;  %v11081_v47 = vld [vmem:[#allocation2 + $0xb2] sm:$0xff] }
 0x26b   : > { %1546 = vrot.lane.b32.xlu1 %v11060_v9, %s16618_s20  ;;  %2080 = vrot.lane.b32.xlu0 %v1287_v7, %s16608_s19  ;;  %v11083_v7 = vld [vmem:[#allocation2 + $0x169] sm:$0xff] }
 0x26d   : > { %v11065_v23 = vpop.permute.xlu1 %1662  ;;  %v11067_v51 = vpop.permute.xlu0 %1564 }
 0x26e   : > { %16773 = vst [vmem:[#allocation108_spill] sm:$0xff] %v11065_v23  ;;  %16774 = vst [vmem:[#allocation109_spill] sm:$0xff] %v11067_v51 }
 0x26f   : > { %1578 = vrot.lane.b32.xlu1 %v11069_v2, %s16618_s20  ;;  %1544 = vrot.lane.b32.xlu0 %v11071_v17, %s16618_s20 }
 0x271   : > { %v11077_v56 = vpop.permute.xlu1 %1694  ;;  %v11079_v36 = vpop.permute.xlu0 %1660 }
 0x272   : > { %16775 = vst [vmem:[#allocation110_spill] sm:$0xff] %v11077_v56  ;;  %16776 = vst [vmem:[#allocation111_spill] sm:$0xff] %v11079_v36 }
 0x273   : > { %1674 = vrot.lane.b32.xlu1 %v11081_v47, %s16616_s26  ;;  %1576 = vrot.lane.b32.xlu0 %v11083_v7, %s16618_s20 }
 0x275   : > { %v11089_v51 = vpop.permute.xlu1 %1914  ;;  %v11091_v23 = vpop.permute.xlu0 %1692 }
 0x276   : > { %16777 = vst [vmem:[#allocation112_spill] sm:$0xff] %v11089_v51  ;;  %16778 = vst [vmem:[#allocation113_spill] sm:$0xff] %v11091_v23 }
 0x277   : > { %1706 = vrot.lane.b32.xlu1 %v11093_v60, %s16616_s26  ;;  %1672 = vrot.lane.b32.xlu0 %v11095_v3, %s16616_s26 }
 0x279   : > { %v11101_v56 = vpop.permute.xlu1 %1946  ;;  %v11103_v36 = vpop.permute.xlu0 %1784 }
 0x27a   : > { %16779 = vst [vmem:[#allocation114_spill] sm:$0xff] %v11101_v56  ;;  %16780 = vst [vmem:[#allocation115_spill] sm:$0xff] %v11103_v36 }
 0x27b   : > { %1926 = vrot.lane.b32.xlu1 %v11060_v9, %s16612_s29  ;;  %1704 = vrot.lane.b32.xlu0 %v11105_v48, %s16616_s26 }
 0x27d   : > { %v11111_v23 = vpop.permute.xlu1 %2042  ;;  %v11113_v51 = vpop.permute.xlu0 %1816 }
 0x27e   : > { %16781 = vst [vmem:[#allocation116_spill] sm:$0xff] %v11111_v23  ;;  %16782 = vst [vmem:[#allocation117_spill] sm:$0xff] %v11113_v51 }
 0x27f   : > { %1958 = vrot.lane.b32.xlu1 %v11069_v2, %s16612_s29  ;;  %1796 = vrot.lane.b32.xlu0 %v11115_v38, %s16614_s18 }
 0x281   : > { %v11121_v56 = vpop.permute.xlu1 %2074  ;;  %v11123_v36 = vpop.permute.xlu0 %1912 }
 0x282   : > { %16783 = vst [vmem:[#allocation118_spill] sm:$0xff] %v11121_v56  ;;  %16784 = vst [vmem:[#allocation119_spill] sm:$0xff] %v11123_v36 }
 0x283   : > { %2054 = vrot.lane.b32.xlu1 %v11081_v47, %s16608_s19  ;;  %1828 = vrot.lane.b32.xlu0 %v11125_v37, %s16614_s18 }
 0x285   : > { %v11131_v51 = vpop.permute.xlu1 %1786  ;;  %v11133_v23 = vpop.permute.xlu0 %1944 }
 0x286   : > { %16785 = vst [vmem:[#allocation120_spill] sm:$0xff] %v11131_v51  ;;  %16786 = vst [vmem:[#allocation121_spill] sm:$0xff] %v11133_v23 }
 0x287   : > { %2086 = vrot.lane.b32.xlu1 %v11093_v60, %s16608_s19  ;;  %1924 = vrot.lane.b32.xlu0 %v11071_v17, %s16612_s29 }
 0x289   : > { %v11139_v56 = vpop.permute.xlu1 %1818  ;;  %v11141_v36 = vpop.permute.xlu0 %2040 }
 0x28a   : > { %16787 = vst [vmem:[#allocation122_spill] sm:$0xff] %v11139_v56  ;;  %16788 = vst [vmem:[#allocation123_spill] sm:$0xff] %v11141_v36 }
 0x28b   : > { %1798 = vrot.lane.b32.xlu1 %v11143_v29, %s16614_s18  ;;  %1956 = vrot.lane.b32.xlu0 %v11083_v7, %s16612_s29 }
 0x28d   : > { %v11149_v51 = vpop.permute.xlu1 %1538  ;;  %v11151_v23 = vpop.permute.xlu0 %2072 }
 0x28e   : > { %16789 = vst [vmem:[#allocation124_spill] sm:$0xff] %v11149_v51  ;;  %16790 = vst [vmem:[#allocation125_spill] sm:$0xff] %v11151_v23 }
 0x28f   : > { %1830 = vrot.lane.b32.xlu1 %v11153_v61, %s16614_s18  ;;  %2052 = vrot.lane.b32.xlu0 %v11095_v3, %s16608_s19 }
 0x291   : > { %v11159_v56 = vpop.permute.xlu1 %1570  ;;  %v11161_v36 = vpop.permute.xlu0 %1536 }
 0x292   : > { %16791 = vst [vmem:[#allocation126_spill] sm:$0xff] %v11159_v56  ;;  %16792 = vst [vmem:[#allocation127_spill] sm:$0xff] %v11161_v36 }
 0x293   : > { %1550 = vrot.lane.b32.xlu1 %v11163_v43, %s16618_s20  ;;  %2084 = vrot.lane.b32.xlu0 %v11105_v48, %s16608_s19 }
 0x295   : > { %v11169_v23 = vpop.permute.xlu1 %1666  ;;  %v11171_v51 = vpop.permute.xlu0 %1568 }
 0x296   : > { %16793 = vst [vmem:[#allocation128_spill] sm:$0xff] %v11169_v23  ;;  %16794 = vst [vmem:[#allocation129_spill] sm:$0xff] %v11171_v51 }
 0x297   : > { %1678 = vrot.lane.b32.xlu1 %v11173_v0, %s16616_s26  ;;  %1548 = vrot.lane.b32.xlu0 %v11175_v41, %s16618_s20  ;;  %s16633_s20 = smov 32  }
 0x299   : > { %v11181_v56 = vpop.permute.xlu1 %1698  ;;  %v11183_v36 = vpop.permute.xlu0 %1664 }
 0x29a   : > { %16795 = vst [vmem:[#allocation130_spill] sm:$0xff] %v11181_v56  ;;  %16796 = vst [vmem:[#allocation131_spill] sm:$0xff] %v11183_v36 }
 0x29b   : > { %1930 = vrot.lane.b32.xlu1 %v11163_v43, %s16612_s29  ;;  %1676 = vrot.lane.b32.xlu0 %v11185_v39, %s16616_s26  ;;  %s17102_s26 = smov 12  }
 0x29d   : > { %v11191_v51 = vpop.permute.xlu1 %1918  ;;  %v11193_v23 = vpop.permute.xlu0 %1696 }
 0x29e   : > { %16797 = vst [vmem:[#allocation132_spill] sm:$0xff] %v11191_v51  ;;  %16798 = vst [vmem:[#allocation133_spill] sm:$0xff] %v11193_v23 }
 0x29f   : > { %1962 = vrot.lane.b32.xlu1 %v11195_v21, %s16612_s29  ;;  %1800 = vrot.lane.b32.xlu0 %v11197_v42, %s16614_s18 }
 0x2a1   : > { %v11203_v56 = vpop.permute.xlu1 %1950  ;;  %v11205_v36 = vpop.permute.xlu0 %1788 }
 0x2a2   : > { %16799 = vst [vmem:[#allocation134_spill] sm:$0xff] %v11203_v56  ;;  %16800 = vst [vmem:[#allocation135_spill] sm:$0xff] %v11205_v36 }
 0x2a3   : > { %2058 = vrot.lane.b32.xlu1 %v11173_v0, %s16608_s19  ;;  %1832 = vrot.lane.b32.xlu0 %v11207_v8, %s16614_s18 }
 0x2a5   : > { %v11213_v23 = vpop.permute.xlu1 %2046  ;;  %v11215_v51 = vpop.permute.xlu0 %1820 }
 0x2a6   : > { %16801 = vst [vmem:[#allocation136_spill] sm:$0xff] %v11213_v23  ;;  %16802 = vst [vmem:[#allocation137_spill] sm:$0xff] %v11215_v51 }
 0x2a7   : > { %1802 = vrot.lane.b32.xlu1 %v11217_v10, %s16614_s18  ;;  %1928 = vrot.lane.b32.xlu0 %v11175_v41, %s16612_s29 }
 0x2a9   : > { %v11223_v56 = vpop.permute.xlu1 %2078  ;;  %v11225_v36 = vpop.permute.xlu0 %1916 }
 0x2aa   : > { %16804 = vst [vmem:[#allocation139_spill] sm:$0xff] %v11223_v56  ;;  %16805 = vst [vmem:[#allocation140_spill] sm:$0xff] %v11225_v36 }
 0x2ab   : > { %1834 = vrot.lane.b32.xlu1 %v11227_v58, %s16614_s18  ;;  %1960 = vrot.lane.b32.xlu0 %v11229_v55, %s16612_s29  ;;  %s10024_s18 = smov 116   ;;  %s16959_s29 = smov 4  }
 0x2ad   : > { %v11235_v51 = vpop.permute.xlu1 %1790  ;;  %v11237_v23 = vpop.permute.xlu0 %1948 }
 0x2ae   : > { %16806 = vst [vmem:[#allocation141_spill] sm:$0xff] %v11235_v51  ;;  %16807 = vst [vmem:[#allocation142_spill] sm:$0xff] %v11237_v23 }
 0x2af   : > { %2090 = vrot.lane.b32.xlu1 %v11239_v44, %s16608_s19  ;;  %2056 = vrot.lane.b32.xlu0 %v11185_v39, %s16608_s19 }
 0x2b1   : > { %v11245_v56 = vpop.permute.xlu1 %1822  ;;  %v11247_v36 = vpop.permute.xlu0 %2044 }
 0x2b2   : > { %16808 = vst [vmem:[#allocation143_spill] sm:$0xff] %v11245_v56  ;;  %16809 = vst [vmem:[#allocation144_spill] sm:$0xff] %v11247_v36 }
 0x2b3   : > { %2158 = vrot.lane.b32.xlu1 %v10775_v6, %s16610_s28  ;;  %2088 = vrot.lane.b32.xlu0 %v11249_v57, %s16608_s19  ;;  %s10022_s19 = smov 28  }
 0x2b5   : > { %v11255_v23 = vpop.permute.xlu1 %1542  ;;  %v11257_v51 = vpop.permute.xlu0 %2076 }
 0x2b6   : > { %16810 = vst [vmem:[#allocation145_spill] sm:$0xff] %v11255_v23  ;;  %16811 = vst [vmem:[#allocation146_spill] sm:$0xff] %v11257_v51  ;;  %v1438_v51 = vld [vmem:[#allocation2 + $0x109] sm:$0xff] }
 0x2b7   : > { %2162 = vrot.lane.b32.xlu1 %v10804_v28, %s16610_s28  ;;  %2156 = vrot.lane.b32.xlu0 %v1388_v26, %s16610_s28 }
 0x2b9   : > { %v11262_v56 = vpop.permute.xlu1 %1574  ;;  %v11264_v36 = vpop.permute.xlu0 %1540 }
 0x2ba   : > { %16812 = vst [vmem:[#allocation147_spill] sm:$0xff] %v11262_v56 }
 0x2bb   : > { %2166 = vrot.lane.b32.xlu1 %v10874_v50, %s16610_s28  ;;  %2160 = vrot.lane.b32.xlu0 %v10792_v24, %s16610_s28 }
 0x2bd   : > { %v11270_v6 = vpop.permute.xlu1 %1670  ;;  %v11272_v23 = vpop.permute.xlu0 %1572 }
 0x2be   : > { %16813 = vst [vmem:[#allocation148_spill] sm:$0xff] %v11272_v23 }
 0x2bf   : > { %2170 = vrot.lane.b32.xlu1 %v10954_v13, %s16610_s28  ;;  %2164 = vrot.lane.b32.xlu0 %v10850_v22, %s16610_s28 }
 0x2c1   : > { %v11278_v26 = vpop.permute.xlu1 %1702  ;;  %v11280_v28 = vpop.permute.xlu0 %1668 }
 0x2c2   : > { %16814 = vst [vmem:[#allocation149_spill] sm:$0xff] %v11278_v26  ;;  %v1402_v26 = vld [vmem:[#allocation2 + $0xd8] sm:$0xff] }
 0x2c3   : > { %2174 = vrot.lane.b32.xlu1 %v11041_v34, %s16610_s28  ;;  %2168 = vrot.lane.b32.xlu0 %v10929_v35, %s16610_s28 }
 0x2c5   : > { %v11286_v24 = vpop.permute.xlu1 %1922  ;;  %v11288_v50 = vpop.permute.xlu0 %1700 }
 0x2c6   : > { %16815 = vst [vmem:[#allocation150_spill] sm:$0xff] %v11288_v50  ;;  %v1403_v50 = vld [vmem:[#allocation2 + $0xe0] sm:$0xff] }
 0x2c7   : > { %2178 = vrot.lane.b32.xlu1 %v11143_v29, %s16610_s28  ;;  %2172 = vrot.lane.b32.xlu0 %v11015_v62, %s16610_s28 }
 0x2c9   : > { %v11294_v22 = vpop.permute.xlu1 %1954  ;;  %v11296_v13 = vpop.permute.xlu0 %1792 }
 0x2ca   : > { %16816 = vst [vmem:[#allocation151_spill] sm:$0xff] %v11294_v22  ;;  %v1405_v22 = vld [vmem:[#allocation2 + $0xf8] sm:$0xff] }
 0x2cb   : > { %2182 = vrot.lane.b32.xlu1 %v11217_v10, %s16610_s28  ;;  %2176 = vrot.lane.b32.xlu0 %v11115_v38, %s16610_s28 }
 0x2cd   : > { %v11302_v35 = vpop.permute.xlu1 %2050  ;;  %v11304_v34 = vpop.permute.xlu0 %1824 }
 0x2ce   : > { %16817 = vst [vmem:[#allocation152_spill] sm:$0xff] %v11304_v34  ;;  %v1404_v34 = vld [vmem:[#allocation2 + $0xf0] sm:$0xff] }
 0x2cf   : > { %2186 = vrot.lane.b32.xlu1 %v1403_v50, %s16610_s28  ;;  %2180 = vrot.lane.b32.xlu0 %v11197_v42, %s16610_s28 }
 0x2d1   : > { %v11309_v62 = vpop.permute.xlu1 %2082  ;;  %v11311_v23 = vpop.permute.xlu0 %1920 }
 0x2d2   : > { %16818 = vst [vmem:[#allocation153_spill] sm:$0xff] %v11309_v62 }
 0x2d3   : > { %2190 = vrot.lane.b32.xlu1 %v1405_v22, %s16610_s28  ;;  %2184 = vrot.lane.b32.xlu0 %v1402_v26, %s16610_s28 }
 0x2d5   : > { %v11315_v38 = vpop.permute.xlu1 %1794  ;;  %v11317_v56 = vpop.permute.xlu0 %1952 }
 0x2d6   : > { %16819 = vst [vmem:[#allocation154_spill] sm:$0xff] %v11317_v56  ;;  %v1422_v56 = vld [vmem:[#allocation2 + $0x49] sm:$0xff] }
 0x2d7   : > { %2194 = vrot.lane.b32.xlu1 %v10811_v32, %s16610_s28  ;;  %2188 = vrot.lane.b32.xlu0 %v1404_v34, %s16610_s28 }
 0x2d9   : > { %v11322_v50 = vpop.permute.xlu1 %1826  ;;  %v11324_v62 = vpop.permute.xlu0 %2048 }
 0x2da   : > { %16820 = vst [vmem:[#allocation155_spill] sm:$0xff] %v11322_v50  ;;  %v1436_v50 = vld [vmem:[#allocation2 + $0xf1] sm:$0xff] }
 0x2db   : > { %2198 = vrot.lane.b32.xlu1 %v10883_v14, %s16610_s28  ;;  %2192 = vrot.lane.b32.xlu0 %v10797_v27, %s16610_s28 }
 0x2dd   : > { %v11330_v26 = vpop.permute.xlu1 %1546  ;;  %v11332_v22 = vpop.permute.xlu0 %2080 }
 0x2de   : > { %16821 = vst [vmem:[#allocation156_spill] sm:$0xff] %v11332_v22  ;;  %v1425_v22 = vld [vmem:[#allocation2 + $0x69] sm:$0xff] }
 0x2df   : > { %2202 = vrot.lane.b32.xlu1 %v10963_v19, %s16610_s28  ;;  %2196 = vrot.lane.b32.xlu0 %v10859_v45, %s16610_s28 }
 0x2e1   : > { %v11338_v32 = vpop.permute.xlu1 %1578  ;;  %v11340_v34 = vpop.permute.xlu0 %1544 }
 0x2e2   : > { %16822 = vst [vmem:[#allocation157_spill] sm:$0xff] %v11338_v32  ;;  %v1421_v32 = vld [vmem:[#allocation2 + $0x39] sm:$0xff] }
 0x2e3   : > { %2206 = vrot.lane.b32.xlu1 %v11051_v16, %s16610_s28  ;;  %2200 = vrot.lane.b32.xlu0 %v10938_v59, %s16610_s28  ;;  %v1419_v59 = vld [vmem:[#allocation2 + $0x1a0] sm:$0xff] }
 0x2e5   : > { %v11346_v27 = vpop.permute.xlu1 %1674  ;;  %v11348_v14 = vpop.permute.xlu0 %1576 }
 0x2e6   : > { %16823 = vst [vmem:[#allocation158_spill] sm:$0xff] %v11348_v14 }
 0x2e7   : > { %2210 = vrot.lane.b32.xlu1 %v11153_v61, %s16610_s28  ;;  %2204 = vrot.lane.b32.xlu0 %v11025_v15, %s16610_s28  ;;  %v1418_v61 = vld [vmem:[#allocation2 + $0x198] sm:$0xff] }
 0x2e9   : > { %v11354_v45 = vpop.permute.xlu1 %1706  ;;  %v11356_v19 = vpop.permute.xlu0 %1672 }
 0x2ea   : > { %16824 = vst [vmem:[#allocation159_spill] sm:$0xff] %v11354_v45  ;;  %16825 = vst [vmem:[#allocation160_spill] sm:$0xff] %v11356_v19  ;;  %v1461_v19 = vld [vmem:[#allocation2 + $0x9a] sm:$0xff] }
 0x2eb   : > { %2214 = vrot.lane.b32.xlu1 %v11227_v58, %s16610_s28  ;;  %2208 = vrot.lane.b32.xlu0 %v11125_v37, %s16610_s28 }
 0x2ed   : > { %v11362_v16 = vpop.permute.xlu1 %1926  ;;  %v11364_v14 = vpop.permute.xlu0 %1704 }
 0x2ee   : > { %16826 = vst [vmem:[#allocation161_spill] sm:$0xff] %v11364_v14  ;;  %v1423_v14 = vld [vmem:[#allocation2 + $0x51] sm:$0xff] }
 0x2ef   : > { %2218 = vrot.lane.b32.xlu1 %v1419_v59, %s16610_s28  ;;  %2212 = vrot.lane.b32.xlu0 %v11207_v8, %s16610_s28  ;;  %v1420_v59 = vld [vmem:[#allocation2 + $0x31] sm:$0xff] }
 0x2f1   : > { %v11369_v15 = vpop.permute.xlu1 %1958  ;;  %v11371_v45 = vpop.permute.xlu0 %1796 }
 0x2f2   : > { %16827 = vst [vmem:[#allocation162_spill] sm:$0xff] %v11369_v15 }
 0x2f3   : > { %2286 = vrot.lane.b32.xlu1 %v1421_v32, %s10022_s19  ;;  %2216 = vrot.lane.b32.xlu0 %v1418_v61, %s16610_s28  ;;  %s17096_s28 = smov 8  }
 0x2f5   : > { %v11375_v58 = vpop.permute.xlu1 %2054  ;;  %v11377_v37 = vpop.permute.xlu0 %1828 }
 0x2f6   : > { %16828 = vst [vmem:[#allocation163_spill] sm:$0xff] %v11375_v58  ;;  %16829 = vst [vmem:[#allocation164_spill] sm:$0xff] %v11377_v37  ;;  %v1424_v37 = vld [vmem:[#allocation2 + $0x61] sm:$0xff]  ;;  %v1454_v58 = vld [vmem:[#allocation2 + $0x4a] sm:$0xff] }
 0x2f7   : > { %2290 = vrot.lane.b32.xlu1 %v1423_v14, %s10022_s19  ;;  %2284 = vrot.lane.b32.xlu0 %v1420_v59, %s10022_s19 }
 0x2f9   : > { %v11381_v8 = vpop.permute.xlu1 %2086  ;;  %v11383_v15 = vpop.permute.xlu0 %1924 }
 0x2fa   : > { %16830 = vst [vmem:[#allocation165_spill] sm:$0xff] %v11381_v8  ;;  %v1435_v8 = vld [vmem:[#allocation2 + $0xe1] sm:$0xff] }
 0x2fb   : > { %2294 = vrot.lane.b32.xlu1 %v1425_v22, %s10022_s19  ;;  %2288 = vrot.lane.b32.xlu0 %v1422_v56, %s10022_s19 }
 0x2fd   : > { %v11387_v32 = vpop.permute.xlu1 %1798  ;;  %v11389_v61 = vpop.permute.xlu0 %1956 }
 0x2fe   : > { %16831 = vst [vmem:[#allocation166_spill] sm:$0xff] %v11389_v61  ;;  %v1434_v61 = vld [vmem:[#allocation2 + $0xd9] sm:$0xff] }
 0x2ff   : > { %2298 = vrot.lane.b32.xlu1 %v10892_v46, %s10022_s19  ;;  %2292 = vrot.lane.b32.xlu0 %v1424_v37, %s10022_s19 }
 0x301   : > { %v11394_v14 = vpop.permute.xlu1 %1830  ;;  %v11396_v59 = vpop.permute.xlu0 %2052 }
 0x302   : > { %16832 = vst [vmem:[#allocation167_spill] sm:$0xff] %v11394_v14  ;;  %16833 = vst [vmem:[#allocation168_spill] sm:$0xff] %v11396_v59  ;;  %v1439_v14 = vld [vmem:[#allocation2 + $0x111] sm:$0xff] }
 0x303   : > { %2302 = vrot.lane.b32.xlu1 %v10972_v18, %s10022_s19  ;;  %2296 = vrot.lane.b32.xlu0 %v10901_v63, %s10022_s19 }
 0x305   : > { %v11402_v56 = vpop.permute.xlu1 %1550  ;;  %v11404_v22 = vpop.permute.xlu0 %2084 }
 0x306   : > { %16834 = vst [vmem:[#allocation169_spill] sm:$0xff] %v11402_v56  ;;  %16835 = vst [vmem:[#allocation170_spill] sm:$0xff] %v11404_v22  ;;  %v1437_v22 = vld [vmem:[#allocation2 + $0xf9] sm:$0xff] }
 0x307   : > { %2306 = vrot.lane.b32.xlu1 %v11060_v9, %s10022_s19  ;;  %2300 = vrot.lane.b32.xlu0 %v10983_v1, %s10022_s19 }
 0x309   : > { %v11410_v46 = vpop.permute.xlu1 %1678  ;;  %v11412_v37 = vpop.permute.xlu0 %1548 }
 0x30a   : > { %16836 = vst [vmem:[#allocation171_spill] sm:$0xff] %v11410_v46  ;;  %v1456_v46 = vld [vmem:[#allocation2 + $0x62] sm:$0xff] }
 0x30b   : > { %2310 = vrot.lane.b32.xlu1 %v11163_v43, %s10022_s19  ;;  %2304 = vrot.lane.b32.xlu0 %v11071_v17, %s10022_s19 }
 0x30d   : > { %v11418_v18 = vpop.permute.xlu1 %1930  ;;  %v11420_v63 = vpop.permute.xlu0 %1676 }
 0x30e   : > { %16837 = vst [vmem:[#allocation172_spill] sm:$0xff] %v11418_v18  ;;  %v1457_v18 = vld [vmem:[#allocation2 + $0x6a] sm:$0xff] }
 0x30f   : > { %2314 = vrot.lane.b32.xlu1 %v1435_v8, %s10022_s19  ;;  %2308 = vrot.lane.b32.xlu0 %v11175_v41, %s10022_s19 }
 0x311   : > { %v11425_v1 = vpop.permute.xlu1 %1962  ;;  %v11427_v9 = vpop.permute.xlu0 %1800 }
 0x312   : > { %16838 = vst [vmem:[#allocation173_spill] sm:$0xff] %v11425_v1  ;;  %16839 = vst [vmem:[#allocation174_spill] sm:$0xff] %v11427_v9  ;;  %v1441_v1 = vld [vmem:[#allocation2 + $0x129] sm:$0xff] }
 0x313   : > { %2318 = vrot.lane.b32.xlu1 %v1437_v22, %s10022_s19  ;;  %2312 = vrot.lane.b32.xlu0 %v1434_v61, %s10022_s19  ;;  %v1459_v9 = vld [vmem:[#allocation2 + $0x82] sm:$0xff] }
 0x315   : > { %v11431_v43 = vpop.permute.xlu1 %2058  ;;  %v11433_v17 = vpop.permute.xlu0 %1832 }
 0x316   : > { %16840 = vst [vmem:[#allocation175_spill] sm:$0xff] %v11431_v43  ;;  %16841 = vst [vmem:[#allocation176_spill] sm:$0xff] %v11433_v17  ;;  %v1443_v17 = vld [vmem:[#allocation2 + $0x141] sm:$0xff] }
 0x317   : > { %2322 = vrot.lane.b32.xlu1 %v1439_v14, %s10022_s19  ;;  %2316 = vrot.lane.b32.xlu0 %v1436_v50, %s10022_s19  ;;  %v1440_v43 = vld [vmem:[#allocation2 + $0x121] sm:$0xff] }
 0x319   : > { %v11437_v41 = vpop.permute.xlu1 %1802  ;;  %v11439_v8 = vpop.permute.xlu0 %1928 }
 0x31a   : > { %16842 = vst [vmem:[#allocation177_spill] sm:$0xff] %v11437_v41  ;;  %16843 = vst [vmem:[#allocation178_spill] sm:$0xff] %v11439_v8  ;;  %v1442_v8 = vld [vmem:[#allocation2 + $0x139] sm:$0xff] }
 0x31b   : > { %2326 = vrot.lane.b32.xlu1 %v1441_v1, %s10022_s19  ;;  %2320 = vrot.lane.b32.xlu0 %v1438_v51, %s10022_s19  ;;  %v2771_v1 = vld [vmem:[%s16848_s4] sm:$0xff]  ;;  %v2772_v51 = vld [vmem:[%s16848_s4 + $0x8] sm:$0xff] }
 0x31c   : > { %v1458_v41 = vld [vmem:[#allocation2 + $0x7a] sm:$0xff] }
 0x31d   : > { %v11443_v61 = vpop.permute.xlu1 %1834  ;;  %v11445_v22 = vpop.permute.xlu0 %1960 }
 0x31e   : > { %16844 = vst [vmem:[#allocation179_spill] sm:$0xff] %v11443_v61  ;;  %16845 = vst [vmem:[#allocation180_spill] sm:$0xff] %v11445_v22  ;;  %v2773_v22 = vld [vmem:[%s16848_s4 + $0x10] sm:$0xff]  ;;  %v2774_v61 = vld [vmem:[%s16848_s4 + $0x18] sm:$0xff] }
 0x31f   : > { %2330 = vrot.lane.b32.xlu1 %v1443_v17, %s10022_s19  ;;  %2324 = vrot.lane.b32.xlu0 %v1440_v43, %s10022_s19  ;;  %v9778_v17 = vpack.c.bf16 %v2772_v51, %v2771_v1  ;;  %v2775_v51 = vld [vmem:[%s16848_s4 + $0x20] sm:$0xf] }
 0x321   : > { %v11449_v50 = vpop.permute.xlu1 %2090  ;;  %v11451_v14 = vpop.permute.xlu0 %2056  ;;  %9779 = vmatprep.subr.bf16.mxu1 %v9778_v17 }
 0x322   : > { %16846 = vst [vmem:[#allocation181_spill] sm:$0xff] %v11449_v50  ;;  %16847 = vst [vmem:[#allocation182_spill] sm:$0xff] %v11451_v14  ;;  %9781 = vmatpush3.bf16.msra.mxu1 %v9778_v17 }
 0x323   : > { %2334 = vrot.lane.b32.xlu1 %v10981_v49, %s10022_s19  ;;  %2328 = vrot.lane.b32.xlu0 %v1442_v8, %s10022_s19  ;;  %v9782_v49 = vpack.c.bf16 %v2774_v61, %v2773_v22  ;;  %v1450_v22 = vld [vmem:[#allocation2 + $0x199] sm:$0xff] }
 0x325   : > { %v11462_v43 = vpop.permute.xlu1 %2158  ;;  %v11464_v50 = vpop.permute.xlu0 %2088  ;;  %9783 = vmatprep.subr.bf16.mxu1 %v9782_v49 }
 0x326   : > { %16849 = vst [vmem:[#allocation183_spill] sm:$0xff] %v11464_v50  ;;  %9785 = vmatpush3.bf16.msra.mxu1 %v9782_v49 }
 0x327   : > { %2338 = vrot.lane.b32.xlu1 %v11069_v2, %s10022_s19  ;;  %2332 = vrot.lane.b32.xlu0 %v10993_v33, %s10022_s19  ;;  %v1451_v2 = vld [vmem:[#allocation2 + $0x1a1] sm:$0xff] }
 0x328   : > { %9554 = vmatprep.subr.msk.mxu1 %vm650_vm0, %v2775_v51 }
 0x329   : > { %v11476_v8 = vpop.permute.xlu1 %2162  ;;  %v11478_v1 = vpop.permute.xlu0 %2156 }
 0x32a   : > { %9555 = vmatpush3.msk.msra.mxu1 %vm650_vm0, %v2775_v51  ;;  %v1455_v51 = vld [vmem:[#allocation2 + $0x52] sm:$0xff] }
 0x32b   : > { %2342 = vrot.lane.b32.xlu1 %v11195_v21, %s10022_s19  ;;  %2336 = vrot.lane.b32.xlu0 %v11083_v7, %s10022_s19  ;;  %v1453_v7 = vld [vmem:[#allocation2 + $0x3a] sm:$0xff] }
 0x32d   : > { %v11488_v33 = vpop.permute.xlu1 %2166  ;;  %v11490_v61 = vpop.permute.xlu0 %2160 }
 0x32f   : > { %2346 = vrot.lane.b32.xlu1 %v1451_v2, %s10022_s19  ;;  %2340 = vrot.lane.b32.xlu0 %v11229_v55, %s10022_s19  ;;  %v1452_v2 = vld [vmem:[#allocation2 + $0x32] sm:$0xff] }
 0x331   : > { %v11496_v17 = vpop.permute.xlu1 %2170  ;;  %v11498_v21 = vpop.permute.xlu0 %2164 }
 0x333   : > { %2414 = vrot.lane.b32.xlu1 %v1453_v7, %s16633_s20  ;;  %2344 = vrot.lane.b32.xlu0 %v1450_v22, %s10022_s19 }
 0x335   : > { %v11502_v49 = vpop.permute.xlu1 %2174  ;;  %v11504_v50 = vpop.permute.xlu0 %2168 }
 0x337   : > { %2418 = vrot.lane.b32.xlu1 %v1455_v51, %s16633_s20  ;;  %2412 = vrot.lane.b32.xlu0 %v1452_v2, %s16633_s20 }
 0x339   : > { %v11508_v55 = vpop.permute.xlu1 %2178  ;;  %v11510_v14 = vpop.permute.xlu0 %2172 }
 0x33b   : > { %2422 = vrot.lane.b32.xlu1 %v1457_v18, %s16633_s20  ;;  %2416 = vrot.lane.b32.xlu0 %v1454_v58, %s16633_s20 }
 0x33d   : > { %v11514_v22 = vpop.permute.xlu1 %2182  ;;  %v11516_v7 = vpop.permute.xlu0 %2176 }
 0x33e   : > { %16850 = vst [vmem:[#allocation184_spill] sm:$0xff] %v11514_v22  ;;  %v1460_v22 = vld [vmem:[#allocation2 + $0x92] sm:$0xff] }
 0x33f   : > { %2426 = vrot.lane.b32.xlu1 %v1459_v9, %s16633_s20  ;;  %2420 = vrot.lane.b32.xlu0 %v1456_v46, %s16633_s20 }
 0x341   : > { %v11520_v51 = vpop.permute.xlu1 %2186  ;;  %v11522_v2 = vpop.permute.xlu0 %2180 }
 0x342   : > { %16851 = vst [vmem:[#allocation185_spill] sm:$0xff] %v11520_v51  ;;  %16852 = vst [vmem:[#allocation186_spill] sm:$0xff] %v11522_v2  ;;  %v16917_v2 = vld [vmem:[#allocation72_spill] sm:$0xff] }
 0x343   : > { %2430 = vrot.lane.b32.xlu1 %v1461_v19, %s16633_s20  ;;  %2424 = vrot.lane.b32.xlu0 %v1458_v41, %s16633_s20 }
 0x345   : > { %v11526_v58 = vpop.permute.xlu1 %2190  ;;  %v11528_v18 = vpop.permute.xlu0 %2184 }
 0x346   : > { %16853 = vst [vmem:[#allocation187_spill] sm:$0xff] %v11526_v58  ;;  %16854 = vst [vmem:[#allocation188_spill] sm:$0xff] %v11528_v18  ;;  %v1467_v58 = vld [vmem:[#allocation2 + $0xe2] sm:$0xff]  ;;  %v16904_v18 = vld [vmem:[#allocation48_spill] sm:$0xff] }
 0x347   : > { %2434 = vrot.lane.b32.xlu1 %v11081_v47, %s16633_s20  ;;  %2428 = vrot.lane.b32.xlu0 %v1460_v22, %s16633_s20 }
 0x349   : > { %v11533_v46 = vpop.permute.xlu1 %2194  ;;  %v11535_v9 = vpop.permute.xlu0 %2188 }
 0x34a   : > { %16855 = vst [vmem:[#allocation189_spill] sm:$0xff] %v11533_v46  ;;  %16856 = vst [vmem:[#allocation190_spill] sm:$0xff] %v11535_v9  ;;  %v1469_v46 = vld [vmem:[#allocation2 + $0xfa] sm:$0xff] }
 0x34b   : > { %2438 = vrot.lane.b32.xlu1 %v11173_v0, %s16633_s20  ;;  %2432 = vrot.lane.b32.xlu0 %v11095_v3, %s16633_s20  ;;  %v1466_v9 = vld [vmem:[#allocation2 + $0xda] sm:$0xff] }
 0x34d   : > { %v11541_v19 = vpop.permute.xlu1 %2198  ;;  %v11543_v41 = vpop.permute.xlu0 %2192 }
 0x34e   : > { %16857 = vst [vmem:[#allocation191_spill] sm:$0xff] %v11541_v19  ;;  %16858 = vst [vmem:[#allocation192_spill] sm:$0xff] %v11543_v41  ;;  %v1471_v19 = vld [vmem:[#allocation2 + $0x112] sm:$0xff] }
 0x34f   : > { %2442 = vrot.lane.b32.xlu1 %v1467_v58, %s16633_s20  ;;  %2436 = vrot.lane.b32.xlu0 %v11185_v39, %s16633_s20  ;;  %v1468_v41 = vld [vmem:[#allocation2 + $0xf2] sm:$0xff] }
 0x351   : > { %v11548_v47 = vpop.permute.xlu1 %2202  ;;  %v11550_v22 = vpop.permute.xlu0 %2196 }
 0x352   : > { %16859 = vst [vmem:[#allocation193_spill] sm:$0xff] %v11548_v47  ;;  %16860 = vst [vmem:[#allocation194_spill] sm:$0xff] %v11550_v22  ;;  %v1473_v47 = vld [vmem:[#allocation2 + $0x12a] sm:$0xff] }
 0x353   : > { %2446 = vrot.lane.b32.xlu1 %v1469_v46, %s16633_s20  ;;  %2440 = vrot.lane.b32.xlu0 %v1466_v9, %s16633_s20  ;;  %v1470_v22 = vld [vmem:[#allocation2 + $0x10a] sm:$0xff] }
 0x355   : > { %v11554_v0 = vpop.permute.xlu1 %2206  ;;  %v11556_v3 = vpop.permute.xlu0 %2200 }
 0x356   : > { %16861 = vst [vmem:[#allocation195_spill] sm:$0xff] %v11554_v0  ;;  %16862 = vst [vmem:[#allocation196_spill] sm:$0xff] %v11556_v3  ;;  %v1475_v0 = vld [vmem:[#allocation2 + $0x142] sm:$0xff] }
 0x357   : > { %2450 = vrot.lane.b32.xlu1 %v1471_v19, %s16633_s20  ;;  %2444 = vrot.lane.b32.xlu0 %v1468_v41, %s16633_s20  ;;  %v1472_v3 = vld [vmem:[#allocation2 + $0x122] sm:$0xff] }
 0x359   : > { %v11560_v39 = vpop.permute.xlu1 %2210  ;;  %v11562_v58 = vpop.permute.xlu0 %2204 }
 0x35a   : > { %16863 = vst [vmem:[#allocation197_spill] sm:$0xff] %v11560_v39  ;;  %16864 = vst [vmem:[#allocation198_spill] sm:$0xff] %v11562_v58  ;;  %v1477_v39 = vld [vmem:[#allocation2 + $0x15a] sm:$0xff] }
 0x35b   : > { %2454 = vrot.lane.b32.xlu1 %v1473_v47, %s16633_s20  ;;  %2448 = vrot.lane.b32.xlu0 %v1470_v22, %s16633_s20  ;;  %v1474_v58 = vld [vmem:[#allocation2 + $0x13a] sm:$0xff] }
 0x35d   : > { %v11566_v46 = vpop.permute.xlu1 %2214  ;;  %v11568_v9 = vpop.permute.xlu0 %2208 }
 0x35e   : > { %16865 = vst [vmem:[#allocation199_spill] sm:$0xff] %v11566_v46  ;;  %16866 = vst [vmem:[#allocation200_spill] sm:$0xff] %v11568_v9  ;;  %v1476_v46 = vld [vmem:[#allocation2 + $0x152] sm:$0xff]  ;;  %v16881_v9 = vld [vmem:[#allocation37_spill] sm:$0xff] }
 0x35f   : > { %2458 = vrot.lane.b32.xlu1 %v1475_v0, %s16633_s20  ;;  %2452 = vrot.lane.b32.xlu0 %v1472_v3, %s16633_s20 }
 0x361   : > { %v11572_v19 = vpop.permute.xlu1 %2218  ;;  %v11574_v41 = vpop.permute.xlu0 %2212 }
 0x362   : > { %16867 = vst [vmem:[#allocation201_spill] sm:$0xff] %v11572_v19  ;;  %16868 = vst [vmem:[#allocation202_spill] sm:$0xff] %v11574_v41 }
 0x363   : > { %2462 = vrot.lane.b32.xlu1 %v1477_v39, %s16633_s20  ;;  %2456 = vrot.lane.b32.xlu0 %v1474_v58, %s16633_s20  ;;  %v1483_v39 = vld [vmem:[#allocation2 + $0x1a2] sm:$0xff] }
 0x365   : > { %v11578_v47 = vpop.permute.xlu1 %2286  ;;  %v11580_v22 = vpop.permute.xlu0 %2216 }
 0x366   : > { %16869 = vst [vmem:[#allocation203_spill] sm:$0xff] %v11580_v22 }
 0x367   : > { %2466 = vrot.lane.b32.xlu1 %v11093_v60, %s16633_s20  ;;  %2460 = vrot.lane.b32.xlu0 %v1476_v46, %s16633_s20  ;;  %v1482_v60 = vld [vmem:[#allocation2 + $0x19a] sm:$0xff] }
 0x369   : > { %v11585_v0 = vpop.permute.xlu1 %2290  ;;  %v11587_v3 = vpop.permute.xlu0 %2284 }
 0x36b   : > { %2470 = vrot.lane.b32.xlu1 %v11239_v44, %s16633_s20  ;;  %2464 = vrot.lane.b32.xlu0 %v11105_v48, %s16633_s20 }
 0x36d   : > { %v11593_v58 = vpop.permute.xlu1 %2294  ;;  %v11595_v19 = vpop.permute.xlu0 %2288 }
 0x36f   : > { %2474 = vrot.lane.b32.xlu1 %v1483_v39, %s16633_s20  ;;  %2468 = vrot.lane.b32.xlu0 %v11249_v57, %s16633_s20 }
 0x371   : > { %v11600_v46 = vpop.permute.xlu1 %2298  ;;  %v11602_v22 = vpop.permute.xlu0 %2292 }
 0x373   : > { %3256 = vrot.lane.b32.xlu1 %v10515_v54, %s10024_s18  ;;  %2472 = vrot.lane.b32.xlu0 %v1482_v60, %s16633_s20  ;;  %s10026_s20 = smov 48  }
 0x375   : > { %v11607_v44 = vpop.permute.xlu1 %2302  ;;  %v11609_v48 = vpop.permute.xlu0 %2296 }
 0x377   : > { %3260 = vrot.lane.b32.xlu1 %v10532_v5, %s10024_s18  ;;  %3254 = vrot.lane.b32.xlu0 %v10530_v4, %s10024_s18 }
 0x379   : > { %v11615_v57 = vpop.permute.xlu1 %2306  ;;  %v11617_v39 = vpop.permute.xlu0 %2300 }
 0x37a   : > { %16870 = vst [vmem:[#allocation204_spill] sm:$0xff] %v11615_v57 }
 0x37b   : > { %3264 = vrot.lane.b32.xlu1 %v10564_v30, %s10024_s18  ;;  %3258 = vrot.lane.b32.xlu0 %v10550_v20, %s10024_s18 }
 0x37d   : > { %v11623_v60 = vpop.permute.xlu1 %2310  ;;  %v11625_v54 = vpop.permute.xlu0 %2304 }
 0x37e   : > { %16871 = vst [vmem:[#allocation205_spill] sm:$0xff] %v11623_v60 }
 0x37f   : > { %3268 = vrot.lane.b32.xlu1 %v10584_v52, %s10024_s18  ;;  %3262 = vrot.lane.b32.xlu0 %v10566_v31, %s10024_s18 }
 0x381   : > { %v11631_v5 = vpop.permute.xlu1 %2314  ;;  %v11633_v4 = vpop.permute.xlu0 %2308 }
 0x382   : > { %16872 = vst [vmem:[#allocation206_spill] sm:$0xff] %v11631_v5  ;;  %16873 = vst [vmem:[#allocation207_spill] sm:$0xff] %v11633_v4  ;;  %v16908_v4 = vld [vmem:[#allocation44_spill] sm:$0xff] }
 0x383   : > { %3272 = vrot.lane.b32.xlu1 %v10608_v11, %s10024_s18  ;;  %3266 = vrot.lane.b32.xlu0 %v10588_v53, %s10024_s18  ;;  %v16878_v11 = vld [vmem:[#allocation30_spill] sm:$0xff] }
 0x385   : > { %v11639_v30 = vpop.permute.xlu1 %2318  ;;  %v11641_v20 = vpop.permute.xlu0 %2312 }
 0x386   : > { %16874 = vst [vmem:[#allocation208_spill] sm:$0xff] %v11639_v30  ;;  %16875 = vst [vmem:[#allocation209_spill] sm:$0xff] %v11641_v20  ;;  %v16885_v30 = vld [vmem:[#allocation10_spill] sm:$0xff]  ;;  %v9868_v20 = vld [vmem:[#allocation2 + $0x20] sm:$0xff] }
 0x387   : > { %3276 = vrot.lane.b32.xlu1 %v10632_v25, %s10024_s18  ;;  %3270 = vrot.lane.b32.xlu0 %v10612_v12, %s10024_s18  ;;  %v16882_v25 = vld [vmem:[#allocation34_spill] sm:$0xff] }
 0x389   : > { %v11647_v52 = vpop.permute.xlu1 %2322  ;;  %v11649_v31 = vpop.permute.xlu0 %2316 }
 0x38a   : > { %16876 = vst [vmem:[#allocation210_spill] sm:$0xff] %v11647_v52  ;;  %16877 = vst [vmem:[#allocation211_spill] sm:$0xff] %v11649_v31  ;;  %v1195_v31 = vld [vmem:[#allocation2] sm:$0xff] }
 0x38b   : > { %3280 = vrot.lane.b32.xlu1 %v10656_v40, %s10024_s18  ;;  %3274 = vrot.lane.b32.xlu0 %v16878_v11, %s10024_s18  ;;  %v16886_v40 = vld [vmem:[#allocation38_spill] sm:$0xff] }
 0x38d   : > { %v11655_v53 = vpop.permute.xlu1 %2326  ;;  %v11657_v41 = vpop.permute.xlu0 %2320 }
 0x38e   : > { %16879 = vst [vmem:[#allocation212_spill] sm:$0xff] %v11655_v53  ;;  %16880 = vst [vmem:[#allocation213_spill] sm:$0xff] %v11657_v41  ;;  %v16889_v41 = vld [vmem:[#allocation14_spill] sm:$0xff] }
 0x38f   : > { %3284 = vrot.lane.b32.xlu1 %v16881_v9, %s10024_s18  ;;  %3278 = vrot.lane.b32.xlu0 %v16882_v25, %s10024_s18  ;;  %v16890_v9 = vld [vmem:[#allocation13_spill] sm:$0xff]  ;;  %v1196_v25 = vld [vmem:[#allocation2 + $0x8] sm:$0xff] }
 0x391   : > { %v11663_v12 = vpop.permute.xlu1 %2330  ;;  %v11665_v52 = vpop.permute.xlu0 %2324 }
 0x392   : > { %16883 = vst [vmem:[#allocation214_spill] sm:$0xff] %v11663_v12  ;;  %16884 = vst [vmem:[#allocation215_spill] sm:$0xff] %v11665_v52 }
 0x393   : > { %3288 = vrot.lane.b32.xlu1 %v16885_v30, %s10024_s18  ;;  %3282 = vrot.lane.b32.xlu0 %v16886_v40, %s10024_s18  ;;  %v16893_v30 = vld [vmem:[#allocation19_spill] sm:$0xff]  ;;  %v16894_v40 = vld [vmem:[#allocation16_spill] sm:$0xff] }
 0x395   : > { %v11671_v11 = vpop.permute.xlu1 %2334  ;;  %v11673_v53 = vpop.permute.xlu0 %2328 }
 0x396   : > { %16887 = vst [vmem:[#allocation216_spill] sm:$0xff] %v11671_v11  ;;  %16888 = vst [vmem:[#allocation217_spill] sm:$0xff] %v11673_v53  ;;  %v16895_v11 = vld [vmem:[#allocation41_spill] sm:$0xff] }
 0x397   : > { %3292 = vrot.lane.b32.xlu1 %v16889_v41, %s10024_s18  ;;  %3286 = vrot.lane.b32.xlu0 %v16890_v9, %s10024_s18  ;;  %v2509_v53 = vsel %vm553_vm1, %v1196_v25, %v16895_v11  ;;  %v16898_v9 = vld [vmem:[#allocation43_spill] sm:$0xff]  ;;  %v16902_v11 = vld [vmem:[#allocation45_spill] sm:$0xff] }
 0x398   : > { %v2542_v51 = vsel %vm2540_vm4, %v2509_v53, %v16898_v9  ;;  %v2511_v25 = vsel %vm553_vm1, %v9868_v20, %v16902_v11  ;;  %v16912_v11 = vld [vmem:[#allocation47_spill] sm:$0xff] }
 0x399   : > { %v11679_v12 = vpop.permute.xlu1 %2338  ;;  %v11681_v52 = vpop.permute.xlu0 %2332  ;;  %v2544_v53 = vsel %vm2540_vm4, %v2511_v25, %v16904_v18  ;;  %v9869_v18 = vld [vmem:[#allocation2 + $0x18] sm:$0xff] }
 0x39a   : > { %16891 = vst [vmem:[#allocation218_spill] sm:$0xff] %v11679_v12  ;;  %16892 = vst [vmem:[#allocation219_spill] sm:$0xff] %v11681_v52  ;;  %v16899_v12 = vld [vmem:[#allocation23_spill] sm:$0xff]  ;;  %v16901_v52 = vld [vmem:[#allocation42_spill] sm:$0xff]  ;;  %v2510_v25 = vsel %vm553_vm1, %v9869_v18, %v16912_v11 }
 0x39b   : > { %3296 = vrot.lane.b32.xlu1 %v16893_v30, %s10024_s18  ;;  %3290 = vrot.lane.b32.xlu0 %v16894_v40, %s10024_s18  ;;  %v16900_v30 = vld [vmem:[#allocation20_spill] sm:$0xff]  ;;  %v2508_v40 = vsel %vm553_vm1, %v1195_v31, %v16901_v52  ;;  %v16919_v18 = vld [vmem:[#allocation63_spill] sm:$0xff] }
 0x39c   : > { %v2541_v31 = vsel %vm2540_vm4, %v2508_v40, %v16908_v4  ;;  %v16909_v52 = vld [vmem:[#allocation52_spill] sm:$0xff]  ;;  %v16915_v40 = vld [vmem:[#allocation59_spill] sm:$0xff] }
 0x39d   : > { %v11689_v5 = vpop.permute.xlu1 %2342  ;;  %v11691_v41 = vpop.permute.xlu0 %2336 }
 0x39e   : > { %16896 = vst [vmem:[#allocation41_spill] sm:$0xff] %v11689_v5  ;;  %16897 = vst [vmem:[#allocation220_spill] sm:$0xff] %v11691_v41  ;;  %v16903_v5 = vld [vmem:[#allocation60_spill] sm:$0xff] }
 0x39f   : > { %3300 = vrot.lane.b32.xlu1 %v16899_v12, %s10024_s18  ;;  %3294 = vrot.lane.b32.xlu0 %v16900_v30, %s10024_s18  ;;  %v2575_v41 = vsel %vm2573_vm5, %v2542_v51, %v16903_v5  ;;  %v16907_v12 = vld [vmem:[#allocation80_spill] sm:$0xff]  ;;  %v16910_v5 = vld [vmem:[#allocation27_spill] sm:$0xff] }
 0x3a0   : > { %v2577_v30 = vsel %vm2573_vm5, %v2544_v53, %v16907_v12  ;;  %v2608_v20 = vsel %vm2606_vm6, %v2575_v41, %v16909_v52  ;;  %v16911_v51 = vld [vmem:[#allocation24_spill] sm:$0xff]  ;;  %v16914_v53 = vld [vmem:[#allocation51_spill] sm:$0xff] }
 0x3a1   : > { %v11707_v9 = vpop.permute.xlu1 %2346  ;;  %v11709_v60 = vpop.permute.xlu0 %2340  ;;  %v2543_v4 = vsel %vm2540_vm4, %v2510_v25, %v16914_v53  ;;  %v9870_v52 = vld [vmem:[#allocation2 + $0x38] sm:$0xff] }
 0x3a2   : > { %16905 = vst [vmem:[#allocation43_spill] sm:$0xff] %v11707_v9  ;;  %16906 = vst [vmem:[#allocation42_spill] sm:$0xff] %v11709_v60  ;;  %v16913_v9 = vld [vmem:[#allocation55_spill] sm:$0xff]  ;;  %v16916_v60 = vld [vmem:[#allocation64_spill] sm:$0xff] }
 0x3a3   : > { %3304 = vrot.lane.b32.xlu1 %v16910_v5, %s10024_s18  ;;  %3298 = vrot.lane.b32.xlu0 %v16911_v51, %s10024_s18  ;;  %v2574_v12 = vsel %vm2573_vm5, %v2541_v31, %v16913_v9  ;;  %v2513_v5 = vsel %vm553_vm1, %v9870_v52, %v16916_v60  ;;  %v2610_v51 = vsel %vm2606_vm6, %v2577_v30, %v16917_v2  ;;  %v9871_v9 = vld [vmem:[#allocation2 + $0x30] sm:$0xff]  ;;  %v16921_v53 = vld [vmem:[#allocation68_spill] sm:$0xff] }
 0x3a4   : > { %v2607_v41 = vsel %vm2606_vm6, %v2574_v12, %v16915_v40  ;;  %v16920_v31 = vld [vmem:[#allocation67_spill] sm:$0xff]  ;;  %v2546_v12 = vsel %vm2540_vm4, %v2513_v5, %v16921_v53  ;;  %v16922_v40 = vld [vmem:[#allocation56_spill] sm:$0xff] }
 0x3a5   : > { %v2415_v57 = vpop.permute.xlu1 %2414  ;;  %v11733_v10 = vpop.permute.xlu0 %2344  ;;  %v2640_v11 = vsel %vm2639_vm7, %v2607_v41, %v16919_v18  ;;  %v2512_v25 = vsel %vm553_vm1, %v9871_v9, %v16920_v31  ;;  %v2641_v56 = vsel %vm2639_vm7, %v2608_v20, %v16922_v40  ;;  %v16923_v60 = vld [vmem:[#allocation71_spill] sm:$0xff]  ;;  %v16927_v18 = vld [vmem:[#allocation28_spill] sm:$0xff] }
 0x3a6   : > { %16918 = vst [vmem:[#allocation45_spill] sm:$0xff] %v11733_v10  ;;  %v2545_v52 = vsel %vm2540_vm4, %v2512_v25, %v16923_v60  ;;  %v16924_v30 = vld [vmem:[#allocation75_spill] sm:$0xff]  ;;  %v16925_v10 = vld [vmem:[#allocation100_spill] sm:$0xff]  ;;  %v2673_v25 = vsel %vm2672_vm8, %v2640_v11, %v11478_v1  ;;  %v2674_v1 = vsel %vm2672_vm8, %v2641_v56, %v11462_v43 }
 0x3a7   : > { %v2576_v2 = vsel %vm2573_vm5, %v2543_v4, %v16924_v30  ;;  %v2579_v59 = vsel %vm2573_vm5, %v2546_v12, %v16925_v10  ;;  %v16926_v41 = vld [vmem:[#allocation31_spill] sm:$0xff]  ;;  %3302 = vrot.lane.b32.xlu0 %v16927_v18, %s10024_s18  ;;  %v16929_v20 = vld [vmem:[#allocation76_spill] sm:$0xff]  ;;  %v2706_v53 = vsel %vm2705_vm9, %v2673_v25, %v11587_v3 }
 0x3a8   : > { %3308 = vrot.lane.b32.xlu1 %v16926_v41, %s10024_s18  ;;  %v16928_v5 = vld [vmem:[#allocation79_spill] sm:$0xff]  ;;  %v2643_v31 = vsel %vm2639_vm7, %v2610_v51, %v16929_v20  ;;  %v16931_v30 = vld [vmem:[#allocation84_spill] sm:$0xff]  ;;  %v2707_v41 = vsel %vm2705_vm9, %v2674_v1, %v11578_v47 }
 0x3a9   : > { %v2609_v9 = vsel %vm2606_vm6, %v2576_v2, %v16928_v5  ;;  %v16930_v4 = vld [vmem:[#allocation83_spill] sm:$0xff]  ;;  %v2419_v12 = vpop.permute.xlu1 %2418  ;;  %v2413_v40 = vpop.permute.xlu0 %2412  ;;  %v16932_v5 = vld [vmem:[#allocation92_spill] sm:$0xff] }
 0x3aa   : > { %v2642_v10 = vsel %vm2639_vm7, %v2609_v9, %v16930_v4  ;;  %v9872_v60 = vld [vmem:[#allocation2 + $0x50] sm:$0xff]  ;;  %v2612_v51 = vsel %vm2606_vm6, %v2579_v59, %v16932_v5  ;;  %v2739_v11 = vsel %vm2738_vm10, %v2706_v53, %v2413_v40  ;;  %v9873_v9 = vld [vmem:[#allocation2 + $0x48] sm:$0xff]  ;;  %v16936_v59 = vld [vmem:[#allocation32_spill] sm:$0xff] }
 0x3ab   : > { %v2515_v2 = vsel %vm553_vm1, %v9872_v60, %v16931_v30  ;;  %v16933_v20 = vld [vmem:[#allocation87_spill] sm:$0xff]  ;;  %3306 = vrot.lane.b32.xlu0 %v16936_v59, %s10024_s18  ;;  %v16937_v30 = vld [vmem:[#allocation88_spill] sm:$0xff]  ;;  %v2675_v40 = vsel %vm2672_vm8, %v2642_v10, %v11490_v61  ;;  %9556 = vmatprep.mubr.msk.f32.mxu1 %vm2776_vm11, %v2739_v11  ;;  %v9874_v10 = vld [vmem:[#allocation2 + $0x68] sm:$0xff] }
 0x3ac   : > { %v2514_v3 = vsel %vm553_vm1, %v9873_v9, %v16933_v20  ;;  %v16934_v25 = vld [vmem:[#allocation95_spill] sm:$0xff]  ;;  %v2548_v56 = vsel %vm2540_vm4, %v2515_v2, %v16937_v30  ;;  %v16941_v20 = vld [vmem:[#allocation96_spill] sm:$0xff]  ;;  %v2708_v2 = vsel %vm2705_vm9, %v2675_v40, %v11595_v19  ;;  %v2676_v30 = vsel %vm2672_vm8, %v2643_v31, %v11476_v8  ;;  %v16949_v31 = vld [vmem:[#allocation141_spill] sm:$0xff] }
 0x3ad   : > { %v2578_v4 = vsel %vm2573_vm5, %v2545_v52, %v16934_v25  ;;  %v16935_v60 = vld [vmem:[#allocation35_spill] sm:$0xff]  ;;  %v2740_v52 = vsel %vm2738_vm10, %v2707_v41, %v2415_v57  ;;  %v2645_v25 = vsel %vm2639_vm7, %v2612_v51, %v16941_v20  ;;  %v2417_v61 = vpop.permute.xlu0 %2416  ;;  %v16942_v57 = vld [vmem:[#allocation104_spill] sm:$0xff]  ;;  %v9875_v51 = vld [vmem:[#allocation2 + $0x60] sm:$0xff] }
 0x3ae   : > { %3312 = vrot.lane.b32.xlu1 %v16935_v60, %s10024_s18  ;;  %v16938_v43 = vld [vmem:[#allocation99_spill] sm:$0xff]  ;;  %9557 = vmatmul.mubr.msk.f32.vlgmr.msra.gmra.mrb[16].mxu1 %vm2776_vm11, %v2740_v52  ;;  %v2517_v41 = vsel %vm553_vm1, %v9874_v10, %v16942_v57  ;;  %v16943_v11 = vld [vmem:[#allocation120_spill] sm:$0xff] }
 0x3af   : > { %v2611_v53 = vsel %vm2606_vm6, %v2578_v4, %v16938_v43  ;;  %v16939_v47 = vld [vmem:[#allocation91_spill] sm:$0xff]  ;;  %v2423_v4 = vpop.permute.xlu1 %2422  ;;  %v2741_v43 = vsel %vm2738_vm10, %v2708_v2, %v2417_v61  ;;  %v16945_v40 = vld [vmem:[#allocation108_spill] sm:$0xff] }
 0x3b0   : > { %v2547_v5 = vsel %vm2540_vm4, %v2514_v3, %v16939_v47  ;;  %v16940_v1 = vld [vmem:[#allocation103_spill] sm:$0xff]  ;;  %v2581_v3 = vsel %vm2573_vm5, %v2548_v56, %v16943_v11  ;;  %v2550_v52 = vsel %vm2540_vm4, %v2517_v41, %v16945_v40  ;;  %v2709_v47 = vsel %vm2705_vm9, %v2676_v30, %v11585_v0  ;;  %v16947_v56 = vld [vmem:[#allocation36_spill] sm:$0xff]  ;;  %9559 = vmatprep.mubr.msk.f32.mxu1 %vm2776_vm11, %v2741_v43  ;;  %v9876_v40 = vld [vmem:[#allocation2 + $0x80] sm:$0xff] }
 0x3b1   : > { %v2644_v9 = vsel %vm2639_vm7, %v2611_v53, %v16940_v1  ;;  %v16944_v53 = vld [vmem:[#allocation107_spill] sm:$0xff]  ;;  %3310 = vrot.lane.b32.xlu0 %v16947_v56, %s10024_s18  ;;  %v2583_v2 = vsel %vm2573_vm5, %v2550_v52, %v16949_v31  ;;  %v2742_v10 = vsel %vm2738_vm10, %v2709_v47, %v2419_v12  ;;  %v16952_v30 = vld [vmem:[#allocation112_spill] sm:$0xff]  ;;  %v2678_v47 = vsel %vm2672_vm8, %v2645_v25, %v11488_v33 }
 0x3b2   : > { %v2516_v19 = vsel %vm553_vm1, %v9875_v51, %v16944_v53  ;;  %v16946_v1 = vld [vmem:[#allocation39_spill] sm:$0xff]  ;;  %v2677_v61 = vsel %vm2672_vm8, %v2644_v9, %v11498_v21  ;;  %v2614_v51 = vsel %vm2606_vm6, %v2581_v3, %v16952_v30  ;;  %9560 = vmatmul.mubr.msk.f32.gmra.mrb[18].mxu1 %vm2776_vm11, %v2742_v10  ;;  %v2421_v21 = vpop.permute.xlu0 %2420  ;;  %v3416_v9 = vld [vmem:[#allocation3 + $0x9] sm:$0xff] }
 0x3b3   : > { %3316 = vrot.lane.b32.xlu1 %v16946_v1, %s10024_s18  ;;  %v16948_v20 = vld [vmem:[#allocation115_spill] sm:$0xff]  ;;  %v2427_v53 = vpop.permute.xlu1 %2426  ;;  %v16954_v52 = vld [vmem:[#allocation124_spill] sm:$0xff] }
 0x3b4   : > { %v2580_v8 = vsel %vm2573_vm5, %v2547_v5, %v16948_v20  ;;  %v16950_v0 = vld [vmem:[#allocation111_spill] sm:$0xff]  ;;  %v2710_v5 = vsel %vm2705_vm9, %v2677_v61, %v11602_v22  ;;  %v16955_v20 = vld [vmem:[#allocation128_spill] sm:$0xff]  ;;  %v2711_v61 = vsel %vm2705_vm9, %v2678_v47, %v11593_v58 }
 0x3b5   : > { %v2549_v57 = vsel %vm2540_vm4, %v2516_v19, %v16950_v0  ;;  %v16951_v41 = vld [vmem:[#allocation119_spill] sm:$0xff]  ;;  %v2519_v19 = vsel %vm553_vm1, %v9876_v40, %v16954_v52  ;;  %v2743_v3 = vsel %vm2738_vm10, %v2710_v5, %v2421_v21  ;;  %v16957_v10 = vld [vmem:[#allocation40_spill] sm:$0xff] }
 0x3b6   : > { %v2613_v11 = vsel %vm2606_vm6, %v2580_v8, %v16951_v41  ;;  %v16953_v12 = vld [vmem:[#allocation123_spill] sm:$0xff]  ;;  %v2552_v22 = vsel %vm2540_vm4, %v2519_v19, %v16955_v20  ;;  %v16956_v8 = vld [vmem:[#allocation132_spill] sm:$0xff]  ;;  %3314 = vrot.lane.b32.xlu0 %v16957_v10, %s10024_s18  ;;  %9562 = vmatprep.mubr.msk.f32.mxu1 %vm2776_vm11, %v2743_v3  ;;  %s17190_s18 = smov 20  }
 0x3b7   : > { %v2646_v43 = vsel %vm2639_vm7, %v2613_v11, %v16953_v12  ;;  %v2616_v31 = vsel %vm2606_vm6, %v2583_v2, %v16956_v8  ;;  %v9877_v0 = vld [vmem:[#allocation2 + $0x78] sm:$0xff]  ;;  %v16958_v41 = vld [vmem:[#allocation127_spill] sm:$0xff]  ;;  %v2585_v25 = vsel %vm2573_vm5, %v2552_v22, %v11315_v38  ;;  %v2744_v2 = vsel %vm2738_vm10, %v2711_v61, %v2423_v4  ;;  %3706 = vrot.lane.b32.xlu1 %v3416_v9, %s16959_s29 }
 0x3b8   : > { %v2518_v33 = vsel %vm553_vm1, %v9877_v0, %v16958_v41  ;;  %v2679_v11 = vsel %vm2672_vm8, %v2646_v43, %v11504_v50  ;;  %v3415_v58 = vld [vmem:[#allocation3 + $0x1] sm:$0xff]  ;;  %9563 = vmatmul.mubr.msk.f32.gmra.mrb[20].mxu1 %vm2776_vm11, %v2744_v2  ;;  %v2431_v50 = vpop.permute.xlu1 %2430  ;;  %v2425_v43 = vpop.permute.xlu0 %2424 }
 0x3b9   : > { %v16960_v30 = vld [vmem:[#allocation131_spill] sm:$0xff]  ;;  %v16962_v40 = vld [vmem:[#allocation116_spill] sm:$0xff]  ;;  %v2712_v38 = vsel %vm2705_vm9, %v2679_v11, %v11609_v48  ;;  %v2618_v48 = vsel %vm2606_vm6, %v2585_v25, %v11286_v24 }
 0x3ba   : > { %v2551_v5 = vsel %vm2540_vm4, %v2518_v33, %v16960_v30  ;;  %v16961_v21 = vld [vmem:[#allocation135_spill] sm:$0xff]  ;;  %v2647_v52 = vsel %vm2639_vm7, %v2614_v51, %v16962_v40  ;;  %v16963_v4 = vld [vmem:[#allocation140_spill] sm:$0xff]  ;;  %3704 = vrot.lane.b32.xlu0 %v3415_v58, %s16959_s29 }
 0x3bb   : > { %v2582_v12 = vsel %vm2573_vm5, %v2549_v57, %v16961_v21  ;;  %v2680_v19 = vsel %vm2672_vm8, %v2647_v52, %v11496_v17  ;;  %v16964_v47 = vld [vmem:[#allocation136_spill] sm:$0xff]  ;;  %v2745_v57 = vsel %vm2738_vm10, %v2712_v38, %v2425_v43  ;;  %v16966_v17 = vld [vmem:[#allocation145_spill] sm:$0xff]  ;;  %v2584_v25 = vsel %vm2573_vm5, %v2551_v5, %v11296_v13  ;;  %v16973_v43 = vld [vmem:[#allocation171_spill] sm:$0xff] }
 0x3bc   : > { %v2615_v9 = vsel %vm2606_vm6, %v2582_v12, %v16963_v4  ;;  %v2649_v3 = vsel %vm2639_vm7, %v2616_v31, %v16964_v47  ;;  %v16965_v20 = vld [vmem:[#allocation144_spill] sm:$0xff]  ;;  %v2713_v22 = vsel %vm2705_vm9, %v2680_v19, %v11600_v46  ;;  %9565 = vmatprep.mubr.msk.f32.mxu1 %vm2776_vm11, %v2745_v57  ;;  %v9879_v31 = vld [vmem:[#allocation2 + $0x90] sm:$0xff]  ;;  %v2429_v2 = vpop.permute.xlu0 %2428  ;;  %v16970_v52 = vld [vmem:[#allocation177_spill] sm:$0xff] }
 0x3bd   : > { %v2648_v51 = vsel %vm2639_vm7, %v2615_v9, %v16965_v20  ;;  %v9878_v8 = vld [vmem:[#allocation2 + $0x98] sm:$0xff]  ;;  %v2520_v0 = vsel %vm553_vm1, %v9879_v31, %v11264_v36  ;;  %v2746_v24 = vsel %vm2738_vm10, %v2713_v22, %v2427_v53  ;;  %v2435_v36 = vpop.permute.xlu1 %2434  ;;  %v2682_v53 = vsel %vm2672_vm8, %v2649_v3, %v11502_v49  ;;  %v9880_v49 = vld [vmem:[#allocation2 + $0xa8] sm:$0xff]  ;;  %v16975_v3 = vld [vmem:[#allocation57_spill] sm:$0xff] }
 0x3be   : > { %v2521_v61 = vsel %vm553_vm1, %v9878_v8, %v16966_v17  ;;  %v2681_v41 = vsel %vm2672_vm8, %v2648_v51, %v11510_v14  ;;  %v2553_v33 = vsel %vm2540_vm4, %v2520_v0, %v11280_v28  ;;  %9566 = vmatmul.mubr.msk.f32.gmra.mrb[22].mxu1 %vm2776_vm11, %v2746_v24  ;;  %v2617_v14 = vsel %vm2606_vm6, %v2584_v25, %v11311_v23  ;;  %v16967_v12 = vld [vmem:[#allocation168_spill] sm:$0xff]  ;;  %v16974_v9 = vld [vmem:[#allocation186_spill] sm:$0xff]  ;;  %v16978_v8 = vld [vmem:[#allocation207_spill] sm:$0xff] }
 0x3bf   : > { %v2554_v46 = vsel %vm2540_vm4, %v2521_v61, %v11270_v6  ;;  %v2714_v11 = vsel %vm2705_vm9, %v2681_v41, %v11617_v39  ;;  %v2651_v6 = vsel %vm2639_vm7, %v2618_v48, %v11302_v35  ;;  %v2650_v13 = vsel %vm2639_vm7, %v2617_v14, %v11324_v62  ;;  %v16976_v20 = vld [vmem:[#allocation174_spill] sm:$0xff]  ;;  %v16977_v48 = vld [vmem:[#allocation163_spill] sm:$0xff]  ;;  %v16979_v0 = vld [vmem:[#allocation172_spill] sm:$0xff] }
 0x3c0   : > { %v2747_v28 = vsel %vm2738_vm10, %v2714_v11, %v2429_v2  ;;  %v2523_v39 = vsel %vm553_vm1, %v11143_v29, %v11330_v26  ;;  %v2587_v58 = vsel %vm2573_vm5, %v2554_v46, %v11387_v32  ;;  %v2715_v23 = vsel %vm2705_vm9, %v2682_v53, %v11607_v44  ;;  %v2433_v5 = vpop.permute.xlu0 %2432  ;;  %v16980_v24 = vld [vmem:[#allocation178_spill] sm:$0xff] }
 0x3c1   : > { %9568 = vmatprep.mubr.msk.f32.mxu1 %vm2776_vm11, %v2747_v28  ;;  %v2522_v35 = vsel %vm553_vm1, %v9880_v49, %v11340_v34  ;;  %v2586_v30 = vsel %vm2573_vm5, %v2553_v33, %v11371_v45  ;;  %v2683_v62 = vsel %vm2672_vm8, %v2650_v13, %v11516_v7  ;;  %v2748_v29 = vsel %vm2738_vm10, %v2715_v23, %v2431_v50  ;;  %v2439_v45 = vpop.permute.xlu1 %2438  ;;  %v16971_v50 = vld [vmem:[#allocation204_spill] sm:$0xff]  ;;  %v16983_v14 = vld [vmem:[#allocation182_spill] sm:$0xff] }
 0x3c2   : > { %v2556_v26 = vsel %vm2540_vm4, %v2523_v39, %v11346_v27  ;;  %v2619_v32 = vsel %vm2606_vm6, %v2586_v30, %v11383_v15  ;;  %v2524_v44 = vsel %vm553_vm1, %v11197_v42, %v11412_v37  ;;  %v2716_v34 = vsel %vm2705_vm9, %v2683_v62, %v11625_v54  ;;  %9569 = vmatmul.mubr.msk.f32.gmra.mrb[24].mxu1 %vm2776_vm11, %v2748_v29  ;;  %v16968_v37 = vld [vmem:[#allocation169_spill] sm:$0xff]  ;;  %v16969_v54 = vld [vmem:[#allocation138_spill] sm:$0xff]  ;;  %v16981_v33 = vld [vmem:[#allocation184_spill] sm:$0xff] }
 0x3c3   : > { %v2620_v7 = vsel %vm2606_vm6, %v2587_v58, %v11362_v16  ;;  %v2557_v27 = vsel %vm2540_vm4, %v2524_v44, %v11420_v63  ;;  %v2684_v15 = vsel %vm2672_vm8, %v2651_v6, %v11508_v55  ;;  %v2749_v21 = vsel %vm2738_vm10, %v2716_v34, %v2433_v5  ;;  %v16972_v63 = vld [vmem:[#allocation160_spill] sm:$0xff]  ;;  %v16984_v6 = vld [vmem:[#allocation205_spill] sm:$0xff]  ;;  %v16987_v30 = vld [vmem:[#allocation46_spill] sm:$0xff] }
 0x3c4   : > { %v2652_v42 = vsel %vm2639_vm7, %v2619_v32, %v16967_v12  ;;  %v2525_v40 = vsel %vm553_vm1, %v16969_v54, %v16968_v37  ;;  %v2589_v38 = vsel %vm2573_vm5, %v2556_v26, %v16970_v52  ;;  %v2717_v16 = vsel %vm2705_vm9, %v2684_v15, %v16971_v50  ;;  %9571 = vmatprep.mubr.msk.f32.mxu1 %vm2776_vm11, %v2749_v21  ;;  %v2437_v31 = vpop.permute.xlu0 %2436  ;;  %v16985_v13 = vld [vmem:[#allocation188_spill] sm:$0xff]  ;;  %v16986_v58 = vld [vmem:[#allocation61_spill] sm:$0xff]  ;;  %v16988_v29 = vld [vmem:[#allocation175_spill] sm:$0xff] }
 0x3c5   : > { %v2555_v55 = vsel %vm2540_vm4, %v2522_v35, %v16972_v63  ;;  %v2558_v4 = vsel %vm2540_vm4, %v2525_v40, %v16973_v43  ;;  %v2685_v19 = vsel %vm2672_vm8, %v2652_v42, %v16974_v9  ;;  %v2750_v47 = vsel %vm2738_vm10, %v2717_v16, %v2435_v36  ;;  %v2443_v61 = vpop.permute.xlu1 %2442  ;;  %v16982_v36 = vld [vmem:[#allocation62_spill] sm:$0xff]  ;;  %v9881_v35 = vld [vmem:[#allocation2 + $0xe0] sm:$0xff]  ;;  %v9882_v37 = vld [vmem:[#allocation2 + $0xd8] sm:$0xff] }
 0x3c6   : > { %v2590_v57 = vsel %vm2573_vm5, %v2557_v27, %v16975_v3  ;;  %v2588_v51 = vsel %vm2573_vm5, %v2555_v55, %v16976_v20  ;;  %v2653_v22 = vsel %vm2639_vm7, %v2620_v7, %v16977_v48  ;;  %v2718_v17 = vsel %vm2705_vm9, %v2685_v19, %v16978_v8  ;;  %9572 = vmatmul.mubr.msk.f32.gmra.mrb[26].mxu1 %vm2776_vm11, %v2750_v47  ;;  %v16989_v32 = vld [vmem:[#allocation209_spill] sm:$0xff]  ;;  %v16990_v7 = vld [vmem:[#allocation50_spill] sm:$0xff]  ;;  %v9883_v9 = vld [vmem:[#allocation2 + $0xf8] sm:$0xff] }
 0x3c7   : > { %v2622_v41 = vsel %vm2606_vm6, %v2589_v38, %v16979_v0  ;;  %v2621_v46 = vsel %vm2606_vm6, %v2588_v51, %v16980_v24  ;;  %v2686_v25 = vsel %vm2672_vm8, %v2653_v22, %v16981_v33  ;;  %v2751_v11 = vsel %vm2738_vm10, %v2718_v17, %v2437_v31  ;;  %v16991_v15 = vld [vmem:[#allocation185_spill] sm:$0xff]  ;;  %v16992_v21 = vld [vmem:[#allocation54_spill] sm:$0xff]  ;;  %v17003_v0 = vld [vmem:[#allocation211_spill] sm:$0xff] }
 0x3c8   : > { %v2591_v2 = vsel %vm2573_vm5, %v2558_v4, %v16982_v36  ;;  %v2654_v53 = vsel %vm2639_vm7, %v2621_v46, %v16983_v14  ;;  %v2719_v28 = vsel %vm2705_vm9, %v2686_v25, %v16984_v6  ;;  %9574 = vmatprep.mubr.msk.f32.mxu1 %vm2776_vm11, %v2751_v11  ;;  %v2623_v23 = vsel %vm2606_vm6, %v2590_v57, %v16986_v58  ;;  %v2441_v5 = vpop.permute.xlu0 %2440  ;;  %v16993_v54 = vld [vmem:[#allocation49_spill] sm:$0xff]  ;;  %v16994_v52 = vld [vmem:[#allocation82_spill] sm:$0xff]  ;;  %v17006_v36 = vld [vmem:[#allocation187_spill] sm:$0xff] }
 0x3c9   : > { %v2687_v39 = vsel %vm2672_vm8, %v2654_v53, %v16985_v13  ;;  %v2752_v49 = vsel %vm2738_vm10, %v2719_v28, %v2439_v45  ;;  %v2527_v62 = vsel %vm553_vm1, %v9881_v35, %v16987_v30  ;;  %v2655_v26 = vsel %vm2639_vm7, %v2622_v41, %v16988_v29  ;;  %v2447_v34 = vpop.permute.xlu1 %2446  ;;  %v16995_v50 = vld [vmem:[#allocation65_spill] sm:$0xff]  ;;  %v16996_v63 = vld [vmem:[#allocation206_spill] sm:$0xff]  ;;  %v9884_v53 = vld [vmem:[#allocation2 + $0xf0] sm:$0xff] }
 0x3ca   : > { %v2720_v44 = vsel %vm2705_vm9, %v2687_v39, %v16989_v32  ;;  %9575 = vmatmul.mubr.msk.f32.gmra.mrb[28].mxu1 %vm2776_vm11, %v2752_v49  ;;  %v2560_v27 = vsel %vm2540_vm4, %v2527_v62, %v16990_v7  ;;  %v2688_v45 = vsel %vm2672_vm8, %v2655_v26, %v16991_v15  ;;  %v2624_v12 = vsel %vm2606_vm6, %v2591_v2, %v16992_v21  ;;  %v16997_v43 = vld [vmem:[#allocation53_spill] sm:$0xff]  ;;  %v16998_v19 = vld [vmem:[#allocation66_spill] sm:$0xff]  ;;  %v17010_v49 = vld [vmem:[#allocation208_spill] sm:$0xff] }
 0x3cb   : > { %v2753_v42 = vsel %vm2738_vm10, %v2720_v44, %v2441_v5  ;;  %v2526_v40 = vsel %vm553_vm1, %v9882_v37, %v16993_v54  ;;  %v2593_v38 = vsel %vm2573_vm5, %v2560_v27, %v16994_v52  ;;  %v2656_v16 = vsel %vm2639_vm7, %v2623_v23, %v16995_v50  ;;  %v16999_v3 = vld [vmem:[#allocation190_spill] sm:$0xff]  ;;  %v17001_v22 = vld [vmem:[#allocation77_spill] sm:$0xff]  ;;  %v9885_v29 = vld [vmem:[#allocation2 + $0x110] sm:$0xff] }
 0x3cc   : > { %v2721_v55 = vsel %vm2705_vm9, %v2688_v45, %v16996_v63  ;;  %9577 = vmatprep.mubr.msk.f32.mxu1 %vm2776_vm11, %v2753_v42  ;;  %v2559_v4 = vsel %vm2540_vm4, %v2526_v40, %v16997_v43  ;;  %v2529_v47 = vsel %vm553_vm1, %v9883_v9, %v16998_v19  ;;  %v2689_v57 = vsel %vm2672_vm8, %v2656_v16, %v16999_v3  ;;  %v17000_v51 = vld [vmem:[#allocation70_spill] sm:$0xff]  ;;  %v2445_v46 = vpop.permute.xlu0 %2444  ;;  %v17004_v33 = vld [vmem:[#allocation81_spill] sm:$0xff]  ;;  %v17013_v44 = vld [vmem:[#allocation192_spill] sm:$0xff] }
 0x3cd   : > { %v2754_v20 = vsel %vm2738_vm10, %v2721_v55, %v2443_v61  ;;  %v2562_v48 = vsel %vm2540_vm4, %v2529_v47, %v17000_v51  ;;  %v2592_v8 = vsel %vm2573_vm5, %v2559_v4, %v17001_v22  ;;  %v17002_v17 = vld [vmem:[#allocation58_spill] sm:$0xff]  ;;  %v2722_v41 = vsel %vm2705_vm9, %v2689_v57, %v17003_v0  ;;  %v2451_v24 = vpop.permute.xlu1 %2450  ;;  %v17007_v6 = vld [vmem:[#allocation69_spill] sm:$0xff] }
 0x3ce   : > { %v2657_v31 = vsel %vm2639_vm7, %v2624_v12, %v17002_v17  ;;  %9578 = vmatmul.mubr.msk.f32.gmra.mrb[30].mxu1 %vm2776_vm11, %v2754_v20  ;;  %v2625_v25 = vsel %vm2606_vm6, %v2592_v8, %v17004_v33  ;;  %v17005_v61 = vld [vmem:[#allocation74_spill] sm:$0xff]  ;;  %v2755_v14 = vsel %vm2738_vm10, %v2722_v41, %v2445_v46  ;;  %v2528_v28 = vsel %vm553_vm1, %v9884_v53, %v17007_v6  ;;  %v17008_v13 = vld [vmem:[#allocation85_spill] sm:$0xff]  ;;  %v17031_v53 = vld [vmem:[#allocation215_spill] sm:$0xff] }
 0x3cf   : > { %v2626_v11 = vsel %vm2606_vm6, %v2593_v38, %v17005_v61  ;;  %v2690_v2 = vsel %vm2672_vm8, %v2657_v31, %v17006_v36  ;;  %v2658_v39 = vsel %vm2639_vm7, %v2625_v25, %v17008_v13  ;;  %v17009_v58 = vld [vmem:[#allocation102_spill] sm:$0xff]  ;;  %9580 = vmatprep.mubr.msk.f32.mxu1 %vm2776_vm11, %v2755_v14  ;;  %v17011_v30 = vld [vmem:[#allocation73_spill] sm:$0xff] }
 0x3d0   : > { %v2595_v23 = vsel %vm2573_vm5, %v2562_v48, %v17009_v58  ;;  %v2723_v35 = vsel %vm2705_vm9, %v2690_v2, %v17010_v49  ;;  %v2561_v62 = vsel %vm2540_vm4, %v2528_v28, %v17011_v30  ;;  %v17012_v26 = vld [vmem:[#allocation86_spill] sm:$0xff]  ;;  %v2691_v5 = vsel %vm2672_vm8, %v2658_v39, %v17013_v44  ;;  %v17015_v45 = vld [vmem:[#allocation97_spill] sm:$0xff]  ;;  %v2449_v52 = vpop.permute.xlu0 %2448  ;;  %v17034_v49 = vld [vmem:[#allocation191_spill] sm:$0xff] }
 0x3d1   : > { %v2531_v32 = vsel %vm553_vm1, %v9885_v29, %v17012_v26  ;;  %v2756_v7 = vsel %vm2738_vm10, %v2723_v35, %v2447_v34  ;;  %v17014_v27 = vld [vmem:[#allocation90_spill] sm:$0xff]  ;;  %v2594_v21 = vsel %vm2573_vm5, %v2561_v62, %v17015_v45  ;;  %v17017_v37 = vld [vmem:[#allocation213_spill] sm:$0xff]  ;;  %v2455_v40 = vpop.permute.xlu1 %2454 }
 0x3d2   : > { %v2564_v15 = vsel %vm2540_vm4, %v2531_v32, %v17014_v27  ;;  %v17016_v12 = vld [vmem:[#allocation78_spill] sm:$0xff]  ;;  %v2724_v54 = vsel %vm2705_vm9, %v2691_v5, %v17017_v37  ;;  %9581 = vmatmul.mubr.msk.f32.gmra.mrb[32].mxu1 %vm2776_vm11, %v2756_v7  ;;  %v17018_v38 = vld [vmem:[#allocation101_spill] sm:$0xff]  ;;  %v17037_v5 = vld [vmem:[#allocation143_spill] sm:$0xff] }
 0x3d3   : > { %v2659_v42 = vsel %vm2639_vm7, %v2626_v11, %v17016_v12  ;;  %v2627_v50 = vsel %vm2606_vm6, %v2594_v21, %v17018_v38  ;;  %v17019_v34 = vld [vmem:[#allocation94_spill] sm:$0xff]  ;;  %v17020_v63 = vld [vmem:[#allocation189_spill] sm:$0xff]  ;;  %v2757_v43 = vsel %vm2738_vm10, %v2724_v54, %v2449_v52  ;;  %v17038_v27 = vld [vmem:[#allocation212_spill] sm:$0xff] }
 0x3d4   : > { %v2628_v16 = vsel %vm2606_vm6, %v2595_v23, %v17019_v34  ;;  %v2692_v55 = vsel %vm2672_vm8, %v2659_v42, %v17020_v63  ;;  %v9886_v4 = vld [vmem:[#allocation2 + $0x108] sm:$0xff]  ;;  %v17021_v9 = vld [vmem:[#allocation89_spill] sm:$0xff]  ;;  %9583 = vmatprep.mubr.msk.f32.mxu1 %vm2776_vm11, %v2757_v43  ;;  %v2453_v13 = vpop.permute.xlu0 %2452  ;;  %v17041_v54 = vld [vmem:[#allocation196_spill] sm:$0xff] }
 0x3d5   : > { %v2530_v19 = vsel %vm553_vm1, %v9886_v4, %v17021_v9  ;;  %v17022_v47 = vld [vmem:[#allocation105_spill] sm:$0xff]  ;;  %v17023_v57 = vld [vmem:[#allocation122_spill] sm:$0xff]  ;;  %v2459_v28 = vpop.permute.xlu1 %2458 }
 0x3d6   : > { %v2660_v3 = vsel %vm2639_vm7, %v2627_v50, %v17022_v47  ;;  %v2597_v20 = vsel %vm2573_vm5, %v2564_v15, %v17023_v57  ;;  %v17024_v51 = vld [vmem:[#allocation210_spill] sm:$0xff]  ;;  %v17025_v22 = vld [vmem:[#allocation93_spill] sm:$0xff] }
 0x3d7   : > { %v2725_v48 = vsel %vm2705_vm9, %v2692_v55, %v17024_v51  ;;  %v2563_v8 = vsel %vm2540_vm4, %v2530_v19, %v17025_v22  ;;  %v9887_v17 = vld [vmem:[#allocation2 + $0x128] sm:$0xff]  ;;  %v17029_v11 = vld [vmem:[#allocation117_spill] sm:$0xff] }
 0x3d8   : > { %v17026_v31 = vld [vmem:[#allocation106_spill] sm:$0xff]  ;;  %v2758_v33 = vsel %vm2738_vm10, %v2725_v48, %v2451_v24  ;;  %v2596_v36 = vsel %vm2573_vm5, %v2563_v8, %v17029_v11  ;;  %v17032_v39 = vld [vmem:[#allocation121_spill] sm:$0xff]  ;;  %v2457_v47 = vpop.permute.xlu0 %2456  ;;  %v9890_v8 = vld [vmem:[#allocation2 + $0x138] sm:$0xff] }
 0x3d9   : > { %v2533_v0 = vsel %vm553_vm1, %v9887_v17, %v17026_v31  ;;  %v17027_v41 = vld [vmem:[#allocation194_spill] sm:$0xff]  ;;  %9584 = vmatmul.mubr.msk.f32.gmra.mrb[34].mxu1 %vm2776_vm11, %v2758_v33  ;;  %v2629_v58 = vsel %vm2606_vm6, %v2596_v36, %v17032_v39  ;;  %v9888_v62 = vld [vmem:[#allocation2 + $0x120] sm:$0xff]  ;;  %v2463_v19 = vpop.permute.xlu1 %2462 }
 0x3da   : > { %v2693_v46 = vsel %vm2672_vm8, %v2660_v3, %v17027_v41  ;;  %v17028_v25 = vld [vmem:[#allocation110_spill] sm:$0xff]  ;;  %v17035_v29 = vld [vmem:[#allocation109_spill] sm:$0xff] }
 0x3db   : > { %v2566_v61 = vsel %vm2540_vm4, %v2533_v0, %v17028_v25  ;;  %v17030_v2 = vld [vmem:[#allocation98_spill] sm:$0xff]  ;;  %v2726_v6 = vsel %vm2705_vm9, %v2693_v46, %v17031_v53  ;;  %v2532_v26 = vsel %vm553_vm1, %v9888_v62, %v17035_v29  ;;  %v17036_v32 = vld [vmem:[#allocation125_spill] sm:$0xff]  ;;  %v17051_v46 = vld [vmem:[#allocation155_spill] sm:$0xff] }
 0x3dc   : > { %v2661_v14 = vsel %vm2639_vm7, %v2628_v16, %v17030_v2  ;;  %v17033_v24 = vld [vmem:[#allocation114_spill] sm:$0xff]  ;;  %v2759_v30 = vsel %vm2738_vm10, %v2726_v6, %v2453_v13  ;;  %v2662_v44 = vsel %vm2639_vm7, %v2629_v58, %v17036_v32  ;;  %v2599_v7 = vsel %vm2573_vm5, %v2566_v61, %v17037_v5  ;;  %v17039_v45 = vld [vmem:[#allocation113_spill] sm:$0xff]  ;;  %v9891_v2 = vld [vmem:[#allocation2 + $0x158] sm:$0xff]  ;;  %v2461_v32 = vpop.permute.xlu0 %2460 }
 0x3dd   : > { %v2630_v23 = vsel %vm2606_vm6, %v2597_v20, %v17033_v24  ;;  %v2694_v35 = vsel %vm2672_vm8, %v2661_v14, %v17034_v49  ;;  %9586 = vmatprep.mubr.msk.f32.mxu1 %vm2776_vm11, %v2759_v30  ;;  %v2565_v21 = vsel %vm2540_vm4, %v2532_v26, %v17039_v45  ;;  %v9889_v12 = vld [vmem:[#allocation2 + $0x140] sm:$0xff]  ;;  %v17040_v42 = vld [vmem:[#allocation126_spill] sm:$0xff]  ;;  %v2695_v52 = vsel %vm2672_vm8, %v2662_v44, %v17041_v54  ;;  %v17054_v14 = vld [vmem:[#allocation147_spill] sm:$0xff]  ;;  %v2467_v26 = vpop.permute.xlu1 %2466 }
 0x3de   : > { %v2727_v15 = vsel %vm2705_vm9, %v2694_v35, %v17038_v27  ;;  %v2535_v37 = vsel %vm553_vm1, %v9889_v12, %v17040_v42  ;;  %v17042_v50 = vld [vmem:[#allocation130_spill] sm:$0xff]  ;;  %v17043_v16 = vld [vmem:[#allocation137_spill] sm:$0xff]  ;;  %v2537_v53 = vsel %vm553_vm1, %v9891_v2, %v17054_v14  ;;  %v17058_v35 = vld [vmem:[#allocation139_spill] sm:$0xff] }
 0x3df   : > { %v2760_v38 = vsel %vm2738_vm10, %v2727_v15, %v2455_v40  ;;  %v2568_v34 = vsel %vm2540_vm4, %v2535_v37, %v17042_v50  ;;  %v2598_v63 = vsel %vm2573_vm5, %v2565_v21, %v17043_v16  ;;  %v17044_v55 = vld [vmem:[#allocation118_spill] sm:$0xff]  ;;  %v17045_v4 = vld [vmem:[#allocation217_spill] sm:$0xff]  ;;  %v17059_v62 = vld [vmem:[#allocation219_spill] sm:$0xff] }
 0x3e0   : > { %v2663_v43 = vsel %vm2639_vm7, %v2630_v23, %v17044_v55  ;;  %v2728_v9 = vsel %vm2705_vm9, %v2695_v52, %v17045_v4  ;;  %9587 = vmatmul.mubr.msk.f32.gmra.mrb[36].mxu1 %vm2776_vm11, %v2760_v38  ;;  %v17046_v3 = vld [vmem:[#allocation142_spill] sm:$0xff]  ;;  %v17048_v51 = vld [vmem:[#allocation193_spill] sm:$0xff]  ;;  %v2601_v33 = vsel %vm2573_vm5, %v2568_v34, %v17051_v46  ;;  %v17057_v23 = vld [vmem:[#allocation152_spill] sm:$0xff] }
 0x3e1   : > { %v2631_v57 = vsel %vm2606_vm6, %v2598_v63, %v17046_v3  ;;  %v17047_v40 = vld [vmem:[#allocation134_spill] sm:$0xff]  ;;  %v2696_v48 = vsel %vm2672_vm8, %v2663_v43, %v17048_v51  ;;  %v2761_v22 = vsel %vm2738_vm10, %v2728_v9, %v2457_v47  ;;  %v17049_v17 = vld [vmem:[#allocation129_spill] sm:$0xff]  ;;  %v17062_v27 = vld [vmem:[#allocation195_spill] sm:$0xff]  ;;  %v2471_v51 = vpop.permute.xlu1 %2470 }
 0x3e2   : > { %v2632_v20 = vsel %vm2606_vm6, %v2599_v7, %v17047_v40  ;;  %v2534_v31 = vsel %vm553_vm1, %v9890_v8, %v17049_v17  ;;  %v17050_v0 = vld [vmem:[#allocation146_spill] sm:$0xff]  ;;  %9589 = vmatprep.mubr.msk.f32.mxu1 %vm2776_vm11, %v2761_v22  ;;  %v17053_v11 = vld [vmem:[#allocation133_spill] sm:$0xff]  ;;  %v9892_v21 = vld [vmem:[#allocation2 + $0x150] sm:$0xff] }
 0x3e3   : > { %v2664_v41 = vsel %vm2639_vm7, %v2631_v57, %v17050_v0  ;;  %v17052_v25 = vld [vmem:[#allocation214_spill] sm:$0xff]  ;;  %v2567_v36 = vsel %vm2540_vm4, %v2534_v31, %v17053_v11  ;;  %v17056_v58 = vld [vmem:[#allocation149_spill] sm:$0xff]  ;;  %v2665_v30 = vsel %vm2639_vm7, %v2632_v20, %v17058_v35  ;;  %v17063_v12 = vld [vmem:[#allocation148_spill] sm:$0xff] }
 0x3e4   : > { %v2729_v61 = vsel %vm2705_vm9, %v2696_v48, %v17052_v25  ;;  %v17055_v6 = vld [vmem:[#allocation198_spill] sm:$0xff]  ;;  %v2570_v24 = vsel %vm2540_vm4, %v2537_v53, %v17056_v58  ;;  %v2600_v49 = vsel %vm2573_vm5, %v2567_v36, %v17057_v23  ;;  %v2698_v15 = vsel %vm2672_vm8, %v2665_v30, %v17062_v27  ;;  %v17064_v37 = vld [vmem:[#allocation156_spill] sm:$0xff]  ;;  %v17065_v52 = vld [vmem:[#allocation167_spill] sm:$0xff]  ;;  %v2465_v48 = vpop.permute.xlu0 %2464 }
 0x3e5   : > { %v2697_v13 = vsel %vm2672_vm8, %v2664_v41, %v17055_v6  ;;  %v2762_v39 = vsel %vm2738_vm10, %v2729_v61, %v2459_v28  ;;  %v17060_v44 = vld [vmem:[#allocation154_spill] sm:$0xff]  ;;  %v17061_v28 = vld [vmem:[#allocation151_spill] sm:$0xff]  ;;  %v2536_v42 = vsel %vm553_vm1, %v9892_v21, %v17063_v12  ;;  %v2603_v38 = vsel %vm2573_vm5, %v2570_v24, %v17065_v52  ;;  %v17066_v50 = vld [vmem:[#allocation216_spill] sm:$0xff]  ;;  %v2475_v27 = vpop.permute.xlu1 %2474 }
 0x3e6   : > { %v2730_v29 = vsel %vm2705_vm9, %v2697_v13, %v17059_v62  ;;  %9590 = vmatmul.mubr.msk.f32.gmra.mrb[38].mxu1 %vm2776_vm11, %v2762_v39  ;;  %v2633_v5 = vsel %vm2606_vm6, %v2600_v49, %v17060_v44  ;;  %v2634_v7 = vsel %vm2606_vm6, %v2601_v33, %v17061_v28  ;;  %v2731_v34 = vsel %vm2705_vm9, %v2698_v15, %v17066_v50  ;;  %v17067_v16 = vld [vmem:[#allocation150_spill] sm:$0xff]  ;;  %v17068_v55 = vld [vmem:[#allocation200_spill] sm:$0xff]  ;;  %v17070_v3 = vld [vmem:[#allocation153_spill] sm:$0xff] }
 0x3e7   : > { %v2763_v45 = vsel %vm2738_vm10, %v2730_v29, %v2461_v32  ;;  %v2666_v54 = vsel %vm2639_vm7, %v2633_v5, %v17064_v37  ;;  %v2569_v63 = vsel %vm2540_vm4, %v2536_v42, %v17067_v16  ;;  %v2764_v4 = vsel %vm2738_vm10, %v2731_v34, %v2463_v19  ;;  %v17069_v9 = vld [vmem:[#allocation164_spill] sm:$0xff]  ;;  %v17072_v22 = vld [vmem:[#allocation166_spill] sm:$0xff]  ;;  %v17074_v19 = vld [vmem:[#allocation197_spill] sm:$0xff] }
 0x3e8   : > { %9592 = vmatprep.mubr.msk.f32.mxu1 %vm2776_vm11, %v2763_v45  ;;  %v2699_v43 = vsel %vm2672_vm8, %v2666_v54, %v17068_v55  ;;  %v2602_v47 = vsel %vm2573_vm5, %v2569_v63, %v17069_v9  ;;  %v2667_v57 = vsel %vm2639_vm7, %v2634_v7, %v17070_v3  ;;  %v17071_v40 = vld [vmem:[#allocation220_spill] sm:$0xff]  ;;  %v17073_v17 = vld [vmem:[#allocation162_spill] sm:$0xff]  ;;  %v9893_v46 = vld [vmem:[#allocation2 + $0x170] sm:$0xff]  ;;  %v2469_v15 = vpop.permute.xlu0 %2468 }
 0x3e9   : > { %v2732_v20 = vsel %vm2705_vm9, %v2699_v43, %v17071_v40  ;;  %v2635_v8 = vsel %vm2606_vm6, %v2602_v47, %v17072_v22  ;;  %v2636_v31 = vsel %vm2606_vm6, %v2603_v38, %v17073_v17  ;;  %v2700_v0 = vsel %vm2672_vm8, %v2667_v57, %v17074_v19  ;;  %v17075_v33 = vld [vmem:[#allocation157_spill] sm:$0xff]  ;;  %v9894_v61 = vld [vmem:[#allocation2 + $0x168] sm:$0xff]  ;;  %v17079_v13 = vld [vmem:[#allocation159_spill] sm:$0xff]  ;;  %v3257_v3 = vpop.permute.xlu1 %3256 }
 0x3ea   : > { %9593 = vmatmul.mubr.msk.f32.gmra.mrb[40].mxu1 %vm2776_vm11, %v2764_v4  ;;  %v2765_v41 = vsel %vm2738_vm10, %v2732_v20, %v2465_v48  ;;  %v2539_v25 = vsel %vm553_vm1, %v9893_v46, %v17075_v33  ;;  %v17076_v11 = vld [vmem:[#allocation158_spill] sm:$0xff]  ;;  %v17080_v58 = vld [vmem:[#allocation161_spill] sm:$0xff]  ;;  %v17082_v30 = vld [vmem:[#allocation176_spill] sm:$0xff]  ;;  %3352 = vst.msk [vmem:[#allocation3 + $0x21] sm:$0xff] %vm553_vm1, %v3257_v3 }
 0x3eb   : > { %v2538_v36 = vsel %vm553_vm1, %v9894_v61, %v17076_v11  ;;  %v17077_v2 = vld [vmem:[#allocation170_spill] sm:$0xff]  ;;  %9595 = vmatprep.mubr.msk.f32.mxu1 %vm2776_vm11, %v2765_v41  ;;  %v2572_v39 = vsel %vm2540_vm4, %v2539_v25, %v17079_v13  ;;  %v17083_v29 = vld [vmem:[#allocation179_spill] sm:$0xff]  ;;  %v17084_v44 = vld [vmem:[#allocation165_spill] sm:$0xff] }
 0x3ec   : > { %v2668_v14 = vsel %vm2639_vm7, %v2635_v8, %v17077_v2  ;;  %v17078_v53 = vld [vmem:[#allocation218_spill] sm:$0xff]  ;;  %v2571_v24 = vsel %vm2540_vm4, %v2538_v36, %v17080_v58  ;;  %v2605_v32 = vsel %vm2573_vm5, %v2572_v39, %v17083_v29  ;;  %v2669_v5 = vsel %vm2639_vm7, %v2636_v31, %v17084_v44  ;;  %v17086_v45 = vld [vmem:[#allocation180_spill] sm:$0xff]  ;;  %v17088_v37 = vld [vmem:[#allocation183_spill] sm:$0xff]  ;;  %v2473_v57 = vpop.permute.xlu0 %2472 }
 0x3ed   : > { %v2733_v6 = vsel %vm2705_vm9, %v2700_v0, %v17078_v53  ;;  %v17081_v23 = vld [vmem:[#allocation202_spill] sm:$0xff]  ;;  %v2604_v62 = vsel %vm2573_vm5, %v2571_v24, %v17082_v30  ;;  %v17089_v52 = vld [vmem:[#allocation41_spill] sm:$0xff]  ;;  %v17091_v16 = vld [vmem:[#allocation203_spill] sm:$0xff]  ;;  %v3261_v17 = vpop.permute.xlu1 %3260 }
 0x3ee   : > { %v2701_v49 = vsel %vm2672_vm8, %v2668_v14, %v17081_v23  ;;  %v2766_v35 = vsel %vm2738_vm10, %v2733_v6, %v2467_v26  ;;  %v17085_v28 = vld [vmem:[#allocation42_spill] sm:$0xff]  ;;  %v2637_v21 = vsel %vm2606_vm6, %v2604_v62, %v17086_v45  ;;  %v17087_v26 = vld [vmem:[#allocation199_spill] sm:$0xff]  ;;  %v17090_v50 = vld [vmem:[#allocation173_spill] sm:$0xff]  ;;  %3354 = vst.msk [vmem:[#allocation3 + $0x39] sm:$0xff] %vm553_vm1, %v3261_v17 }
 0x3ef   : > { %v2734_v7 = vsel %vm2705_vm9, %v2701_v49, %v17085_v28  ;;  %9596 = vmatmul.mubr.msk.f32.gmra.mrb[42].mxu1 %vm2776_vm11, %v2766_v35  ;;  %v2702_v12 = vsel %vm2672_vm8, %v2669_v5, %v17087_v26  ;;  %v2670_v54 = vsel %vm2639_vm7, %v2637_v21, %v17088_v37  ;;  %v2638_v34 = vsel %vm2606_vm6, %v2605_v32, %v17090_v50  ;;  %v17092_v43 = vld [vmem:[#allocation181_spill] sm:$0xff]  ;;  %v17095_v22 = vld [vmem:[#allocation43_spill] sm:$0xff] }
 0x3f0   : > { %v2767_v42 = vsel %vm2738_vm10, %v2734_v7, %v2469_v15  ;;  %v2735_v38 = vsel %vm2705_vm9, %v2702_v12, %v17089_v52  ;;  %v2703_v63 = vsel %vm2672_vm8, %v2670_v54, %v17091_v16  ;;  %v2671_v4 = vsel %vm2639_vm7, %v2638_v34, %v17092_v43  ;;  %v17093_v9 = vld [vmem:[#allocation45_spill] sm:$0xff]  ;;  %v3255_v31 = vpop.permute.xlu0 %3254 }
 0x3f1   : > { %9598 = vmatprep.mubr.msk.f32.mxu1 %vm2776_vm11, %v2767_v42  ;;  %v2768_v55 = vsel %vm2738_vm10, %v2735_v38, %v2471_v51  ;;  %v2736_v47 = vsel %vm2705_vm9, %v2703_v63, %v17093_v9  ;;  %v17094_v40 = vld [vmem:[#allocation201_spill] sm:$0xff]  ;;  %3351 = vst.msk [vmem:[#allocation3 + $0x19] sm:$0xff] %vm553_vm1, %v3255_v31  ;;  %v3265_v19 = vpop.permute.xlu1 %3264  ;;  %v12239_v41 = vld [vmem:[#allocation3 + $0x21] sm:$0xff] }
 0x3f2   : > { %v2704_v20 = vsel %vm2672_vm8, %v2671_v4, %v17094_v40  ;;  %v2769_v48 = vsel %vm2738_vm10, %v2736_v47, %v2473_v57  ;;  %3356 = vst.msk [vmem:[#allocation3 + $0x51] sm:$0xff] %vm553_vm1, %v3265_v19  ;;  %3710 = vrot.lane.b32.xlu1 %v12239_v41, %s16959_s29  ;;  %v3448_v19 = vld [vmem:[#allocation3 + $0xa] sm:$0xff] }
 0x3f3   : > { %9599 = vmatmul.mubr.msk.f32.gmra.mrb[44].mxu1 %vm2776_vm11, %v2768_v55  ;;  %v2737_v51 = vsel %vm2705_vm9, %v2704_v20, %v17095_v22 }
 0x3f4   : > { %9601 = vmatprep.mubr.msk.f32.mxu1 %vm2776_vm11, %v2769_v48  ;;  %v2770_v8 = vsel %vm2738_vm10, %v2737_v51, %v2475_v27  ;;  %v3259_v0 = vpop.permute.xlu0 %3258 }
 0x3f5   : > { %3353 = vst.msk [vmem:[#allocation3 + $0x31] sm:$0xff] %vm553_vm1, %v3259_v0  ;;  %v3269_v46 = vpop.permute.xlu1 %3268  ;;  %v12245_v25 = vld [vmem:[#allocation3 + $0x39] sm:$0xff] }
 0x3f6   : > { %3358 = vst.msk [vmem:[#allocation3 + $0x69] sm:$0xff] %vm553_vm1, %v3269_v46  ;;  %3714 = vrot.lane.b32.xlu1 %v12245_v25, %s16959_s29  ;;  %v3447_v46 = vld [vmem:[#allocation3 + $0x2] sm:$0xff] }
 0x3f7   : > { %9602 = vmatmul.mubr.msk.f32.gmra.mrb[46].mxu1 %vm2776_vm11, %v2770_v8 }
 0x3f8   : > { %v3263_v33 = vpop.permute.xlu0 %3262  ;;  %v12247_v61 = vld [vmem:[#allocation3 + $0x19] sm:$0xff] }
 0x3f9   : > { %3355 = vst.msk [vmem:[#allocation3 + $0x49] sm:$0xff] %vm553_vm1, %v3263_v33  ;;  %3708 = vrot.lane.b32.xlu0 %v12247_v61, %s16959_s29  ;;  %v3273_v11 = vpop.permute.xlu1 %3272  ;;  %v12255_v2 = vld [vmem:[#allocation3 + $0x51] sm:$0xff]  ;;  %v12389_v33 = vld [vmem:[#allocation3 + $0x22] sm:$0xff] }
 0x3fa   : > { %3360 = vst.msk [vmem:[#allocation3 + $0x81] sm:$0xff] %vm553_vm1, %v3273_v11  ;;  %3718 = vrot.lane.b32.xlu1 %v12255_v2, %s16959_s29  ;;  %v12394_v11 = vld [vmem:[#allocation3 + $0x3a] sm:$0xff] }
 0x3fc   : > { %v3267_v36 = vpop.permute.xlu0 %3266  ;;  %v12257_v14 = vld [vmem:[#allocation3 + $0x31] sm:$0xff] }
 0x3fd   : > { %3357 = vst.msk [vmem:[#allocation3 + $0x61] sm:$0xff] %vm553_vm1, %v3267_v36  ;;  %3712 = vrot.lane.b32.xlu0 %v12257_v14, %s16959_s29  ;;  %v3277_v53 = vpop.permute.xlu1 %3276  ;;  %v12265_v13 = vld [vmem:[#allocation3 + $0x69] sm:$0xff]  ;;  %v12396_v36 = vld [vmem:[#allocation3 + $0x1a] sm:$0xff] }
 0x3fe   : > { %3362 = vst.msk [vmem:[#allocation3 + $0x99] sm:$0xff] %vm553_vm1, %v3277_v53  ;;  %3722 = vrot.lane.b32.xlu1 %v12265_v13, %s16959_s29  ;;  %v12402_v53 = vld [vmem:[#allocation3 + $0x52] sm:$0xff] }
 0x400   : > { %v3271_v6 = vpop.permute.xlu0 %3270  ;;  %v12267_v39 = vld [vmem:[#allocation3 + $0x49] sm:$0xff] }
 0x401   : > { %3359 = vst.msk [vmem:[#allocation3 + $0x79] sm:$0xff] %vm553_vm1, %v3271_v6  ;;  %3716 = vrot.lane.b32.xlu0 %v12267_v39, %s16959_s29  ;;  %v3281_v58 = vpop.permute.xlu1 %3280  ;;  %v12275_v23 = vld [vmem:[#allocation3 + $0x81] sm:$0xff]  ;;  %v12404_v6 = vld [vmem:[#allocation3 + $0x32] sm:$0xff] }
 0x402   : > { %3364 = vst.msk [vmem:[#allocation3 + $0xb1] sm:$0xff] %vm553_vm1, %v3281_v58  ;;  %3726 = vrot.lane.b32.xlu1 %v12275_v23, %s16959_s29  ;;  %v12410_v58 = vld [vmem:[#allocation3 + $0x6a] sm:$0xff] }
 0x403   : > { %v3389_v1 = vld [vmem:[#allocation3 + $0x48] sm:$0xff] }
 0x404   : > { %v3275_v24 = vpop.permute.xlu0 %3274  ;;  %v12277_v49 = vld [vmem:[#allocation3 + $0x61] sm:$0xff] }
 0x405   : > { %3361 = vst.msk [vmem:[#allocation3 + $0x91] sm:$0xff] %vm553_vm1, %v3275_v24  ;;  %3720 = vrot.lane.b32.xlu0 %v12277_v49, %s16959_s29  ;;  %v3285_v35 = vpop.permute.xlu1 %3284  ;;  %v12285_v62 = vld [vmem:[#allocation3 + $0x99] sm:$0xff]  ;;  %v12412_v24 = vld [vmem:[#allocation3 + $0x4a] sm:$0xff] }
 0x406   : > { %3366 = vst.msk [vmem:[#allocation3 + $0xc9] sm:$0xff] %vm553_vm1, %v3285_v35  ;;  %3730 = vrot.lane.b32.xlu1 %v12285_v62, %s16959_s29  ;;  %v12418_v35 = vld [vmem:[#allocation3 + $0x82] sm:$0xff] }
 0x407   : > { %v3392_v10 = vld [vmem:[#allocation3 + $0x68] sm:$0xff]  ;;  %v3391_v60 = vld [vmem:[#allocation3 + $0x60] sm:$0xff] }
 0x408   : > { %v3279_v30 = vpop.permute.xlu0 %3278  ;;  %v12287_v29 = vld [vmem:[#allocation3 + $0x79] sm:$0xff] }
 0x409   : > { %3363 = vst.msk [vmem:[#allocation3 + $0xa9] sm:$0xff] %vm553_vm1, %v3279_v30  ;;  %3724 = vrot.lane.b32.xlu0 %v12287_v29, %s16959_s29  ;;  %v3289_v32 = vpop.permute.xlu1 %3288  ;;  %v12295_v5 = vld [vmem:[#allocation3 + $0xb1] sm:$0xff]  ;;  %v12420_v30 = vld [vmem:[#allocation3 + $0x62] sm:$0xff] }
 0x40a   : > { %3368 = vst.msk [vmem:[#allocation3 + $0xe1] sm:$0xff] %vm553_vm1, %v3289_v32  ;;  %3734 = vrot.lane.b32.xlu1 %v12295_v5, %s16959_s29  ;;  %v12426_v32 = vld [vmem:[#allocation3 + $0x9a] sm:$0xff] }
 0x40b   : > { %v3394_v56 = vld [vmem:[#allocation3 + $0x80] sm:$0xff]  ;;  %v3393_v18 = vld [vmem:[#allocation3 + $0x78] sm:$0xff] }
 0x40c   : > { %v3283_v44 = vpop.permute.xlu0 %3282  ;;  %v12297_v28 = vld [vmem:[#allocation3 + $0x91] sm:$0xff] }
 0x40d   : > { %3365 = vst.msk [vmem:[#allocation3 + $0xc1] sm:$0xff] %vm553_vm1, %v3283_v44  ;;  %3728 = vrot.lane.b32.xlu0 %v12297_v28, %s16959_s29  ;;  %v3293_v7 = vpop.permute.xlu1 %3292  ;;  %v12305_v15 = vld [vmem:[#allocation3 + $0xc9] sm:$0xff]  ;;  %v12428_v44 = vld [vmem:[#allocation3 + $0x7a] sm:$0xff] }
 0x40e   : > { %3370 = vst.msk [vmem:[#allocation3 + $0xf9] sm:$0xff] %vm553_vm1, %v3293_v7  ;;  %3738 = vrot.lane.b32.xlu1 %v12305_v15, %s16959_s29  ;;  %v3462_v7 = vld [vmem:[#allocation3 + $0xb2] sm:$0xff] }
 0x40f   : > { %v3396_v59 = vld [vmem:[#allocation3 + $0x98] sm:$0xff] }
 0x410   : > { %v3287_v27 = vpop.permute.xlu0 %3286  ;;  %v12307_v45 = vld [vmem:[#allocation3 + $0xa9] sm:$0xff] }
 0x411   : > { %3367 = vst.msk [vmem:[#allocation3 + $0xd9] sm:$0xff] %vm553_vm1, %v3287_v27  ;;  %3732 = vrot.lane.b32.xlu0 %v12307_v45, %s16959_s29  ;;  %v3297_v21 = vpop.permute.xlu1 %3296  ;;  %v12315_v12 = vld [vmem:[#allocation3 + $0xe1] sm:$0xff]  ;;  %v3459_v27 = vld [vmem:[#allocation3 + $0x92] sm:$0xff] }
 0x412   : > { %3372 = vst.msk [vmem:[#allocation3 + $0x111] sm:$0xff] %vm553_vm1, %v3297_v21  ;;  %3742 = vrot.lane.b32.xlu1 %v12315_v12, %s16959_s29  ;;  %v3464_v21 = vld [vmem:[#allocation3 + $0xca] sm:$0xff] }
 0x414   : > { %v3291_v26 = vpop.permute.xlu0 %3290  ;;  %v12317_v42 = vld [vmem:[#allocation3 + $0xc1] sm:$0xff] }
 0x415   : > { %3369 = vst.msk [vmem:[#allocation3 + $0xf1] sm:$0xff] %vm553_vm1, %v3291_v26  ;;  %3736 = vrot.lane.b32.xlu0 %v12317_v42, %s16959_s29  ;;  %v3301_v37 = vpop.permute.xlu1 %3300  ;;  %v12325_v52 = vld [vmem:[#allocation3 + $0xf9] sm:$0xff]  ;;  %v3461_v26 = vld [vmem:[#allocation3 + $0xaa] sm:$0xff] }
 0x416   : > { %3374 = vst.msk [vmem:[#allocation3 + $0x129] sm:$0xff] %vm553_vm1, %v3301_v37  ;;  %3746 = vrot.lane.b32.xlu1 %v12325_v52, %s16959_s29  ;;  %v3466_v37 = vld [vmem:[#allocation3 + $0xe2] sm:$0xff] }
 0x418   : > { %v3295_v54 = vpop.permute.xlu0 %3294  ;;  %v12327_v38 = vld [vmem:[#allocation3 + $0xd9] sm:$0xff] }
 0x419   : > { %3371 = vst.msk [vmem:[#allocation3 + $0x109] sm:$0xff] %vm553_vm1, %v3295_v54  ;;  %3740 = vrot.lane.b32.xlu0 %v12327_v38, %s16959_s29  ;;  %v3305_v50 = vpop.permute.xlu1 %3304  ;;  %v12335_v16 = vld [vmem:[#allocation3 + $0x111] sm:$0xff]  ;;  %v3463_v54 = vld [vmem:[#allocation3 + $0xc2] sm:$0xff] }
 0x41a   : > { %3376 = vst.msk [vmem:[#allocation3 + $0x141] sm:$0xff] %vm553_vm1, %v3305_v50  ;;  %3750 = vrot.lane.b32.xlu1 %v12335_v16, %s16959_s29  ;;  %v3468_v50 = vld [vmem:[#allocation3 + $0xfa] sm:$0xff] }
 0x41c   : > { %v3299_v34 = vpop.permute.xlu0 %3298  ;;  %v12337_v63 = vld [vmem:[#allocation3 + $0xf1] sm:$0xff] }
 0x41d   : > { %3373 = vst.msk [vmem:[#allocation3 + $0x121] sm:$0xff] %vm553_vm1, %v3299_v34  ;;  %3744 = vrot.lane.b32.xlu0 %v12337_v63, %s16959_s29  ;;  %v3309_v55 = vpop.permute.xlu1 %3308  ;;  %v12345_v4 = vld [vmem:[#allocation3 + $0x129] sm:$0xff]  ;;  %v3465_v34 = vld [vmem:[#allocation3 + $0xda] sm:$0xff] }
 0x41e   : > { %3378 = vst.msk [vmem:[#allocation3 + $0x159] sm:$0xff] %vm553_vm1, %v3309_v55  ;;  %3754 = vrot.lane.b32.xlu1 %v12345_v4, %s16959_s29  ;;  %v3470_v55 = vld [vmem:[#allocation3 + $0x112] sm:$0xff] }
 0x420   : > { %v3303_v43 = vpop.permute.xlu0 %3302  ;;  %v12347_v9 = vld [vmem:[#allocation3 + $0x109] sm:$0xff] }
 0x421   : > { %3375 = vst.msk [vmem:[#allocation3 + $0x139] sm:$0xff] %vm553_vm1, %v3303_v43  ;;  %3748 = vrot.lane.b32.xlu0 %v12347_v9, %s16959_s29  ;;  %v3313_v47 = vpop.permute.xlu1 %3312  ;;  %v12355_v57 = vld [vmem:[#allocation3 + $0x141] sm:$0xff]  ;;  %v3467_v43 = vld [vmem:[#allocation3 + $0xf2] sm:$0xff] }
 0x422   : > { %3380 = vst.msk [vmem:[#allocation3 + $0x171] sm:$0xff] %vm553_vm1, %v3313_v47  ;;  %3758 = vrot.lane.b32.xlu1 %v12355_v57, %s16959_s29  ;;  %v3472_v47 = vld [vmem:[#allocation3 + $0x12a] sm:$0xff] }
 0x424   : > { %v3307_v3 = vpop.permute.xlu0 %3306  ;;  %v12357_v40 = vld [vmem:[#allocation3 + $0x121] sm:$0xff] }
 0x425   : > { %3377 = vst.msk [vmem:[#allocation3 + $0x151] sm:$0xff] %vm553_vm1, %v3307_v3  ;;  %3752 = vrot.lane.b32.xlu0 %v12357_v40, %s16959_s29  ;;  %v3317_v20 = vpop.permute.xlu1 %3316  ;;  %v12365_v22 = vld [vmem:[#allocation3 + $0x159] sm:$0xff]  ;;  %v3469_v3 = vld [vmem:[#allocation3 + $0x10a] sm:$0xff] }
 0x426   : > { %3382 = vst.msk [vmem:[#allocation3 + $0x189] sm:$0xff] %vm553_vm1, %v3317_v20  ;;  %3762 = vrot.lane.b32.xlu1 %v12365_v22, %s16959_s29 }
 0x428   : > { %v3311_v48 = vpop.permute.xlu0 %3310  ;;  %v12367_v51 = vld [vmem:[#allocation3 + $0x139] sm:$0xff] }
 0x429   : > { %3379 = vst.msk [vmem:[#allocation3 + $0x169] sm:$0xff] %vm553_vm1, %v3311_v48  ;;  %3756 = vrot.lane.b32.xlu0 %v12367_v51, %s16959_s29  ;;  %v12375_v17 = vld [vmem:[#allocation3 + $0x171] sm:$0xff]  ;;  %v12446_v20 = vpop.permute.xlu1 %3706  ;;  %v3474_v48 = vld [vmem:[#allocation3 + $0x142] sm:$0xff] }
 0x42a   : > { %3766 = vrot.lane.b32.xlu1 %v12375_v17, %s16959_s29 }
 0x42c   : > { %v3315_v8 = vpop.permute.xlu0 %3314  ;;  %v12377_v31 = vld [vmem:[#allocation3 + $0x151] sm:$0xff] }
 0x42d   : > { %3381 = vst.msk [vmem:[#allocation3 + $0x181] sm:$0xff] %vm553_vm1, %v3315_v8  ;;  %3760 = vrot.lane.b32.xlu0 %v12377_v31, %s16959_s29  ;;  %v3471_v8 = vld [vmem:[#allocation3 + $0x122] sm:$0xff] }
 0x42e   : > { %3834 = vrot.lane.b32.xlu1 %v3448_v19, %s17096_s28 }
 0x430   : > { %v12384_v0 = vld [vmem:[#allocation3 + $0x169] sm:$0xff]  ;;  %v12450_v19 = vpop.permute.xlu0 %3704 }
 0x431   : > { %3764 = vrot.lane.b32.xlu0 %v12384_v0, %s16959_s29  ;;  %s17216_s29 = smov 24  }
 0x432   : > { %3838 = vrot.lane.b32.xlu1 %v12389_v33, %s17096_s28 }
 0x435   : > { %3832 = vrot.lane.b32.xlu0 %v3447_v46, %s17096_s28 }
 0x436   : > { %3842 = vrot.lane.b32.xlu1 %v12394_v11, %s17096_s28 }
 0x439   : > { %3836 = vrot.lane.b32.xlu0 %v12396_v36, %s17096_s28 }
 0x43a   : > { %3846 = vrot.lane.b32.xlu1 %v12402_v53, %s17096_s28 }
 0x43d   : > { %3840 = vrot.lane.b32.xlu0 %v12404_v6, %s17096_s28 }
 0x43e   : > { %3850 = vrot.lane.b32.xlu1 %v12410_v58, %s17096_s28 }
 0x441   : > { %3844 = vrot.lane.b32.xlu0 %v12412_v24, %s17096_s28 }
 0x442   : > { %3854 = vrot.lane.b32.xlu1 %v12418_v35, %s17096_s28 }
 0x445   : > { %3848 = vrot.lane.b32.xlu0 %v12420_v30, %s17096_s28 }
 0x446   : > { %3858 = vrot.lane.b32.xlu1 %v12426_v32, %s17096_s28 }
 0x449   : > { %3852 = vrot.lane.b32.xlu0 %v12428_v44, %s17096_s28 }
 0x44a   : > { %3862 = vrot.lane.b32.xlu1 %v3462_v7, %s17096_s28  ;;  %v3476_v7 = vld [vmem:[#allocation3 + $0x15a] sm:$0xff] }
 0x44d   : > { %3856 = vrot.lane.b32.xlu0 %v3459_v27, %s17096_s28  ;;  %v3473_v27 = vld [vmem:[#allocation3 + $0x13a] sm:$0xff] }
 0x44e   : > { %3866 = vrot.lane.b32.xlu1 %v3464_v21, %s17096_s28 }
 0x451   : > { %3860 = vrot.lane.b32.xlu0 %v3461_v26, %s17096_s28 }
 0x452   : > { %3870 = vrot.lane.b32.xlu1 %v3466_v37, %s17096_s28  ;;  %v3478_v37 = vld [vmem:[#allocation3 + $0x172] sm:$0xff] }
 0x455   : > { %3864 = vrot.lane.b32.xlu0 %v3463_v54, %s17096_s28  ;;  %v3475_v54 = vld [vmem:[#allocation3 + $0x152] sm:$0xff] }
 0x456   : > { %3874 = vrot.lane.b32.xlu1 %v3468_v50, %s17096_s28 }
 0x459   : > { %3868 = vrot.lane.b32.xlu0 %v3465_v34, %s17096_s28 }
 0x45a   : > { %3878 = vrot.lane.b32.xlu1 %v3470_v55, %s17096_s28  ;;  %v3386_v55 = vld [vmem:[#allocation3 + $0x20] sm:$0xff] }
 0x45d   : > { %3872 = vrot.lane.b32.xlu0 %v3467_v43, %s17096_s28  ;;  %v3477_v43 = vld [vmem:[#allocation3 + $0x16a] sm:$0xff] }
 0x45e   : > { %3882 = vrot.lane.b32.xlu1 %v3472_v47, %s17096_s28 }
 0x461   : > { %3876 = vrot.lane.b32.xlu0 %v3469_v3, %s17096_s28 }
 0x462   : > { %3886 = vrot.lane.b32.xlu1 %v3474_v48, %s17096_s28  ;;  %v3388_v48 = vld [vmem:[#allocation3 + $0x38] sm:$0xff] }
 0x464   : > { %v12452_v46 = vpop.permute.xlu1 %3710 }
 0x465   : > { %3880 = vrot.lane.b32.xlu0 %v3471_v8, %s17096_s28  ;;  %17097 = vst [vmem:[#allocation60_spill] sm:$0xff] %v12452_v46  ;;  %v3385_v8 = vld [vmem:[#allocation3 + $0x18] sm:$0xff]  ;;  %v12639_v46 = vld [vmem:[#allocation3 + $0x180] sm:$0xff] }
 0x466   : > { %3890 = vrot.lane.b32.xlu1 %v3476_v7, %s17096_s28 }
 0x468   : > { %v12456_v21 = vpop.permute.xlu1 %3714 }
 0x469   : > { %3884 = vrot.lane.b32.xlu0 %v3473_v27, %s17096_s28  ;;  %17098 = vst [vmem:[#allocation48_spill] sm:$0xff] %v12456_v21 }
 0x46a   : > { %3894 = vrot.lane.b32.xlu1 %v3478_v37, %s17096_s28  ;;  %v3390_v37 = vld [vmem:[#allocation3 + $0x50] sm:$0xff] }
 0x46b   : > { %v12458_v26 = vpop.permute.xlu0 %3708 }
 0x46c   : > { %17099 = vst [vmem:[#allocation80_spill] sm:$0xff] %v12458_v26  ;;  %v12462_v50 = vpop.permute.xlu1 %3718 }
 0x46d   : > { %3888 = vrot.lane.b32.xlu0 %v3475_v54, %s17096_s28  ;;  %17100 = vst [vmem:[#allocation44_spill] sm:$0xff] %v12462_v50  ;;  %v3387_v54 = vld [vmem:[#allocation3 + $0x30] sm:$0xff] }
 0x46e   : > { %3962 = vrot.lane.b32.xlu1 %v3386_v55, %s17102_s26 }
 0x46f   : > { %v12464_v34 = vpop.permute.xlu0 %3712 }
 0x470   : > { %17101 = vst [vmem:[#allocation52_spill] sm:$0xff] %v12464_v34  ;;  %v12468_v47 = vpop.permute.xlu1 %3722  ;;  %v12625_v34 = vld [vmem:[#allocation3 + $0x188] sm:$0xff] }
 0x471   : > { %3892 = vrot.lane.b32.xlu0 %v3477_v43, %s17096_s28  ;;  %17103 = vst [vmem:[#allocation47_spill] sm:$0xff] %v12468_v47  ;;  %v12605_v47 = vld [vmem:[#allocation3 + $0x150] sm:$0xff] }
 0x472   : > { %3966 = vrot.lane.b32.xlu1 %v3388_v48, %s17102_s26 }
 0x473   : > { %v12470_v3 = vpop.permute.xlu0 %3716 }
 0x474   : > { %17104 = vst [vmem:[#allocation55_spill] sm:$0xff] %v12470_v3  ;;  %v12474_v7 = vpop.permute.xlu1 %3726 }
 0x475   : > { %3960 = vrot.lane.b32.xlu0 %v3385_v8, %s17102_s26  ;;  %17105 = vst [vmem:[#allocation51_spill] sm:$0xff] %v12474_v7 }
 0x476   : > { %3970 = vrot.lane.b32.xlu1 %v3390_v37, %s17102_s26 }
 0x477   : > { %v12476_v27 = vpop.permute.xlu0 %3720 }
 0x478   : > { %17106 = vst [vmem:[#allocation59_spill] sm:$0xff] %v12476_v27  ;;  %v12480_v55 = vpop.permute.xlu1 %3730 }
 0x479   : > { %3964 = vrot.lane.b32.xlu0 %v3387_v54, %s17102_s26  ;;  %17107 = vst [vmem:[#allocation64_spill] sm:$0xff] %v12480_v55  ;;  %v3395_v55 = vld [vmem:[#allocation3 + $0x90] sm:$0xff] }
 0x47a   : > { %3974 = vrot.lane.b32.xlu1 %v3392_v10, %s17102_s26 }
 0x47b   : > { %v12482_v43 = vpop.permute.xlu0 %3724 }
 0x47c   : > { %17108 = vst [vmem:[#allocation72_spill] sm:$0xff] %v12482_v43  ;;  %v12486_v48 = vpop.permute.xlu1 %3734 }
 0x47d   : > { %3968 = vrot.lane.b32.xlu0 %v3389_v1, %s17102_s26  ;;  %17109 = vst [vmem:[#allocation63_spill] sm:$0xff] %v12486_v48  ;;  %v3398_v48 = vld [vmem:[#allocation3 + $0xb0] sm:$0xff] }
 0x47e   : > { %3978 = vrot.lane.b32.xlu1 %v3394_v56, %s17102_s26 }
 0x47f   : > { %v12488_v8 = vpop.permute.xlu0 %3728 }
 0x480   : > { %17110 = vst [vmem:[#allocation67_spill] sm:$0xff] %v12488_v8  ;;  %v12492_v37 = vpop.permute.xlu1 %3738 }
 0x481   : > { %3972 = vrot.lane.b32.xlu0 %v3391_v60, %s17102_s26  ;;  %17111 = vst [vmem:[#allocation68_spill] sm:$0xff] %v12492_v37  ;;  %v12498_v1 = vpop.f32.mrb[16].mxu1 }
 0x482   : > { %3982 = vrot.lane.b32.xlu1 %v3396_v59, %s17102_s26  ;;  %17113 = vst [vmem:[#allocation71_spill] sm:$0xff] %v12498_v1  ;;  %v12502_v8 = vpop.f32.mrb[17].mxu1  ;;  %v3400_v59 = vld [vmem:[#allocation3 + $0xc8] sm:$0xff] }
 0x483   : > { %v12494_v54 = vpop.permute.xlu0 %3732  ;;  %17115 = vst [vmem:[#allocation100_spill] sm:$0xff] %v12502_v8 }
 0x484   : > { %17112 = vst [vmem:[#allocation56_spill] sm:$0xff] %v12494_v54  ;;  %v12500_v10 = vpop.permute.xlu1 %3742 }
 0x485   : > { %3976 = vrot.lane.b32.xlu0 %v3393_v18, %s17102_s26  ;;  %17114 = vst [vmem:[#allocation75_spill] sm:$0xff] %v12500_v10  ;;  %v12508_v60 = vpop.f32.mrb[18].mxu1  ;;  %v3397_v18 = vld [vmem:[#allocation3 + $0xa8] sm:$0xff] }
 0x486   : > { %3986 = vrot.lane.b32.xlu1 %v3398_v48, %s17102_s26  ;;  %17117 = vst [vmem:[#allocation76_spill] sm:$0xff] %v12508_v60  ;;  %v12512_v54 = vpop.f32.mrb[19].mxu1  ;;  %v3402_v48 = vld [vmem:[#allocation3 + $0xe0] sm:$0xff] }
 0x487   : > { %v12504_v56 = vpop.permute.xlu0 %3736  ;;  %17119 = vst [vmem:[#allocation84_spill] sm:$0xff] %v12512_v54 }
 0x488   : > { %17116 = vst [vmem:[#allocation79_spill] sm:$0xff] %v12504_v56  ;;  %v12510_v37 = vpop.permute.xlu1 %3746 }
 0x489   : > { %3980 = vrot.lane.b32.xlu0 %v3395_v55, %s17102_s26  ;;  %17118 = vst [vmem:[#allocation83_spill] sm:$0xff] %v12510_v37  ;;  %v3399_v55 = vld [vmem:[#allocation3 + $0xc0] sm:$0xff] }
 0x48a   : > { %3990 = vrot.lane.b32.xlu1 %v3400_v59, %s17102_s26  ;;  %v3404_v59 = vld [vmem:[#allocation3 + $0xf8] sm:$0xff] }
 0x48b   : > { %v12514_v1 = vpop.permute.xlu0 %3740  ;;  %v12518_v8 = vpop.f32.mrb[20].mxu1 }
 0x48c   : > { %17120 = vst [vmem:[#allocation92_spill] sm:$0xff] %v12514_v1  ;;  %17121 = vst [vmem:[#allocation87_spill] sm:$0xff] %v12518_v8  ;;  %v12520_v10 = vpop.permute.xlu1 %3750  ;;  %v12522_v56 = vpop.f32.mrb[21].mxu1 }
 0x48d   : > { %3984 = vrot.lane.b32.xlu0 %v3397_v18, %s17102_s26  ;;  %17122 = vst [vmem:[#allocation95_spill] sm:$0xff] %v12520_v10  ;;  %17123 = vst [vmem:[#allocation88_spill] sm:$0xff] %v12522_v56  ;;  %v3401_v18 = vld [vmem:[#allocation3 + $0xd8] sm:$0xff] }
 0x48e   : > { %3994 = vrot.lane.b32.xlu1 %v3402_v48, %s17102_s26  ;;  %v3406_v48 = vld [vmem:[#allocation3 + $0x110] sm:$0xff] }
 0x48f   : > { %v12524_v60 = vpop.permute.xlu0 %3744 }
 0x490   : > { %17124 = vst [vmem:[#allocation99_spill] sm:$0xff] %v12524_v60  ;;  %v12530_v37 = vpop.permute.xlu1 %3754 }
 0x491   : > { %3988 = vrot.lane.b32.xlu0 %v3399_v55, %s17102_s26  ;;  %v12528_v54 = vpop.f32.mrb[22].mxu1  ;;  %17126 = vst [vmem:[#allocation103_spill] sm:$0xff] %v12530_v37  ;;  %v12542_v55 = vld [vmem:[#allocation3 + $0xf0] sm:$0xff] }
 0x492   : > { %17125 = vst [vmem:[#allocation91_spill] sm:$0xff] %v12528_v54  ;;  %v12532_v1 = vpop.f32.mrb[23].mxu1  ;;  %3998 = vrot.lane.b32.xlu1 %v3404_v59, %s17102_s26 }
 0x493   : > { %17127 = vst [vmem:[#allocation96_spill] sm:$0xff] %v12532_v1  ;;  %v12534_v8 = vpop.permute.xlu0 %3748 }
 0x494   : > { %17128 = vst [vmem:[#allocation104_spill] sm:$0xff] %v12534_v8  ;;  %v12540_v10 = vpop.permute.xlu1 %3758 }
 0x495   : > { %3992 = vrot.lane.b32.xlu0 %v3401_v18, %s17102_s26  ;;  %v12538_v56 = vpop.f32.mrb[24].mxu1  ;;  %17130 = vst [vmem:[#allocation107_spill] sm:$0xff] %v12540_v10  ;;  %v12555_v18 = vld [vmem:[#allocation3 + $0x128] sm:$0xff] }
 0x496   : > { %17129 = vst [vmem:[#allocation120_spill] sm:$0xff] %v12538_v56  ;;  %v12544_v54 = vpop.f32.mrb[25].mxu1  ;;  %4002 = vrot.lane.b32.xlu1 %v3406_v48, %s17102_s26  ;;  %v12557_v56 = vld [vmem:[#allocation3 + $0x108] sm:$0xff] }
 0x497   : > { %17131 = vst [vmem:[#allocation108_spill] sm:$0xff] %v12544_v54  ;;  %v12546_v37 = vpop.permute.xlu0 %3752 }
 0x498   : > { %17132 = vst [vmem:[#allocation115_spill] sm:$0xff] %v12546_v37  ;;  %v12553_v59 = vpop.permute.xlu1 %3762 }
 0x499   : > { %3996 = vrot.lane.b32.xlu0 %v12542_v55, %s17102_s26  ;;  %v12551_v1 = vpop.f32.mrb[26].mxu1  ;;  %17134 = vst [vmem:[#allocation111_spill] sm:$0xff] %v12553_v59  ;;  %v12573_v59 = vld [vmem:[#allocation3 + $0x120] sm:$0xff] }
 0x49a   : > { %17133 = vst [vmem:[#allocation141_spill] sm:$0xff] %v12551_v1  ;;  %v12559_v10 = vpop.f32.mrb[27].mxu1  ;;  %4006 = vrot.lane.b32.xlu1 %v12555_v18, %s17102_s26  ;;  %v12571_v1 = vld [vmem:[#allocation3 + $0x140] sm:$0xff] }
 0x49b   : > { %17135 = vst [vmem:[#allocation119_spill] sm:$0xff] %v12559_v10  ;;  %v12561_v8 = vpop.permute.xlu0 %3756 }
 0x49c   : > { %17136 = vst [vmem:[#allocation112_spill] sm:$0xff] %v12561_v8  ;;  %v12569_v54 = vpop.permute.xlu1 %3766 }
 0x49d   : > { %4000 = vrot.lane.b32.xlu0 %v12557_v56, %s17102_s26  ;;  %v12567_v48 = vpop.f32.mrb[28].mxu1  ;;  %17138 = vst [vmem:[#allocation124_spill] sm:$0xff] %v12569_v54  ;;  %v12589_v54 = vld [vmem:[#allocation3 + $0x138] sm:$0xff] }
 0x49e   : > { %17137 = vst [vmem:[#allocation123_spill] sm:$0xff] %v12567_v48  ;;  %v12575_v37 = vpop.f32.mrb[29].mxu1  ;;  %4010 = vrot.lane.b32.xlu1 %v12571_v1, %s17102_s26  ;;  %v12587_v48 = vld [vmem:[#allocation3 + $0x158] sm:$0xff] }
 0x49f   : > { %17139 = vst [vmem:[#allocation128_spill] sm:$0xff] %v12575_v37  ;;  %v12577_v60 = vpop.permute.xlu0 %3760 }
 0x4a0   : > { %17140 = vst [vmem:[#allocation132_spill] sm:$0xff] %v12577_v60  ;;  %v12585_v8 = vpop.permute.xlu1 %3834 }
 0x4a1   : > { %4004 = vrot.lane.b32.xlu0 %v12573_v59, %s17102_s26  ;;  %v12583_v10 = vpop.f32.mrb[30].mxu1 }
 0x4a2   : > { %17141 = vst [vmem:[#allocation127_spill] sm:$0xff] %v12583_v10  ;;  %v12591_v7 = vpop.f32.mrb[31].mxu1  ;;  %4014 = vrot.lane.b32.xlu1 %v12587_v48, %s17102_s26  ;;  %v12603_v10 = vld [vmem:[#allocation3 + $0x170] sm:$0xff] }
 0x4a3   : > { %17142 = vst [vmem:[#allocation131_spill] sm:$0xff] %v12591_v7  ;;  %v12593_v43 = vpop.permute.xlu0 %3764 }
 0x4a4   : > { %17143 = vst [vmem:[#allocation135_spill] sm:$0xff] %v12593_v43  ;;  %v12601_v60 = vpop.permute.xlu1 %3838 }
 0x4a5   : > { %4008 = vrot.lane.b32.xlu0 %v12589_v54, %s17102_s26  ;;  %v12599_v37 = vpop.f32.mrb[32].mxu1  ;;  %17145 = vst [vmem:[#allocation140_spill] sm:$0xff] %v12601_v60 }
 0x4a6   : > { %17144 = vst [vmem:[#allocation116_spill] sm:$0xff] %v12599_v37  ;;  %v12607_v27 = vpop.f32.mrb[33].mxu1  ;;  %4018 = vrot.lane.b32.xlu1 %v12603_v10, %s17102_s26  ;;  %v12619_v37 = vld [vmem:[#allocation3 + $0x168] sm:$0xff] }
 0x4a7   : > { %17146 = vst [vmem:[#allocation136_spill] sm:$0xff] %v12607_v27  ;;  %v12609_v50 = vpop.permute.xlu0 %3832 }
 0x4a8   : > { %v12617_v43 = vpop.permute.xlu1 %3842 }
 0x4a9   : > { %4012 = vrot.lane.b32.xlu0 %v12605_v47, %s17102_s26  ;;  %17148 = vst [vmem:[#allocation145_spill] sm:$0xff] %v12617_v43 }
 0x4aa   : > { %4022 = vrot.lane.b32.xlu1 %v12625_v34, %s17102_s26 }
 0x4ab   : > { %v12623_v21 = vpop.permute.xlu0 %3836 }
 0x4ac   : > { %v12615_v7 = vpop.f32.mrb[34].mxu1  ;;  %17150 = vst [vmem:[#allocation169_spill] sm:$0xff] %v12623_v21  ;;  %v12633_v60 = vpop.permute.xlu1 %3846 }
 0x4ad   : > { %17147 = vst [vmem:[#allocation144_spill] sm:$0xff] %v12615_v7  ;;  %v12621_v3 = vpop.f32.mrb[35].mxu1  ;;  %4016 = vrot.lane.b32.xlu0 %v12619_v37, %s17102_s26  ;;  %17152 = vst [vmem:[#allocation177_spill] sm:$0xff] %v12633_v60 }
 0x4ae   : > { %17149 = vst [vmem:[#allocation168_spill] sm:$0xff] %v12621_v3  ;;  %4090 = vrot.lane.b32.xlu1 %v12239_v41, %s17155_s1 }
 0x4af   : > { %v12637_v43 = vpop.permute.xlu0 %3840 }
 0x4b0   : > { %17154 = vst [vmem:[#allocation160_spill] sm:$0xff] %v12637_v43  ;;  %v12647_v21 = vpop.permute.xlu1 %3850 }
 0x4b1   : > { %4020 = vrot.lane.b32.xlu0 %v12639_v46, %s17102_s26  ;;  %17157 = vst [vmem:[#allocation186_spill] sm:$0xff] %v12647_v21  ;;  %v3581_v21 = vld [vmem:[#allocation3 + $0x68] sm:$0xff]  ;;  %s17267_s26 = smov 32  }
 0x4b2   : > { %4094 = vrot.lane.b32.xlu1 %v12245_v25, %s17155_s1 }
 0x4b3   : > { %v12631_v27 = vpop.f32.mrb[36].mxu1 }
 0x4b4   : > { %17151 = vst [vmem:[#allocation138_spill] sm:$0xff] %v12631_v27  ;;  %v12635_v7 = vpop.f32.mrb[37].mxu1  ;;  %v12651_v27 = vpop.permute.xlu0 %3844 }
 0x4b5   : > { %17153 = vst [vmem:[#allocation204_spill] sm:$0xff] %v12635_v7  ;;  %4088 = vrot.lane.b32.xlu0 %v12247_v61, %s17155_s1  ;;  %v12659_v41 = vpop.permute.xlu1 %3854 }
 0x4b6   : > { %17160 = vst [vmem:[#allocation163_spill] sm:$0xff] %v12659_v41  ;;  %4098 = vrot.lane.b32.xlu1 %v12255_v2, %s17155_s1  ;;  %v3579_v41 = vld [vmem:[#allocation3 + $0x50] sm:$0xff] }
 0x4b8   : > { %v12663_v43 = vpop.permute.xlu0 %3848 }
 0x4b9   : > { %v12645_v3 = vpop.f32.mrb[38].mxu1  ;;  %17162 = vst [vmem:[#allocation172_spill] sm:$0xff] %v12663_v43  ;;  %4092 = vrot.lane.b32.xlu0 %v12257_v14, %s17155_s1  ;;  %v12671_v25 = vpop.permute.xlu1 %3858  ;;  %v3578_v43 = vld [vmem:[#allocation3 + $0x48] sm:$0xff] }
 0x4ba   : > { %17156 = vst [vmem:[#allocation171_spill] sm:$0xff] %v12645_v3  ;;  %v12649_v26 = vpop.f32.mrb[39].mxu1  ;;  %17164 = vst [vmem:[#allocation184_spill] sm:$0xff] %v12671_v25  ;;  %4102 = vrot.lane.b32.xlu1 %v12265_v13, %s17155_s1  ;;  %v3577_v25 = vld [vmem:[#allocation3 + $0x38] sm:$0xff] }
 0x4bb   : > { %17158 = vst [vmem:[#allocation57_spill] sm:$0xff] %v12649_v26 }
 0x4bc   : > { %v12675_v61 = vpop.permute.xlu0 %3852 }
 0x4bd   : > { %v12657_v7 = vpop.f32.mrb[40].mxu1  ;;  %17166 = vst [vmem:[#allocation182_spill] sm:$0xff] %v12675_v61  ;;  %4096 = vrot.lane.b32.xlu0 %v12267_v39, %s17155_s1  ;;  %v12683_v2 = vpop.permute.xlu1 %3862  ;;  %v3576_v61 = vld [vmem:[#allocation3 + $0x30] sm:$0xff] }
 0x4be   : > { %17159 = vst [vmem:[#allocation174_spill] sm:$0xff] %v12657_v7  ;;  %v12661_v60 = vpop.f32.mrb[41].mxu1  ;;  %17168 = vst [vmem:[#allocation188_spill] sm:$0xff] %v12683_v2  ;;  %4106 = vrot.lane.b32.xlu1 %v12275_v23, %s17155_s1  ;;  %v12949_v2 = vld [vmem:[#allocation3 + $0x18a] sm:$0xff] }
 0x4bf   : > { %17161 = vst [vmem:[#allocation207_spill] sm:$0xff] %v12661_v60 }
 0x4c0   : > { %v12687_v14 = vpop.permute.xlu0 %3856 }
 0x4c1   : > { %17170 = vst [vmem:[#allocation46_spill] sm:$0xff] %v12687_v14  ;;  %4100 = vrot.lane.b32.xlu0 %v12277_v49, %s17155_s1  ;;  %v12695_v13 = vpop.permute.xlu1 %3866  ;;  %v12961_v14 = vld [vmem:[#allocation3 + $0x182] sm:$0xff] }
 0x4c2   : > { %v12669_v26 = vpop.f32.mrb[42].mxu1  ;;  %17172 = vst [vmem:[#allocation209_spill] sm:$0xff] %v12695_v13  ;;  %4110 = vrot.lane.b32.xlu1 %v12285_v62, %s17155_s1  ;;  %v12927_v13 = vld [vmem:[#allocation3 + $0x13a] sm:$0xff] }
 0x4c3   : > { %17163 = vst [vmem:[#allocation178_spill] sm:$0xff] %v12669_v26  ;;  %v12673_v3 = vpop.f32.mrb[43].mxu1 }
 0x4c4   : > { %17165 = vst [vmem:[#allocation62_spill] sm:$0xff] %v12673_v3  ;;  %v12699_v39 = vpop.permute.xlu0 %3860 }
 0x4c5   : > { %17174 = vst [vmem:[#allocation185_spill] sm:$0xff] %v12699_v39  ;;  %4104 = vrot.lane.b32.xlu0 %v12287_v29, %s17155_s1  ;;  %v12951_v39 = vld [vmem:[#allocation3 + $0x16a] sm:$0xff] }
 0x4c6   : > { %v12681_v60 = vpop.f32.mrb[44].mxu1  ;;  %4114 = vrot.lane.b32.xlu1 %v12295_v5, %s17155_s1 }
 0x4c7   : > { %17167 = vst [vmem:[#allocation205_spill] sm:$0xff] %v12681_v60  ;;  %v12685_v7 = vpop.f32.mrb[45].mxu1 }
 0x4c8   : > { %17169 = vst [vmem:[#allocation61_spill] sm:$0xff] %v12685_v7  ;;  %v12705_v7 = vpop.permute.xlu1 %3870  ;;  %v12707_v23 = vpop.permute.xlu0 %3864 }
 0x4c9   : > { %17175 = vst [vmem:[#allocation54_spill] sm:$0xff] %v12705_v7  ;;  %17176 = vst [vmem:[#allocation49_spill] sm:$0xff] %v12707_v23  ;;  %4108 = vrot.lane.b32.xlu0 %v12297_v28, %s17155_s1  ;;  %v12903_v7 = vld [vmem:[#allocation3 + $0x10a] sm:$0xff]  ;;  %v12937_v23 = vld [vmem:[#allocation3 + $0x172] sm:$0xff] }
 0x4ca   : > { %v12693_v3 = vpop.f32.mrb[46].mxu1  ;;  %4118 = vrot.lane.b32.xlu1 %v12305_v15, %s17155_s1 }
 0x4cb   : > { %17171 = vst [vmem:[#allocation175_spill] sm:$0xff] %v12693_v3  ;;  %v12697_v26 = vpop.f32.mrb[47].mxu1  ;;  %v12781_v3 = vld [vmem:[#allocation3 + $0x189] sm:$0xff] }
 0x4cc   : > { %17173 = vst [vmem:[#allocation50_spill] sm:$0xff] %v12697_v26  ;;  %v12713_v49 = vpop.permute.xlu1 %3874  ;;  %v12715_v26 = vpop.permute.xlu0 %3868 }
 0x4cd   : > { %17177 = vst [vmem:[#allocation82_spill] sm:$0xff] %v12713_v49  ;;  %17178 = vst [vmem:[#allocation65_spill] sm:$0xff] %v12715_v26  ;;  %4112 = vrot.lane.b32.xlu0 %v12307_v45, %s17155_s1  ;;  %v12879_v49 = vld [vmem:[#allocation3 + $0xda] sm:$0xff]  ;;  %v12913_v26 = vld [vmem:[#allocation3 + $0x142] sm:$0xff] }
 0x4ce   : > { %4122 = vrot.lane.b32.xlu1 %v12315_v12, %s17155_s1 }
 0x4d0   : > { %v12721_v62 = vpop.permute.xlu1 %3878  ;;  %v12723_v29 = vpop.permute.xlu0 %3872 }
 0x4d1   : > { %17179 = vst [vmem:[#allocation206_spill] sm:$0xff] %v12721_v62  ;;  %17180 = vst [vmem:[#allocation53_spill] sm:$0xff] %v12723_v29  ;;  %4116 = vrot.lane.b32.xlu0 %v12317_v42, %s17155_s1  ;;  %v12889_v29 = vld [vmem:[#allocation3 + $0x112] sm:$0xff] }
 0x4d2   : > { %4126 = vrot.lane.b32.xlu1 %v12325_v52, %s17155_s1 }
 0x4d4   : > { %v12729_v5 = vpop.permute.xlu1 %3882  ;;  %v12731_v28 = vpop.permute.xlu0 %3876 }
 0x4d5   : > { %17181 = vst [vmem:[#allocation66_spill] sm:$0xff] %v12729_v5  ;;  %17182 = vst [vmem:[#allocation190_spill] sm:$0xff] %v12731_v28  ;;  %4120 = vrot.lane.b32.xlu0 %v12327_v38, %s17155_s1  ;;  %v12865_v5 = vld [vmem:[#allocation3 + $0xe2] sm:$0xff] }
 0x4d6   : > { %4130 = vrot.lane.b32.xlu1 %v12335_v16, %s17155_s1 }
 0x4d8   : > { %v12737_v15 = vpop.permute.xlu1 %3886  ;;  %v12739_v45 = vpop.permute.xlu0 %3880 }
 0x4d9   : > { %17183 = vst [vmem:[#allocation70_spill] sm:$0xff] %v12737_v15  ;;  %17184 = vst [vmem:[#allocation77_spill] sm:$0xff] %v12739_v45  ;;  %4124 = vrot.lane.b32.xlu0 %v12337_v63, %s17155_s1  ;;  %v12867_v45 = vld [vmem:[#allocation3 + $0xc2] sm:$0xff] }
 0x4da   : > { %4134 = vrot.lane.b32.xlu1 %v12345_v4, %s17155_s1 }
 0x4dc   : > { %v12745_v12 = vpop.permute.xlu1 %3890  ;;  %v12747_v42 = vpop.permute.xlu0 %3884 }
 0x4dd   : > { %17185 = vst [vmem:[#allocation58_spill] sm:$0xff] %v12745_v12  ;;  %17186 = vst [vmem:[#allocation211_spill] sm:$0xff] %v12747_v42  ;;  %4128 = vrot.lane.b32.xlu0 %v12347_v9, %s17155_s1  ;;  %v12841_v12 = vld [vmem:[#allocation3 + $0xb2] sm:$0xff] }
 0x4de   : > { %4138 = vrot.lane.b32.xlu1 %v12355_v57, %s17155_s1 }
 0x4e0   : > { %v12753_v52 = vpop.permute.xlu1 %3894  ;;  %v12755_v38 = vpop.permute.xlu0 %3888 }
 0x4e1   : > { %17187 = vst [vmem:[#allocation81_spill] sm:$0xff] %v12753_v52  ;;  %17188 = vst [vmem:[#allocation74_spill] sm:$0xff] %v12755_v38  ;;  %4132 = vrot.lane.b32.xlu0 %v12357_v40, %s17155_s1  ;;  %v12853_v38 = vld [vmem:[#allocation3 + $0xca] sm:$0xff] }
 0x4e2   : > { %4142 = vrot.lane.b32.xlu1 %v12365_v22, %s17155_s1 }
 0x4e4   : > { %v12761_v16 = vpop.permute.xlu1 %3962  ;;  %v12763_v63 = vpop.permute.xlu0 %3892 }
 0x4e5   : > { %17189 = vst [vmem:[#allocation187_spill] sm:$0xff] %v12763_v63  ;;  %4136 = vrot.lane.b32.xlu0 %v12367_v51, %s17155_s1 }
 0x4e6   : > { %4146 = vrot.lane.b32.xlu1 %v12375_v17, %s17155_s1  ;;  %v12791_v17 = vld [vmem:[#allocation3 + $0x181] sm:$0xff] }
 0x4e8   : > { %v12769_v4 = vpop.permute.xlu1 %3966  ;;  %v12771_v9 = vpop.permute.xlu0 %3960 }
 0x4e9   : > { %4140 = vrot.lane.b32.xlu0 %v12377_v31, %s17155_s1 }
 0x4ea   : > { %4150 = vrot.lane.b32.xlu1 %v12781_v3, %s17155_s1 }
 0x4ec   : > { %v12777_v57 = vpop.permute.xlu1 %3970  ;;  %v12779_v40 = vpop.permute.xlu0 %3964 }
 0x4ed   : > { %4144 = vrot.lane.b32.xlu0 %v12384_v0, %s17155_s1 }
 0x4ee   : > { %4218 = vrot.lane.b32.xlu1 %v12389_v33, %s17190_s18 }
 0x4f0   : > { %v12787_v22 = vpop.permute.xlu1 %3974  ;;  %v12789_v51 = vpop.permute.xlu0 %3968 }
 0x4f1   : > { %4148 = vrot.lane.b32.xlu0 %v12791_v17, %s17155_s1 }
 0x4f2   : > { %4222 = vrot.lane.b32.xlu1 %v12394_v11, %s17190_s18 }
 0x4f4   : > { %v12797_v31 = vpop.permute.xlu1 %3978  ;;  %v12799_v60 = vpop.permute.xlu0 %3972 }
 0x4f5   : > { %17191 = vst [vmem:[#allocation69_spill] sm:$0xff] %v12797_v31  ;;  %4216 = vrot.lane.b32.xlu0 %v12396_v36, %s17190_s18 }
 0x4f6   : > { %4226 = vrot.lane.b32.xlu1 %v12402_v53, %s17190_s18 }
 0x4f8   : > { %v12805_v0 = vpop.permute.xlu1 %3982  ;;  %v12807_v52 = vpop.permute.xlu0 %3976 }
 0x4f9   : > { %17192 = vst [vmem:[#allocation85_spill] sm:$0xff] %v12805_v0  ;;  %17193 = vst [vmem:[#allocation102_spill] sm:$0xff] %v12807_v52  ;;  %4220 = vrot.lane.b32.xlu0 %v12404_v6, %s17190_s18 }
 0x4fa   : > { %4230 = vrot.lane.b32.xlu1 %v12410_v58, %s17190_s18 }
 0x4fc   : > { %v12813_v33 = vpop.permute.xlu1 %3986  ;;  %v12815_v63 = vpop.permute.xlu0 %3980 }
 0x4fd   : > { %17194 = vst [vmem:[#allocation208_spill] sm:$0xff] %v12813_v33  ;;  %17195 = vst [vmem:[#allocation73_spill] sm:$0xff] %v12815_v63  ;;  %4224 = vrot.lane.b32.xlu0 %v12412_v24, %s17190_s18 }
 0x4fe   : > { %4234 = vrot.lane.b32.xlu1 %v12418_v35, %s17190_s18  ;;  %v12843_v35 = vld [vmem:[#allocation3 + $0x92] sm:$0xff] }
 0x500   : > { %v12821_v11 = vpop.permute.xlu1 %3990  ;;  %v12823_v36 = vpop.permute.xlu0 %3984 }
 0x501   : > { %17196 = vst [vmem:[#allocation86_spill] sm:$0xff] %v12821_v11  ;;  %17197 = vst [vmem:[#allocation192_spill] sm:$0xff] %v12823_v36  ;;  %4228 = vrot.lane.b32.xlu0 %v12420_v30, %s17190_s18  ;;  %v12939_v11 = vld [vmem:[#allocation3 + $0x152] sm:$0xff] }
 0x502   : > { %4238 = vrot.lane.b32.xlu1 %v12426_v32, %s17190_s18 }
 0x504   : > { %v12829_v53 = vpop.permute.xlu1 %3994  ;;  %v12831_v6 = vpop.permute.xlu0 %3988 }
 0x505   : > { %17198 = vst [vmem:[#allocation90_spill] sm:$0xff] %v12829_v53  ;;  %17199 = vst [vmem:[#allocation97_spill] sm:$0xff] %v12831_v6  ;;  %4232 = vrot.lane.b32.xlu0 %v12428_v44, %s17190_s18  ;;  %v12855_v44 = vld [vmem:[#allocation3 + $0xaa] sm:$0xff]  ;;  %v12915_v53 = vld [vmem:[#allocation3 + $0x122] sm:$0xff] }
 0x506   : > { %4242 = vrot.lane.b32.xlu1 %v12841_v12, %s17190_s18 }
 0x508   : > { %v12837_v58 = vpop.permute.xlu1 %3998  ;;  %v12839_v24 = vpop.permute.xlu0 %3992 }
 0x509   : > { %17200 = vst [vmem:[#allocation78_spill] sm:$0xff] %v12837_v58  ;;  %17201 = vst [vmem:[#allocation213_spill] sm:$0xff] %v12839_v24  ;;  %4236 = vrot.lane.b32.xlu0 %v12843_v35, %s17190_s18  ;;  %v12891_v58 = vld [vmem:[#allocation3 + $0xf2] sm:$0xff]  ;;  %v12925_v24 = vld [vmem:[#allocation3 + $0x15a] sm:$0xff] }
 0x50a   : > { %4246 = vrot.lane.b32.xlu1 %v12853_v38, %s17190_s18 }
 0x50c   : > { %v12849_v30 = vpop.permute.xlu1 %4002  ;;  %v12851_v32 = vpop.permute.xlu0 %3996 }
 0x50d   : > { %17202 = vst [vmem:[#allocation101_spill] sm:$0xff] %v12849_v30  ;;  %17203 = vst [vmem:[#allocation94_spill] sm:$0xff] %v12851_v32  ;;  %4240 = vrot.lane.b32.xlu0 %v12855_v44, %s17190_s18  ;;  %v12877_v30 = vld [vmem:[#allocation3 + $0xfa] sm:$0xff]  ;;  %v12901_v32 = vld [vmem:[#allocation3 + $0x12a] sm:$0xff] }
 0x50e   : > { %4250 = vrot.lane.b32.xlu1 %v12865_v5, %s17190_s18 }
 0x510   : > { %v12861_v15 = vpop.permute.xlu1 %4006  ;;  %v12863_v42 = vpop.permute.xlu0 %4000 }
 0x511   : > { %17204 = vst [vmem:[#allocation189_spill] sm:$0xff] %v12861_v15  ;;  %17205 = vst [vmem:[#allocation89_spill] sm:$0xff] %v12863_v42  ;;  %4244 = vrot.lane.b32.xlu0 %v12867_v45, %s17190_s18 }
 0x512   : > { %4254 = vrot.lane.b32.xlu1 %v12877_v30, %s17190_s18 }
 0x514   : > { %v12873_v62 = vpop.permute.xlu1 %4010  ;;  %v12875_v28 = vpop.permute.xlu0 %4004 }
 0x515   : > { %17206 = vst [vmem:[#allocation105_spill] sm:$0xff] %v12873_v62  ;;  %17207 = vst [vmem:[#allocation122_spill] sm:$0xff] %v12875_v28  ;;  %4248 = vrot.lane.b32.xlu0 %v12879_v49, %s17190_s18 }
 0x516   : > { %4258 = vrot.lane.b32.xlu1 %v12889_v29, %s17190_s18 }
 0x518   : > { %v12885_v15 = vpop.permute.xlu1 %4014  ;;  %v12887_v42 = vpop.permute.xlu0 %4008 }
 0x519   : > { %17208 = vst [vmem:[#allocation210_spill] sm:$0xff] %v12885_v15  ;;  %17209 = vst [vmem:[#allocation93_spill] sm:$0xff] %v12887_v42  ;;  %4252 = vrot.lane.b32.xlu0 %v12891_v58, %s17190_s18 }
 0x51a   : > { %4262 = vrot.lane.b32.xlu1 %v12901_v32, %s17190_s18 }
 0x51c   : > { %v12897_v62 = vpop.permute.xlu1 %4018  ;;  %v12899_v28 = vpop.permute.xlu0 %4012 }
 0x51d   : > { %17210 = vst [vmem:[#allocation106_spill] sm:$0xff] %v12897_v62  ;;  %17211 = vst [vmem:[#allocation194_spill] sm:$0xff] %v12899_v28  ;;  %4256 = vrot.lane.b32.xlu0 %v12903_v7, %s17190_s18 }
 0x51e   : > { %4266 = vrot.lane.b32.xlu1 %v12913_v26, %s17190_s18 }
 0x520   : > { %v12909_v15 = vpop.permute.xlu1 %4022  ;;  %v12911_v42 = vpop.permute.xlu0 %4016 }
 0x521   : > { %17212 = vst [vmem:[#allocation110_spill] sm:$0xff] %v12909_v15  ;;  %17213 = vst [vmem:[#allocation117_spill] sm:$0xff] %v12911_v42  ;;  %4260 = vrot.lane.b32.xlu0 %v12915_v53, %s17190_s18 }
 0x522   : > { %4270 = vrot.lane.b32.xlu1 %v12925_v24, %s17190_s18 }
 0x524   : > { %v12921_v62 = vpop.permute.xlu1 %4090  ;;  %v12923_v28 = vpop.permute.xlu0 %4020 }
 0x525   : > { %17214 = vst [vmem:[#allocation98_spill] sm:$0xff] %v12923_v28  ;;  %4264 = vrot.lane.b32.xlu0 %v12927_v13, %s17190_s18 }
 0x526   : > { %4274 = vrot.lane.b32.xlu1 %v12937_v23, %s17190_s18 }
 0x528   : > { %v12933_v15 = vpop.permute.xlu1 %4094  ;;  %v12935_v42 = vpop.permute.xlu0 %4088 }
 0x529   : > { %4268 = vrot.lane.b32.xlu0 %v12939_v11, %s17190_s18 }
 0x52a   : > { %4278 = vrot.lane.b32.xlu1 %v12949_v2, %s17190_s18 }
 0x52c   : > { %v12945_v28 = vpop.permute.xlu1 %4098  ;;  %v12947_v6 = vpop.permute.xlu0 %4092 }
 0x52d   : > { %4272 = vrot.lane.b32.xlu0 %v12951_v39, %s17190_s18 }
 0x52e   : > { %4346 = vrot.lane.b32.xlu1 %v3577_v25, %s17216_s29 }
 0x530   : > { %v12957_v33 = vpop.permute.xlu1 %4102  ;;  %v12959_v36 = vpop.permute.xlu0 %4096 }
 0x531   : > { %17215 = vst [vmem:[#allocation215_spill] sm:$0xff] %v12957_v33  ;;  %4276 = vrot.lane.b32.xlu0 %v12961_v14, %s17190_s18  ;;  %v3583_v33 = vld [vmem:[#allocation3 + $0x80] sm:$0xff] }
 0x532   : > { %4350 = vrot.lane.b32.xlu1 %v3579_v41, %s17216_s29 }
 0x534   : > { %v12966_v0 = vpop.permute.xlu1 %4106  ;;  %v12968_v63 = vpop.permute.xlu0 %4100 }
 0x535   : > { %17217 = vst [vmem:[#allocation121_spill] sm:$0xff] %v12966_v0  ;;  %17218 = vst [vmem:[#allocation114_spill] sm:$0xff] %v12968_v63  ;;  %4344 = vrot.lane.b32.xlu0 %v3576_v61, %s17216_s29  ;;  %v3580_v63 = vld [vmem:[#allocation3 + $0x60] sm:$0xff] }
 0x536   : > { %4354 = vrot.lane.b32.xlu1 %v3581_v21, %s17216_s29 }
 0x538   : > { %v12972_v31 = vpop.permute.xlu1 %4110  ;;  %v12974_v52 = vpop.permute.xlu0 %4104 }
 0x539   : > { %17219 = vst [vmem:[#allocation191_spill] sm:$0xff] %v12972_v31  ;;  %17220 = vst [vmem:[#allocation109_spill] sm:$0xff] %v12974_v52  ;;  %4348 = vrot.lane.b32.xlu0 %v3578_v43, %s17216_s29  ;;  %v3585_v31 = vld [vmem:[#allocation3 + $0x98] sm:$0xff] }
 0x53a   : > { %4358 = vrot.lane.b32.xlu1 %v3583_v33, %s17216_s29  ;;  %v3582_v52 = vld [vmem:[#allocation3 + $0x78] sm:$0xff] }
 0x53c   : > { %v12978_v25 = vpop.permute.xlu1 %4114  ;;  %v12980_v0 = vpop.permute.xlu0 %4108 }
 0x53d   : > { %17221 = vst [vmem:[#allocation125_spill] sm:$0xff] %v12978_v25  ;;  %17222 = vst [vmem:[#allocation143_spill] sm:$0xff] %v12980_v0  ;;  %4352 = vrot.lane.b32.xlu0 %v3580_v63, %s17216_s29  ;;  %v3587_v25 = vld [vmem:[#allocation3 + $0xb0] sm:$0xff] }
 0x53e   : > { %4362 = vrot.lane.b32.xlu1 %v3585_v31, %s17216_s29  ;;  %v3584_v0 = vld [vmem:[#allocation3 + $0x90] sm:$0xff] }
 0x540   : > { %v12984_v41 = vpop.permute.xlu1 %4118  ;;  %v12986_v61 = vpop.permute.xlu0 %4112 }
 0x541   : > { %17223 = vst [vmem:[#allocation212_spill] sm:$0xff] %v12984_v41  ;;  %17224 = vst [vmem:[#allocation113_spill] sm:$0xff] %v12986_v61  ;;  %4356 = vrot.lane.b32.xlu0 %v3582_v52, %s17216_s29  ;;  %v3589_v41 = vld [vmem:[#allocation3 + $0xc8] sm:$0xff] }
 0x542   : > { %4366 = vrot.lane.b32.xlu1 %v3587_v25, %s17216_s29  ;;  %v3586_v61 = vld [vmem:[#allocation3 + $0xa8] sm:$0xff] }
 0x544   : > { %v12990_v21 = vpop.permute.xlu1 %4122  ;;  %v12992_v43 = vpop.permute.xlu0 %4116 }
 0x545   : > { %17225 = vst [vmem:[#allocation126_spill] sm:$0xff] %v12990_v21  ;;  %17226 = vst [vmem:[#allocation196_spill] sm:$0xff] %v12992_v43  ;;  %4360 = vrot.lane.b32.xlu0 %v3584_v0, %s17216_s29  ;;  %v3591_v21 = vld [vmem:[#allocation3 + $0xe0] sm:$0xff] }
 0x546   : > { %4370 = vrot.lane.b32.xlu1 %v3589_v41, %s17216_s29  ;;  %v3588_v43 = vld [vmem:[#allocation3 + $0xc0] sm:$0xff] }
 0x548   : > { %v12996_v63 = vpop.permute.xlu1 %4126  ;;  %v12998_v33 = vpop.permute.xlu0 %4120 }
 0x549   : > { %17227 = vst [vmem:[#allocation130_spill] sm:$0xff] %v12996_v63  ;;  %17228 = vst [vmem:[#allocation137_spill] sm:$0xff] %v12998_v33  ;;  %4364 = vrot.lane.b32.xlu0 %v3586_v61, %s17216_s29  ;;  %v3593_v63 = vld [vmem:[#allocation3 + $0xf8] sm:$0xff] }
 0x54a   : > { %4374 = vrot.lane.b32.xlu1 %v3591_v21, %s17216_s29  ;;  %v3590_v33 = vld [vmem:[#allocation3 + $0xd8] sm:$0xff] }
 0x54c   : > { %v13002_v52 = vpop.permute.xlu1 %4130  ;;  %v13004_v31 = vpop.permute.xlu0 %4124 }
 0x54d   : > { %17229 = vst [vmem:[#allocation118_spill] sm:$0xff] %v13002_v52  ;;  %17230 = vst [vmem:[#allocation217_spill] sm:$0xff] %v13004_v31  ;;  %4368 = vrot.lane.b32.xlu0 %v3588_v43, %s17216_s29  ;;  %v3595_v52 = vld [vmem:[#allocation3 + $0x110] sm:$0xff] }
 0x54e   : > { %4378 = vrot.lane.b32.xlu1 %v3593_v63, %s17216_s29  ;;  %v3619_v31 = vld [vmem:[#allocation3 + $0xb1] sm:$0xff] }
 0x550   : > { %v13008_v0 = vpop.permute.xlu1 %4134  ;;  %v13010_v25 = vpop.permute.xlu0 %4128 }
 0x551   : > { %17231 = vst [vmem:[#allocation142_spill] sm:$0xff] %v13008_v0  ;;  %17232 = vst [vmem:[#allocation134_spill] sm:$0xff] %v13010_v25  ;;  %4372 = vrot.lane.b32.xlu0 %v3590_v33, %s17216_s29  ;;  %v3612_v0 = vld [vmem:[#allocation3 + $0x61] sm:$0xff]  ;;  %v3614_v25 = vld [vmem:[#allocation3 + $0x79] sm:$0xff] }
 0x552   : > { %4382 = vrot.lane.b32.xlu1 %v3595_v52, %s17216_s29 }
 0x554   : > { %v13014_v41 = vpop.permute.xlu1 %4138  ;;  %v13016_v61 = vpop.permute.xlu0 %4132 }
 0x555   : > { %17233 = vst [vmem:[#allocation193_spill] sm:$0xff] %v13014_v41  ;;  %17234 = vst [vmem:[#allocation129_spill] sm:$0xff] %v13016_v61  ;;  %4376 = vrot.lane.b32.xlu0 %v12542_v55, %s17216_s29  ;;  %v3610_v41 = vld [vmem:[#allocation3 + $0x49] sm:$0xff]  ;;  %v3617_v61 = vld [vmem:[#allocation3 + $0x99] sm:$0xff] }
 0x556   : > { %4386 = vrot.lane.b32.xlu1 %v12555_v18, %s17216_s29 }
 0x558   : > { %v13021_v21 = vpop.permute.xlu1 %4142  ;;  %v13023_v43 = vpop.permute.xlu0 %4136 }
 0x559   : > { %17235 = vst [vmem:[#allocation146_spill] sm:$0xff] %v13021_v21  ;;  %17236 = vst [vmem:[#allocation155_spill] sm:$0xff] %v13023_v43  ;;  %4380 = vrot.lane.b32.xlu0 %v12557_v56, %s17216_s29  ;;  %v3608_v21 = vld [vmem:[#allocation3 + $0x31] sm:$0xff]  ;;  %v3615_v43 = vld [vmem:[#allocation3 + $0x81] sm:$0xff] }
 0x55a   : > { %4390 = vrot.lane.b32.xlu1 %v12571_v1, %s17216_s29 }
 0x55c   : > { %v13029_v63 = vpop.permute.xlu1 %4146  ;;  %v13031_v33 = vpop.permute.xlu0 %4140 }
 0x55d   : > { %17237 = vst [vmem:[#allocation214_spill] sm:$0xff] %v13029_v63  ;;  %17238 = vst [vmem:[#allocation133_spill] sm:$0xff] %v13031_v33  ;;  %4384 = vrot.lane.b32.xlu0 %v12573_v59, %s17216_s29  ;;  %v3609_v63 = vld [vmem:[#allocation3 + $0x39] sm:$0xff]  ;;  %v3613_v33 = vld [vmem:[#allocation3 + $0x69] sm:$0xff] }
 0x55e   : > { %4394 = vrot.lane.b32.xlu1 %v12587_v48, %s17216_s29 }
 0x560   : > { %v13037_v55 = vpop.permute.xlu1 %4150  ;;  %v13039_v52 = vpop.permute.xlu0 %4144 }
 0x561   : > { %17239 = vst [vmem:[#allocation147_spill] sm:$0xff] %v13037_v55  ;;  %17240 = vst [vmem:[#allocation198_spill] sm:$0xff] %v13039_v52  ;;  %4388 = vrot.lane.b32.xlu0 %v12589_v54, %s17216_s29  ;;  %v3607_v54 = vld [vmem:[#allocation3 + $0x1a0] sm:$0xff]  ;;  %v3611_v52 = vld [vmem:[#allocation3 + $0x51] sm:$0xff] }
 0x562   : > { %4398 = vrot.lane.b32.xlu1 %v12603_v10, %s17216_s29 }
 0x564   : > { %v13045_v56 = vpop.permute.xlu1 %4218  ;;  %v13047_v18 = vpop.permute.xlu0 %4148 }
 0x565   : > { %17241 = vst [vmem:[#allocation149_spill] sm:$0xff] %v13047_v18  ;;  %4392 = vrot.lane.b32.xlu0 %v12605_v47, %s17216_s29  ;;  %v3606_v47 = vld [vmem:[#allocation3 + $0x198] sm:$0xff] }
 0x566   : > { %4402 = vrot.lane.b32.xlu1 %v12625_v34, %s17216_s29 }
 0x568   : > { %v13053_v1 = vpop.permute.xlu1 %4222  ;;  %v13055_v59 = vpop.permute.xlu0 %4216 }
 0x569   : > { %4396 = vrot.lane.b32.xlu0 %v12619_v37, %s17216_s29 }
 0x56a   : > { %4406 = vrot.lane.b32.xlu1 %v3607_v54, %s17216_s29 }
 0x56c   : > { %v13061_v48 = vpop.permute.xlu1 %4226  ;;  %v13063_v55 = vpop.permute.xlu0 %4220 }
 0x56d   : > { %4400 = vrot.lane.b32.xlu0 %v12639_v46, %s17216_s29 }
 0x56e   : > { %4474 = vrot.lane.b32.xlu1 %v3609_v63, %s10022_s19 }
 0x570   : > { %v13068_v10 = vpop.permute.xlu1 %4230  ;;  %v13070_v18 = vpop.permute.xlu0 %4224 }
 0x571   : > { %4404 = vrot.lane.b32.xlu0 %v3606_v47, %s17216_s29 }
 0x572   : > { %4478 = vrot.lane.b32.xlu1 %v3611_v52, %s10022_s19 }
 0x574   : > { %v13074_v34 = vpop.permute.xlu1 %4234  ;;  %v13076_v37 = vpop.permute.xlu0 %4228 }
 0x575   : > { %17242 = vst [vmem:[#allocation152_spill] sm:$0xff] %v13074_v34  ;;  %4472 = vrot.lane.b32.xlu0 %v3608_v21, %s10022_s19  ;;  %v3640_v34 = vld [vmem:[#allocation3 + $0x32] sm:$0xff] }
 0x576   : > { %4482 = vrot.lane.b32.xlu1 %v3613_v33, %s10022_s19 }
 0x578   : > { %v13080_v46 = vpop.permute.xlu1 %4238  ;;  %v13082_v54 = vpop.permute.xlu0 %4232 }
 0x579   : > { %17243 = vst [vmem:[#allocation139_spill] sm:$0xff] %v13080_v46  ;;  %17244 = vst [vmem:[#allocation219_spill] sm:$0xff] %v13082_v54  ;;  %4476 = vrot.lane.b32.xlu0 %v3610_v41, %s10022_s19  ;;  %v3622_v46 = vld [vmem:[#allocation3 + $0xd9] sm:$0xff]  ;;  %v3645_v54 = vld [vmem:[#allocation3 + $0x6a] sm:$0xff] }
 0x57a   : > { %4486 = vrot.lane.b32.xlu1 %v3615_v43, %s10022_s19 }
 0x57c   : > { %v13086_v63 = vpop.permute.xlu1 %4242  ;;  %v13088_v47 = vpop.permute.xlu0 %4236 }
 0x57d   : > { %17245 = vst [vmem:[#allocation154_spill] sm:$0xff] %v13086_v63  ;;  %17246 = vst [vmem:[#allocation151_spill] sm:$0xff] %v13088_v47  ;;  %4480 = vrot.lane.b32.xlu0 %v3612_v0, %s10022_s19  ;;  %v3616_v63 = vld [vmem:[#allocation3 + $0x91] sm:$0xff] }
 0x57e   : > { %4490 = vrot.lane.b32.xlu1 %v3617_v61, %s10022_s19  ;;  %v3643_v47 = vld [vmem:[#allocation3 + $0x52] sm:$0xff] }
 0x580   : > { %v13092_v21 = vpop.permute.xlu1 %4246  ;;  %v13094_v52 = vpop.permute.xlu0 %4240 }
 0x581   : > { %17247 = vst [vmem:[#allocation195_spill] sm:$0xff] %v13092_v21  ;;  %17248 = vst [vmem:[#allocation148_spill] sm:$0xff] %v13094_v52  ;;  %4484 = vrot.lane.b32.xlu0 %v3614_v25, %s10022_s19  ;;  %v3621_v21 = vld [vmem:[#allocation3 + $0xc9] sm:$0xff] }
 0x582   : > { %4494 = vrot.lane.b32.xlu1 %v3619_v31, %s10022_s19  ;;  %v3618_v52 = vld [vmem:[#allocation3 + $0xa9] sm:$0xff]  ;;  %v4953_v31 = vld [vmem:[%s16556_s7 + $0x8] sm:$0xff] }
 0x583   : > { %v4952_v25 = vld [vmem:[%s16556_s7] sm:$0xff] }
 0x584   : > { %v13098_v41 = vpop.permute.xlu1 %4250  ;;  %v13100_v33 = vpop.permute.xlu0 %4244  ;;  %v9786_v61 = vpack.c.bf16 %v4953_v31, %v4952_v25 }
 0x585   : > { %17249 = vst [vmem:[#allocation156_spill] sm:$0xff] %v13098_v41  ;;  %17250 = vst [vmem:[#allocation167_spill] sm:$0xff] %v13100_v33  ;;  %4488 = vrot.lane.b32.xlu0 %v3616_v63, %s10022_s19  ;;  %v3623_v41 = vld [vmem:[#allocation3 + $0xe1] sm:$0xff]  ;;  %v3625_v33 = vld [vmem:[#allocation3 + $0xf9] sm:$0xff] }
 0x586   : > { %4498 = vrot.lane.b32.xlu1 %v3621_v21, %s10022_s19  ;;  %9787 = vmatprep.subr.bf16.mxu0 %v9786_v61 }
 0x587   : > { %9789 = vmatpush3.bf16.msra.mxu0 %v9786_v61 }
 0x588   : > { %v13104_v0 = vpop.permute.xlu1 %4254  ;;  %v13106_v43 = vpop.permute.xlu0 %4248 }
 0x589   : > { %17251 = vst [vmem:[#allocation216_spill] sm:$0xff] %v13104_v0  ;;  %17252 = vst [vmem:[#allocation150_spill] sm:$0xff] %v13106_v43  ;;  %4492 = vrot.lane.b32.xlu0 %v3618_v52, %s10022_s19  ;;  %v3620_v43 = vld [vmem:[#allocation3 + $0xc1] sm:$0xff] }
 0x58a   : > { %4502 = vrot.lane.b32.xlu1 %v3623_v41, %s10022_s19  ;;  %v4954_v41 = vld [vmem:[%s16556_s7 + $0x10] sm:$0xff] }
 0x58c   : > { %v13116_v63 = vpop.permute.xlu1 %4258  ;;  %v13118_v0 = vpop.permute.xlu0 %4252 }
 0x58d   : > { %17253 = vst [vmem:[#allocation200_spill] sm:$0xff] %v13116_v63  ;;  %17254 = vst [vmem:[#allocation164_spill] sm:$0xff] %v13118_v0  ;;  %4496 = vrot.lane.b32.xlu0 %v3620_v43, %s10022_s19  ;;  %v3627_v63 = vld [vmem:[#allocation3 + $0x111] sm:$0xff] }
 0x58e   : > { %4506 = vrot.lane.b32.xlu1 %v3625_v33, %s10022_s19  ;;  %v3624_v0 = vld [vmem:[#allocation3 + $0xf1] sm:$0xff]  ;;  %v4955_v33 = vld [vmem:[%s16556_s7 + $0x18] sm:$0xff] }
 0x58f   : > { %v9790_v43 = vpack.c.bf16 %v4955_v33, %v4954_v41  ;;  %v4956_v41 = vld [vmem:[%s16556_s7 + $0x20] sm:$0xf]  ;;  %v3633_v33 = vld [vmem:[#allocation3 + $0x159] sm:$0xff] }
 0x590   : > { %v13122_v21 = vpop.permute.xlu1 %4262  ;;  %v13124_v52 = vpop.permute.xlu0 %4256 }
 0x591   : > { %17255 = vst [vmem:[#allocation153_spill] sm:$0xff] %v13122_v21  ;;  %17256 = vst [vmem:[#allocation220_spill] sm:$0xff] %v13124_v52  ;;  %4500 = vrot.lane.b32.xlu0 %v3622_v46, %s10022_s19  ;;  %v3626_v21 = vld [vmem:[#allocation3 + $0x109] sm:$0xff]  ;;  %9791 = vmatprep.subr.bf16.mxu0 %v9790_v43  ;;  %v3628_v52 = vld [vmem:[#allocation3 + $0x121] sm:$0xff] }
 0x592   : > { %4510 = vrot.lane.b32.xlu1 %v3627_v63, %s10022_s19  ;;  %9793 = vmatpush3.bf16.msra.mxu0 %v9790_v43  ;;  %v3630_v43 = vld [vmem:[#allocation3 + $0x139] sm:$0xff] }
 0x593   : > { %9612 = vmatprep.subr.msk.mxu0 %vm650_vm0, %v4956_v41 }
 0x594   : > { %v13128_v25 = vpop.permute.xlu1 %4266  ;;  %v13130_v31 = vpop.permute.xlu0 %4260 }
 0x595   : > { %17257 = vst [vmem:[#allocation166_spill] sm:$0xff] %v13128_v25  ;;  %17258 = vst [vmem:[#allocation162_spill] sm:$0xff] %v13130_v31  ;;  %4504 = vrot.lane.b32.xlu0 %v3624_v0, %s10022_s19  ;;  %v3629_v25 = vld [vmem:[#allocation3 + $0x129] sm:$0xff]  ;;  %v3631_v31 = vld [vmem:[#allocation3 + $0x141] sm:$0xff] }
 0x596   : > { %4514 = vrot.lane.b32.xlu1 %v3629_v25, %s10022_s19  ;;  %9613 = vmatpush3.msk.msra.mxu0 %vm650_vm0, %v4956_v41 }
 0x598   : > { %v13140_v46 = vpop.permute.xlu1 %4270  ;;  %v13142_v61 = vpop.permute.xlu0 %4264 }
 0x599   : > { %17259 = vst [vmem:[#allocation197_spill] sm:$0xff] %v13140_v46  ;;  %17260 = vst [vmem:[#allocation157_spill] sm:$0xff] %v13142_v61  ;;  %4508 = vrot.lane.b32.xlu0 %v3626_v21, %s10022_s19  ;;  %v3632_v46 = vld [vmem:[#allocation3 + $0x151] sm:$0xff]  ;;  %v3641_v61 = vld [vmem:[#allocation3 + $0x3a] sm:$0xff] }
 0x59a   : > { %4518 = vrot.lane.b32.xlu1 %v3631_v31, %s10022_s19 }
 0x59c   : > { %v13146_v0 = vpop.permute.xlu1 %4274  ;;  %v13148_v63 = vpop.permute.xlu0 %4268 }
 0x59d   : > { %17261 = vst [vmem:[#allocation158_spill] sm:$0xff] %v13146_v0  ;;  %17262 = vst [vmem:[#allocation170_spill] sm:$0xff] %v13148_v63  ;;  %4512 = vrot.lane.b32.xlu0 %v3628_v52, %s10022_s19  ;;  %v3635_v0 = vld [vmem:[#allocation3 + $0x171] sm:$0xff] }
 0x59e   : > { %4522 = vrot.lane.b32.xlu1 %v3633_v33, %s10022_s19  ;;  %v3639_v33 = vld [vmem:[#allocation3 + $0x1a1] sm:$0xff] }
 0x5a0   : > { %v13156_v25 = vpop.permute.xlu1 %4278  ;;  %v13159_v21 = vpop.permute.xlu0 %4272 }
 0x5a1   : > { %17263 = vst [vmem:[#allocation218_spill] sm:$0xff] %v13156_v25  ;;  %17264 = vst [vmem:[#allocation159_spill] sm:$0xff] %v13159_v21  ;;  %4516 = vrot.lane.b32.xlu0 %v3630_v43, %s10022_s19  ;;  %v3634_v21 = vld [vmem:[#allocation3 + $0x169] sm:$0xff] }
 0x5a2   : > { %4526 = vrot.lane.b32.xlu1 %v3635_v0, %s10022_s19 }
 0x5a4   : > { %v13163_v31 = vpop.permute.xlu1 %4346  ;;  %v13165_v52 = vpop.permute.xlu0 %4276 }
 0x5a5   : > { %17265 = vst [vmem:[#allocation161_spill] sm:$0xff] %v13165_v52  ;;  %4520 = vrot.lane.b32.xlu0 %v3632_v46, %s10022_s19  ;;  %v3638_v46 = vld [vmem:[#allocation3 + $0x199] sm:$0xff] }
 0x5a6   : > { %4530 = vrot.lane.b32.xlu1 %v12781_v3, %s10022_s19 }
 0x5a8   : > { %v13169_v25 = vpop.permute.xlu1 %4350  ;;  %v13171_v41 = vpop.permute.xlu0 %4344 }
 0x5a9   : > { %4524 = vrot.lane.b32.xlu0 %v3634_v21, %s10022_s19 }
 0x5aa   : > { %4534 = vrot.lane.b32.xlu1 %v3639_v33, %s10022_s19 }
 0x5ac   : > { %v13176_v43 = vpop.permute.xlu1 %4354  ;;  %v13178_v52 = vpop.permute.xlu0 %4348 }
 0x5ad   : > { %4528 = vrot.lane.b32.xlu0 %v12791_v17, %s10022_s19 }
 0x5ae   : > { %4602 = vrot.lane.b32.xlu1 %v3641_v61, %s17267_s26 }
 0x5b0   : > { %v13183_v0 = vpop.permute.xlu1 %4358  ;;  %v13185_v63 = vpop.permute.xlu0 %4352 }
 0x5b1   : > { %17266 = vst [vmem:[#allocation202_spill] sm:$0xff] %v13183_v0  ;;  %4532 = vrot.lane.b32.xlu0 %v3638_v46, %s10022_s19  ;;  %v3642_v0 = vld [vmem:[#allocation3 + $0x4a] sm:$0xff]  ;;  %s10025_s19 = smov 40  }
 0x5b2   : > { %4606 = vrot.lane.b32.xlu1 %v3643_v47, %s17267_s26 }
 0x5b4   : > { %v13189_v3 = vpop.permute.xlu1 %4362  ;;  %v13191_v21 = vpop.permute.xlu0 %4356 }
 0x5b5   : > { %17268 = vst [vmem:[#allocation176_spill] sm:$0xff] %v13189_v3  ;;  %17269 = vst [vmem:[#allocation179_spill] sm:$0xff] %v13191_v21  ;;  %4600 = vrot.lane.b32.xlu0 %v3640_v34, %s17267_s26  ;;  %v3647_v3 = vld [vmem:[#allocation3 + $0x82] sm:$0xff] }
 0x5b6   : > { %4610 = vrot.lane.b32.xlu1 %v3645_v54, %s17267_s26  ;;  %v3644_v21 = vld [vmem:[#allocation3 + $0x62] sm:$0xff] }
 0x5b8   : > { %v13195_v17 = vpop.permute.xlu1 %4366  ;;  %v13197_v33 = vpop.permute.xlu0 %4360 }
 0x5b9   : > { %17270 = vst [vmem:[#allocation165_spill] sm:$0xff] %v13195_v17  ;;  %17271 = vst [vmem:[#allocation42_spill] sm:$0xff] %v13197_v33  ;;  %4604 = vrot.lane.b32.xlu0 %v3642_v0, %s17267_s26  ;;  %v3649_v17 = vld [vmem:[#allocation3 + $0x9a] sm:$0xff] }
 0x5ba   : > { %4614 = vrot.lane.b32.xlu1 %v3647_v3, %s17267_s26  ;;  %v3646_v33 = vld [vmem:[#allocation3 + $0x7a] sm:$0xff] }
 0x5bc   : > { %v13201_v61 = vpop.permute.xlu1 %4370  ;;  %v13203_v46 = vpop.permute.xlu0 %4364 }
 0x5bd   : > { %4608 = vrot.lane.b32.xlu0 %v3644_v21, %s17267_s26 }
 0x5be   : > { %4618 = vrot.lane.b32.xlu1 %v3649_v17, %s17267_s26 }
 0x5c0   : > { %v13207_v34 = vpop.permute.xlu1 %4374  ;;  %v13209_v47 = vpop.permute.xlu0 %4368 }
 0x5c1   : > { %4612 = vrot.lane.b32.xlu0 %v3646_v33, %s17267_s26 }
 0x5c2   : > { %4622 = vrot.lane.b32.xlu1 %v12841_v12, %s17267_s26 }
 0x5c4   : > { %v13213_v54 = vpop.permute.xlu1 %4378  ;;  %v13215_v0 = vpop.permute.xlu0 %4372 }
 0x5c5   : > { %17272 = vst [vmem:[#allocation180_spill] sm:$0xff] %v13213_v54  ;;  %4616 = vrot.lane.b32.xlu0 %v12843_v35, %s17267_s26 }
 0x5c6   : > { %4626 = vrot.lane.b32.xlu1 %v12853_v38, %s17267_s26 }
 0x5c8   : > { %v13221_v3 = vpop.permute.xlu1 %4382  ;;  %v13223_v21 = vpop.permute.xlu0 %4376 }
 0x5c9   : > { %17273 = vst [vmem:[#allocation199_spill] sm:$0xff] %v13221_v3  ;;  %17274 = vst [vmem:[#allocation183_spill] sm:$0xff] %v13223_v21  ;;  %4620 = vrot.lane.b32.xlu0 %v12855_v44, %s17267_s26 }
 0x5ca   : > { %4630 = vrot.lane.b32.xlu1 %v12865_v5, %s17267_s26 }
 0x5cc   : > { %v13229_v17 = vpop.permute.xlu1 %4386  ;;  %v13231_v33 = vpop.permute.xlu0 %4380 }
 0x5cd   : > { %17275 = vst [vmem:[#allocation41_spill] sm:$0xff] %v13229_v17  ;;  %17276 = vst [vmem:[#allocation173_spill] sm:$0xff] %v13231_v33  ;;  %4624 = vrot.lane.b32.xlu0 %v12867_v45, %s17267_s26 }
 0x5ce   : > { %4634 = vrot.lane.b32.xlu1 %v12877_v30, %s17267_s26 }
 0x5d0   : > { %v13237_v12 = vpop.permute.xlu1 %4390  ;;  %v13239_v35 = vpop.permute.xlu0 %4384 }
 0x5d1   : > { %17277 = vst [vmem:[#allocation203_spill] sm:$0xff] %v13237_v12  ;;  %17278 = vst [vmem:[#allocation181_spill] sm:$0xff] %v13239_v35  ;;  %4628 = vrot.lane.b32.xlu0 %v12879_v49, %s17267_s26 }
 0x5d2   : > { %4638 = vrot.lane.b32.xlu1 %v12889_v29, %s17267_s26 }
 0x5d4   : > { %v13245_v38 = vpop.permute.xlu1 %4394  ;;  %v13247_v44 = vpop.permute.xlu0 %4388 }
 0x5d5   : > { %17279 = vst [vmem:[#allocation45_spill] sm:$0xff] %v13245_v38  ;;  %17280 = vst [vmem:[#allocation201_spill] sm:$0xff] %v13247_v44  ;;  %4632 = vrot.lane.b32.xlu0 %v12891_v58, %s17267_s26 }
 0x5d6   : > { %4642 = vrot.lane.b32.xlu1 %v12901_v32, %s17267_s26 }
 0x5d8   : > { %v13253_v5 = vpop.permute.xlu1 %4398  ;;  %v13255_v45 = vpop.permute.xlu0 %4392 }
 0x5d9   : > { %17281 = vst [vmem:[#allocation43_spill] sm:$0xff] %v13253_v5  ;;  %17282 = vst [vmem:[#allocation221_spill] sm:$0xff] %v13255_v45  ;;  %4636 = vrot.lane.b32.xlu0 %v12903_v7, %s17267_s26 }
 0x5da   : > { %4646 = vrot.lane.b32.xlu1 %v12913_v26, %s17267_s26 }
 0x5dc   : > { %v13261_v49 = vpop.permute.xlu1 %4402  ;;  %v13263_v30 = vpop.permute.xlu0 %4396 }
 0x5dd   : > { %17283 = vst [vmem:[#allocation222_spill] sm:$0xff] %v13261_v49  ;;  %17284 = vst [vmem:[#allocation223_spill] sm:$0xff] %v13263_v30  ;;  %4640 = vrot.lane.b32.xlu0 %v12915_v53, %s17267_s26 }
 0x5de   : > { %4650 = vrot.lane.b32.xlu1 %v12925_v24, %s17267_s26 }
 0x5e0   : > { %v13269_v29 = vpop.permute.xlu1 %4406  ;;  %v13271_v58 = vpop.permute.xlu0 %4400 }
 0x5e1   : > { %17285 = vst [vmem:[#allocation224_spill] sm:$0xff] %v13269_v29  ;;  %17286 = vst [vmem:[#allocation225_spill] sm:$0xff] %v13271_v58  ;;  %4644 = vrot.lane.b32.xlu0 %v12927_v13, %s17267_s26  ;;  %v3671_v13 = vld [vmem:[#allocation3 + $0x1a2] sm:$0xff] }
 0x5e2   : > { %4654 = vrot.lane.b32.xlu1 %v12937_v23, %s17267_s26  ;;  %v3670_v23 = vld [vmem:[#allocation3 + $0x19a] sm:$0xff] }
 0x5e4   : > { %v13277_v7 = vpop.permute.xlu1 %4474  ;;  %v13279_v32 = vpop.permute.xlu0 %4404 }
 0x5e5   : > { %17287 = vst [vmem:[#allocation226_spill] sm:$0xff] %v13279_v32  ;;  %4648 = vrot.lane.b32.xlu0 %v12939_v11, %s17267_s26 }
 0x5e6   : > { %4658 = vrot.lane.b32.xlu1 %v12949_v2, %s17267_s26 }
 0x5e8   : > { %v13285_v26 = vpop.permute.xlu1 %4478  ;;  %v4473_v53 = vpop.permute.xlu0 %4472 }
 0x5e9   : > { %4652 = vrot.lane.b32.xlu0 %v12951_v39, %s17267_s26 }
 0x5ea   : > { %4662 = vrot.lane.b32.xlu1 %v3671_v13, %s17267_s26 }
 0x5ec   : > { %v13291_v24 = vpop.permute.xlu1 %4482  ;;  %v13293_v29 = vpop.permute.xlu0 %4476 }
 0x5ed   : > { %4656 = vrot.lane.b32.xlu0 %v12961_v14, %s17267_s26 }
 0x5f0   : > { %v13298_v11 = vpop.permute.xlu1 %4486  ;;  %v13300_v32 = vpop.permute.xlu0 %4480 }
 0x5f1   : > { %4660 = vrot.lane.b32.xlu0 %v3670_v23, %s17267_s26 }
 0x5f4   : > { %v13303_v2 = vpop.permute.xlu1 %4490  ;;  %v13305_v39 = vpop.permute.xlu0 %4484 }
 0x5f8   : > { %v13307_v49 = vpop.permute.xlu1 %4494  ;;  %v13309_v58 = vpop.permute.xlu0 %4488 }
 0x5fc   : > { %v13311_v5 = vpop.permute.xlu1 %4498  ;;  %v13313_v13 = vpop.permute.xlu0 %4492 }
 0x600   : > { %v13315_v14 = vpop.permute.xlu1 %4502  ;;  %v13317_v30 = vpop.permute.xlu0 %4496 }
 0x601   : > { %17288 = vst [vmem:[#allocation227_spill] sm:$0xff] %v13315_v14 }
 0x604   : > { %v13319_v38 = vpop.permute.xlu1 %4506  ;;  %v13321_v45 = vpop.permute.xlu0 %4500 }
 0x605   : > { %17289 = vst [vmem:[#allocation228_spill] sm:$0xff] %v13319_v38  ;;  %17290 = vst [vmem:[#allocation229_spill] sm:$0xff] %v13321_v45 }
 0x608   : > { %v13323_v23 = vpop.permute.xlu1 %4510  ;;  %v13325_v12 = vpop.permute.xlu0 %4504 }
 0x609   : > { %17291 = vst [vmem:[#allocation230_spill] sm:$0xff] %v13323_v23  ;;  %17292 = vst [vmem:[#allocation231_spill] sm:$0xff] %v13325_v12  ;;  %v3383_v12 = vld [vmem:[#allocation3] sm:$0xff] }
 0x60c   : > { %v13327_v44 = vpop.permute.xlu1 %4514  ;;  %v13329_v17 = vpop.permute.xlu0 %4508 }
 0x60d   : > { %17293 = vst [vmem:[#allocation232_spill] sm:$0xff] %v13327_v44  ;;  %17294 = vst [vmem:[#allocation233_spill] sm:$0xff] %v13329_v17  ;;  %v3384_v17 = vld [vmem:[#allocation3 + $0x8] sm:$0xff] }
 0x610   : > { %v13331_v35 = vpop.permute.xlu1 %4518  ;;  %v13333_v3 = vpop.permute.xlu0 %4512 }
 0x611   : > { %17295 = vst [vmem:[#allocation234_spill] sm:$0xff] %v13331_v35  ;;  %v4696_v35 = vsel %vm553_vm1, %v3383_v12, %v12450_v19  ;;  %v9895_v12 = vld [vmem:[#allocation3 + $0x18] sm:$0xff] }
 0x614   : > { %v13335_v33 = vpop.permute.xlu1 %4522  ;;  %v13337_v54 = vpop.permute.xlu0 %4516 }
 0x615   : > { %17296 = vst [vmem:[#allocation235_spill] sm:$0xff] %v13335_v33  ;;  %v4697_v33 = vsel %vm553_vm1, %v3384_v17, %v12446_v20  ;;  %v17303_v20 = vld [vmem:[#allocation80_spill] sm:$0xff] }
 0x616   : > { %v4698_v17 = vsel %vm553_vm1, %v9895_v12, %v17303_v20  ;;  %v17306_v12 = vld [vmem:[#allocation140_spill] sm:$0xff] }
 0x618   : > { %v13339_v21 = vpop.permute.xlu1 %4526  ;;  %v13341_v38 = vpop.permute.xlu0 %4520 }
 0x619   : > { %17297 = vst [vmem:[#allocation236_spill] sm:$0xff] %v13339_v21  ;;  %17298 = vst [vmem:[#allocation237_spill] sm:$0xff] %v13341_v38  ;;  %v4728_v21 = vsel %vm2540_vm4, %v4696_v35, %v12609_v50  ;;  %v17305_v35 = vld [vmem:[#allocation169_spill] sm:$0xff] }
 0x61c   : > { %v13343_v14 = vpop.permute.xlu1 %4530  ;;  %v13345_v23 = vpop.permute.xlu0 %4524 }
 0x61d   : > { %17299 = vst [vmem:[#allocation238_spill] sm:$0xff] %v13343_v14  ;;  %17300 = vst [vmem:[#allocation239_spill] sm:$0xff] %v13345_v23  ;;  %v4729_v14 = vsel %vm2540_vm4, %v4697_v33, %v12585_v8  ;;  %v4760_v23 = vsel %vm2573_vm5, %v4728_v21, %v12771_v9  ;;  %v9896_v33 = vld [vmem:[#allocation3 + $0x20] sm:$0xff]  ;;  %v17304_v9 = vld [vmem:[#allocation60_spill] sm:$0xff] }
 0x61e   : > { %v4792_v19 = vsel %vm2606_vm6, %v4760_v23, %v12935_v42  ;;  %v4699_v21 = vsel %vm553_vm1, %v9896_v33, %v17304_v9  ;;  %v17307_v33 = vld [vmem:[#allocation52_spill] sm:$0xff] }
 0x61f   : > { %v4824_v8 = vsel %vm2639_vm7, %v4792_v19, %v13055_v59  ;;  %v17308_v9 = vld [vmem:[#allocation48_spill] sm:$0xff] }
 0x620   : > { %v13347_v44 = vpop.permute.xlu1 %4534  ;;  %v13349_v45 = vpop.permute.xlu0 %4528 }
 0x621   : > { %17301 = vst [vmem:[#allocation240_spill] sm:$0xff] %v13347_v44  ;;  %17302 = vst [vmem:[#allocation241_spill] sm:$0xff] %v13349_v45  ;;  %v4761_v45 = vsel %vm2573_vm5, %v4729_v14, %v12761_v16  ;;  %v4730_v16 = vsel %vm2540_vm4, %v4698_v17, %v17305_v35  ;;  %v4856_v14 = vsel %vm2672_vm8, %v4824_v8, %v13171_v41  ;;  %v9897_v8 = vld [vmem:[#allocation3 + $0x30] sm:$0xff] }
 0x622   : > { %v4793_v50 = vsel %vm2606_vm6, %v4761_v45, %v12921_v62  ;;  %v4731_v62 = vsel %vm2540_vm4, %v4699_v21, %v17306_v12  ;;  %v4762_v59 = vsel %vm2573_vm5, %v4730_v16, %v12779_v40  ;;  %v4888_v19 = vsel %vm2705_vm9, %v4856_v14, %v4473_v53  ;;  %v17309_v21 = vld [vmem:[#allocation160_spill] sm:$0xff] }
 0x623   : > { %v4825_v42 = vsel %vm2639_vm7, %v4793_v50, %v13045_v56  ;;  %v4763_v17 = vsel %vm2573_vm5, %v4731_v62, %v12769_v4  ;;  %v4794_v56 = vsel %vm2606_vm6, %v4762_v59, %v12947_v6  ;;  %v4700_v40 = vsel %vm553_vm1, %v9897_v8, %v17307_v33  ;;  %v9898_v6 = vld [vmem:[#allocation3 + $0x38] sm:$0xff]  ;;  %v17313_v8 = vld [vmem:[#allocation177_spill] sm:$0xff] }
 0x624   : > { %v4603_v38 = vpop.permute.xlu1 %4602  ;;  %v13361_v44 = vpop.permute.xlu0 %4532  ;;  %v4857_v45 = vsel %vm2672_vm8, %v4825_v42, %v13163_v31  ;;  %v4795_v31 = vsel %vm2606_vm6, %v4763_v17, %v12933_v15  ;;  %v4826_v53 = vsel %vm2639_vm7, %v4794_v56, %v13063_v55  ;;  %v4732_v35 = vsel %vm2540_vm4, %v4700_v40, %v17309_v21  ;;  %v17310_v42 = vld [vmem:[#allocation145_spill] sm:$0xff]  ;;  %v17312_v56 = vld [vmem:[#allocation44_spill] sm:$0xff] }
 0x625   : > { %v4889_v41 = vsel %vm2705_vm9, %v4857_v45, %v13277_v7  ;;  %v4701_v7 = vsel %vm553_vm1, %v9898_v6, %v17308_v9  ;;  %v4827_v16 = vsel %vm2639_vm7, %v4795_v31, %v13053_v1  ;;  %v4858_v15 = vsel %vm2672_vm8, %v4826_v53, %v13178_v52  ;;  %v9901_v9 = vld [vmem:[#allocation3 + $0x60] sm:$0xff] }
 0x626   : > { %v4921_v4 = vsel %vm2738_vm10, %v4889_v41, %v4603_v38  ;;  %v4733_v38 = vsel %vm2540_vm4, %v4701_v7, %v17310_v42  ;;  %v4764_v14 = vsel %vm2573_vm5, %v4732_v35, %v12789_v51  ;;  %v4859_v12 = vsel %vm2672_vm8, %v4827_v16, %v13169_v25  ;;  %v17311_v51 = vld [vmem:[#allocation55_spill] sm:$0xff]  ;;  %v9902_v35 = vld [vmem:[#allocation3 + $0x68] sm:$0xff] }
 0x627   : > { %v4890_v62 = vsel %vm2705_vm9, %v4858_v15, %v13293_v29  ;;  %v4765_v1 = vsel %vm2573_vm5, %v4733_v38, %v12777_v57  ;;  %v4796_v52 = vsel %vm2606_vm6, %v4764_v14, %v12959_v36  ;;  %v4891_v45 = vsel %vm2705_vm9, %v4859_v12, %v13285_v26  ;;  %v9900_v36 = vld [vmem:[#allocation3 + $0x50] sm:$0xff]  ;;  %v17317_v16 = vld [vmem:[#allocation47_spill] sm:$0xff]  ;;  %v17318_v15 = vld [vmem:[#allocation172_spill] sm:$0xff] }
 0x628   : > { %v4607_v23 = vpop.permute.xlu1 %4606  ;;  %v4601_v20 = vpop.permute.xlu0 %4600  ;;  %v4797_v25 = vsel %vm2606_vm6, %v4765_v1, %v12945_v28  ;;  %v4828_v29 = vsel %vm2639_vm7, %v4796_v52, %v13070_v18  ;;  %v4703_v26 = vsel %vm553_vm1, %v9900_v36, %v17312_v56  ;;  %v17319_v14 = vld [vmem:[#allocation179_spill] sm:$0xff]  ;;  %v17322_v52 = vld [vmem:[#allocation202_spill] sm:$0xff]  ;;  %v17325_v56 = vld [vmem:[#allocation72_spill] sm:$0xff] }
 0x629   : > { %v4920_v50 = vsel %vm2738_vm10, %v4888_v19, %v4601_v20  ;;  %v9899_v20 = vld [vmem:[#allocation3 + $0x48] sm:$0xff]  ;;  %v4923_v57 = vsel %vm2738_vm10, %v4891_v45, %v4607_v23  ;;  %v4860_v28 = vsel %vm2672_vm8, %v4828_v29, %v13185_v63  ;;  %v4735_v23 = vsel %vm2540_vm4, %v4703_v26, %v17313_v8  ;;  %v17314_v63 = vld [vmem:[#allocation114_spill] sm:$0xff] }
 0x62a   : > { %9614 = vmatprep.mubr.msk.f32.mxu0 %vm2776_vm11, %v4920_v50  ;;  %v4702_v17 = vsel %vm553_vm1, %v9899_v20, %v17311_v51  ;;  %v4829_v50 = vsel %vm2639_vm7, %v4797_v25, %v13061_v48  ;;  %v4767_v48 = vsel %vm2573_vm5, %v4735_v23, %v12787_v22  ;;  %v9903_v36 = vld [vmem:[#allocation3 + $0x78] sm:$0xff]  ;;  %v9904_v23 = vld [vmem:[#allocation3 + $0x80] sm:$0xff] }
 0x62b   : > { %9615 = vmatmul.mubr.msk.f32.vlgmr.msra.gmra.mrb[16].mxu0 %vm2776_vm11, %v4921_v4  ;;  %v4734_v41 = vsel %vm2540_vm4, %v4702_v17, %v12651_v27  ;;  %v4861_v40 = vsel %vm2672_vm8, %v4829_v50, %v13176_v43  ;;  %v4892_v27 = vsel %vm2705_vm9, %v4860_v28, %v13300_v32  ;;  %v17316_v43 = vld [vmem:[#allocation215_spill] sm:$0xff]  ;;  %v17324_v17 = vld [vmem:[#allocation109_spill] sm:$0xff]  ;;  %v4706_v26 = vsel %vm553_vm1, %v9903_v36, %v17325_v56 }
 0x62c   : > { %v4611_v55 = vpop.permute.xlu1 %4610  ;;  %v4605_v59 = vpop.permute.xlu0 %4604  ;;  %v4766_v33 = vsel %vm2573_vm5, %v4734_v41, %v12799_v60  ;;  %v4893_v4 = vsel %vm2705_vm9, %v4861_v40, %v13291_v24  ;;  %v17315_v60 = vld [vmem:[#allocation59_spill] sm:$0xff]  ;;  %v4799_v21 = vsel %vm2606_vm6, %v4767_v48, %v17316_v43  ;;  %v4705_v24 = vsel %vm553_vm1, %v9902_v35, %v17317_v16  ;;  %v17326_v41 = vld [vmem:[#allocation121_spill] sm:$0xff]  ;;  %v17329_v40 = vld [vmem:[#allocation182_spill] sm:$0xff] }
 0x62d   : > { %v4922_v19 = vsel %vm2738_vm10, %v4890_v62, %v4605_v59  ;;  %v4798_v53 = vsel %vm2606_vm6, %v4766_v33, %v17314_v63  ;;  %v4704_v7 = vsel %vm553_vm1, %v9901_v9, %v17315_v60  ;;  %v4925_v22 = vsel %vm2738_vm10, %v4893_v4, %v4611_v55  ;;  %v17320_v62 = vld [vmem:[#allocation186_spill] sm:$0xff]  ;;  %v17328_v33 = vld [vmem:[#allocation51_spill] sm:$0xff]  ;;  %v17333_v9 = vld [vmem:[#allocation73_spill] sm:$0xff] }
 0x62e   : > { %9617 = vmatprep.mubr.msk.f32.mxu0 %vm2776_vm11, %v4922_v19  ;;  %v4830_v32 = vsel %vm2639_vm7, %v4798_v53, %v13076_v37  ;;  %v4736_v42 = vsel %vm2540_vm4, %v4704_v7, %v17318_v15  ;;  %v4831_v38 = vsel %vm2639_vm7, %v4799_v21, %v13068_v10  ;;  %v4737_v55 = vsel %vm2540_vm4, %v4705_v24, %v17320_v62  ;;  %v17321_v59 = vld [vmem:[#allocation102_spill] sm:$0xff]  ;;  %v17323_v10 = vld [vmem:[#allocation69_spill] sm:$0xff]  ;;  %v17334_v7 = vld [vmem:[#allocation176_spill] sm:$0xff] }
 0x62f   : > { %9618 = vmatmul.mubr.msk.f32.gmra.mrb[18].mxu0 %vm2776_vm11, %v4923_v57  ;;  %v4862_v12 = vsel %vm2672_vm8, %v4830_v32, %v17319_v14  ;;  %v4768_v1 = vsel %vm2573_vm5, %v4736_v42, %v17321_v59  ;;  %v4863_v45 = vsel %vm2672_vm8, %v4831_v38, %v17322_v52  ;;  %v4769_v51 = vsel %vm2573_vm5, %v4737_v55, %v17323_v10  ;;  %v17331_v63 = vld [vmem:[#allocation42_spill] sm:$0xff]  ;;  %v17336_v16 = vld [vmem:[#allocation143_spill] sm:$0xff]  ;;  %v9905_v38 = vld [vmem:[#allocation3 + $0x90] sm:$0xff] }
 0x630   : > { %v4615_v18 = vpop.permute.xlu1 %4614  ;;  %v4609_v31 = vpop.permute.xlu0 %4608  ;;  %v4894_v19 = vsel %vm2705_vm9, %v4862_v12, %v13305_v39  ;;  %v4800_v25 = vsel %vm2606_vm6, %v4768_v1, %v17324_v17  ;;  %v4895_v29 = vsel %vm2705_vm9, %v4863_v45, %v13298_v11  ;;  %v4801_v50 = vsel %vm2606_vm6, %v4769_v51, %v17326_v41  ;;  %v17327_v39 = vld [vmem:[#allocation219_spill] sm:$0xff]  ;;  %v9906_v52 = vld [vmem:[#allocation3 + $0x98] sm:$0xff]  ;;  %v17340_v45 = vld [vmem:[#allocation64_spill] sm:$0xff] }
 0x631   : > { %v4924_v6 = vsel %vm2738_vm10, %v4892_v27, %v4609_v31  ;;  %v4832_v28 = vsel %vm2639_vm7, %v4800_v25, %v17327_v39  ;;  %v4927_v8 = vsel %vm2738_vm10, %v4895_v29, %v4615_v18  ;;  %v4707_v11 = vsel %vm553_vm1, %v9904_v23, %v17328_v33  ;;  %v17330_v31 = vld [vmem:[#allocation152_spill] sm:$0xff]  ;;  %v17337_v14 = vld [vmem:[#allocation67_spill] sm:$0xff]  ;;  %v17345_v56 = vld [vmem:[#allocation165_spill] sm:$0xff] }
 0x632   : > { %9620 = vmatprep.mubr.msk.f32.mxu0 %vm2776_vm11, %v4924_v6  ;;  %v4738_v27 = vsel %vm2540_vm4, %v4706_v26, %v17329_v40  ;;  %v4833_v48 = vsel %vm2639_vm7, %v4801_v50, %v17330_v31  ;;  %v4864_v53 = vsel %vm2672_vm8, %v4832_v28, %v17331_v63  ;;  %v17332_v6 = vld [vmem:[#allocation163_spill] sm:$0xff]  ;;  %v4708_v12 = vsel %vm553_vm1, %v9905_v38, %v17337_v14  ;;  %v17343_v29 = vld [vmem:[#allocation184_spill] sm:$0xff]  ;;  %v17349_v31 = vld [vmem:[#allocation125_spill] sm:$0xff] }
 0x633   : > { %9621 = vmatmul.mubr.msk.f32.gmra.mrb[20].mxu0 %vm2776_vm11, %v4925_v22  ;;  %v4739_v18 = vsel %vm2540_vm4, %v4707_v11, %v17332_v6  ;;  %v4770_v60 = vsel %vm2573_vm5, %v4738_v27, %v17333_v9  ;;  %v4865_v43 = vsel %vm2672_vm8, %v4833_v48, %v17334_v7  ;;  %v4896_v21 = vsel %vm2705_vm9, %v4864_v53, %v13309_v58  ;;  %v17335_v22 = vld [vmem:[#allocation85_spill] sm:$0xff]  ;;  %v17338_v62 = vld [vmem:[#allocation191_spill] sm:$0xff]  ;;  %v17346_v39 = vld [vmem:[#allocation208_spill] sm:$0xff] }
 0x634   : > { %v4619_v37 = vpop.permute.xlu1 %4618  ;;  %v4613_v20 = vpop.permute.xlu0 %4612  ;;  %v4771_v35 = vsel %vm2573_vm5, %v4739_v18, %v17335_v22  ;;  %v4802_v24 = vsel %vm2606_vm6, %v4770_v60, %v17336_v16  ;;  %v4897_v15 = vsel %vm2705_vm9, %v4865_v43, %v13303_v2  ;;  %v17339_v58 = vld [vmem:[#allocation151_spill] sm:$0xff]  ;;  %v4709_v2 = vsel %vm553_vm1, %v9906_v52, %v17340_v45  ;;  %v9907_v11 = vld [vmem:[#allocation3 + $0xa8] sm:$0xff]  ;;  %v9908_v6 = vld [vmem:[#allocation3 + $0xb0] sm:$0xff] }
 0x635   : > { %v4926_v57 = vsel %vm2738_vm10, %v4894_v19, %v4613_v20  ;;  %v4803_v55 = vsel %vm2606_vm6, %v4771_v35, %v17338_v62  ;;  %v4834_v59 = vsel %vm2639_vm7, %v4802_v24, %v17339_v58  ;;  %v4929_v1 = vsel %vm2738_vm10, %v4897_v15, %v4619_v37  ;;  %v17341_v19 = vld [vmem:[#allocation46_spill] sm:$0xff]  ;;  %v17342_v10 = vld [vmem:[#allocation139_spill] sm:$0xff]  ;;  %v17348_v40 = vld [vmem:[#allocation56_spill] sm:$0xff] }
 0x636   : > { %9623 = vmatprep.mubr.msk.f32.mxu0 %vm2776_vm11, %v4926_v57  ;;  %v4740_v20 = vsel %vm2540_vm4, %v4708_v12, %v17341_v19  ;;  %v4835_v51 = vsel %vm2639_vm7, %v4803_v55, %v17342_v10  ;;  %v4866_v17 = vsel %vm2672_vm8, %v4834_v59, %v13203_v46  ;;  %v4741_v37 = vsel %vm2540_vm4, %v4709_v2, %v17343_v29  ;;  %v17344_v57 = vld [vmem:[#allocation192_spill] sm:$0xff]  ;;  %v17347_v46 = vld [vmem:[#allocation113_spill] sm:$0xff]  ;;  %v17351_v18 = vld [vmem:[#allocation63_spill] sm:$0xff] }
 0x637   : > { %9624 = vmatmul.mubr.msk.f32.gmra.mrb[22].mxu0 %vm2776_vm11, %v4927_v8  ;;  %v4772_v36 = vsel %vm2573_vm5, %v4740_v20, %v17344_v57  ;;  %v4867_v26 = vsel %vm2672_vm8, %v4835_v51, %v17345_v56  ;;  %v4898_v41 = vsel %vm2705_vm9, %v4866_v17, %v13313_v13  ;;  %v4773_v28 = vsel %vm2573_vm5, %v4741_v37, %v17346_v39  ;;  %v17350_v13 = vld [vmem:[#allocation148_spill] sm:$0xff]  ;;  %v17352_v9 = vld [vmem:[#allocation185_spill] sm:$0xff]  ;;  %v17353_v7 = vld [vmem:[#allocation154_spill] sm:$0xff] }
 0x638   : > { %v4623_v4 = vpop.permute.xlu1 %4622  ;;  %v4617_v32 = vpop.permute.xlu0 %4616  ;;  %v4804_v8 = vsel %vm2606_vm6, %v4772_v36, %v17347_v46  ;;  %v4899_v23 = vsel %vm2705_vm9, %v4867_v26, %v13307_v49  ;;  %v4710_v27 = vsel %vm553_vm1, %v9907_v11, %v17348_v40  ;;  %v4805_v48 = vsel %vm2606_vm6, %v4773_v28, %v17349_v31  ;;  %v17354_v22 = vld [vmem:[#allocation188_spill] sm:$0xff]  ;;  %v17355_v35 = vld [vmem:[#allocation97_spill] sm:$0xff]  ;;  %v17356_v38 = vld [vmem:[#allocation86_spill] sm:$0xff] }
 0x639   : > { %v4928_v42 = vsel %vm2738_vm10, %v4896_v21, %v4617_v32  ;;  %v4836_v63 = vsel %vm2639_vm7, %v4804_v8, %v17350_v13  ;;  %v4931_v53 = vsel %vm2738_vm10, %v4899_v23, %v4623_v4  ;;  %v4711_v49 = vsel %vm553_vm1, %v9908_v6, %v17351_v18  ;;  %v9909_v58 = vld [vmem:[#allocation3 + $0xc0] sm:$0xff]  ;;  %v9910_v19 = vld [vmem:[#allocation3 + $0xc8] sm:$0xff]  ;;  %v17362_v10 = vld [vmem:[#allocation49_spill] sm:$0xff] }
 0x63a   : > { %9626 = vmatprep.mubr.msk.f32.mxu0 %vm2776_vm11, %v4928_v42  ;;  %v4742_v60 = vsel %vm2540_vm4, %v4710_v27, %v17352_v9  ;;  %v4837_v43 = vsel %vm2639_vm7, %v4805_v48, %v17353_v7  ;;  %v4868_v21 = vsel %vm2672_vm8, %v4836_v63, %v13209_v47  ;;  %v4743_v4 = vsel %vm2540_vm4, %v4711_v49, %v17354_v22  ;;  %v17357_v47 = vld [vmem:[#allocation196_spill] sm:$0xff]  ;;  %v17358_v59 = vld [vmem:[#allocation79_spill] sm:$0xff]  ;;  %v17364_v36 = vld [vmem:[#allocation209_spill] sm:$0xff] }
 0x63b   : > { %9627 = vmatmul.mubr.msk.f32.gmra.mrb[24].mxu0 %vm2776_vm11, %v4929_v1  ;;  %v4774_v16 = vsel %vm2573_vm5, %v4742_v60, %v17355_v35  ;;  %v4869_v24 = vsel %vm2672_vm8, %v4837_v43, %v13201_v61  ;;  %v4900_v15 = vsel %vm2705_vm9, %v4868_v21, %v13317_v30  ;;  %v4775_v14 = vsel %vm2573_vm5, %v4743_v4, %v17356_v38  ;;  %v17359_v61 = vld [vmem:[#allocation212_spill] sm:$0xff]  ;;  %v17360_v30 = vld [vmem:[#allocation167_spill] sm:$0xff]  ;;  %v17365_v56 = vld [vmem:[#allocation213_spill] sm:$0xff] }
 0x63c   : > { %v4627_v25 = vpop.permute.xlu1 %4626  ;;  %v4621_v50 = vpop.permute.xlu0 %4620  ;;  %v4806_v12 = vsel %vm2606_vm6, %v4774_v16, %v17357_v47  ;;  %v4901_v62 = vsel %vm2705_vm9, %v4869_v24, %v13311_v5  ;;  %v4712_v1 = vsel %vm553_vm1, %v9909_v58, %v17358_v59  ;;  %v4807_v52 = vsel %vm2606_vm6, %v4775_v14, %v17359_v61  ;;  %v17361_v20 = vld [vmem:[#allocation68_spill] sm:$0xff]  ;;  %v17363_v17 = vld [vmem:[#allocation195_spill] sm:$0xff]  ;;  %v17367_v46 = vld [vmem:[#allocation90_spill] sm:$0xff] }
 0x63d   : > { %v4930_v33 = vsel %vm2738_vm10, %v4898_v41, %v4621_v50  ;;  %v4838_v45 = vsel %vm2639_vm7, %v4806_v12, %v17360_v30  ;;  %v4933_v2 = vsel %vm2738_vm10, %v4901_v62, %v4627_v25  ;;  %v4713_v5 = vsel %vm553_vm1, %v9910_v19, %v17361_v20  ;;  %v17366_v50 = vld [vmem:[#allocation229_spill] sm:$0xff]  ;;  %v9911_v27 = vld [vmem:[#allocation3 + $0xd8] sm:$0xff]  ;;  %v17370_v31 = vld [vmem:[#allocation92_spill] sm:$0xff] }
 0x63e   : > { %9629 = vmatprep.mubr.msk.f32.mxu0 %vm2776_vm11, %v4930_v33  ;;  %v4744_v51 = vsel %vm2540_vm4, %v4712_v1, %v17362_v10  ;;  %v4839_v29 = vsel %vm2639_vm7, %v4807_v52, %v17363_v17  ;;  %v4870_v37 = vsel %vm2672_vm8, %v4838_v45, %v13215_v0  ;;  %v4745_v25 = vsel %vm2540_vm4, %v4713_v5, %v17364_v36  ;;  %v17368_v0 = vld [vmem:[#allocation137_spill] sm:$0xff]  ;;  %v17369_v33 = vld [vmem:[#allocation227_spill] sm:$0xff]  ;;  %v17372_v63 = vld [vmem:[#allocation150_spill] sm:$0xff] }
 0x63f   : > { %9630 = vmatmul.mubr.msk.f32.gmra.mrb[26].mxu0 %vm2776_vm11, %v4931_v53  ;;  %v4776_v26 = vsel %vm2573_vm5, %v4744_v51, %v17365_v56  ;;  %v4871_v41 = vsel %vm2672_vm8, %v4839_v29, %v13207_v34  ;;  %v4902_v39 = vsel %vm2705_vm9, %v4870_v37, %v17366_v50  ;;  %v4777_v8 = vsel %vm2573_vm5, %v4745_v25, %v17367_v46  ;;  %v17371_v34 = vld [vmem:[#allocation126_spill] sm:$0xff]  ;;  %v9912_v18 = vld [vmem:[#allocation3 + $0xe0] sm:$0xff]  ;;  %v17374_v60 = vld [vmem:[#allocation65_spill] sm:$0xff] }
 0x640   : > { %v4631_v32 = vpop.permute.xlu1 %4630  ;;  %v4625_v42 = vpop.permute.xlu0 %4624  ;;  %v4808_v23 = vsel %vm2606_vm6, %v4776_v26, %v17368_v0  ;;  %v4903_v11 = vsel %vm2705_vm9, %v4871_v41, %v17369_v33  ;;  %v4714_v48 = vsel %vm553_vm1, %v9911_v27, %v17370_v31  ;;  %v4809_v13 = vsel %vm2606_vm6, %v4777_v8, %v17371_v34  ;;  %v17373_v49 = vld [vmem:[#allocation75_spill] sm:$0xff]  ;;  %v17375_v43 = vld [vmem:[#allocation156_spill] sm:$0xff]  ;;  %v17377_v16 = vld [vmem:[#allocation54_spill] sm:$0xff] }
 0x641   : > { %v4932_v55 = vsel %vm2738_vm10, %v4900_v15, %v4625_v42  ;;  %v4840_v53 = vsel %vm2639_vm7, %v4808_v23, %v17372_v63  ;;  %v4935_v6 = vsel %vm2738_vm10, %v4903_v11, %v4631_v32  ;;  %v4715_v9 = vsel %vm553_vm1, %v9912_v18, %v17373_v49  ;;  %v17376_v22 = vld [vmem:[#allocation183_spill] sm:$0xff]  ;;  %v17378_v24 = vld [vmem:[#allocation94_spill] sm:$0xff]  ;;  %v17379_v42 = vld [vmem:[#allocation180_spill] sm:$0xff] }
 0x642   : > { %9632 = vmatprep.mubr.msk.f32.mxu0 %vm2776_vm11, %v4932_v55  ;;  %v4746_v7 = vsel %vm2540_vm4, %v4714_v48, %v17374_v60  ;;  %v4841_v21 = vsel %vm2639_vm7, %v4809_v13, %v17375_v43  ;;  %v4872_v4 = vsel %vm2672_vm8, %v4840_v53, %v17376_v22  ;;  %v4747_v32 = vsel %vm2540_vm4, %v4715_v9, %v17377_v16  ;;  %v17380_v14 = vld [vmem:[#allocation231_spill] sm:$0xff]  ;;  %v17381_v62 = vld [vmem:[#allocation78_spill] sm:$0xff]  ;;  %v17382_v58 = vld [vmem:[#allocation217_spill] sm:$0xff] }
 0x643   : > { %9633 = vmatmul.mubr.msk.f32.gmra.mrb[28].mxu0 %vm2776_vm11, %v4933_v2  ;;  %v4778_v15 = vsel %vm2573_vm5, %v4746_v7, %v17378_v24  ;;  %v4873_v38 = vsel %vm2672_vm8, %v4841_v21, %v17379_v42  ;;  %v4904_v47 = vsel %vm2705_vm9, %v4872_v4, %v17380_v14  ;;  %v4779_v55 = vsel %vm2573_vm5, %v4747_v32, %v17381_v62  ;;  %v17383_v1 = vld [vmem:[#allocation228_spill] sm:$0xff]  ;;  %v9913_v30 = vld [vmem:[#allocation3 + $0xf0] sm:$0xff]  ;;  %v17384_v45 = vld [vmem:[#allocation99_spill] sm:$0xff] }
 0x644   : > { %v4635_v57 = vpop.permute.xlu1 %4634  ;;  %v4629_v28 = vpop.permute.xlu0 %4628  ;;  %v4810_v59 = vsel %vm2606_vm6, %v4778_v15, %v17382_v58  ;;  %v4905_v61 = vsel %vm2705_vm9, %v4873_v38, %v17383_v1  ;;  %v4716_v2 = vsel %vm553_vm1, %v9913_v30, %v17384_v45  ;;  %v17385_v19 = vld [vmem:[#allocation130_spill] sm:$0xff]  ;;  %v17386_v5 = vld [vmem:[#allocation164_spill] sm:$0xff]  ;;  %v17387_v29 = vld [vmem:[#allocation83_spill] sm:$0xff] }
 0x645   : > { %v4934_v40 = vsel %vm2738_vm10, %v4902_v39, %v4629_v28  ;;  %v4811_v20 = vsel %vm2606_vm6, %v4779_v55, %v17385_v19  ;;  %v4842_v10 = vsel %vm2639_vm7, %v4810_v59, %v17386_v5  ;;  %v4937_v51 = vsel %vm2738_vm10, %v4905_v61, %v4635_v57  ;;  %v9914_v17 = vld [vmem:[#allocation3 + $0xf8] sm:$0xff]  ;;  %v17388_v36 = vld [vmem:[#allocation53_spill] sm:$0xff]  ;;  %v17389_v56 = vld [vmem:[#allocation216_spill] sm:$0xff] }
 0x646   : > { %9635 = vmatprep.mubr.msk.f32.mxu0 %vm2776_vm11, %v4934_v40  ;;  %v4717_v37 = vsel %vm553_vm1, %v9914_v17, %v17387_v29  ;;  %v4748_v25 = vsel %vm2540_vm4, %v4716_v2, %v17388_v36  ;;  %v4843_v26 = vsel %vm2639_vm7, %v4811_v20, %v17389_v56  ;;  %v17390_v41 = vld [vmem:[#allocation173_spill] sm:$0xff]  ;;  %v17391_v28 = vld [vmem:[#allocation82_spill] sm:$0xff]  ;;  %v17393_v0 = vld [vmem:[#allocation199_spill] sm:$0xff] }
 0x647   : > { %9636 = vmatmul.mubr.msk.f32.gmra.mrb[30].mxu0 %vm2776_vm11, %v4935_v6  ;;  %v4874_v50 = vsel %vm2672_vm8, %v4842_v10, %v17390_v41  ;;  %v4749_v57 = vsel %vm2540_vm4, %v4717_v37, %v17391_v28  ;;  %v17392_v46 = vld [vmem:[#allocation89_spill] sm:$0xff]  ;;  %v4875_v23 = vsel %vm2672_vm8, %v4843_v26, %v17393_v0  ;;  %v17396_v48 = vld [vmem:[#allocation134_spill] sm:$0xff]  ;;  %v9915_v6 = vld [vmem:[#allocation3 + $0x108] sm:$0xff] }
 0x648   : > { %v4639_v35 = vpop.permute.xlu1 %4638  ;;  %v4633_v12 = vpop.permute.xlu0 %4632  ;;  %v4780_v8 = vsel %vm2573_vm5, %v4748_v25, %v17392_v46  ;;  %v17394_v33 = vld [vmem:[#allocation233_spill] sm:$0xff]  ;;  %v17397_v13 = vld [vmem:[#allocation230_spill] sm:$0xff]  ;;  %v17398_v18 = vld [vmem:[#allocation104_spill] sm:$0xff] }
 0x649   : > { %v4936_v52 = vsel %vm2738_vm10, %v4904_v47, %v4633_v12  ;;  %v4906_v11 = vsel %vm2705_vm9, %v4874_v50, %v17394_v33  ;;  %v17395_v27 = vld [vmem:[#allocation101_spill] sm:$0xff]  ;;  %v4812_v34 = vsel %vm2606_vm6, %v4780_v8, %v17396_v48  ;;  %v4907_v63 = vsel %vm2705_vm9, %v4875_v23, %v17397_v13  ;;  %v17399_v9 = vld [vmem:[#allocation118_spill] sm:$0xff]  ;;  %v17400_v7 = vld [vmem:[#allocation220_spill] sm:$0xff] }
 0x64a   : > { %9638 = vmatprep.mubr.msk.f32.mxu0 %vm2776_vm11, %v4936_v52  ;;  %v4781_v31 = vsel %vm2573_vm5, %v4749_v57, %v17395_v27  ;;  %v4718_v49 = vsel %vm553_vm1, %v9915_v6, %v17398_v18  ;;  %v4844_v43 = vsel %vm2639_vm7, %v4812_v34, %v17400_v7  ;;  %v4939_v21 = vsel %vm2738_vm10, %v4907_v63, %v4639_v35  ;;  %v9916_v22 = vld [vmem:[#allocation3 + $0x110] sm:$0xff]  ;;  %v17401_v4 = vld [vmem:[#allocation95_spill] sm:$0xff]  ;;  %v17402_v32 = vld [vmem:[#allocation190_spill] sm:$0xff] }
 0x64b   : > { %9639 = vmatmul.mubr.msk.f32.gmra.mrb[32].mxu0 %vm2776_vm11, %v4937_v51  ;;  %v4813_v60 = vsel %vm2606_vm6, %v4781_v31, %v17399_v9  ;;  %v4719_v16 = vsel %vm553_vm1, %v9916_v22, %v17401_v4  ;;  %v4750_v24 = vsel %vm2540_vm4, %v4718_v49, %v17402_v32  ;;  %v17403_v15 = vld [vmem:[#allocation200_spill] sm:$0xff]  ;;  %v17404_v38 = vld [vmem:[#allocation181_spill] sm:$0xff]  ;;  %v17405_v12 = vld [vmem:[#allocation206_spill] sm:$0xff] }
 0x64c   : > { %v4643_v39 = vpop.permute.xlu1 %4642  ;;  %v4637_v40 = vpop.permute.xlu0 %4636  ;;  %v4845_v42 = vsel %vm2639_vm7, %v4813_v60, %v17403_v15  ;;  %v4876_v14 = vsel %vm2672_vm8, %v4844_v43, %v17404_v38  ;;  %v4751_v35 = vsel %vm2540_vm4, %v4719_v16, %v17405_v12  ;;  %v17406_v62 = vld [vmem:[#allocation122_spill] sm:$0xff]  ;;  %v17407_v58 = vld [vmem:[#allocation41_spill] sm:$0xff]  ;;  %v17410_v19 = vld [vmem:[#allocation232_spill] sm:$0xff] }
 0x64d   : > { %v4938_v53 = vsel %vm2738_vm10, %v4906_v11, %v4637_v40  ;;  %v4782_v55 = vsel %vm2573_vm5, %v4750_v24, %v17406_v62  ;;  %v4877_v59 = vsel %vm2672_vm8, %v4845_v42, %v17407_v58  ;;  %v4908_v1 = vsel %vm2705_vm9, %v4876_v14, %v13333_v3  ;;  %v17408_v52 = vld [vmem:[#allocation189_spill] sm:$0xff]  ;;  %v9917_v10 = vld [vmem:[#allocation3 + $0x120] sm:$0xff]  ;;  %v17412_v29 = vld [vmem:[#allocation142_spill] sm:$0xff] }
 0x64e   : > { %9641 = vmatprep.mubr.msk.f32.mxu0 %vm2776_vm11, %v4938_v53  ;;  %v4783_v30 = vsel %vm2573_vm5, %v4751_v35, %v17408_v52  ;;  %v17409_v45 = vld [vmem:[#allocation129_spill] sm:$0xff]  ;;  %v4909_v20 = vsel %vm2705_vm9, %v4877_v59, %v17410_v19  ;;  %v17411_v51 = vld [vmem:[#allocation115_spill] sm:$0xff]  ;;  %v17413_v3 = vld [vmem:[#allocation162_spill] sm:$0xff] }
 0x64f   : > { %9642 = vmatmul.mubr.msk.f32.gmra.mrb[34].mxu0 %vm2776_vm11, %v4939_v21  ;;  %v4814_v2 = vsel %vm2606_vm6, %v4782_v55, %v17409_v45  ;;  %v4720_v17 = vsel %vm553_vm1, %v9917_v10, %v17411_v51  ;;  %v4815_v37 = vsel %vm2606_vm6, %v4783_v30, %v17412_v29  ;;  %v4941_v25 = vsel %vm2738_vm10, %v4909_v20, %v4643_v39  ;;  %v9918_v56 = vld [vmem:[#allocation3 + $0x128] sm:$0xff]  ;;  %v17414_v26 = vld [vmem:[#allocation103_spill] sm:$0xff]  ;;  %v17415_v50 = vld [vmem:[#allocation77_spill] sm:$0xff] }
 0x650   : > { %v4647_v47 = vpop.permute.xlu1 %4646  ;;  %v4641_v61 = vpop.permute.xlu0 %4640  ;;  %v4846_v36 = vsel %vm2639_vm7, %v4814_v2, %v17413_v3  ;;  %v4721_v41 = vsel %vm553_vm1, %v9918_v56, %v17414_v26  ;;  %v4752_v28 = vsel %vm2540_vm4, %v4720_v17, %v17415_v50  ;;  %v17416_v57 = vld [vmem:[#allocation153_spill] sm:$0xff]  ;;  %v17418_v33 = vld [vmem:[#allocation66_spill] sm:$0xff]  ;;  %v17420_v27 = vld [vmem:[#allocation203_spill] sm:$0xff] }
 0x651   : > { %v4940_v5 = vsel %vm2738_vm10, %v4908_v1, %v4641_v61  ;;  %v4847_v46 = vsel %vm2639_vm7, %v4815_v37, %v17416_v57  ;;  %v17417_v8 = vld [vmem:[#allocation201_spill] sm:$0xff]  ;;  %v4753_v39 = vsel %vm2540_vm4, %v4721_v41, %v17418_v33  ;;  %v17422_v53 = vld [vmem:[#allocation155_spill] sm:$0xff]  ;;  %v17423_v18 = vld [vmem:[#allocation234_spill] sm:$0xff] }
 0x652   : > { %9644 = vmatprep.mubr.msk.f32.mxu0 %vm2776_vm11, %v4940_v5  ;;  %v4878_v0 = vsel %vm2672_vm8, %v4846_v36, %v17417_v8  ;;  %v17419_v11 = vld [vmem:[#allocation93_spill] sm:$0xff]  ;;  %v4879_v31 = vsel %vm2672_vm8, %v4847_v46, %v17420_v27  ;;  %v9919_v60 = vld [vmem:[#allocation3 + $0x138] sm:$0xff]  ;;  %v17424_v7 = vld [vmem:[#allocation112_spill] sm:$0xff] }
 0x653   : > { %9645 = vmatmul.mubr.msk.f32.gmra.mrb[36].mxu0 %vm2776_vm11, %v4941_v25  ;;  %v4784_v40 = vsel %vm2573_vm5, %v4752_v28, %v17419_v11  ;;  %v4910_v48 = vsel %vm2705_vm9, %v4878_v0, %v13337_v54  ;;  %v17421_v13 = vld [vmem:[#allocation105_spill] sm:$0xff]  ;;  %v4911_v49 = vsel %vm2705_vm9, %v4879_v31, %v17423_v18  ;;  %v4722_v43 = vsel %vm553_vm1, %v9919_v60, %v17424_v7  ;;  %v9920_v32 = vld [vmem:[#allocation3 + $0x140] sm:$0xff]  ;;  %v17429_v14 = vld [vmem:[#allocation166_spill] sm:$0xff] }
 0x654   : > { %v4651_v23 = vpop.permute.xlu1 %4650  ;;  %v4645_v34 = vpop.permute.xlu0 %4644  ;;  %v4785_v63 = vsel %vm2573_vm5, %v4753_v39, %v17421_v13  ;;  %v4816_v6 = vsel %vm2606_vm6, %v4784_v40, %v17422_v53  ;;  %v17425_v21 = vld [vmem:[#allocation193_spill] sm:$0xff]  ;;  %v4943_v16 = vsel %vm2738_vm10, %v4911_v49, %v4647_v47  ;;  %v17427_v24 = vld [vmem:[#allocation107_spill] sm:$0xff]  ;;  %v17431_v58 = vld [vmem:[#allocation70_spill] sm:$0xff] }
 0x655   : > { %v4942_v9 = vsel %vm2738_vm10, %v4910_v48, %v4645_v34  ;;  %v4817_v22 = vsel %vm2606_vm6, %v4785_v63, %v17425_v21  ;;  %v17426_v54 = vld [vmem:[#allocation157_spill] sm:$0xff]  ;;  %v4723_v15 = vsel %vm553_vm1, %v9920_v32, %v17427_v24  ;;  %v17428_v42 = vld [vmem:[#allocation211_spill] sm:$0xff]  ;;  %v17432_v59 = vld [vmem:[#allocation194_spill] sm:$0xff] }
 0x656   : > { %v4848_v4 = vsel %vm2639_vm7, %v4816_v6, %v17426_v54  ;;  %9647 = vmatprep.mubr.msk.f32.mxu0 %vm2776_vm11, %v4942_v9  ;;  %v4754_v38 = vsel %vm2540_vm4, %v4722_v43, %v17428_v42  ;;  %v4849_v12 = vsel %vm2639_vm7, %v4817_v22, %v17429_v14  ;;  %v17430_v35 = vld [vmem:[#allocation221_spill] sm:$0xff]  ;;  %v4755_v47 = vsel %vm2540_vm4, %v4723_v15, %v17431_v58  ;;  %v17435_v19 = vld [vmem:[#allocation210_spill] sm:$0xff]  ;;  %v17437_v51 = vld [vmem:[#allocation235_spill] sm:$0xff] }
 0x657   : > { %v4880_v62 = vsel %vm2672_vm8, %v4848_v4, %v17430_v35  ;;  %9648 = vmatmul.mubr.msk.f32.gmra.mrb[38].mxu0 %vm2776_vm11, %v4943_v16  ;;  %v4786_v1 = vsel %vm2573_vm5, %v4754_v38, %v17432_v59  ;;  %v17433_v61 = vld [vmem:[#allocation45_spill] sm:$0xff]  ;;  %v4787_v20 = vsel %vm2573_vm5, %v4755_v47, %v17435_v19  ;;  %v17438_v3 = vld [vmem:[#allocation132_spill] sm:$0xff]  ;;  %v17439_v25 = vld [vmem:[#allocation146_spill] sm:$0xff] }
 0x658   : > { %v4655_v55 = vpop.permute.xlu1 %4654  ;;  %v4881_v52 = vsel %vm2672_vm8, %v4849_v12, %v17433_v61  ;;  %v17434_v30 = vld [vmem:[#allocation237_spill] sm:$0xff]  ;;  %v4649_v2 = vpop.permute.xlu0 %4648  ;;  %v4819_v56 = vsel %vm2606_vm6, %v4787_v20, %v17439_v25  ;;  %v17440_v26 = vld [vmem:[#allocation170_spill] sm:$0xff]  ;;  %v17441_v57 = vld [vmem:[#allocation111_spill] sm:$0xff] }
 0x659   : > { %v4912_v45 = vsel %vm2705_vm9, %v4880_v62, %v17434_v30  ;;  %v17436_v5 = vld [vmem:[#allocation133_spill] sm:$0xff]  ;;  %v4913_v17 = vsel %vm2705_vm9, %v4881_v52, %v17437_v51  ;;  %v9922_v28 = vld [vmem:[#allocation3 + $0x158] sm:$0xff]  ;;  %v17444_v11 = vld [vmem:[#allocation223_spill] sm:$0xff] }
 0x65a   : > { %v4818_v10 = vsel %vm2606_vm6, %v4786_v1, %v17436_v5  ;;  %v4944_v29 = vsel %vm2738_vm10, %v4912_v45, %v4649_v2  ;;  %v9921_v37 = vld [vmem:[#allocation3 + $0x150] sm:$0xff]  ;;  %v4945_v50 = vsel %vm2738_vm10, %v4913_v17, %v4651_v23  ;;  %v4725_v46 = vsel %vm553_vm1, %v9922_v28, %v17441_v57  ;;  %v17442_v8 = vld [vmem:[#allocation74_spill] sm:$0xff]  ;;  %v17447_v34 = vld [vmem:[#allocation43_spill] sm:$0xff] }
 0x65b   : > { %v4724_v36 = vsel %vm553_vm1, %v9921_v37, %v17438_v3  ;;  %v4850_v41 = vsel %vm2639_vm7, %v4818_v10, %v17440_v26  ;;  %9650 = vmatprep.mubr.msk.f32.mxu0 %vm2776_vm11, %v4944_v29  ;;  %v17443_v33 = vld [vmem:[#allocation197_spill] sm:$0xff]  ;;  %v17445_v27 = vld [vmem:[#allocation58_spill] sm:$0xff]  ;;  %v17448_v63 = vld [vmem:[#allocation239_spill] sm:$0xff] }
 0x65c   : > { %v4756_v0 = vsel %vm2540_vm4, %v4724_v36, %v17442_v8  ;;  %v4851_v39 = vsel %vm2639_vm7, %v4819_v56, %v17443_v33  ;;  %v4882_v40 = vsel %vm2672_vm8, %v4850_v41, %v17444_v11  ;;  %9651 = vmatmul.mubr.msk.f32.gmra.mrb[40].mxu0 %vm2776_vm11, %v4945_v50  ;;  %v4757_v23 = vsel %vm2540_vm4, %v4725_v46, %v17445_v27  ;;  %v17446_v31 = vld [vmem:[#allocation117_spill] sm:$0xff]  ;;  %v4653_v6 = vpop.permute.xlu0 %4652  ;;  %v17449_v18 = vld [vmem:[#allocation106_spill] sm:$0xff]  ;;  %v17451_v7 = vld [vmem:[#allocation236_spill] sm:$0xff]  ;;  %v4659_v21 = vpop.permute.xlu1 %4658 }
 0x65d   : > { %v4788_v48 = vsel %vm2573_vm5, %v4756_v0, %v17446_v31  ;;  %v4883_v13 = vsel %vm2672_vm8, %v4851_v39, %v17447_v34  ;;  %v4914_v53 = vsel %vm2705_vm9, %v4882_v40, %v17448_v63  ;;  %v4789_v49 = vsel %vm2573_vm5, %v4757_v23, %v17449_v18  ;;  %v17450_v9 = vld [vmem:[#allocation198_spill] sm:$0xff]  ;;  %v9923_v54 = vld [vmem:[#allocation3 + $0x168] sm:$0xff]  ;;  %v17452_v4 = vld [vmem:[#allocation135_spill] sm:$0xff] }
 0x65e   : > { %v4820_v60 = vsel %vm2606_vm6, %v4788_v48, %v17450_v9  ;;  %v4915_v43 = vsel %vm2705_vm9, %v4883_v13, %v17451_v7  ;;  %v4946_v22 = vsel %vm2738_vm10, %v4914_v53, %v4653_v6  ;;  %v4726_v16 = vsel %vm553_vm1, %v9923_v54, %v17452_v4  ;;  %v17453_v32 = vld [vmem:[#allocation214_spill] sm:$0xff]  ;;  %v17454_v15 = vld [vmem:[#allocation159_spill] sm:$0xff]  ;;  %v9924_v14 = vld [vmem:[#allocation3 + $0x170] sm:$0xff] }
 0x65f   : > { %v4821_v24 = vsel %vm2606_vm6, %v4789_v49, %v17453_v32  ;;  %v4852_v42 = vsel %vm2639_vm7, %v4820_v60, %v17454_v15  ;;  %v4947_v38 = vsel %vm2738_vm10, %v4915_v43, %v4655_v55  ;;  %9653 = vmatprep.mubr.msk.f32.mxu0 %vm2776_vm11, %v4946_v22  ;;  %v17455_v12 = vld [vmem:[#allocation124_spill] sm:$0xff]  ;;  %v17456_v62 = vld [vmem:[#allocation187_spill] sm:$0xff]  ;;  %v17457_v47 = vld [vmem:[#allocation158_spill] sm:$0xff]  ;;  %v17472_v63 = vmov 0.0  }
 0x660   : > { %v4727_v35 = vsel %vm553_vm1, %v9924_v14, %v17455_v12  ;;  %v4758_v58 = vsel %vm2540_vm4, %v4726_v16, %v17456_v62  ;;  %v4853_v59 = vsel %vm2639_vm7, %v4821_v24, %v17457_v47  ;;  %v17458_v1 = vld [vmem:[#allocation225_spill] sm:$0xff]  ;;  %9654 = vmatmul.mubr.msk.f32.gmra.mrb[42].mxu0 %vm2776_vm11, %v4947_v38  ;;  %v17460_v30 = vld [vmem:[#allocation98_spill] sm:$0xff]  ;;  %v4657_v10 = vpop.permute.xlu0 %4656  ;;  %v17466_v56 = vld [vmem:[#allocation147_spill] sm:$0xff]  ;;  %v4663_v33 = vpop.permute.xlu1 %4662  ;;  %5394 = vst.msk [vmem:[#allocation4 + $0x10] sm:$0x3] %vm5393_vm12, %v17472_v63 }
 0x661   : > { %v4884_v61 = vsel %vm2672_vm8, %v4852_v42, %v17458_v1  ;;  %v17459_v52 = vld [vmem:[#allocation81_spill] sm:$0xff]  ;;  %v4790_v45 = vsel %vm2573_vm5, %v4758_v58, %v17460_v30  ;;  %v17461_v2 = vld [vmem:[#allocation222_spill] sm:$0xff]  ;;  %v17470_v39 = vld [vmem:[#allocation224_spill] sm:$0xff]  ;;  %5398 = vst.msk [vmem:[#allocation4 + $0x1a8] sm:$0x3] %vm5393_vm12, %v17472_v63 }
 0x662   : > { %v4759_v55 = vsel %vm2540_vm4, %v4727_v35, %v17459_v52  ;;  %v4885_v19 = vsel %vm2672_vm8, %v4853_v59, %v17461_v2  ;;  %v17462_v20 = vld [vmem:[#allocation241_spill] sm:$0xff]  ;;  %v17463_v51 = vld [vmem:[#allocation110_spill] sm:$0xff]  ;;  %v17471_v23 = vld [vmem:[#allocation240_spill] sm:$0xff]  ;;  %5418 = vst.msk [vmem:[#allocation4 + $0x11] sm:$0x1] %vm5399_vm13, %v17472_v63 }
 0x663   : > { %v4916_v5 = vsel %vm2705_vm9, %v4884_v61, %v17462_v20  ;;  %v4791_v17 = vsel %vm2573_vm5, %v4759_v55, %v17463_v51  ;;  %v17464_v29 = vld [vmem:[#allocation149_spill] sm:$0xff]  ;;  %v17465_v3 = vld [vmem:[#allocation238_spill] sm:$0xff]  ;;  %5400 = vst.msk [vmem:[#allocation4] sm:$0x1] %vm5399_vm13, %v17472_v63  ;;  %5401 = vst.msk [vmem:[#allocation4 + $0x18] sm:$0x1] %vm5399_vm13, %v17472_v63 }
 0x664   : > { %v4822_v37 = vsel %vm2606_vm6, %v4790_v45, %v17464_v29  ;;  %v4917_v36 = vsel %vm2705_vm9, %v4885_v19, %v17465_v3  ;;  %v4948_v25 = vsel %vm2738_vm10, %v4916_v5, %v4657_v10  ;;  %v4823_v26 = vsel %vm2606_vm6, %v4791_v17, %v17466_v56  ;;  %v17467_v41 = vld [vmem:[#allocation161_spill] sm:$0xff]  ;;  %v17468_v57 = vld [vmem:[#allocation218_spill] sm:$0xff]  ;;  %v4661_v27 = vpop.permute.xlu0 %4660  ;;  %5402 = vst.msk [vmem:[#allocation4 + $0x30] sm:$0x1] %vm5399_vm13, %v17472_v63 }
 0x665   : > { %v4854_v50 = vsel %vm2639_vm7, %v4822_v37, %v17467_v41  ;;  %v4949_v28 = vsel %vm2738_vm10, %v4917_v36, %v4659_v21  ;;  %9656 = vmatprep.mubr.msk.f32.mxu0 %vm2776_vm11, %v4948_v25  ;;  %v4855_v46 = vsel %vm2639_vm7, %v4823_v26, %v17468_v57  ;;  %v17469_v8 = vld [vmem:[#allocation226_spill] sm:$0xff]  ;;  %5403 = vst.msk [vmem:[#allocation4 + $0x48] sm:$0x1] %vm5399_vm13, %v17472_v63  ;;  %5404 = vst.msk [vmem:[#allocation4 + $0x60] sm:$0x1] %vm5399_vm13, %v17472_v63  ;;  %vm7051_vm5 = vcmask 588800  }
 0x666   : > { %v4886_v0 = vsel %vm2672_vm8, %v4854_v50, %v17469_v8  ;;  %9657 = vmatmul.mubr.msk.f32.gmra.mrb[44].mxu0 %vm2776_vm11, %v4949_v28  ;;  %v4887_v11 = vsel %vm2672_vm8, %v4855_v46, %v17470_v39  ;;  %v5501_v13 = vld [vmem:[#allocation4 + $0x1] sm:$0xff]  ;;  %5405 = vst.msk [vmem:[#allocation4 + $0x78] sm:$0x1] %vm5399_vm13, %v17472_v63  ;;  %5406 = vst.msk [vmem:[#allocation4 + $0x90] sm:$0x1] %vm5399_vm13, %v17472_v63 }
 0x667   : > { %v4918_v40 = vsel %vm2705_vm9, %v4886_v0, %v13361_v44  ;;  %v4919_v31 = vsel %vm2705_vm9, %v4887_v11, %v17471_v23  ;;  %5790 = vrot.lane.b32.xlu0 %v5501_v13, %s17096_s28  ;;  %v5502_v44 = vld [vmem:[#allocation4 + $0x9] sm:$0xff]  ;;  %5407 = vst.msk [vmem:[#allocation4 + $0xa8] sm:$0x1] %vm5399_vm13, %v17472_v63  ;;  %5408 = vst.msk [vmem:[#allocation4 + $0xc0] sm:$0x1] %vm5399_vm13, %v17472_v63 }
 0x668   : > { %v4950_v48 = vsel %vm2738_vm10, %v4918_v40, %v4661_v27  ;;  %v4951_v34 = vsel %vm2738_vm10, %v4919_v31, %v4663_v33  ;;  %5792 = vrot.lane.b32.xlu1 %v5502_v44, %s17096_s28  ;;  %5409 = vst.msk [vmem:[#allocation4 + $0xd8] sm:$0x1] %vm5399_vm13, %v17472_v63  ;;  %5410 = vst.msk [vmem:[#allocation4 + $0xf0] sm:$0x1] %vm5399_vm13, %v17472_v63  ;;  %v13943_v53 = vld [vmem:[%s16557_s8] ss:$0 sm:$0xff] }
 0x669   : > { %9659 = vmatprep.mubr.msk.f32.mxu0 %vm2776_vm11, %v4950_v48  ;;  %5411 = vst.msk [vmem:[#allocation4 + $0x108] sm:$0x1] %vm5399_vm13, %v17472_v63  ;;  %5412 = vst.msk [vmem:[#allocation4 + $0x120] sm:$0x1] %vm5399_vm13, %v17472_v63  ;;  %v13948_v18 = vld [vmem:[%s16558_s9] ss:$0 sm:$0xff] }
 0x66a   : > { %9660 = vmatmul.mubr.msk.f32.gmra.mrb[46].mxu0 %vm2776_vm11, %v4951_v34  ;;  %5413 = vst.msk [vmem:[#allocation4 + $0x138] sm:$0x1] %vm5399_vm13, %v17472_v63  ;;  %5414 = vst.msk [vmem:[#allocation4 + $0x150] sm:$0x1] %vm5399_vm13, %v17472_v63 }
 0x66b   : > { %5415 = vst.msk [vmem:[#allocation4 + $0x168] sm:$0x1] %vm5399_vm13, %v17472_v63  ;;  %5416 = vst.msk [vmem:[#allocation4 + $0x180] sm:$0x1] %vm5399_vm13, %v17472_v63 }
 0x66c   : > { %5417 = vst.msk [vmem:[#allocation4 + $0x198] sm:$0x1] %vm5399_vm13, %v17472_v63  ;;  %5419 = vst.msk [vmem:[#allocation4 + $0x29] sm:$0x1] %vm5399_vm13, %v17472_v63 }
 0x66d   : > { %5420 = vst.msk [vmem:[#allocation4 + $0x41] sm:$0x1] %vm5399_vm13, %v17472_v63  ;;  %5421 = vst.msk [vmem:[#allocation4 + $0x59] sm:$0x1] %vm5399_vm13, %v17472_v63 }
 0x66e   : > { %5422 = vst.msk [vmem:[#allocation4 + $0x71] sm:$0x1] %vm5399_vm13, %v17472_v63  ;;  %5423 = vst.msk [vmem:[#allocation4 + $0x89] sm:$0x1] %vm5399_vm13, %v17472_v63 }
 0x66f   : > { %5424 = vst.msk [vmem:[#allocation4 + $0xa1] sm:$0x1] %vm5399_vm13, %v17472_v63  ;;  %5425 = vst.msk [vmem:[#allocation4 + $0xb9] sm:$0x1] %vm5399_vm13, %v17472_v63 }
 0x670   : > { %5426 = vst.msk [vmem:[#allocation4 + $0xd1] sm:$0x1] %vm5399_vm13, %v17472_v63  ;;  %5427 = vst.msk [vmem:[#allocation4 + $0xe9] sm:$0x1] %vm5399_vm13, %v17472_v63 }
 0x671   : > { %5428 = vst.msk [vmem:[#allocation4 + $0x101] sm:$0x1] %vm5399_vm13, %v17472_v63  ;;  %5429 = vst.msk [vmem:[#allocation4 + $0x119] sm:$0x1] %vm5399_vm13, %v17472_v63 }
 0x672   : > { %5430 = vst.msk [vmem:[#allocation4 + $0x131] sm:$0x1] %vm5399_vm13, %v17472_v63  ;;  %5431 = vst.msk [vmem:[#allocation4 + $0x149] sm:$0x1] %vm5399_vm13, %v17472_v63 }
 0x673   : > { %5432 = vst.msk [vmem:[#allocation4 + $0x161] sm:$0x1] %vm5399_vm13, %v17472_v63  ;;  %5433 = vst.msk [vmem:[#allocation4 + $0x179] sm:$0x1] %vm5399_vm13, %v17472_v63 }
 0x674   : > { %5434 = vst.msk [vmem:[#allocation4 + $0x191] sm:$0x1] %vm5399_vm13, %v17472_v63  ;;  %5435 = vst.msk [vmem:[#allocation4 + $0x1a9] sm:$0x1] %vm5399_vm13, %v17472_v63 }
 0x6fe   : > { %v9616_v6 = vpop.f32.mrb[16].mxu0 }
 0x6ff   : > { %v5289_v49 = vmul.f32 %v9616_v6, %v13943_v53  ;;  %v5122_v9 = vpop.f32.mrb[17].mxu0 }
 0x700   : > { %v5288_v60 = vmul.f32 %v13943_v53, %v5122_v9 }
 0x701   : > { %v5328_v7 = vadd.f32 %v13948_v18, %v5289_v49 }
 0x702   : > { %v5327_v43 = vadd.f32 %v13948_v18, %v5288_v60  ;;  %v9619_v21 = vpop.f32.mrb[18].mxu0 }
 0x703   : > { %v5360_v22 = vmax.f32 %v5328_v7, 0.0  ;;  %v5291_v54 = vmul.f32 %v9619_v21, %v13943_v53  ;;  %v5132_v4 = vpop.f32.mrb[19].mxu0 }
 0x704   : > { %v5359_v16 = vmax.f32 %v5327_v43, 0.0  ;;  %v5290_v32 = vmul.f32 %v13943_v53, %v5132_v4 }
 0x705   : > { %5438 = vst.msk [vmem:[#allocation4 + $0x21] sm:$0xff] %vm2540_vm4, %v5360_v22  ;;  %v5330_v24 = vadd.f32 %v13948_v18, %v5291_v54 }
 0x706   : > { %5437 = vst.msk [vmem:[#allocation4 + $0x19] sm:$0xff] %vm2540_vm4, %v5359_v16  ;;  %v5329_v15 = vadd.f32 %v13948_v18, %v5290_v32  ;;  %v9622_v42 = vpop.f32.mrb[20].mxu0 }
 0x707   : > { %v5362_v38 = vmax.f32 %v5330_v24, 0.0  ;;  %v5293_v14 = vmul.f32 %v9622_v42, %v13943_v53  ;;  %v5142_v12 = vpop.f32.mrb[21].mxu0 }
 0x708   : > { %v5361_v35 = vmax.f32 %v5329_v15, 0.0  ;;  %v5292_v62 = vmul.f32 %v13943_v53, %v5142_v12 }
 0x709   : > { %5440 = vst.msk [vmem:[#allocation4 + $0x39] sm:$0xff] %vm2540_vm4, %v5362_v38  ;;  %v5332_v58 = vadd.f32 %v13948_v18, %v5293_v14 }
 0x70a   : > { %5439 = vst.msk [vmem:[#allocation4 + $0x31] sm:$0xff] %vm2540_vm4, %v5361_v35  ;;  %v5331_v47 = vadd.f32 %v13948_v18, %v5292_v62  ;;  %v9625_v59 = vpop.f32.mrb[22].mxu0 }
 0x70b   : > { %v5364_v1 = vmax.f32 %v5332_v58, 0.0  ;;  %v5295_v61 = vmul.f32 %v9625_v59, %v13943_v53  ;;  %v5152_v52 = vpop.f32.mrb[23].mxu0 }
 0x70c   : > { %v5363_v55 = vmax.f32 %v5331_v47, 0.0  ;;  %v5294_v30 = vmul.f32 %v13943_v53, %v5152_v52  ;;  %v13968_v45 = vld [vmem:[#allocation4 + $0x21] sm:$0xff] }
 0x70d   : > { %5442 = vst.msk [vmem:[#allocation4 + $0x51] sm:$0xff] %vm2540_vm4, %v5364_v1  ;;  %v5334_v2 = vadd.f32 %v13948_v18, %v5295_v61  ;;  %5796 = vrot.lane.b32.xlu1 %v13968_v45, %s17096_s28  ;;  %v13974_v19 = vld [vmem:[#allocation4 + $0x19] sm:$0xff] }
 0x70e   : > { %5441 = vst.msk [vmem:[#allocation4 + $0x49] sm:$0xff] %vm2540_vm4, %v5363_v55  ;;  %v5333_v20 = vadd.f32 %v13948_v18, %v5294_v30  ;;  %5794 = vrot.lane.b32.xlu0 %v13974_v19, %s17096_s28  ;;  %v9628_v5 = vpop.f32.mrb[24].mxu0 }
 0x70f   : > { %v5366_v10 = vmax.f32 %v5334_v2, 0.0  ;;  %v5297_v51 = vmul.f32 %v9628_v5, %v13943_v53  ;;  %v5162_v17 = vpop.f32.mrb[25].mxu0 }
 0x710   : > { %v5365_v29 = vmax.f32 %v5333_v20, 0.0  ;;  %v5296_v37 = vmul.f32 %v13943_v53, %v5162_v17  ;;  %v13982_v3 = vld [vmem:[#allocation4 + $0x39] sm:$0xff] }
 0x711   : > { %5444 = vst.msk [vmem:[#allocation4 + $0x69] sm:$0xff] %vm2540_vm4, %v5366_v10  ;;  %v5336_v36 = vadd.f32 %v13948_v18, %v5297_v51  ;;  %5800 = vrot.lane.b32.xlu1 %v13982_v3, %s17096_s28  ;;  %v13988_v25 = vld [vmem:[#allocation4 + $0x31] sm:$0xff] }
 0x712   : > { %5443 = vst.msk [vmem:[#allocation4 + $0x61] sm:$0xff] %vm2540_vm4, %v5365_v29  ;;  %v5335_v56 = vadd.f32 %v13948_v18, %v5296_v37  ;;  %5798 = vrot.lane.b32.xlu0 %v13988_v25, %s17096_s28  ;;  %v9631_v26 = vpop.f32.mrb[26].mxu0 }
 0x713   : > { %v5368_v41 = vmax.f32 %v5336_v36, 0.0  ;;  %v5299_v50 = vmul.f32 %v9631_v26, %v13943_v53  ;;  %v5172_v28 = vpop.f32.mrb[27].mxu0 }
 0x714   : > { %v5367_v57 = vmax.f32 %v5335_v56, 0.0  ;;  %v5298_v46 = vmul.f32 %v13943_v53, %v5172_v28  ;;  %v13996_v8 = vld [vmem:[#allocation4 + $0x51] sm:$0xff] }
 0x715   : > { %5446 = vst.msk [vmem:[#allocation4 + $0x81] sm:$0xff] %vm2540_vm4, %v5368_v41  ;;  %v5338_v0 = vadd.f32 %v13948_v18, %v5299_v50  ;;  %5804 = vrot.lane.b32.xlu1 %v13996_v8, %s17096_s28  ;;  %v14002_v33 = vld [vmem:[#allocation4 + $0x49] sm:$0xff] }
 0x716   : > { %5445 = vst.msk [vmem:[#allocation4 + $0x79] sm:$0xff] %vm2540_vm4, %v5367_v57  ;;  %v5337_v39 = vadd.f32 %v13948_v18, %v5298_v46  ;;  %5802 = vrot.lane.b32.xlu0 %v14002_v33, %s17096_s28  ;;  %v9634_v11 = vpop.f32.mrb[28].mxu0 }
 0x717   : > { %v5370_v40 = vmax.f32 %v5338_v0, 0.0  ;;  %v5301_v27 = vmul.f32 %v9634_v11, %v13943_v53  ;;  %v5182_v23 = vpop.f32.mrb[29].mxu0 }
 0x718   : > { %v5369_v31 = vmax.f32 %v5337_v39, 0.0  ;;  %v5300_v48 = vmul.f32 %v13943_v53, %v5182_v23  ;;  %v14010_v34 = vld [vmem:[#allocation4 + $0x69] sm:$0xff] }
 0x719   : > { %5448 = vst.msk [vmem:[#allocation4 + $0x99] sm:$0xff] %vm2540_vm4, %v5370_v40  ;;  %v5340_v13 = vadd.f32 %v13948_v18, %v5301_v27  ;;  %5808 = vrot.lane.b32.xlu1 %v14010_v34, %s17096_s28  ;;  %v14016_v63 = vld [vmem:[#allocation4 + $0x61] sm:$0xff] }
 0x71a   : > { %5447 = vst.msk [vmem:[#allocation4 + $0x91] sm:$0xff] %vm2540_vm4, %v5369_v31  ;;  %v5339_v44 = vadd.f32 %v13948_v18, %v5300_v48  ;;  %5806 = vrot.lane.b32.xlu0 %v14016_v63, %s17096_s28  ;;  %v9637_v6 = vpop.f32.mrb[30].mxu0 }
 0x71b   : > { %v5372_v49 = vmax.f32 %v5340_v13, 0.0  ;;  %v5303_v9 = vmul.f32 %v9637_v6, %v13943_v53  ;;  %v5192_v60 = vpop.f32.mrb[31].mxu0 }
 0x71c   : > { %v5371_v7 = vmax.f32 %v5339_v44, 0.0  ;;  %v5302_v43 = vmul.f32 %v13943_v53, %v5192_v60  ;;  %v14024_v21 = vld [vmem:[#allocation4 + $0x81] sm:$0xff] }
 0x71d   : > { %5450 = vst.msk [vmem:[#allocation4 + $0xb1] sm:$0xff] %vm2540_vm4, %v5372_v49  ;;  %v5342_v22 = vadd.f32 %v13948_v18, %v5303_v9  ;;  %5812 = vrot.lane.b32.xlu1 %v14024_v21, %s17096_s28  ;;  %v14030_v54 = vld [vmem:[#allocation4 + $0x79] sm:$0xff] }
 0x71e   : > { %5449 = vst.msk [vmem:[#allocation4 + $0xa9] sm:$0xff] %vm2540_vm4, %v5371_v7  ;;  %v5341_v4 = vadd.f32 %v13948_v18, %v5302_v43  ;;  %5810 = vrot.lane.b32.xlu0 %v14030_v54, %s17096_s28  ;;  %v9640_v16 = vpop.f32.mrb[32].mxu0 }
 0x71f   : > { %v5374_v32 = vmax.f32 %v5342_v22, 0.0  ;;  %v5305_v24 = vmul.f32 %v9640_v16, %v13943_v53  ;;  %v5202_v15 = vpop.f32.mrb[33].mxu0 }
 0x720   : > { %v5373_v42 = vmax.f32 %v5341_v4, 0.0  ;;  %v5304_v38 = vmul.f32 %v13943_v53, %v5202_v15  ;;  %v14038_v14 = vld [vmem:[#allocation4 + $0x99] sm:$0xff] }
 0x721   : > { %5452 = vst.msk [vmem:[#allocation4 + $0xc9] sm:$0xff] %vm2540_vm4, %v5374_v32  ;;  %v5344_v12 = vadd.f32 %v13948_v18, %v5305_v24  ;;  %5816 = vrot.lane.b32.xlu1 %v14038_v14, %s17096_s28  ;;  %v14044_v35 = vld [vmem:[#allocation4 + $0x91] sm:$0xff] }
 0x722   : > { %5451 = vst.msk [vmem:[#allocation4 + $0xc1] sm:$0xff] %vm2540_vm4, %v5373_v42  ;;  %v5343_v62 = vadd.f32 %v13948_v18, %v5304_v38  ;;  %5814 = vrot.lane.b32.xlu0 %v14044_v35, %s17096_s28  ;;  %v9643_v58 = vpop.f32.mrb[34].mxu0 }
 0x723   : > { %v5376_v47 = vmax.f32 %v5344_v12, 0.0  ;;  %v5307_v59 = vmul.f32 %v9643_v58, %v13943_v53  ;;  %v5212_v1 = vpop.f32.mrb[35].mxu0 }
 0x724   : > { %v5375_v61 = vmax.f32 %v5343_v62, 0.0  ;;  %v5306_v52 = vmul.f32 %v13943_v53, %v5212_v1  ;;  %v14052_v55 = vld [vmem:[#allocation4 + $0xb1] sm:$0xff] }
 0x725   : > { %5454 = vst.msk [vmem:[#allocation4 + $0xe1] sm:$0xff] %vm2540_vm4, %v5376_v47  ;;  %v5346_v30 = vadd.f32 %v13948_v18, %v5307_v59  ;;  %5820 = vrot.lane.b32.xlu1 %v14052_v55, %s17096_s28  ;;  %v14058_v2 = vld [vmem:[#allocation4 + $0xa9] sm:$0xff] }
 0x726   : > { %5453 = vst.msk [vmem:[#allocation4 + $0xd9] sm:$0xff] %vm2540_vm4, %v5375_v61  ;;  %v5345_v20 = vadd.f32 %v13948_v18, %v5306_v52  ;;  %5818 = vrot.lane.b32.xlu0 %v14058_v2, %s17096_s28  ;;  %v9646_v5 = vpop.f32.mrb[36].mxu0 }
 0x727   : > { %v5378_v10 = vmax.f32 %v5346_v30, 0.0  ;;  %v5309_v51 = vmul.f32 %v9646_v5, %v13943_v53  ;;  %v5222_v17 = vpop.f32.mrb[37].mxu0 }
 0x728   : > { %v5377_v29 = vmax.f32 %v5345_v20, 0.0  ;;  %v5308_v37 = vmul.f32 %v13943_v53, %v5222_v17  ;;  %v14066_v36 = vld [vmem:[#allocation4 + $0xc9] sm:$0xff] }
 0x729   : > { %5456 = vst.msk [vmem:[#allocation4 + $0xf9] sm:$0xff] %vm2540_vm4, %v5378_v10  ;;  %v5348_v56 = vadd.f32 %v13948_v18, %v5309_v51  ;;  %5824 = vrot.lane.b32.xlu1 %v14066_v36, %s17096_s28  ;;  %v14072_v26 = vld [vmem:[#allocation4 + $0xc1] sm:$0xff] }
 0x72a   : > { %5455 = vst.msk [vmem:[#allocation4 + $0xf1] sm:$0xff] %vm2540_vm4, %v5377_v29  ;;  %v5347_v41 = vadd.f32 %v13948_v18, %v5308_v37  ;;  %5822 = vrot.lane.b32.xlu0 %v14072_v26, %s17096_s28  ;;  %v9649_v50 = vpop.f32.mrb[38].mxu0 }
 0x72b   : > { %v5380_v28 = vmax.f32 %v5348_v56, 0.0  ;;  %v5311_v57 = vmul.f32 %v9649_v50, %v13943_v53  ;;  %v5232_v46 = vpop.f32.mrb[39].mxu0 }
 0x72c   : > { %v5379_v0 = vmax.f32 %v5347_v41, 0.0  ;;  %v5310_v39 = vmul.f32 %v13943_v53, %v5232_v46  ;;  %v14080_v11 = vld [vmem:[#allocation4 + $0xe1] sm:$0xff] }
 0x72d   : > { %5458 = vst.msk [vmem:[#allocation4 + $0x111] sm:$0xff] %vm2540_vm4, %v5380_v28  ;;  %v5350_v40 = vadd.f32 %v13948_v18, %v5311_v57  ;;  %5828 = vrot.lane.b32.xlu1 %v14080_v11, %s17096_s28  ;;  %v14086_v27 = vld [vmem:[#allocation4 + $0xd9] sm:$0xff] }
 0x72e   : > { %5457 = vst.msk [vmem:[#allocation4 + $0x109] sm:$0xff] %vm2540_vm4, %v5379_v0  ;;  %v5349_v23 = vadd.f32 %v13948_v18, %v5310_v39  ;;  %5826 = vrot.lane.b32.xlu0 %v14086_v27, %s17096_s28 }
 0x72f   : > { %v9652_v31 = vpop.f32.mrb[40].mxu0  ;;  %v5382_v48 = vmax.f32 %v5350_v40, 0.0 }
 0x730   : > { %v5313_v13 = vmul.f32 %v9652_v31, %v13943_v53  ;;  %v5242_v44 = vpop.f32.mrb[41].mxu0  ;;  %v5381_v6 = vmax.f32 %v5349_v23, 0.0  ;;  %v14094_v9 = vld [vmem:[#allocation4 + $0xf9] sm:$0xff]  ;;  %v5534_v31 = vld [vmem:[#allocation4 + $0xa] sm:$0xff] }
 0x731   : > { %v5312_v49 = vmul.f32 %v13943_v53, %v5242_v44  ;;  %5460 = vst.msk [vmem:[#allocation4 + $0x129] sm:$0xff] %vm2540_vm4, %v5382_v48  ;;  %5832 = vrot.lane.b32.xlu1 %v14094_v9, %s17096_s28  ;;  %v14100_v7 = vld [vmem:[#allocation4 + $0xf1] sm:$0xff]  ;;  %v5533_v48 = vld [vmem:[#allocation4 + $0x2] sm:$0xff]  ;;  %v14172_v44 = vld [vmem:[#allocation4 + $0x1a] sm:$0xff] }
 0x732   : > { %v5352_v60 = vadd.f32 %v13948_v18, %v5313_v13  ;;  %5459 = vst.msk [vmem:[#allocation4 + $0x121] sm:$0xff] %vm2540_vm4, %v5381_v6  ;;  %5830 = vrot.lane.b32.xlu0 %v14100_v7, %s17096_s28  ;;  %v14168_v13 = vld [vmem:[#allocation4 + $0x22] sm:$0xff]  ;;  %v14176_v6 = vld [vmem:[#allocation4 + $0x3a] sm:$0xff] }
 0x733   : > { %v5351_v43 = vadd.f32 %v13948_v18, %v5312_v49  ;;  %v9655_v22 = vpop.f32.mrb[42].mxu0  ;;  %v14180_v49 = vld [vmem:[#allocation4 + $0x32] sm:$0xff] }
 0x734   : > { %v5384_v4 = vmax.f32 %v5352_v60, 0.0  ;;  %v5315_v16 = vmul.f32 %v9655_v22, %v13943_v53  ;;  %v5252_v32 = vpop.f32.mrb[43].mxu0  ;;  %v14108_v42 = vld [vmem:[#allocation4 + $0x111] sm:$0xff] }
 0x735   : > { %v5383_v24 = vmax.f32 %v5351_v43, 0.0  ;;  %v5314_v15 = vmul.f32 %v13943_v53, %v5252_v32  ;;  %5836 = vrot.lane.b32.xlu1 %v14108_v42, %s17096_s28  ;;  %v14114_v12 = vld [vmem:[#allocation4 + $0x109] sm:$0xff]  ;;  %v14184_v60 = vld [vmem:[#allocation4 + $0x52] sm:$0xff]  ;;  %v14204_v32 = vld [vmem:[#allocation4 + $0x7a] sm:$0xff] }
 0x736   : > { %5462 = vst.msk [vmem:[#allocation4 + $0x141] sm:$0xff] %vm2540_vm4, %v5384_v4  ;;  %v5354_v38 = vadd.f32 %v13948_v18, %v5315_v16  ;;  %5834 = vrot.lane.b32.xlu0 %v14114_v12, %s17096_s28  ;;  %v14188_v43 = vld [vmem:[#allocation4 + $0x4a] sm:$0xff]  ;;  %v14196_v4 = vld [vmem:[#allocation4 + $0x62] sm:$0xff] }
 0x737   : > { %5461 = vst.msk [vmem:[#allocation4 + $0x139] sm:$0xff] %vm2540_vm4, %v5383_v24  ;;  %v5353_v62 = vadd.f32 %v13948_v18, %v5314_v15  ;;  %v14192_v22 = vld [vmem:[#allocation4 + $0x6a] sm:$0xff]  ;;  %v14200_v16 = vld [vmem:[#allocation4 + $0x82] sm:$0xff]  ;;  %v14208_v24 = vld [vmem:[#allocation4 + $0x9a] sm:$0xff] }
 0x738   : > { %v5386_v47 = vmax.f32 %v5354_v38, 0.0  ;;  %v14122_v30 = vld [vmem:[#allocation4 + $0x129] sm:$0xff]  ;;  %v14212_v15 = vld [vmem:[#allocation4 + $0x92] sm:$0xff] }
 0x739   : > { %v9658_v58 = vpop.f32.mrb[44].mxu0  ;;  %v5385_v61 = vmax.f32 %v5353_v62, 0.0  ;;  %5840 = vrot.lane.b32.xlu1 %v14122_v30, %s17096_s28  ;;  %v14128_v5 = vld [vmem:[#allocation4 + $0x121] sm:$0xff]  ;;  %v14216_v38 = vld [vmem:[#allocation4 + $0xb2] sm:$0xff]  ;;  %v14220_v62 = vld [vmem:[#allocation4 + $0xaa] sm:$0xff] }
 0x73a   : > { %v5317_v59 = vmul.f32 %v9658_v58, %v13943_v53  ;;  %v5262_v1 = vpop.f32.mrb[45].mxu0  ;;  %5464 = vst.msk [vmem:[#allocation4 + $0x159] sm:$0xff] %vm2540_vm4, %v5386_v47  ;;  %5838 = vrot.lane.b32.xlu0 %v14128_v5, %s17096_s28  ;;  %v14224_v58 = vld [vmem:[#allocation4 + $0xca] sm:$0xff]  ;;  %v14228_v47 = vld [vmem:[#allocation4 + $0xc2] sm:$0xff] }
 0x73b   : > { %v5316_v52 = vmul.f32 %v13943_v53, %v5262_v1  ;;  %5463 = vst.msk [vmem:[#allocation4 + $0x151] sm:$0xff] %vm2540_vm4, %v5385_v61  ;;  %v14236_v1 = vld [vmem:[#allocation4 + $0xda] sm:$0xff] }
 0x73c   : > { %v5356_v20 = vadd.f32 %v13948_v18, %v5317_v59  ;;  %v14232_v59 = vld [vmem:[#allocation4 + $0xe2] sm:$0xff]  ;;  %v14240_v61 = vld [vmem:[#allocation4 + $0xfa] sm:$0xff] }
 0x73d   : > { %v5355_v10 = vadd.f32 %v13948_v18, %v5316_v52  ;;  %v9661_v51 = vpop.f32.mrb[46].mxu0  ;;  %v14136_v50 = vld [vmem:[#allocation4 + $0x141] sm:$0xff]  ;;  %v14244_v52 = vld [vmem:[#allocation4 + $0xf2] sm:$0xff] }
 0x73e   : > { %v5388_v17 = vmax.f32 %v5356_v20, 0.0  ;;  %v5319_v29 = vmul.f32 %v9661_v51, %v13943_v53  ;;  %v5272_v37 = vpop.f32.mrb[47].mxu0  ;;  %5844 = vrot.lane.b32.xlu1 %v14136_v50, %s17096_s28  ;;  %v14142_v57 = vld [vmem:[#allocation4 + $0x139] sm:$0xff]  ;;  %v5558_v51 = vld [vmem:[#allocation4 + $0x12a] sm:$0xff] }
 0x73f   : > { %v5387_v56 = vmax.f32 %v5355_v10, 0.0  ;;  %v5318_v41 = vmul.f32 %v13943_v53, %v5272_v37  ;;  %5842 = vrot.lane.b32.xlu0 %v14142_v57, %s17096_s28  ;;  %v14248_v20 = vld [vmem:[#allocation4 + $0x112] sm:$0xff]  ;;  %v14252_v10 = vld [vmem:[#allocation4 + $0x10a] sm:$0xff]  ;;  %v14263_v37 = vpop.permute.xlu0 %5790 }
 0x740   : > { %5466 = vst.msk [vmem:[#allocation4 + $0x171] sm:$0xff] %vm2540_vm4, %v5388_v17  ;;  %v5358_v28 = vadd.f32 %v13948_v18, %v5319_v29  ;;  %v14257_v17 = vld [vmem:[#allocation4 + $0x122] sm:$0xff]  ;;  %v14259_v29 = vpop.permute.xlu1 %5792  ;;  %17474 = vst [vmem:[#allocation60_spill] sm:$0xff] %v14263_v37 }
 0x741   : > { %5465 = vst.msk [vmem:[#allocation4 + $0x169] sm:$0xff] %vm2540_vm4, %v5387_v56  ;;  %v5357_v46 = vadd.f32 %v13948_v18, %v5318_v41  ;;  %v14148_v39 = vld [vmem:[#allocation4 + $0x159] sm:$0xff]  ;;  %17473 = vst [vmem:[#allocation80_spill] sm:$0xff] %v14259_v29  ;;  %v5560_v56 = vld [vmem:[#allocation4 + $0x142] sm:$0xff] }
 0x742   : > { %v5390_v0 = vmax.f32 %v5358_v28, 0.0  ;;  %5848 = vrot.lane.b32.xlu1 %v14148_v39, %s17096_s28  ;;  %v14153_v40 = vld [vmem:[#allocation4 + $0x151] sm:$0xff]  ;;  %v5559_v41 = vld [vmem:[#allocation4 + $0x13a] sm:$0xff] }
 0x743   : > { %v5389_v53 = vmax.f32 %v5357_v46, 0.0  ;;  %5846 = vrot.lane.b32.xlu0 %v14153_v40, %s17096_s28  ;;  %v14321_v29 = vld [vmem:[#allocation4 + $0x60] sm:$0xff] }
 0x744   : > { %5468 = vst.msk [vmem:[#allocation4 + $0x189] sm:$0xff] %vm2540_vm4, %v5390_v0  ;;  %v5562_v0 = vld [vmem:[#allocation4 + $0x15a] sm:$0xff]  ;;  %17493 = vst [vmem:[#allocation69_spill] sm:$0xff] %v14321_v29 }
 0x745   : > { %5467 = vst.msk [vmem:[#allocation4 + $0x181] sm:$0xff] %vm2540_vm4, %v5389_v53  ;;  %v5561_v53 = vld [vmem:[#allocation4 + $0x152] sm:$0xff] }
 0x747   : > { %v14158_v18 = vld [vmem:[#allocation4 + $0x171] sm:$0xff] }
 0x748   : > { %5852 = vrot.lane.b32.xlu1 %v14158_v18, %s17096_s28  ;;  %v14162_v23 = vld [vmem:[#allocation4 + $0x169] sm:$0xff] }
 0x749   : > { %5850 = vrot.lane.b32.xlu0 %v14162_v23, %s17096_s28 }
 0x74c   : > { %5920 = vrot.lane.b32.xlu1 %v5534_v31, %s17155_s1 }
 0x74d   : > { %5918 = vrot.lane.b32.xlu0 %v5533_v48, %s17155_s1 }
 0x750   : > { %5924 = vrot.lane.b32.xlu1 %v14168_v13, %s17155_s1 }
 0x751   : > { %5922 = vrot.lane.b32.xlu0 %v14172_v44, %s17155_s1 }
 0x754   : > { %5928 = vrot.lane.b32.xlu1 %v14176_v6, %s17155_s1 }
 0x755   : > { %5926 = vrot.lane.b32.xlu0 %v14180_v49, %s17155_s1 }
 0x758   : > { %5932 = vrot.lane.b32.xlu1 %v14184_v60, %s17155_s1 }
 0x759   : > { %5930 = vrot.lane.b32.xlu0 %v14188_v43, %s17155_s1 }
 0x75c   : > { %5936 = vrot.lane.b32.xlu1 %v14192_v22, %s17155_s1 }
 0x75d   : > { %5934 = vrot.lane.b32.xlu0 %v14196_v4, %s17155_s1 }
 0x760   : > { %5940 = vrot.lane.b32.xlu1 %v14200_v16, %s17155_s1 }
 0x761   : > { %5938 = vrot.lane.b32.xlu0 %v14204_v32, %s17155_s1 }
 0x764   : > { %5944 = vrot.lane.b32.xlu1 %v14208_v24, %s17155_s1 }
 0x765   : > { %5942 = vrot.lane.b32.xlu0 %v14212_v15, %s17155_s1 }
 0x768   : > { %5948 = vrot.lane.b32.xlu1 %v14216_v38, %s17155_s1 }
 0x769   : > { %5946 = vrot.lane.b32.xlu0 %v14220_v62, %s17155_s1 }
 0x76c   : > { %5952 = vrot.lane.b32.xlu1 %v14224_v58, %s17155_s1 }
 0x76d   : > { %5950 = vrot.lane.b32.xlu0 %v14228_v47, %s17155_s1 }
 0x770   : > { %5956 = vrot.lane.b32.xlu1 %v14232_v59, %s17155_s1 }
 0x771   : > { %5954 = vrot.lane.b32.xlu0 %v14236_v1, %s17155_s1 }
 0x774   : > { %5960 = vrot.lane.b32.xlu1 %v14240_v61, %s17155_s1 }
 0x775   : > { %5958 = vrot.lane.b32.xlu0 %v14244_v52, %s17155_s1 }
 0x778   : > { %5964 = vrot.lane.b32.xlu1 %v14248_v20, %s17155_s1 }
 0x779   : > { %5962 = vrot.lane.b32.xlu0 %v14252_v10, %s17155_s1 }
 0x77c   : > { %5968 = vrot.lane.b32.xlu1 %v5558_v51, %s17155_s1  ;;  %v5564_v51 = vld [vmem:[#allocation4 + $0x172] sm:$0xff] }
 0x77d   : > { %5966 = vrot.lane.b32.xlu0 %v14257_v17, %s17155_s1 }
 0x77f   : > { %v14267_v28 = vpop.permute.xlu1 %5796 }
 0x780   : > { %5972 = vrot.lane.b32.xlu1 %v5560_v56, %s17155_s1  ;;  %17475 = vst [vmem:[#allocation169_spill] sm:$0xff] %v14267_v28  ;;  %v14269_v46 = vpop.permute.xlu0 %5794  ;;  %v5563_v56 = vld [vmem:[#allocation4 + $0x16a] sm:$0xff]  ;;  %v14281_v28 = vld [vmem:[#allocation4 + $0x20] sm:$0xff] }
 0x781   : > { %5970 = vrot.lane.b32.xlu0 %v5559_v41, %s17155_s1  ;;  %17476 = vst [vmem:[#allocation140_spill] sm:$0xff] %v14269_v46  ;;  %17480 = vst [vmem:[#allocation145_spill] sm:$0xff] %v14281_v28 }
 0x783   : > { %v14273_v31 = vpop.permute.xlu1 %5800 }
 0x784   : > { %5976 = vrot.lane.b32.xlu1 %v5562_v0, %s17155_s1  ;;  %17477 = vst [vmem:[#allocation52_spill] sm:$0xff] %v14273_v31  ;;  %v14275_v48 = vpop.permute.xlu0 %5798  ;;  %v14285_v0 = vld [vmem:[#allocation4 + $0x18] sm:$0xff] }
 0x785   : > { %5974 = vrot.lane.b32.xlu0 %v5561_v53, %s17155_s1  ;;  %17478 = vst [vmem:[#allocation48_spill] sm:$0xff] %v14275_v48  ;;  %17482 = vst [vmem:[#allocation44_spill] sm:$0xff] %v14285_v0 }
 0x787   : > { %v14279_v41 = vpop.permute.xlu1 %5804 }
 0x788   : > { %5980 = vrot.lane.b32.xlu1 %v5564_v51, %s17155_s1  ;;  %17479 = vst [vmem:[#allocation160_spill] sm:$0xff] %v14279_v41  ;;  %v14283_v46 = vpop.permute.xlu0 %5802  ;;  %v14293_v51 = vld [vmem:[#allocation4 + $0x38] sm:$0xff] }
 0x789   : > { %5978 = vrot.lane.b32.xlu0 %v5563_v56, %s17155_s1  ;;  %17481 = vst [vmem:[#allocation55_spill] sm:$0xff] %v14283_v46  ;;  %17484 = vst [vmem:[#allocation114_spill] sm:$0xff] %v14293_v51  ;;  %v14297_v56 = vld [vmem:[#allocation4 + $0x30] sm:$0xff] }
 0x78a   : > { %v14305_v46 = vld [vmem:[#allocation4 + $0x50] sm:$0xff] }
 0x78b   : > { %v14291_v53 = vpop.permute.xlu1 %5808  ;;  %17487 = vst [vmem:[#allocation47_spill] sm:$0xff] %v14305_v46 }
 0x78c   : > { %6048 = vrot.lane.b32.xlu1 %v14281_v28, %s17216_s29  ;;  %17483 = vst [vmem:[#allocation177_spill] sm:$0xff] %v14291_v53  ;;  %v14295_v31 = vpop.permute.xlu0 %5806  ;;  %v14309_v28 = vld [vmem:[#allocation4 + $0x48] sm:$0xff] }
 0x78d   : > { %6046 = vrot.lane.b32.xlu0 %v14285_v0, %s17216_s29  ;;  %17485 = vst [vmem:[#allocation59_spill] sm:$0xff] %v14295_v31  ;;  %17489 = vst [vmem:[#allocation179_spill] sm:$0xff] %v14309_v28  ;;  %v14317_v31 = vld [vmem:[#allocation4 + $0x68] sm:$0xff] }
 0x78e   : > { %17491 = vst [vmem:[#allocation102_spill] sm:$0xff] %v14317_v31 }
 0x78f   : > { %v14303_v41 = vpop.permute.xlu1 %5812 }
 0x790   : > { %6052 = vrot.lane.b32.xlu1 %v14293_v51, %s17216_s29  ;;  %17486 = vst [vmem:[#allocation215_spill] sm:$0xff] %v14303_v41  ;;  %v14307_v48 = vpop.permute.xlu0 %5810  ;;  %v5495_v51 = vld [vmem:[#allocation4 + $0x138] sm:$0xff] }
 0x791   : > { %6050 = vrot.lane.b32.xlu0 %v14297_v56, %s17216_s29  ;;  %17488 = vst [vmem:[#allocation172_spill] sm:$0xff] %v14307_v48  ;;  %v14329_v48 = vld [vmem:[#allocation4 + $0x80] sm:$0xff] }
 0x792   : > { %17495 = vst [vmem:[#allocation72_spill] sm:$0xff] %v14329_v48 }
 0x793   : > { %v14315_v53 = vpop.permute.xlu1 %5816 }
 0x794   : > { %6056 = vrot.lane.b32.xlu1 %v14305_v46, %s17216_s29  ;;  %17490 = vst [vmem:[#allocation186_spill] sm:$0xff] %v14315_v53  ;;  %v14319_v0 = vpop.permute.xlu0 %5814  ;;  %v14333_v46 = vld [vmem:[#allocation4 + $0x78] sm:$0xff] }
 0x795   : > { %6054 = vrot.lane.b32.xlu0 %v14309_v28, %s17216_s29  ;;  %17492 = vst [vmem:[#allocation202_spill] sm:$0xff] %v14319_v0  ;;  %17497 = vst [vmem:[#allocation219_spill] sm:$0xff] %v14333_v46  ;;  %v14341_v53 = vld [vmem:[#allocation4 + $0x98] sm:$0xff] }
 0x796   : > { %17499 = vst [vmem:[#allocation182_spill] sm:$0xff] %v14341_v53 }
 0x797   : > { %v14327_v41 = vpop.permute.xlu1 %5820 }
 0x798   : > { %6060 = vrot.lane.b32.xlu1 %v14317_v31, %s17216_s29  ;;  %17494 = vst [vmem:[#allocation109_spill] sm:$0xff] %v14327_v41  ;;  %v14331_v37 = vpop.permute.xlu0 %5818  ;;  %v14353_v41 = vld [vmem:[#allocation4 + $0xb0] sm:$0xff] }
 0x799   : > { %6058 = vrot.lane.b32.xlu0 %v14321_v29, %s17216_s29  ;;  %17496 = vst [vmem:[#allocation121_spill] sm:$0xff] %v14331_v37  ;;  %v14345_v29 = vld [vmem:[#allocation4 + $0x90] sm:$0xff]  ;;  %17503 = vst [vmem:[#allocation73_spill] sm:$0xff] %v14353_v41 }
 0x79a   : > { %17501 = vst [vmem:[#allocation42_spill] sm:$0xff] %v14345_v29 }
 0x79b   : > { %v14339_v0 = vpop.permute.xlu1 %5824 }
 0x79c   : > { %6064 = vrot.lane.b32.xlu1 %v14329_v48, %s17216_s29  ;;  %17498 = vst [vmem:[#allocation51_spill] sm:$0xff] %v14339_v0  ;;  %v14343_v31 = vpop.permute.xlu0 %5822  ;;  %v14365_v0 = vld [vmem:[#allocation4 + $0xc8] sm:$0xff] }
 0x79d   : > { %6062 = vrot.lane.b32.xlu0 %v14333_v46, %s17216_s29  ;;  %17500 = vst [vmem:[#allocation152_spill] sm:$0xff] %v14343_v31  ;;  %v14357_v46 = vld [vmem:[#allocation4 + $0xa8] sm:$0xff]  ;;  %17507 = vst [vmem:[#allocation67_spill] sm:$0xff] %v14365_v0 }
 0x79e   : > { %17505 = vst [vmem:[#allocation85_spill] sm:$0xff] %v14357_v46 }
 0x79f   : > { %v14351_v37 = vpop.permute.xlu1 %5828 }
 0x7a0   : > { %6068 = vrot.lane.b32.xlu1 %v14341_v53, %s17216_s29  ;;  %17502 = vst [vmem:[#allocation163_spill] sm:$0xff] %v14351_v37  ;;  %v14355_v48 = vpop.permute.xlu0 %5826  ;;  %v14377_v37 = vld [vmem:[#allocation4 + $0xe0] sm:$0xff] }
 0x7a1   : > { %6066 = vrot.lane.b32.xlu0 %v14345_v29, %s17216_s29  ;;  %17504 = vst [vmem:[#allocation176_spill] sm:$0xff] %v14355_v48  ;;  %v14369_v29 = vld [vmem:[#allocation4 + $0xc0] sm:$0xff]  ;;  %17511 = vst [vmem:[#allocation46_spill] sm:$0xff] %v14377_v37 }
 0x7a2   : > { %17509 = vst [vmem:[#allocation151_spill] sm:$0xff] %v14369_v29 }
 0x7a3   : > { %v14363_v31 = vpop.permute.xlu1 %5832 }
 0x7a4   : > { %6072 = vrot.lane.b32.xlu1 %v14353_v41, %s17216_s29  ;;  %17506 = vst [vmem:[#allocation143_spill] sm:$0xff] %v14363_v31  ;;  %v14367_v53 = vpop.permute.xlu0 %5830  ;;  %v14389_v31 = vld [vmem:[#allocation4 + $0xf8] sm:$0xff] }
 0x7a5   : > { %6070 = vrot.lane.b32.xlu0 %v14357_v46, %s17216_s29  ;;  %17508 = vst [vmem:[#allocation191_spill] sm:$0xff] %v14367_v53  ;;  %v14381_v46 = vld [vmem:[#allocation4 + $0xd8] sm:$0xff]  ;;  %17515 = vst [vmem:[#allocation165_spill] sm:$0xff] %v14389_v31 }
 0x7a6   : > { %17513 = vst [vmem:[#allocation184_spill] sm:$0xff] %v14381_v46 }
 0x7a7   : > { %v14375_v48 = vpop.permute.xlu1 %5836 }
 0x7a8   : > { %6076 = vrot.lane.b32.xlu1 %v14365_v0, %s17216_s29  ;;  %17510 = vst [vmem:[#allocation64_spill] sm:$0xff] %v14375_v48  ;;  %v14379_v41 = vpop.permute.xlu0 %5834  ;;  %v5492_v48 = vld [vmem:[#allocation4 + $0x110] sm:$0xff] }
 0x7a9   : > { %6074 = vrot.lane.b32.xlu0 %v14369_v29, %s17216_s29  ;;  %17512 = vst [vmem:[#allocation139_spill] sm:$0xff] %v14379_v41  ;;  %v14393_v29 = vld [vmem:[#allocation4 + $0xf0] sm:$0xff] }
 0x7aa   : > { %17517 = vst [vmem:[#allocation113_spill] sm:$0xff] %v14393_v29 }
 0x7ab   : > { %v14387_v53 = vpop.permute.xlu1 %5840 }
 0x7ac   : > { %6080 = vrot.lane.b32.xlu1 %v14377_v37, %s17216_s29  ;;  %17514 = vst [vmem:[#allocation192_spill] sm:$0xff] %v14387_v53  ;;  %v14391_v0 = vpop.permute.xlu0 %5838  ;;  %v5494_v53 = vld [vmem:[#allocation4 + $0x128] sm:$0xff] }
 0x7ad   : > { %6078 = vrot.lane.b32.xlu0 %v14381_v46, %s17216_s29  ;;  %17516 = vst [vmem:[#allocation208_spill] sm:$0xff] %v14391_v0  ;;  %v14403_v46 = vld [vmem:[#allocation4 + $0x108] sm:$0xff] }
 0x7ae   : > { %17520 = vst [vmem:[#allocation148_spill] sm:$0xff] %v14403_v46 }
 0x7b0   : > { %6084 = vrot.lane.b32.xlu1 %v14389_v31, %s17216_s29  ;;  %v14399_v41 = vpop.permute.xlu1 %5844  ;;  %v5493_v31 = vld [vmem:[#allocation4 + $0x120] sm:$0xff] }
 0x7b1   : > { %6082 = vrot.lane.b32.xlu0 %v14393_v29, %s17216_s29  ;;  %17518 = vst [vmem:[#allocation56_spill] sm:$0xff] %v14399_v41  ;;  %v14401_v37 = vpop.permute.xlu0 %5842 }
 0x7b2   : > { %17519 = vst [vmem:[#allocation125_spill] sm:$0xff] %v14401_v37  ;;  %v5496_v37 = vld [vmem:[#allocation4 + $0x140] sm:$0xff] }
 0x7b4   : > { %6088 = vrot.lane.b32.xlu1 %v5492_v48, %s17216_s29  ;;  %v14408_v0 = vpop.permute.xlu1 %5848 }
 0x7b5   : > { %6086 = vrot.lane.b32.xlu0 %v14403_v46, %s17216_s29  ;;  %17521 = vst [vmem:[#allocation63_spill] sm:$0xff] %v14408_v0  ;;  %v14410_v28 = vpop.permute.xlu0 %5846  ;;  %v5498_v0 = vld [vmem:[#allocation4 + $0x158] sm:$0xff] }
 0x7b6   : > { %17522 = vst [vmem:[#allocation185_spill] sm:$0xff] %v14410_v28  ;;  %v5497_v28 = vld [vmem:[#allocation4 + $0x150] sm:$0xff] }
 0x7b8   : > { %6092 = vrot.lane.b32.xlu1 %v5494_v53, %s17216_s29  ;;  %v5500_v53 = vld [vmem:[#allocation4 + $0x170] sm:$0xff] }
 0x7b9   : > { %6090 = vrot.lane.b32.xlu0 %v5493_v31, %s17216_s29 }
 0x7ba   : > { %v14414_v41 = vpop.permute.xlu1 %5852 }
 0x7bb   : > { %17523 = vst [vmem:[#allocation154_spill] sm:$0xff] %v14414_v41  ;;  %v14416_v29 = vpop.permute.xlu0 %5850 }
 0x7bc   : > { %17524 = vst [vmem:[#allocation188_spill] sm:$0xff] %v14416_v29  ;;  %6096 = vrot.lane.b32.xlu1 %v5496_v37, %s17216_s29  ;;  %v5499_v29 = vld [vmem:[#allocation4 + $0x168] sm:$0xff] }
 0x7bd   : > { %6094 = vrot.lane.b32.xlu0 %v5495_v51, %s17216_s29 }
 0x7be   : > { %v14420_v48 = vpop.permute.xlu1 %5920 }
 0x7bf   : > { %17525 = vst [vmem:[#allocation97_spill] sm:$0xff] %v14420_v48  ;;  %v14422_v46 = vpop.permute.xlu0 %5918  ;;  %v5596_v48 = vld [vmem:[#allocation4 + $0x188] sm:$0xff] }
 0x7c0   : > { %6100 = vrot.lane.b32.xlu1 %v5498_v0, %s17216_s29  ;;  %v5595_v0 = vld [vmem:[#allocation4 + $0x180] sm:$0xff] }
 0x7c1   : > { %6098 = vrot.lane.b32.xlu0 %v5497_v28, %s17216_s29 }
 0x7c2   : > { %v14426_v31 = vpop.permute.xlu1 %5924 }
 0x7c3   : > { %17526 = vst [vmem:[#allocation86_spill] sm:$0xff] %v14426_v31  ;;  %v14428_v41 = vpop.permute.xlu0 %5922 }
 0x7c4   : > { %6104 = vrot.lane.b32.xlu1 %v5500_v53, %s17216_s29 }
 0x7c5   : > { %6102 = vrot.lane.b32.xlu0 %v5499_v29, %s17216_s29 }
 0x7c6   : > { %v14432_v37 = vpop.permute.xlu1 %5928 }
 0x7c7   : > { %v14434_v51 = vpop.permute.xlu0 %5926 }
 0x7c8   : > { %6108 = vrot.lane.b32.xlu1 %v5596_v48, %s17216_s29 }
 0x7c9   : > { %6106 = vrot.lane.b32.xlu0 %v5595_v0, %s17216_s29 }
 0x7ca   : > { %v14438_v28 = vpop.permute.xlu1 %5932 }
 0x7cb   : > { %v14440_v31 = vpop.permute.xlu0 %5930 }
 0x7cc   : > { %6176 = vrot.lane.b32.xlu1 %v13968_v45, %s17267_s26 }
 0x7cd   : > { %6174 = vrot.lane.b32.xlu0 %v13974_v19, %s17267_s26 }
 0x7ce   : > { %v14446_v29 = vpop.permute.xlu1 %5936 }
 0x7cf   : > { %v14448_v53 = vpop.permute.xlu0 %5934 }
 0x7d0   : > { %6180 = vrot.lane.b32.xlu1 %v13982_v3, %s17267_s26 }
 0x7d1   : > { %6178 = vrot.lane.b32.xlu0 %v13988_v25, %s17267_s26 }
 0x7d2   : > { %v14454_v48 = vpop.permute.xlu1 %5940 }
 0x7d3   : > { %v14456_v0 = vpop.permute.xlu0 %5938 }
 0x7d4   : > { %6184 = vrot.lane.b32.xlu1 %v13996_v8, %s17267_s26 }
 0x7d5   : > { %6182 = vrot.lane.b32.xlu0 %v14002_v33, %s17267_s26 }
 0x7d6   : > { %v14462_v45 = vpop.permute.xlu1 %5944 }
 0x7d7   : > { %17527 = vst [vmem:[#allocation196_spill] sm:$0xff] %v14462_v45  ;;  %v14464_v19 = vpop.permute.xlu0 %5942  ;;  %v17615_v45 = vld [vmem:[#allocation60_spill] sm:$0xff] }
 0x7d8   : > { %6188 = vrot.lane.b32.xlu1 %v14010_v34, %s17267_s26 }
 0x7d9   : > { %6186 = vrot.lane.b32.xlu0 %v14016_v63, %s17267_s26 }
 0x7da   : > { %v14470_v3 = vpop.permute.xlu1 %5948 }
 0x7db   : > { %17528 = vst [vmem:[#allocation79_spill] sm:$0xff] %v14470_v3  ;;  %v14472_v25 = vpop.permute.xlu0 %5946  ;;  %v5469_v3 = vld [vmem:[#allocation4] sm:$0xff] }
 0x7dc   : > { %17529 = vst [vmem:[#allocation212_spill] sm:$0xff] %v14472_v25  ;;  %6192 = vrot.lane.b32.xlu1 %v14024_v21, %s17267_s26  ;;  %v5710_v25 = vld [vmem:[#allocation4 + $0xf1] sm:$0xff] }
 0x7dd   : > { %6190 = vrot.lane.b32.xlu0 %v14030_v54, %s17267_s26 }
 0x7de   : > { %v14478_v8 = vpop.permute.xlu1 %5952 }
 0x7df   : > { %17530 = vst [vmem:[#allocation167_spill] sm:$0xff] %v14478_v8  ;;  %v14480_v33 = vpop.permute.xlu0 %5950 }
 0x7e0   : > { %17531 = vst [vmem:[#allocation68_spill] sm:$0xff] %v14480_v33  ;;  %6196 = vrot.lane.b32.xlu1 %v14038_v14, %s17267_s26  ;;  %v17603_v33 = vld [vmem:[#allocation113_spill] sm:$0xff] }
 0x7e1   : > { %6194 = vrot.lane.b32.xlu0 %v14044_v35, %s17267_s26 }
 0x7e2   : > { %v14486_v34 = vpop.permute.xlu1 %5956 }
 0x7e3   : > { %17532 = vst [vmem:[#allocation49_spill] sm:$0xff] %v14486_v34  ;;  %v14488_v63 = vpop.permute.xlu0 %5954 }
 0x7e4   : > { %17533 = vst [vmem:[#allocation195_spill] sm:$0xff] %v14488_v63  ;;  %6200 = vrot.lane.b32.xlu1 %v14052_v55, %s17267_s26  ;;  %v5740_v63 = vld [vmem:[#allocation4 + $0xda] sm:$0xff] }
 0x7e5   : > { %6198 = vrot.lane.b32.xlu0 %v14058_v2, %s17267_s26 }
 0x7e6   : > { %v14494_v21 = vpop.permute.xlu1 %5960 }
 0x7e7   : > { %17534 = vst [vmem:[#allocation209_spill] sm:$0xff] %v14494_v21  ;;  %v14496_v54 = vpop.permute.xlu0 %5958 }
 0x7e8   : > { %17535 = vst [vmem:[#allocation213_spill] sm:$0xff] %v14496_v54  ;;  %6204 = vrot.lane.b32.xlu1 %v14066_v36, %s17267_s26  ;;  %v5708_v54 = vld [vmem:[#allocation4 + $0xd9] sm:$0xff] }
 0x7e9   : > { %6202 = vrot.lane.b32.xlu0 %v14072_v26, %s17267_s26 }
 0x7ea   : > { %v14502_v14 = vpop.permute.xlu1 %5964 }
 0x7eb   : > { %17536 = vst [vmem:[#allocation229_spill] sm:$0xff] %v14502_v14  ;;  %v14504_v35 = vpop.permute.xlu0 %5962 }
 0x7ec   : > { %17537 = vst [vmem:[#allocation90_spill] sm:$0xff] %v14504_v35  ;;  %6208 = vrot.lane.b32.xlu1 %v14080_v11, %s17267_s26  ;;  %v17599_v35 = vld [vmem:[#allocation184_spill] sm:$0xff] }
 0x7ed   : > { %6206 = vrot.lane.b32.xlu0 %v14086_v27, %s17267_s26 }
 0x7ee   : > { %v14510_v55 = vpop.permute.xlu1 %5968 }
 0x7ef   : > { %17538 = vst [vmem:[#allocation137_spill] sm:$0xff] %v14510_v55  ;;  %v14512_v2 = vpop.permute.xlu0 %5966  ;;  %v5738_v55 = vld [vmem:[#allocation4 + $0xc2] sm:$0xff] }
 0x7f0   : > { %17539 = vst [vmem:[#allocation227_spill] sm:$0xff] %v14512_v2  ;;  %6212 = vrot.lane.b32.xlu1 %v14094_v9, %s17267_s26 }
 0x7f1   : > { %6210 = vrot.lane.b32.xlu0 %v14100_v7, %s17267_s26 }
 0x7f2   : > { %v14518_v36 = vpop.permute.xlu1 %5972 }
 0x7f3   : > { %17540 = vst [vmem:[#allocation92_spill] sm:$0xff] %v14518_v36  ;;  %v14520_v26 = vpop.permute.xlu0 %5970 }
 0x7f4   : > { %17541 = vst [vmem:[#allocation126_spill] sm:$0xff] %v14520_v26  ;;  %6216 = vrot.lane.b32.xlu1 %v14108_v42, %s17267_s26 }
 0x7f5   : > { %6214 = vrot.lane.b32.xlu0 %v14114_v12, %s17267_s26 }
 0x7f6   : > { %v14526_v11 = vpop.permute.xlu1 %5976 }
 0x7f7   : > { %17542 = vst [vmem:[#allocation150_spill] sm:$0xff] %v14526_v11  ;;  %v14528_v27 = vpop.permute.xlu0 %5974 }
 0x7f8   : > { %17543 = vst [vmem:[#allocation75_spill] sm:$0xff] %v14528_v27  ;;  %6220 = vrot.lane.b32.xlu1 %v14122_v30, %s17267_s26 }
 0x7f9   : > { %6218 = vrot.lane.b32.xlu0 %v14128_v5, %s17267_s26 }
 0x7fa   : > { %v14534_v9 = vpop.permute.xlu1 %5980 }
 0x7fb   : > { %17544 = vst [vmem:[#allocation65_spill] sm:$0xff] %v14534_v9  ;;  %v14536_v7 = vpop.permute.xlu0 %5978  ;;  %v5628_v9 = vld [vmem:[#allocation4 + $0x189] sm:$0xff] }
 0x7fc   : > { %17545 = vst [vmem:[#allocation156_spill] sm:$0xff] %v14536_v7  ;;  %6224 = vrot.lane.b32.xlu1 %v14136_v50, %s17267_s26 }
 0x7fd   : > { %6222 = vrot.lane.b32.xlu0 %v14142_v57, %s17267_s26 }
 0x7fe   : > { %v14542_v42 = vpop.permute.xlu1 %6048 }
 0x7ff   : > { %v14544_v12 = vpop.permute.xlu0 %6046 }
 0x800   : > { %6228 = vrot.lane.b32.xlu1 %v14148_v39, %s17267_s26  ;;  %v5627_v39 = vld [vmem:[#allocation4 + $0x181] sm:$0xff] }
 0x801   : > { %6226 = vrot.lane.b32.xlu0 %v14153_v40, %s17267_s26 }
 0x802   : > { %v14550_v30 = vpop.permute.xlu1 %6052 }
 0x803   : > { %v14552_v5 = vpop.permute.xlu0 %6050 }
 0x804   : > { %6232 = vrot.lane.b32.xlu1 %v14158_v18, %s17267_s26 }
 0x805   : > { %6230 = vrot.lane.b32.xlu0 %v14162_v23, %s17267_s26 }
 0x806   : > { %v14558_v50 = vpop.permute.xlu1 %6056 }
 0x807   : > { %v14560_v57 = vpop.permute.xlu0 %6054 }
 0x808   : > { %6236 = vrot.lane.b32.xlu1 %v5628_v9, %s17267_s26 }
 0x809   : > { %6234 = vrot.lane.b32.xlu0 %v5627_v39, %s17267_s26  ;;  %s10028_s26 = smov 64  }
 0x80a   : > { %v14564_v40 = vpop.permute.xlu1 %6060 }
 0x80b   : > { %v14566_v7 = vpop.permute.xlu0 %6058 }
 0x80c   : > { %6304 = vrot.lane.b32.xlu1 %v14168_v13, %s10025_s19 }
 0x80d   : > { %6302 = vrot.lane.b32.xlu0 %v14172_v44, %s10025_s19 }
 0x80e   : > { %v14572_v18 = vpop.permute.xlu1 %6064 }
 0x80f   : > { %v14574_v23 = vpop.permute.xlu0 %6062 }
 0x810   : > { %6308 = vrot.lane.b32.xlu1 %v14176_v6, %s10025_s19 }
 0x811   : > { %6306 = vrot.lane.b32.xlu0 %v14180_v49, %s10025_s19 }
 0x812   : > { %v14580_v9 = vpop.permute.xlu1 %6068 }
 0x813   : > { %v14582_v39 = vpop.permute.xlu0 %6066 }
 0x814   : > { %6312 = vrot.lane.b32.xlu1 %v14184_v60, %s10025_s19 }
 0x815   : > { %6310 = vrot.lane.b32.xlu0 %v14188_v43, %s10025_s19 }
 0x816   : > { %v14588_v13 = vpop.permute.xlu1 %6072 }
 0x817   : > { %17546 = vst [vmem:[#allocation183_spill] sm:$0xff] %v14588_v13  ;;  %v14590_v44 = vpop.permute.xlu0 %6070 }
 0x818   : > { %17547 = vst [vmem:[#allocation54_spill] sm:$0xff] %v14590_v44  ;;  %6316 = vrot.lane.b32.xlu1 %v14192_v22, %s10025_s19  ;;  %v5714_v44 = vld [vmem:[#allocation4 + $0x121] sm:$0xff] }
 0x819   : > { %6314 = vrot.lane.b32.xlu0 %v14196_v4, %s10025_s19 }
 0x81a   : > { %v14596_v11 = vpop.permute.xlu1 %6076 }
 0x81b   : > { %17548 = vst [vmem:[#allocation94_spill] sm:$0xff] %v14596_v11  ;;  %v14598_v27 = vpop.permute.xlu0 %6074 }
 0x81c   : > { %17549 = vst [vmem:[#allocation180_spill] sm:$0xff] %v14598_v27  ;;  %6320 = vrot.lane.b32.xlu1 %v14200_v16, %s10025_s19 }
 0x81d   : > { %6318 = vrot.lane.b32.xlu0 %v14204_v32, %s10025_s19 }
 0x81e   : > { %v14604_v36 = vpop.permute.xlu1 %6080 }
 0x81f   : > { %17550 = vst [vmem:[#allocation231_spill] sm:$0xff] %v14604_v36  ;;  %v14606_v26 = vpop.permute.xlu0 %6078  ;;  %v17575_v36 = vld [vmem:[#allocation219_spill] sm:$0xff] }
 0x820   : > { %17551 = vst [vmem:[#allocation78_spill] sm:$0xff] %v14606_v26  ;;  %6324 = vrot.lane.b32.xlu1 %v14208_v24, %s10025_s19  ;;  %v7042_v24 = vld [vmem:[%s16559_s10] sm:$0xff] }
 0x821   : > { %6322 = vrot.lane.b32.xlu0 %v14212_v15, %s10025_s19  ;;  %v7043_v15 = vld [vmem:[%s16559_s10 + $0x8] sm:$0xff] }
 0x822   : > { %v14612_v22 = vpop.permute.xlu1 %6084 }
 0x823   : > { %17552 = vst [vmem:[#allocation217_spill] sm:$0xff] %v14612_v22  ;;  %v14614_v11 = vpop.permute.xlu0 %6082 }
 0x824   : > { %17553 = vst [vmem:[#allocation228_spill] sm:$0xff] %v14614_v11  ;;  %6328 = vrot.lane.b32.xlu1 %v14216_v38, %s10025_s19  ;;  %v9794_v11 = vpack.c.bf16 %v7043_v15, %v7042_v24  ;;  %v7047_v15 = vld [vmem:[%s16559_s10 + $0x28] sm:$0xff] }
 0x825   : > { %6326 = vrot.lane.b32.xlu0 %v14220_v62, %s10025_s19 }
 0x826   : > { %v14620_v16 = vpop.permute.xlu1 %6088  ;;  %9795 = vmatprep.subr.bf16.mxu1 %v9794_v11 }
 0x827   : > { %17554 = vst [vmem:[#allocation99_spill] sm:$0xff] %v14620_v16  ;;  %v14622_v32 = vpop.permute.xlu0 %6086  ;;  %9797 = vmatpush3.bf16.msra.mxu1 %v9794_v11  ;;  %v7045_v16 = vld [vmem:[%s16559_s10 + $0x18] sm:$0xff]  ;;  %v7046_v11 = vld [vmem:[%s16559_s10 + $0x20] sm:$0xff] }
 0x828   : > { %17555 = vst [vmem:[#allocation130_spill] sm:$0xff] %v14622_v32  ;;  %6332 = vrot.lane.b32.xlu1 %v14224_v58, %s10025_s19  ;;  %v7044_v32 = vld [vmem:[%s16559_s10 + $0x10] sm:$0xff] }
 0x829   : > { %6330 = vrot.lane.b32.xlu0 %v14228_v47, %s10025_s19  ;;  %v9798_v58 = vpack.c.bf16 %v7045_v16, %v7044_v32  ;;  %v7048_v32 = vld [vmem:[%s16559_s10 + $0x30] sm:$0xff] }
 0x82a   : > { %v14634_v38 = vpop.permute.xlu1 %6092 }
 0x82b   : > { %17556 = vst [vmem:[#allocation164_spill] sm:$0xff] %v14634_v38  ;;  %v14636_v62 = vpop.permute.xlu0 %6090  ;;  %9799 = vmatprep.subr.bf16.mxu1 %v9798_v58  ;;  %v5698_v38 = vld [vmem:[#allocation4 + $0x61] sm:$0xff] }
 0x82c   : > { %17557 = vst [vmem:[#allocation83_spill] sm:$0xff] %v14636_v62  ;;  %6336 = vrot.lane.b32.xlu1 %v14232_v59, %s10025_s19  ;;  %9801 = vmatpush3.bf16.msra.mxu1 %v9798_v58  ;;  %v9802_v59 = vpack.c.bf16 %v7047_v15, %v7046_v11  ;;  %v7049_v58 = vld [vmem:[%s16559_s10 + $0x38] sm:$0xff]  ;;  %v7050_v15 = vld [vmem:[%s16559_s10 + $0x40] sm:$0xff] }
 0x82d   : > { %6334 = vrot.lane.b32.xlu0 %v14236_v1, %s10025_s19 }
 0x82e   : > { %v14648_v47 = vpop.permute.xlu1 %6096  ;;  %9803 = vmatprep.subr.bf16.mxu1 %v9802_v59 }
 0x82f   : > { %17558 = vst [vmem:[#allocation53_spill] sm:$0xff] %v14648_v47  ;;  %v14650_v24 = vpop.permute.xlu0 %6094  ;;  %v17569_v47 = vld [vmem:[#allocation69_spill] sm:$0xff] }
 0x830   : > { %17559 = vst [vmem:[#allocation216_spill] sm:$0xff] %v14650_v24  ;;  %6340 = vrot.lane.b32.xlu1 %v14240_v61, %s10025_s19  ;;  %9805 = vmatpush3.bf16.msra.mxu1 %v9802_v59  ;;  %v9806_v61 = vpack.c.bf16 %v7049_v58, %v7048_v32  ;;  %v5694_v59 = vld [vmem:[#allocation4 + $0x31] sm:$0xff]  ;;  %v17566_v32 = vld [vmem:[#allocation114_spill] sm:$0xff] }
 0x831   : > { %6338 = vrot.lane.b32.xlu0 %v14244_v52, %s10025_s19 }
 0x832   : > { %v14662_v1 = vpop.permute.xlu1 %6100  ;;  %9807 = vmatprep.subr.bf16.mxu1 %v9806_v61 }
 0x833   : > { %17560 = vst [vmem:[#allocation173_spill] sm:$0xff] %v14662_v1  ;;  %v14664_v16 = vpop.permute.xlu0 %6098 }
 0x834   : > { %17561 = vst [vmem:[#allocation82_spill] sm:$0xff] %v14664_v16  ;;  %6344 = vrot.lane.b32.xlu1 %v14248_v20, %s10025_s19  ;;  %9809 = vmatpush3.bf16.msra.mxu1 %v9806_v61  ;;  %v5697_v16 = vld [vmem:[#allocation4 + $0x51] sm:$0xff] }
 0x835   : > { %6342 = vrot.lane.b32.xlu0 %v14252_v10, %s10025_s19  ;;  %9678 = vmatprep.subr.mxu1 %v7050_v15 }
 0x836   : > { %v14676_v52 = vpop.permute.xlu1 %6104 }
 0x837   : > { %17562 = vst [vmem:[#allocation89_spill] sm:$0xff] %v14676_v52  ;;  %v14678_v11 = vpop.permute.xlu0 %6102 }
 0x838   : > { %17563 = vst [vmem:[#allocation199_spill] sm:$0xff] %v14678_v11  ;;  %6430 = vrot.lane.b32.xlu1 %v14297_v56, %s10026_s20  ;;  %9679 = vmatpush3.msra.mxu1 %v7050_v15  ;;  %v5696_v11 = vld [vmem:[#allocation4 + $0x49] sm:$0xff] }
 0x839   : > { %6346 = vrot.lane.b32.xlu0 %v14257_v17, %s10025_s19  ;;  %v5695_v17 = vld [vmem:[#allocation4 + $0x39] sm:$0xff] }
 0x83a   : > { %v14687_v20 = vpop.permute.xlu1 %6108 }
 0x83b   : > { %17564 = vst [vmem:[#allocation233_spill] sm:$0xff] %v14687_v20  ;;  %v14689_v10 = vpop.permute.xlu0 %6106 }
 0x83c   : > { %17565 = vst [vmem:[#allocation101_spill] sm:$0xff] %v14689_v10  ;;  %6558 = vrot.lane.b32.xlu1 %v5694_v59, %s10027_s3  ;;  %v17567_v59 = vld [vmem:[#allocation179_spill] sm:$0xff] }
 0x83d   : > { %6432 = vrot.lane.b32.xlu0 %v17566_v32, %s10026_s20 }
 0x83e   : > { %v14694_v58 = vpop.permute.xlu1 %6176 }
 0x83f   : > { %v14696_v61 = vpop.permute.xlu0 %6174 }
 0x840   : > { %6686 = vrot.lane.b32.xlu1 %v14180_v49, %s10028_s26  ;;  %v17568_v49 = vld [vmem:[#allocation47_spill] sm:$0xff] }
 0x841   : > { %6560 = vrot.lane.b32.xlu0 %v5695_v17, %s10027_s3 }
 0x842   : > { %v14701_v20 = vpop.permute.xlu1 %6180 }
 0x843   : > { %v14703_v15 = vpop.permute.xlu0 %6178 }
 0x844   : > { %6434 = vrot.lane.b32.xlu1 %v17567_v59, %s10026_s20 }
 0x845   : > { %6688 = vrot.lane.b32.xlu0 %v14176_v6, %s10028_s26 }
 0x846   : > { %v14709_v10 = vpop.permute.xlu1 %6184 }
 0x847   : > { %v14711_v52 = vpop.permute.xlu0 %6182 }
 0x848   : > { %6562 = vrot.lane.b32.xlu1 %v5696_v11, %s10027_s3 }
 0x849   : > { %6436 = vrot.lane.b32.xlu0 %v17568_v49, %s10026_s20 }
 0x84a   : > { %v14716_v17 = vpop.permute.xlu1 %6188 }
 0x84b   : > { %v14718_v1 = vpop.permute.xlu0 %6186 }
 0x84c   : > { %6690 = vrot.lane.b32.xlu1 %v14188_v43, %s10028_s26  ;;  %v17570_v43 = vld [vmem:[#allocation102_spill] sm:$0xff] }
 0x84d   : > { %6564 = vrot.lane.b32.xlu0 %v5697_v16, %s10027_s3 }
 0x84e   : > { %v14723_v6 = vpop.permute.xlu1 %6192 }
 0x84f   : > { %v14725_v24 = vpop.permute.xlu0 %6190 }
 0x850   : > { %6438 = vrot.lane.b32.xlu1 %v17569_v47, %s10026_s20  ;;  %v5699_v47 = vld [vmem:[#allocation4 + $0x69] sm:$0xff] }
 0x851   : > { %6692 = vrot.lane.b32.xlu0 %v14184_v60, %s10028_s26 }
 0x852   : > { %v14731_v11 = vpop.permute.xlu1 %6196 }
 0x853   : > { %v14733_v62 = vpop.permute.xlu0 %6194 }
 0x854   : > { %6566 = vrot.lane.b32.xlu1 %v5698_v38, %s10027_s3  ;;  %v5731_v38 = vld [vmem:[#allocation4 + $0x6a] sm:$0xff] }
 0x855   : > { %6440 = vrot.lane.b32.xlu0 %v17570_v43, %s10026_s20 }
 0x856   : > { %v14738_v16 = vpop.permute.xlu1 %6200 }
 0x857   : > { %17571 = vst [vmem:[#allocation134_spill] sm:$0xff] %v14738_v16  ;;  %v14740_v22 = vpop.permute.xlu0 %6198  ;;  %v5700_v16 = vld [vmem:[#allocation4 + $0x79] sm:$0xff] }
 0x858   : > { %17572 = vst [vmem:[#allocation230_spill] sm:$0xff] %v14740_v22  ;;  %6694 = vrot.lane.b32.xlu1 %v14196_v4, %s10028_s26  ;;  %v17578_v4 = vld [vmem:[#allocation72_spill] sm:$0xff] }
 0x859   : > { %6568 = vrot.lane.b32.xlu0 %v5699_v47, %s10027_s3 }
 0x85a   : > { %v14745_v60 = vpop.permute.xlu1 %6204 }
 0x85b   : > { %17573 = vst [vmem:[#allocation104_spill] sm:$0xff] %v14745_v60  ;;  %v14747_v26 = vpop.permute.xlu0 %6202 }
 0x85c   : > { %17574 = vst [vmem:[#allocation118_spill] sm:$0xff] %v14747_v26  ;;  %6442 = vrot.lane.b32.xlu1 %v17575_v36, %s10026_s20  ;;  %v5732_v26 = vld [vmem:[#allocation4 + $0x7a] sm:$0xff] }
 0x85d   : > { %6696 = vrot.lane.b32.xlu0 %v5731_v38, %s10028_s26  ;;  %v5701_v36 = vld [vmem:[#allocation4 + $0x81] sm:$0xff] }
 0x85e   : > { %v14752_v43 = vpop.permute.xlu1 %6208 }
 0x85f   : > { %17576 = vst [vmem:[#allocation220_spill] sm:$0xff] %v14752_v43  ;;  %v14754_v27 = vpop.permute.xlu0 %6206 }
 0x860   : > { %17577 = vst [vmem:[#allocation95_spill] sm:$0xff] %v14754_v27  ;;  %6570 = vrot.lane.b32.xlu1 %v5700_v16, %s10027_s3  ;;  %v17583_v27 = vld [vmem:[#allocation42_spill] sm:$0xff] }
 0x861   : > { %6444 = vrot.lane.b32.xlu0 %v17578_v4, %s10026_s20  ;;  %v5733_v16 = vld [vmem:[#allocation4 + $0x82] sm:$0xff] }
 0x862   : > { %v14759_v47 = vpop.permute.xlu1 %6212 }
 0x863   : > { %17579 = vst [vmem:[#allocation190_spill] sm:$0xff] %v14759_v47  ;;  %v14761_v60 = vpop.permute.xlu0 %6210 }
 0x864   : > { %17580 = vst [vmem:[#allocation200_spill] sm:$0xff] %v14761_v60  ;;  %6698 = vrot.lane.b32.xlu1 %v5732_v26, %s10028_s26  ;;  %v5702_v60 = vld [vmem:[#allocation4 + $0x91] sm:$0xff]  ;;  %v17586_v26 = vld [vmem:[#allocation182_spill] sm:$0xff] }
 0x865   : > { %6572 = vrot.lane.b32.xlu0 %v5701_v36, %s10027_s3 }
 0x866   : > { %v14765_v38 = vpop.permute.xlu1 %6216 }
 0x867   : > { %17581 = vst [vmem:[#allocation181_spill] sm:$0xff] %v14765_v38  ;;  %v14767_v43 = vpop.permute.xlu0 %6214 }
 0x868   : > { %17582 = vst [vmem:[#allocation206_spill] sm:$0xff] %v14767_v43  ;;  %6446 = vrot.lane.b32.xlu1 %v17583_v27, %s10026_s20  ;;  %v5734_v43 = vld [vmem:[#allocation4 + $0x92] sm:$0xff] }
 0x869   : > { %6700 = vrot.lane.b32.xlu0 %v5733_v16, %s10028_s26  ;;  %v5703_v27 = vld [vmem:[#allocation4 + $0x99] sm:$0xff] }
 0x86a   : > { %v14772_v4 = vpop.permute.xlu1 %6220 }
 0x86b   : > { %17584 = vst [vmem:[#allocation122_spill] sm:$0xff] %v14772_v4  ;;  %v14774_v47 = vpop.permute.xlu0 %6218 }
 0x86c   : > { %17585 = vst [vmem:[#allocation41_spill] sm:$0xff] %v14774_v47  ;;  %6574 = vrot.lane.b32.xlu1 %v5702_v60, %s10027_s3  ;;  %v17591_v47 = vld [vmem:[#allocation85_spill] sm:$0xff] }
 0x86d   : > { %6448 = vrot.lane.b32.xlu0 %v17586_v26, %s10026_s20  ;;  %v5735_v60 = vld [vmem:[#allocation4 + $0x9a] sm:$0xff] }
 0x86e   : > { %v14779_v36 = vpop.permute.xlu1 %6224 }
 0x86f   : > { %17587 = vst [vmem:[#allocation189_spill] sm:$0xff] %v14779_v36  ;;  %v14781_v38 = vpop.permute.xlu0 %6222 }
 0x870   : > { %17588 = vst [vmem:[#allocation129_spill] sm:$0xff] %v14781_v38  ;;  %6702 = vrot.lane.b32.xlu1 %v5734_v43, %s10028_s26  ;;  %v5704_v38 = vld [vmem:[#allocation4 + $0xa9] sm:$0xff]  ;;  %v17594_v43 = vld [vmem:[#allocation73_spill] sm:$0xff] }
 0x871   : > { %6576 = vrot.lane.b32.xlu0 %v5703_v27, %s10027_s3 }
 0x872   : > { %v14785_v16 = vpop.permute.xlu1 %6228 }
 0x873   : > { %17589 = vst [vmem:[#allocation232_spill] sm:$0xff] %v14785_v16  ;;  %v14787_v4 = vpop.permute.xlu0 %6226 }
 0x874   : > { %17590 = vst [vmem:[#allocation115_spill] sm:$0xff] %v14787_v4  ;;  %6450 = vrot.lane.b32.xlu1 %v17591_v47, %s10026_s20  ;;  %v5736_v4 = vld [vmem:[#allocation4 + $0xaa] sm:$0xff] }
 0x875   : > { %6704 = vrot.lane.b32.xlu0 %v5735_v60, %s10028_s26  ;;  %v5705_v47 = vld [vmem:[#allocation4 + $0xb1] sm:$0xff] }
 0x876   : > { %v14792_v26 = vpop.permute.xlu1 %6232 }
 0x877   : > { %17592 = vst [vmem:[#allocation142_spill] sm:$0xff] %v14792_v26  ;;  %v14794_v36 = vpop.permute.xlu0 %6230 }
 0x878   : > { %17593 = vst [vmem:[#allocation162_spill] sm:$0xff] %v14794_v36  ;;  %6578 = vrot.lane.b32.xlu1 %v5704_v38, %s10027_s3  ;;  %v17597_v36 = vld [vmem:[#allocation151_spill] sm:$0xff] }
 0x879   : > { %6452 = vrot.lane.b32.xlu0 %v17594_v43, %s10026_s20  ;;  %v5737_v38 = vld [vmem:[#allocation4 + $0xb2] sm:$0xff] }
 0x87a   : > { %v14799_v27 = vpop.permute.xlu1 %6236 }
 0x87b   : > { %17595 = vst [vmem:[#allocation103_spill] sm:$0xff] %v14799_v27  ;;  %v14801_v16 = vpop.permute.xlu0 %6234 }
 0x87c   : > { %17596 = vst [vmem:[#allocation77_spill] sm:$0xff] %v14801_v16  ;;  %6706 = vrot.lane.b32.xlu1 %v5736_v4, %s10028_s26  ;;  %v5706_v16 = vld [vmem:[#allocation4 + $0xc1] sm:$0xff]  ;;  %v17598_v4 = vld [vmem:[#allocation67_spill] sm:$0xff] }
 0x87d   : > { %6580 = vrot.lane.b32.xlu0 %v5705_v47, %s10027_s3 }
 0x87e   : > { %v14805_v60 = vpop.permute.xlu1 %6304 }
 0x87f   : > { %v14807_v26 = vpop.permute.xlu0 %6302 }
 0x880   : > { %6454 = vrot.lane.b32.xlu1 %v17597_v36, %s10026_s20  ;;  %v5707_v36 = vld [vmem:[#allocation4 + $0xc9] sm:$0xff] }
 0x881   : > { %6708 = vrot.lane.b32.xlu0 %v5737_v38, %s10028_s26 }
 0x882   : > { %v14812_v43 = vpop.permute.xlu1 %6308 }
 0x883   : > { %v14814_v27 = vpop.permute.xlu0 %6306 }
 0x884   : > { %6582 = vrot.lane.b32.xlu1 %v5706_v16, %s10027_s3  ;;  %v5739_v16 = vld [vmem:[#allocation4 + $0xca] sm:$0xff] }
 0x885   : > { %6456 = vrot.lane.b32.xlu0 %v17598_v4, %s10026_s20 }
 0x886   : > { %v14819_v47 = vpop.permute.xlu1 %6312 }
 0x887   : > { %v14821_v2 = vpop.permute.xlu0 %6310 }
 0x888   : > { %6710 = vrot.lane.b32.xlu1 %v5738_v55, %s10028_s26  ;;  %v17600_v55 = vld [vmem:[#allocation46_spill] sm:$0xff] }
 0x889   : > { %6584 = vrot.lane.b32.xlu0 %v5707_v36, %s10027_s3 }
 0x88a   : > { %v14825_v38 = vpop.permute.xlu1 %6316 }
 0x88b   : > { %v14827_v13 = vpop.permute.xlu0 %6314 }
 0x88c   : > { %6458 = vrot.lane.b32.xlu1 %v17599_v35, %s10026_s20  ;;  %v5709_v35 = vld [vmem:[#allocation4 + $0xe1] sm:$0xff] }
 0x88d   : > { %6712 = vrot.lane.b32.xlu0 %v5739_v16, %s10028_s26 }
 0x88e   : > { %v14832_v4 = vpop.permute.xlu1 %6320 }
 0x88f   : > { %v14834_v14 = vpop.permute.xlu0 %6318 }
 0x890   : > { %6586 = vrot.lane.b32.xlu1 %v5708_v54, %s10027_s3  ;;  %v5741_v54 = vld [vmem:[#allocation4 + $0xe2] sm:$0xff] }
 0x891   : > { %6460 = vrot.lane.b32.xlu0 %v17600_v55, %s10026_s20 }
 0x892   : > { %v14839_v36 = vpop.permute.xlu1 %6324 }
 0x893   : > { %v14841_v21 = vpop.permute.xlu0 %6322 }
 0x894   : > { %6714 = vrot.lane.b32.xlu1 %v5740_v63, %s10028_s26  ;;  %v17606_v63 = vld [vmem:[#allocation165_spill] sm:$0xff] }
 0x895   : > { %6588 = vrot.lane.b32.xlu0 %v5709_v35, %s10027_s3 }
 0x896   : > { %v14845_v16 = vpop.permute.xlu1 %6328 }
 0x897   : > { %17601 = vst [vmem:[#allocation153_spill] sm:$0xff] %v14845_v16  ;;  %v14847_v34 = vpop.permute.xlu0 %6326 }
 0x898   : > { %17602 = vst [vmem:[#allocation201_spill] sm:$0xff] %v14847_v34  ;;  %6462 = vrot.lane.b32.xlu1 %v17603_v33, %s10026_s20  ;;  %v5742_v34 = vld [vmem:[#allocation4 + $0xf2] sm:$0xff] }
 0x899   : > { %6716 = vrot.lane.b32.xlu0 %v5741_v54, %s10028_s26  ;;  %v5711_v33 = vld [vmem:[#allocation4 + $0xf9] sm:$0xff] }
 0x89a   : > { %v14852_v55 = vpop.permute.xlu1 %6332 }
 0x89b   : > { %17604 = vst [vmem:[#allocation66_spill] sm:$0xff] %v14852_v55  ;;  %v14854_v8 = vpop.permute.xlu0 %6330 }
 0x89c   : > { %17605 = vst [vmem:[#allocation93_spill] sm:$0xff] %v14854_v8  ;;  %6590 = vrot.lane.b32.xlu1 %v5710_v25, %s10027_s3  ;;  %v17611_v8 = vld [vmem:[#allocation148_spill] sm:$0xff] }
 0x89d   : > { %6464 = vrot.lane.b32.xlu0 %v17606_v63, %s10026_s20  ;;  %v5743_v25 = vld [vmem:[#allocation4 + $0xfa] sm:$0xff] }
 0x89e   : > { %v14859_v35 = vpop.permute.xlu1 %6336 }
 0x89f   : > { %17607 = vst [vmem:[#allocation203_spill] sm:$0xff] %v14859_v35  ;;  %v14861_v16 = vpop.permute.xlu0 %6334 }
 0x8a0   : > { %17608 = vst [vmem:[#allocation105_spill] sm:$0xff] %v14861_v16  ;;  %6718 = vrot.lane.b32.xlu1 %v5742_v34, %s10028_s26  ;;  %v5712_v16 = vld [vmem:[#allocation4 + $0x109] sm:$0xff] }
 0x8a1   : > { %6592 = vrot.lane.b32.xlu0 %v5711_v33, %s10027_s3  ;;  %v5681_v34 = vld [vmem:[#allocation4 + $0x110] sm:$0xff] }
 0x8a2   : > { %v14865_v54 = vpop.permute.xlu1 %6340 }
 0x8a3   : > { %17609 = vst [vmem:[#allocation155_spill] sm:$0xff] %v14865_v54  ;;  %v14867_v55 = vpop.permute.xlu0 %6338 }
 0x8a4   : > { %17610 = vst [vmem:[#allocation234_spill] sm:$0xff] %v14867_v55  ;;  %6466 = vrot.lane.b32.xlu1 %v17611_v8, %s10026_s20  ;;  %v5744_v55 = vld [vmem:[#allocation4 + $0x10a] sm:$0xff]  ;;  %v6782_v8 = vsel %vm2540_vm4, %v5469_v3, %v17615_v45  ;;  %v5682_v3 = vld [vmem:[#allocation4 + $0x120] sm:$0xff] }
 0x8a5   : > { %6720 = vrot.lane.b32.xlu0 %v5743_v25, %s10028_s26  ;;  %v5713_v25 = vld [vmem:[#allocation4 + $0x111] sm:$0xff] }
 0x8a6   : > { %v14872_v63 = vpop.permute.xlu1 %6344 }
 0x8a7   : > { %17612 = vst [vmem:[#allocation112_spill] sm:$0xff] %v14872_v63  ;;  %v14874_v35 = vpop.permute.xlu0 %6342 }
 0x8a8   : > { %17613 = vst [vmem:[#allocation193_spill] sm:$0xff] %v14874_v35  ;;  %6594 = vrot.lane.b32.xlu1 %v5712_v16, %s10027_s3  ;;  %v6814_v35 = vsel %vm2606_vm6, %v6782_v8, %v14422_v46  ;;  %v5470_v16 = vld [vmem:[#allocation4 + $0x8] sm:$0xff]  ;;  %v5745_v46 = vld [vmem:[#allocation4 + $0x112] sm:$0xff] }
 0x8a9   : > { %6468 = vrot.lane.b32.xlu0 %v5681_v34, %s10026_s20  ;;  %v6846_v34 = vsel %vm2672_vm8, %v6814_v35, %v14544_v12  ;;  %v17616_v8 = vld [vmem:[#allocation80_spill] sm:$0xff]  ;;  %v17617_v35 = vld [vmem:[#allocation97_spill] sm:$0xff] }
 0x8aa   : > { %v6431_v33 = vpop.permute.xlu1 %6430 }
 0x8ab   : > { %v14878_v54 = vpop.permute.xlu0 %6346 }
 0x8ac   : > { %17614 = vst [vmem:[#allocation157_spill] sm:$0xff] %v14878_v54  ;;  %6722 = vrot.lane.b32.xlu1 %v5744_v55, %s10028_s26  ;;  %v6878_v54 = vsel %vm2738_vm10, %v6846_v34, %v14696_v61 }
 0x8ad   : > { %6596 = vrot.lane.b32.xlu0 %v5713_v25, %s10027_s3  ;;  %v6911_v55 = vsel %vm6910_vm14, %v6878_v54, %v14807_v26  ;;  %v6783_v25 = vsel %vm2540_vm4, %v5470_v16, %v17616_v8  ;;  %v5746_v8 = vld [vmem:[#allocation4 + $0x122] sm:$0xff] }
 0x8ae   : > { %v6559_v63 = vpop.permute.xlu1 %6558  ;;  %v6944_v12 = vsel %vm6943_vm15, %v6911_v55, %v6431_v33  ;;  %v6815_v61 = vsel %vm2606_vm6, %v6783_v25, %v17617_v35  ;;  %v5683_v33 = vld [vmem:[#allocation4 + $0x128] sm:$0xff]  ;;  %v17618_v25 = vld [vmem:[#allocation140_spill] sm:$0xff] }
 0x8af   : > { %v6433_v45 = vpop.permute.xlu0 %6432  ;;  %v6977_v34 = vsel %vm6976_vm2, %v6944_v12, %v6559_v63  ;;  %v6847_v26 = vsel %vm2672_vm8, %v6815_v61, %v14542_v42  ;;  %v17619_v12 = vld [vmem:[#allocation44_spill] sm:$0xff]  ;;  %v5715_v35 = vld [vmem:[#allocation4 + $0x129] sm:$0xff] }
 0x8b0   : > { %6470 = vrot.lane.b32.xlu1 %v5682_v3, %s10026_s20  ;;  %v6879_v16 = vsel %vm2738_vm10, %v6847_v26, %v14694_v58  ;;  %v6784_v58 = vsel %vm2540_vm4, %v17619_v12, %v17618_v25  ;;  %v5685_v25 = vld [vmem:[#allocation4 + $0x140] sm:$0xff] }
 0x8b1   : > { %6724 = vrot.lane.b32.xlu0 %v5745_v46, %s10028_s26  ;;  %v6912_v55 = vsel %vm6910_vm14, %v6879_v16, %v14805_v60  ;;  %v6816_v60 = vsel %vm2606_vm6, %v6784_v58, %v14428_v41  ;;  %v17620_v16 = vld [vmem:[#allocation169_spill] sm:$0xff] }
 0x8b2   : > { %v6687_v22 = vpop.permute.xlu1 %6686  ;;  %v6945_v63 = vsel %vm6943_vm15, %v6912_v55, %v6433_v45  ;;  %v6848_v45 = vsel %vm2672_vm8, %v6816_v60, %v14552_v5  ;;  %v17621_v41 = vld [vmem:[#allocation145_spill] sm:$0xff]  ;;  %v17622_v5 = vld [vmem:[#allocation86_spill] sm:$0xff] }
 0x8b3   : > { %v7010_v54 = vsel %vm7009_vm3, %v6977_v34, %v6687_v22  ;;  %v6561_v3 = vpop.permute.xlu0 %6560  ;;  %v6880_v34 = vsel %vm2738_vm10, %v6848_v45, %v14703_v15  ;;  %v8104_v58 = vld [vmem:[%s16562_s13] sm:$0xf] }
 0x8b4   : > { %6598 = vrot.lane.b32.xlu1 %v5714_v44, %s10027_s3  ;;  %9680 = vmatprep.mubr.msk.f32.mxu1 %vm7051_vm5, %v7010_v54  ;;  %v6978_v22 = vsel %vm6976_vm2, %v6945_v63, %v6561_v3  ;;  %v5652_v54 = vld [vmem:[#allocation4 + $0x12a] sm:$0xff]  ;;  %v6913_v3 = vsel %vm6910_vm14, %v6880_v34, %v14814_v27  ;;  %v5717_v45 = vld [vmem:[#allocation4 + $0x141] sm:$0xff] }
 0x8b5   : > { %6472 = vrot.lane.b32.xlu0 %v5683_v33, %s10026_s20  ;;  %v6785_v33 = vsel %vm2540_vm4, %v17621_v41, %v17620_v16  ;;  %9728 = vmatprep.subr.msk.mxu0 %vm650_vm0, %v8104_v58 }
 0x8b6   : > { %v6435_v42 = vpop.permute.xlu1 %6434  ;;  %v6817_v63 = vsel %vm2606_vm6, %v6785_v33, %v17622_v5  ;;  %9729 = vmatpush3.msk.msra.mxu0 %vm650_vm0, %v8104_v58  ;;  %v5653_v33 = vld [vmem:[#allocation4 + $0x13a] sm:$0xff]  ;;  %v17625_v58 = vld [vmem:[#allocation55_spill] sm:$0xff] }
 0x8b7   : > { %v6689_v46 = vpop.permute.xlu0 %6688  ;;  %v6946_v55 = vsel %vm6943_vm15, %v6913_v3, %v6435_v42  ;;  %v5684_v42 = vld [vmem:[#allocation4 + $0x138] sm:$0xff] }
 0x8b8   : > { %v7011_v44 = vsel %vm7009_vm3, %v6978_v22, %v6689_v46  ;;  %6726 = vrot.lane.b32.xlu1 %v5746_v8, %s10028_s26  ;;  %v6849_v46 = vsel %vm2672_vm8, %v6817_v63, %v14550_v30  ;;  %v17624_v5 = vld [vmem:[#allocation52_spill] sm:$0xff] }
 0x8b9   : > { %6600 = vrot.lane.b32.xlu0 %v5715_v35, %s10027_s3  ;;  %9681 = vmatmul.mubr.msk.f32.vlgmr.msra.gmra.mrb[48].mxu1 %vm7051_vm5, %v7011_v44  ;;  %v6881_v12 = vsel %vm2738_vm10, %v6849_v46, %v14701_v20 }
 0x8ba   : > { %v6563_v61 = vpop.permute.xlu1 %6562  ;;  %v6914_v44 = vsel %vm6910_vm14, %v6881_v12, %v14812_v43  ;;  %v5716_v43 = vld [vmem:[#allocation4 + $0x139] sm:$0xff] }
 0x8bb   : > { %v6437_v26 = vpop.permute.xlu0 %6436  ;;  %v6979_v15 = vsel %vm6976_vm2, %v6946_v55, %v6563_v61  ;;  %v17623_v61 = vld [vmem:[#allocation48_spill] sm:$0xff] }
 0x8bc   : > { %6348 = vrot.lane.b32.xlu1 %v5652_v54, %s10025_s19  ;;  %v6947_v30 = vsel %vm6943_vm15, %v6914_v44, %v6437_v26  ;;  %v6786_v34 = vsel %vm2540_vm4, %v14297_v56, %v17623_v61  ;;  %v5719_v61 = vld [vmem:[#allocation4 + $0x159] sm:$0xff] }
 0x8bd   : > { %6728 = vrot.lane.b32.xlu0 %v5652_v54, %s10028_s26  ;;  %v6818_v3 = vsel %vm2606_vm6, %v6786_v34, %v14434_v51  ;;  %v6787_v51 = vsel %vm2540_vm4, %v17566_v32, %v17624_v5  ;;  %v17627_v34 = vld [vmem:[#allocation71_spill] sm:$0xff] }
 0x8be   : > { %v6691_v22 = vpop.permute.xlu1 %6690  ;;  %v6850_v26 = vsel %vm2672_vm8, %v6818_v3, %v14560_v57  ;;  %v6819_v57 = vsel %vm2606_vm6, %v6787_v51, %v14432_v37  ;;  %v17628_v3 = vld [vmem:[#allocation100_spill] sm:$0xff]  ;;  %v17632_v5 = vld [vmem:[#allocation87_spill] sm:$0xff] }
 0x8bf   : > { %v7012_v27 = vsel %vm7009_vm3, %v6979_v15, %v6691_v22  ;;  %v6565_v8 = vpop.permute.xlu0 %6564  ;;  %v6882_v41 = vsel %vm2738_vm10, %v6850_v26, %v14711_v52  ;;  %v6851_v22 = vsel %vm2672_vm8, %v6819_v57, %v14558_v50 }
 0x8c0   : > { %6476 = vrot.lane.b32.xlu1 %v5685_v25, %s10026_s20  ;;  %9683 = vmatprep.mubr.msk.f32.mxu1 %vm7051_vm5, %v7012_v27  ;;  %v6980_v20 = vsel %vm6976_vm2, %v6947_v30, %v6565_v8  ;;  %v6915_v55 = vsel %vm6910_vm14, %v6882_v41, %v14821_v2  ;;  %v5654_v27 = vld [vmem:[#allocation4 + $0x142] sm:$0xff]  ;;  %v6883_v32 = vsel %vm2738_vm10, %v6851_v22, %v14709_v10  ;;  %v5686_v30 = vld [vmem:[#allocation4 + $0x150] sm:$0xff]  ;;  %v17630_v41 = vld [vmem:[#allocation160_spill] sm:$0xff] }
 0x8c1   : > { %6474 = vrot.lane.b32.xlu0 %v5684_v42, %s10026_s20  ;;  %v6916_v37 = vsel %vm6910_vm14, %v6883_v32, %v14819_v47  ;;  %v5687_v42 = vld [vmem:[#allocation4 + $0x158] sm:$0xff]  ;;  %v6788_v10 = vsel %vm2540_vm4, %v17567_v59, %v17625_v58  ;;  %v14997_v47 = vld [vmem:[%s17626_s5] ss:$0 sm:$0xff]  ;;  %v17634_v22 = vld [vmem:[#allocation91_spill] sm:$0xff] }
 0x8c2   : > { %v6439_v35 = vpop.permute.xlu1 %6438  ;;  %v3108_v26 = vmul.f32 %v14997_v47, %v17628_v3  ;;  %v3113_v51 = vmul.f32 %v17632_v5, %v14997_v47 }
 0x8c3   : > { %v6693_v60 = vpop.permute.xlu0 %6692  ;;  %v6948_v63 = vsel %vm6943_vm15, %v6915_v55, %v6439_v35  ;;  %v6820_v35 = vsel %vm2606_vm6, %v6788_v10, %v14440_v31  ;;  %v5718_v31 = vld [vmem:[#allocation4 + $0x151] sm:$0xff] }
 0x8c4   : > { %v7013_v54 = vsel %vm7009_vm3, %v6980_v20, %v6693_v60  ;;  %6604 = vrot.lane.b32.xlu1 %v5717_v45, %s10027_s3  ;;  %v6852_v59 = vsel %vm2672_vm8, %v6820_v35, %v14566_v7  ;;  %v17629_v7 = vld [vmem:[#allocation76_spill] sm:$0xff] }
 0x8c5   : > { %6602 = vrot.lane.b32.xlu0 %v5716_v43, %s10027_s3  ;;  %9684 = vmatmul.mubr.msk.f32.gmra.mrb[50].mxu1 %vm7051_vm5, %v7013_v54  ;;  %v6884_v60 = vsel %vm2738_vm10, %v6852_v59, %v14718_v1  ;;  %v3109_v54 = vmul.f32 %v17627_v34, %v14997_v47  ;;  %v6789_v1 = vsel %vm2540_vm4, %v17568_v49, %v17630_v41 }
 0x8c6   : > { %v6567_v16 = vpop.permute.xlu1 %6566  ;;  %v6917_v43 = vsel %vm6910_vm14, %v6884_v60, %v14827_v13  ;;  %v15024_v13 = vld [vmem:[%s16555_s6] ss:$0 sm:$0xff] }
 0x8c7   : > { %v6441_v56 = vpop.permute.xlu0 %6440  ;;  %v6981_v52 = vsel %vm6976_vm2, %v6948_v63, %v6567_v16  ;;  %v3111_v16 = vmul.f32 %v17629_v7, %v14997_v47  ;;  %v6821_v63 = vsel %vm2606_vm6, %v6789_v1, %v14438_v28  ;;  %v15055_v58 = vadd.f32 %v15024_v13, %v3108_v26  ;;  %v17689_v1 = vld [vmem:[#allocation201_spill] sm:$0xff]  ;;  %v7847_v7 = vld [vmem:[#allocation5 + $0x1a] sm:$0xff] }
 0x8c8   : > { %6350 = vrot.lane.b32.xlu1 %v5653_v33, %s10025_s19  ;;  %v6949_v8 = vsel %vm6943_vm15, %v6916_v37, %v6441_v56  ;;  %v5655_v37 = vld [vmem:[#allocation4 + $0x152] sm:$0xff]  ;;  %v15065_v35 = vadd.f32 %v15024_v13, %v3113_v51 }
 0x8c9   : > { %6730 = vrot.lane.b32.xlu0 %v5653_v33, %s10028_s26  ;;  %v17631_v33 = vld [vmem:[#allocation84_spill] sm:$0xff] }
 0x8ca   : > { %v6695_v15 = vpop.permute.xlu1 %6694  ;;  %v3110_v55 = vmul.f32 %v14997_v47, %v17631_v33  ;;  %v17639_v33 = vld [vmem:[#allocation141_spill] sm:$0xff] }
 0x8cb   : > { %v7014_v2 = vsel %vm7009_vm3, %v6981_v52, %v6695_v15  ;;  %v6569_v46 = vpop.permute.xlu0 %6568  ;;  %v17633_v52 = vld [vmem:[#allocation88_spill] sm:$0xff] }
 0x8cc   : > { %6352 = vrot.lane.b32.xlu1 %v5654_v27, %s10025_s19  ;;  %9686 = vmatprep.mubr.msk.f32.mxu1 %vm7051_vm5, %v7014_v2  ;;  %v6982_v50 = vsel %vm6976_vm2, %v6949_v8, %v6569_v46  ;;  %v3112_v15 = vmul.f32 %v14997_v47, %v17633_v52  ;;  %v3115_v2 = vmul.f32 %v17634_v22, %v14997_v47  ;;  %v17635_v8 = vld [vmem:[#allocation96_spill] sm:$0xff] }
 0x8cd   : > { %6732 = vrot.lane.b32.xlu0 %v5654_v27, %s10028_s26  ;;  %v6853_v46 = vsel %vm2672_vm8, %v6821_v63, %v14564_v40  ;;  %v15061_v10 = vadd.f32 %v15024_v13, %v3110_v55  ;;  %v3119_v55 = vmul.f32 %v17639_v33, %v14997_v47  ;;  %v17645_v33 = vld [vmem:[#allocation131_spill] sm:$0xff]  ;;  %v17683_v22 = vld [vmem:[#allocation192_spill] sm:$0xff] }
 0x8ce   : > { %v6443_v25 = vpop.permute.xlu1 %6442  ;;  %v6885_v28 = vsel %vm2738_vm10, %v6853_v46, %v14716_v17  ;;  %v15058_v17 = vadd.f32 %v15024_v13, %v3111_v16  ;;  %v15068_v59 = vadd.f32 %v15024_v13, %v3112_v15  ;;  %v5689_v15 = vld [vmem:[#allocation4 + $0x170] sm:$0xff]  ;;  %v17686_v63 = vld [vmem:[#allocation196_spill] sm:$0xff] }
 0x8cf   : > { %v6697_v12 = vpop.permute.xlu0 %6696  ;;  %v6950_v56 = vsel %vm6943_vm15, %v6917_v43, %v6443_v25  ;;  %v3114_v25 = vmul.f32 %v14997_v47, %v17635_v8  ;;  %v9925_v43 = vld [vmem:[#allocation4 + $0x60] sm:$0xff]  ;;  %v9926_v8 = vld [vmem:[#allocation4 + $0x68] sm:$0xff] }
 0x8d0   : > { %v7015_v44 = vsel %vm7009_vm3, %v6982_v50, %v6697_v12  ;;  %6480 = vrot.lane.b32.xlu1 %v5687_v42, %s10026_s20  ;;  %v15047_v50 = vadd.f32 %v15024_v13, %v3109_v54  ;;  %v17636_v12 = vld [vmem:[#allocation120_spill] sm:$0xff]  ;;  %v6918_v42 = vsel %vm6910_vm14, %v6885_v28, %v14825_v38  ;;  %v15071_v38 = vadd.f32 %v15024_v13, %v3115_v2  ;;  %v9941_v2 = vld [vmem:[#allocation4 + $0x128] sm:$0xff] }
 0x8d1   : > { %6478 = vrot.lane.b32.xlu0 %v5686_v30, %s10026_s20  ;;  %9687 = vmatmul.mubr.msk.f32.gmra.mrb[52].mxu1 %vm7051_vm5, %v7015_v44  ;;  %v3117_v40 = vmul.f32 %v17636_v12, %v14997_v47  ;;  %v15075_v34 = vadd.f32 %v15024_v13, %v3114_v25  ;;  %v17637_v54 = vld [vmem:[#allocation108_spill] sm:$0xff]  ;;  %v17641_v25 = vld [vmem:[#allocation177_spill] sm:$0xff] }
 0x8d2   : > { %v6571_v20 = vpop.permute.xlu1 %6570  ;;  %v6791_v28 = vsel %vm2540_vm4, %v9926_v8, %v17641_v25 }
 0x8d3   : > { %v6445_v45 = vpop.permute.xlu0 %6444  ;;  %v6983_v49 = vsel %vm6976_vm2, %v6950_v56, %v6571_v20  ;;  %v15085_v16 = vadd.f32 %v15024_v13, %v3117_v40  ;;  %v15118_v40 = vadd.f32 %v15024_v13, %v3119_v55  ;;  %v17646_v55 = vld [vmem:[#allocation116_spill] sm:$0xff] }
 0x8d4   : > { %6608 = vrot.lane.b32.xlu1 %v5719_v61, %s10027_s3  ;;  %v6951_v44 = vsel %vm6943_vm15, %v6918_v42, %v6445_v45  ;;  %v5656_v61 = vld [vmem:[#allocation4 + $0x15a] sm:$0xff]  ;;  %v3116_v45 = vmul.f32 %v14997_v47, %v17637_v54 }
 0x8d5   : > { %6606 = vrot.lane.b32.xlu0 %v5718_v31, %s10027_s3  ;;  %v17638_v31 = vld [vmem:[#allocation59_spill] sm:$0xff] }
 0x8d6   : > { %v6699_v57 = vpop.permute.xlu1 %6698  ;;  %v6790_v3 = vsel %vm2540_vm4, %v9925_v43, %v17638_v31  ;;  %v15105_v46 = vadd.f32 %v15024_v13, %v3116_v45  ;;  %v17644_v45 = vld [vmem:[#allocation127_spill] sm:$0xff] }
 0x8d7   : > { %v7016_v27 = vsel %vm7009_vm3, %v6983_v49, %v6699_v57  ;;  %v6573_v32 = vpop.permute.xlu0 %6572  ;;  %v6822_v41 = vsel %vm2606_vm6, %v6790_v3, %v14448_v53  ;;  %v17684_v53 = vld [vmem:[#allocation208_spill] sm:$0xff] }
 0x8d8   : > { %6354 = vrot.lane.b32.xlu1 %v5655_v37, %s10025_s19  ;;  %9689 = vmatprep.mubr.msk.f32.mxu1 %vm7051_vm5, %v7016_v27  ;;  %v6984_v20 = vsel %vm6976_vm2, %v6951_v44, %v6573_v32  ;;  %v6854_v5 = vsel %vm2672_vm8, %v6822_v41, %v14574_v23  ;;  %v5688_v27 = vld [vmem:[#allocation4 + $0x168] sm:$0xff]  ;;  %v6823_v44 = vsel %vm2606_vm6, %v6791_v28, %v14446_v29 }
 0x8d9   : > { %6734 = vrot.lane.b32.xlu0 %v5655_v37, %s10028_s26  ;;  %v6886_v57 = vsel %vm2738_vm10, %v6854_v5, %v14725_v24  ;;  %v17640_v37 = vld [vmem:[#allocation119_spill] sm:$0xff]  ;;  %v6855_v43 = vsel %vm2672_vm8, %v6823_v44, %v14572_v18  ;;  %v3122_v29 = vmul.f32 %v14997_v47, %v17645_v33  ;;  %v3125_v5 = vmul.f32 %v17646_v55, %v14997_v47  ;;  %v17650_v28 = vld [vmem:[#allocation138_spill] sm:$0xff]  ;;  %v17652_v55 = vld [vmem:[#allocation172_spill] sm:$0xff] }
 0x8da   : > { %v6447_v30 = vpop.permute.xlu1 %6446  ;;  %v6919_v23 = vsel %vm6910_vm14, %v6886_v57, %v14834_v14  ;;  %v3118_v24 = vmul.f32 %v14997_v47, %v17640_v37  ;;  %v17642_v14 = vld [vmem:[#allocation123_spill] sm:$0xff] }
 0x8db   : > { %v6701_v60 = vpop.permute.xlu0 %6700  ;;  %v6952_v12 = vsel %vm6943_vm15, %v6919_v23, %v6447_v30  ;;  %v3121_v42 = vmul.f32 %v17642_v14, %v14997_v47  ;;  %v3123_v30 = vmul.f32 %v17644_v45, %v14997_v47  ;;  %v5720_v18 = vld [vmem:[#allocation4 + $0x169] sm:$0xff]  ;;  %v17651_v14 = vld [vmem:[#allocation204_spill] sm:$0xff]  ;;  %v15172_v33 = vadd.f32 %v15024_v13, %v3125_v5 }
 0x8dc   : > { %v7017_v26 = vsel %vm7009_vm3, %v6984_v20, %v6701_v60  ;;  %6356 = vrot.lane.b32.xlu1 %v5656_v61, %s10025_s19  ;;  %v15142_v57 = vadd.f32 %v15024_v13, %v3118_v24  ;;  %v3128_v24 = vmul.f32 %v14997_v47, %v17651_v14 }
 0x8dd   : > { %6736 = vrot.lane.b32.xlu0 %v5656_v61, %s10028_s26  ;;  %9690 = vmatmul.mubr.msk.f32.gmra.mrb[54].mxu1 %vm7051_vm5, %v7017_v26  ;;  %v17643_v61 = vld [vmem:[#allocation128_spill] sm:$0xff] }
 0x8de   : > { %v6575_v51 = vpop.permute.xlu1 %6574  ;;  %v3120_v54 = vmul.f32 %v14997_v47, %v17643_v61  ;;  %v5721_v26 = vld [vmem:[#allocation4 + $0x171] sm:$0xff] }
 0x8df   : > { %v6449_v52 = vpop.permute.xlu0 %6448  ;;  %v6985_v20 = vsel %vm6976_vm2, %v6952_v12, %v6575_v51  ;;  %v6887_v51 = vsel %vm2738_vm10, %v6855_v43, %v14723_v6  ;;  %v17649_v6 = vld [vmem:[#allocation168_spill] sm:$0xff]  ;;  %v3129_v12 = vmul.f32 %v17650_v28, %v14997_v47  ;;  %v17655_v28 = vld [vmem:[#allocation174_spill] sm:$0xff] }
 0x8e0   : > { %6484 = vrot.lane.b32.xlu1 %v5689_v15, %s10026_s20  ;;  %v17647_v15 = vld [vmem:[#allocation136_spill] sm:$0xff]  ;;  %v6920_v8 = vsel %vm6910_vm14, %v6887_v51, %v14832_v4  ;;  %v3126_v25 = vmul.f32 %v14997_v47, %v17649_v6  ;;  %v15162_v61 = vadd.f32 %v15024_v13, %v3120_v54  ;;  %v15165_v4 = vadd.f32 %v15024_v13, %v3123_v30 }
 0x8e1   : > { %6482 = vrot.lane.b32.xlu0 %v5688_v27, %s10026_s20  ;;  %v3124_v23 = vmul.f32 %v14997_v47, %v17647_v15  ;;  %v17648_v27 = vld [vmem:[#allocation144_spill] sm:$0xff]  ;;  %v6953_v44 = vsel %vm6943_vm15, %v6920_v8, %v6449_v52  ;;  %v15196_v15 = vadd.f32 %v15024_v13, %v3128_v24  ;;  %v17654_v8 = vld [vmem:[#allocation57_spill] sm:$0xff]  ;;  %v17656_v24 = vld [vmem:[#allocation207_spill] sm:$0xff] }
 0x8e2   : > { %v6703_v60 = vpop.permute.xlu1 %6702  ;;  %v3127_v37 = vmul.f32 %v17648_v27, %v14997_v47  ;;  %v9927_v52 = vld [vmem:[#allocation4 + $0x78] sm:$0xff]  ;;  %v15190_v5 = vadd.f32 %v15024_v13, %v3126_v25  ;;  %v3130_v6 = vmul.f32 %v14997_v47, %v17654_v8  ;;  %v3133_v25 = vmul.f32 %v17655_v28, %v14997_v47 }
 0x8e3   : > { %v7018_v31 = vsel %vm7009_vm3, %v6985_v20, %v6703_v60  ;;  %v6577_v3 = vpop.permute.xlu0 %6576  ;;  %v15159_v60 = vadd.f32 %v15024_v13, %v3121_v42  ;;  %v6792_v42 = vsel %vm2540_vm4, %v9927_v52, %v17652_v55 }
 0x8e4   : > { %6612 = vrot.lane.b32.xlu1 %v5721_v26, %s10027_s3  ;;  %9692 = vmatprep.mubr.msk.f32.mxu1 %vm7051_vm5, %v7018_v31  ;;  %v6986_v45 = vsel %vm6976_vm2, %v6953_v44, %v6577_v3  ;;  %v5657_v31 = vld [vmem:[#allocation4 + $0x16a] sm:$0xff]  ;;  %v15169_v26 = vadd.f32 %v15024_v13, %v3122_v29  ;;  %v15180_v3 = vadd.f32 %v15024_v13, %v3124_v23  ;;  %v5658_v44 = vld [vmem:[#allocation4 + $0x172] sm:$0xff] }
 0x8e5   : > { %6610 = vrot.lane.b32.xlu0 %v5720_v18, %s10027_s3  ;;  %v15183_v51 = vadd.f32 %v15024_v13, %v3127_v37  ;;  %v6824_v29 = vsel %vm2606_vm6, %v6792_v42, %v14456_v0  ;;  %v15193_v18 = vadd.f32 %v15024_v13, %v3129_v12  ;;  %v17653_v37 = vld [vmem:[#allocation171_spill] sm:$0xff]  ;;  %v17659_v42 = vld [vmem:[#allocation205_spill] sm:$0xff] }
 0x8e6   : > { %v6451_v20 = vpop.permute.xlu1 %6450  ;;  %v6856_v23 = vsel %vm2672_vm8, %v6824_v29, %v14582_v39  ;;  %v3131_v0 = vmul.f32 %v17653_v37, %v14997_v47  ;;  %v17657_v39 = vld [vmem:[#allocation178_spill] sm:$0xff]  ;;  %v17661_v37 = vld [vmem:[#allocation215_spill] sm:$0xff] }
 0x8e7   : > { %v6705_v43 = vpop.permute.xlu0 %6704  ;;  %v6888_v12 = vsel %vm2738_vm10, %v6856_v23, %v14733_v62  ;;  %v17660_v62 = vld [vmem:[#allocation61_spill] sm:$0xff] }
 0x8e8   : > { %v7019_v54 = vsel %vm7009_vm3, %v6986_v45, %v6705_v43  ;;  %6358 = vrot.lane.b32.xlu1 %v5657_v31, %s10025_s19  ;;  %v3132_v45 = vmul.f32 %v14997_v47, %v17656_v24  ;;  %v3135_v43 = vmul.f32 %v17657_v39, %v14997_v47  ;;  %v6921_v55 = vsel %vm6910_vm14, %v6888_v12, %v14841_v21  ;;  %v9928_v23 = vld [vmem:[#allocation4 + $0x80] sm:$0xff]  ;;  %v17662_v24 = vld [vmem:[#allocation175_spill] sm:$0xff]  ;;  %v17663_v21 = vld [vmem:[#allocation50_spill] sm:$0xff] }
 0x8e9   : > { %6738 = vrot.lane.b32.xlu0 %v5657_v31, %s10028_s26  ;;  %9693 = vmatmul.mubr.msk.f32.gmra.mrb[56].mxu1 %vm7051_vm5, %v7019_v54  ;;  %v17658_v31 = vld [vmem:[#allocation62_spill] sm:$0xff]  ;;  %v3137_v54 = vmul.f32 %v17659_v42, %v14997_v47  ;;  %v3136_v29 = vmul.f32 %v14997_v47, %v17660_v62  ;;  %v6793_v8 = vsel %vm2540_vm4, %v9928_v23, %v17661_v37 }
 0x8ea   : > { %v6579_v27 = vpop.permute.xlu1 %6578  ;;  %v3134_v52 = vmul.f32 %v14997_v47, %v17658_v31  ;;  %v6954_v28 = vsel %vm6943_vm15, %v6921_v55, %v6451_v20  ;;  %v3139_v39 = vmul.f32 %v17662_v24, %v14997_v47  ;;  %v3138_v12 = vmul.f32 %v14997_v47, %v17663_v21  ;;  %v5691_v37 = vld [vmem:[#allocation4 + $0x188] sm:$0xff]  ;;  %v9929_v21 = vld [vmem:[#allocation4 + $0x98] sm:$0xff] }
 0x8eb   : > { %v6453_v14 = vpop.permute.xlu0 %6452  ;;  %v6825_v31 = vsel %vm2606_vm6, %v6793_v8, %v14454_v48  ;;  %v6987_v42 = vsel %vm6976_vm2, %v6954_v28, %v6579_v27  ;;  %v15233_v30 = vadd.f32 %v15024_v13, %v3131_v0  ;;  %v15236_v23 = vadd.f32 %v15024_v13, %v3130_v6  ;;  %v17675_v47 = vld [vmem:[#allocation152_spill] sm:$0xff] }
 0x8ec   : > { %6360 = vrot.lane.b32.xlu1 %v5658_v44, %s10025_s19  ;;  %v6857_v20 = vsel %vm2672_vm8, %v6825_v31, %v14580_v9  ;;  %v15243_v48 = vadd.f32 %v15024_v13, %v3133_v25  ;;  %v15246_v27 = vadd.f32 %v15024_v13, %v3132_v45  ;;  %v5690_v9 = vld [vmem:[#allocation4 + $0x180] sm:$0xff]  ;;  %v15253_v6 = vadd.f32 %v15024_v13, %v3135_v43 }
 0x8ed   : > { %6740 = vrot.lane.b32.xlu0 %v5658_v44, %s10028_s26  ;;  %v6889_v0 = vsel %vm2738_vm10, %v6857_v20, %v14731_v11  ;;  %v15256_v8 = vadd.f32 %v15024_v13, %v3134_v52  ;;  %v15259_v25 = vadd.f32 %v15024_v13, %v3137_v54  ;;  %v15265_v11 = vadd.f32 %v15024_v13, %v3136_v29  ;;  %v17670_v54 = vld [vmem:[#allocation186_spill] sm:$0xff]  ;;  %v9931_v20 = vld [vmem:[#allocation4 + $0xb0] sm:$0xff]  ;;  %v17672_v29 = vld [vmem:[#allocation109_spill] sm:$0xff] }
 0x8ee   : > { %v6707_v62 = vpop.permute.xlu1 %6706  ;;  %17664 = vst [vmem:[#allocation107_spill] sm:$0xff] %v15253_v6  ;;  %v6922_v45 = vsel %vm6910_vm14, %v6889_v0, %v14839_v36  ;;  %v15268_v28 = vadd.f32 %v15024_v13, %v3139_v39  ;;  %v15271_v43 = vadd.f32 %v15024_v13, %v3138_v12  ;;  %v6795_v31 = vsel %vm2540_vm4, %v9929_v21, %v17670_v54  ;;  %v17671_v36 = vld [vmem:[#allocation202_spill] sm:$0xff]  ;;  %v17673_v0 = vld [vmem:[#allocation121_spill] sm:$0xff] }
 0x8ef   : > { %v7020_v44 = vsel %vm7009_vm3, %v6987_v42, %v6707_v62  ;;  %v6581_v55 = vpop.permute.xlu0 %6580  ;;  %17665 = vst [vmem:[#allocation211_spill] sm:$0xff] %v15256_v8  ;;  %17666 = vst [vmem:[#allocation166_spill] sm:$0xff] %v15259_v25  ;;  %v6955_v52 = vsel %vm6943_vm15, %v6922_v45, %v6453_v14  ;;  %v9930_v42 = vld [vmem:[#allocation4 + $0x90] sm:$0xff]  ;;  %v9932_v12 = vld [vmem:[#allocation4 + $0xa8] sm:$0xff] }
 0x8f0   : > { %6488 = vrot.lane.b32.xlu1 %v5691_v37, %s10026_s20  ;;  %9695 = vmatprep.mubr.msk.f32.mxu1 %vm7051_vm5, %v7020_v44  ;;  %17667 = vst [vmem:[#allocation221_spill] sm:$0xff] %v15265_v11  ;;  %17668 = vst [vmem:[#allocation70_spill] sm:$0xff] %v15268_v28  ;;  %v6794_v62 = vsel %vm2540_vm4, %v9930_v42, %v17671_v36  ;;  %v6797_v44 = vsel %vm2540_vm4, %v9931_v20, %v17672_v29  ;;  %v5723_v13 = vld [vmem:[#allocation4 + $0x189] sm:$0xff]  ;;  %v9934_v54 = vld [vmem:[#allocation4 + $0xc0] sm:$0xff] }
 0x8f1   : > { %6486 = vrot.lane.b32.xlu0 %v5690_v9, %s10026_s20  ;;  %17669 = vst [vmem:[#allocation194_spill] sm:$0xff] %v15271_v43  ;;  %v6988_v39 = vsel %vm6976_vm2, %v6955_v52, %v6581_v55  ;;  %v6796_v14 = vsel %vm2540_vm4, %v9932_v12, %v17673_v0  ;;  %v9933_v9 = vld [vmem:[#allocation4 + $0xc8] sm:$0xff]  ;;  %v17674_v45 = vld [vmem:[#allocation51_spill] sm:$0xff]  ;;  %v6798_v42 = vsel %vm2540_vm4, %v9934_v54, %v17675_v47  ;;  %v9935_v52 = vld [vmem:[#allocation4 + $0xe0] sm:$0xff] }
 0x8f2   : > { %v6455_v24 = vpop.permute.xlu1 %6454  ;;  %v6799_v21 = vsel %vm2540_vm4, %v9933_v9, %v17674_v45  ;;  %v5722_v20 = vld [vmem:[#allocation4 + $0x181] sm:$0xff]  ;;  %v17676_v29 = vld [vmem:[#allocation163_spill] sm:$0xff]  ;;  %v9936_v12 = vld [vmem:[#allocation4 + $0xd8] sm:$0xff]  ;;  %v6826_v9 = vsel %vm2606_vm6, %v6794_v62, %v14464_v19 }
 0x8f3   : > { %v6709_v37 = vpop.permute.xlu0 %6708  ;;  %v6801_v41 = vsel %vm2540_vm4, %v9935_v52, %v17676_v29  ;;  %v17677_v0 = vld [vmem:[#allocation176_spill] sm:$0xff]  ;;  %v17679_v45 = vld [vmem:[#allocation191_spill] sm:$0xff]  ;;  %v9940_v62 = vld [vmem:[#allocation4 + $0x108] sm:$0xff] }
 0x8f4   : > { %v7021_v36 = vsel %vm7009_vm3, %v6988_v39, %v6709_v37  ;;  %6616 = vrot.lane.b32.xlu1 %v5723_v13, %s10027_s3  ;;  %v6800_v32 = vsel %vm2540_vm4, %v9936_v12, %v17677_v0  ;;  %v9937_v47 = vld [vmem:[#allocation4 + $0xf8] sm:$0xff]  ;;  %v17678_v39 = vld [vmem:[#allocation143_spill] sm:$0xff]  ;;  %v17681_v12 = vld [vmem:[#allocation54_spill] sm:$0xff] }
 0x8f5   : > { %6614 = vrot.lane.b32.xlu0 %v5722_v20, %s10027_s3  ;;  %9696 = vmatmul.mubr.msk.f32.gmra.mrb[58].mxu1 %vm7051_vm5, %v7021_v36  ;;  %v6803_v37 = vsel %vm2540_vm4, %v9937_v47, %v17678_v39  ;;  %v9938_v13 = vld [vmem:[#allocation4 + $0xf0] sm:$0xff]  ;;  %v17680_v29 = vld [vmem:[#allocation64_spill] sm:$0xff]  ;;  %v6858_v0 = vsel %vm2672_vm8, %v6826_v9, %v17681_v12  ;;  %v6807_v47 = vsel %vm2540_vm4, %v9941_v2, %v17683_v22  ;;  %v9942_v39 = vld [vmem:[#allocation4 + $0x120] sm:$0xff] }
 0x8f6   : > { %v6802_v54 = vsel %vm2540_vm4, %v9938_v13, %v17679_v45  ;;  %v9939_v52 = vld [vmem:[#allocation4 + $0x110] sm:$0xff]  ;;  %v6583_v19 = vpop.permute.xlu1 %6582  ;;  %v6806_v13 = vsel %vm2540_vm4, %v9942_v39, %v17684_v53  ;;  %v17685_v45 = vld [vmem:[#allocation230_spill] sm:$0xff]  ;;  %v6827_v9 = vsel %vm2606_vm6, %v6795_v31, %v17686_v63  ;;  %v17729_v43 = vld [vmem:[#allocation93_spill] sm:$0xff] }
 0x8f7   : > { %v6805_v55 = vsel %vm2540_vm4, %v9939_v52, %v17680_v29  ;;  %v17682_v20 = vld [vmem:[#allocation139_spill] sm:$0xff]  ;;  %v6890_v49 = vsel %vm2738_vm10, %v6858_v0, %v17685_v45  ;;  %v6457_v52 = vpop.permute.xlu0 %6456  ;;  %v5659_v29 = vld [vmem:[#allocation4 + $0x182] sm:$0xff]  ;;  %v17691_v0 = vld [vmem:[#allocation68_spill] sm:$0xff] }
 0x8f8   : > { %v6804_v36 = vsel %vm2540_vm4, %v9940_v62, %v17682_v20  ;;  %v17687_v12 = vld [vmem:[#allocation79_spill] sm:$0xff]  ;;  %v17688_v62 = vld [vmem:[#allocation212_spill] sm:$0xff]  ;;  %v6923_v22 = vsel %vm6910_vm14, %v6890_v49, %v17689_v1  ;;  %6362 = vrot.lane.b32.xlu1 %v5659_v29, %s10025_s19  ;;  %v6830_v39 = vsel %vm2606_vm6, %v6798_v42, %v17691_v0  ;;  %v17692_v45 = vld [vmem:[#allocation49_spill] sm:$0xff] }
 0x8f9   : > { %v6829_v56 = vsel %vm2606_vm6, %v6797_v44, %v17687_v12  ;;  %v6828_v20 = vsel %vm2606_vm6, %v6796_v14, %v17688_v62  ;;  %v17690_v53 = vld [vmem:[#allocation167_spill] sm:$0xff]  ;;  %v6833_v63 = vsel %vm2606_vm6, %v6801_v41, %v17692_v45  ;;  %v6956_v31 = vsel %vm6943_vm15, %v6923_v22, %v6455_v24  ;;  %6742 = vrot.lane.b32.xlu0 %v5659_v29, %s10028_s26  ;;  %v17694_v12 = vld [vmem:[#allocation209_spill] sm:$0xff]  ;;  %v17697_v41 = vld [vmem:[#allocation90_spill] sm:$0xff] }
 0x8fa   : > { %v6831_v2 = vsel %vm2606_vm6, %v6799_v21, %v17690_v53  ;;  %v17693_v44 = vld [vmem:[#allocation195_spill] sm:$0xff]  ;;  %v6835_v1 = vsel %vm2606_vm6, %v6803_v37, %v17694_v12  ;;  %v17695_v49 = vld [vmem:[#allocation213_spill] sm:$0xff]  ;;  %v6989_v21 = vsel %vm6976_vm2, %v6956_v31, %v6583_v19  ;;  %v6711_v53 = vpop.permute.xlu1 %6710  ;;  %v6836_v24 = vsel %vm2606_vm6, %v6804_v36, %v17697_v41  ;;  %v17702_v36 = vld [vmem:[#allocation94_spill] sm:$0xff] }
 0x8fb   : > { %v6832_v14 = vsel %vm2606_vm6, %v6800_v32, %v17693_v44  ;;  %v6834_v62 = vsel %vm2606_vm6, %v6802_v54, %v17695_v49  ;;  %v17696_v42 = vld [vmem:[#allocation229_spill] sm:$0xff]  ;;  %v17698_v22 = vld [vmem:[#allocation183_spill] sm:$0xff]  ;;  %v7022_v32 = vsel %vm7009_vm3, %v6989_v21, %v6711_v53  ;;  %v6585_v45 = vpop.permute.xlu0 %6584  ;;  %v17701_v49 = vld [vmem:[#allocation134_spill] sm:$0xff] }
 0x8fc   : > { %v6837_v0 = vsel %vm2606_vm6, %v6805_v55, %v17696_v42  ;;  %v6859_v29 = vsel %vm2672_vm8, %v6827_v9, %v17698_v22  ;;  %v5660_v44 = vld [vmem:[#allocation4 + $0x18a] sm:$0xff]  ;;  %v17699_v12 = vld [vmem:[#allocation137_spill] sm:$0xff]  ;;  %9698 = vmatprep.mubr.msk.f32.mxu1 %vm7051_vm5, %v7022_v32  ;;  %v6861_v9 = vsel %vm2672_vm8, %v6829_v56, %v17702_v36  ;;  %v17703_v21 = vld [vmem:[#allocation180_spill] sm:$0xff] }
 0x8fd   : > { %v6839_v54 = vsel %vm2606_vm6, %v6807_v47, %v17699_v12  ;;  %v17700_v19 = vld [vmem:[#allocation227_spill] sm:$0xff]  ;;  %v6891_v55 = vsel %vm2738_vm10, %v6859_v29, %v17701_v49  ;;  %6364 = vrot.lane.b32.xlu1 %v5660_v44, %s10025_s19  ;;  %v6860_v53 = vsel %vm2672_vm8, %v6828_v20, %v17703_v21  ;;  %v17705_v47 = vld [vmem:[#allocation153_spill] sm:$0xff]  ;;  %6744 = vrot.lane.b32.xlu0 %v5660_v44, %s10028_s26  ;;  %v17706_v29 = vld [vmem:[#allocation78_spill] sm:$0xff] }
 0x8fe   : > { %v6838_v31 = vsel %vm2606_vm6, %v6806_v13, %v17700_v19  ;;  %v17704_v42 = vld [vmem:[#allocation231_spill] sm:$0xff]  ;;  %v6924_v22 = vsel %vm6910_vm14, %v6891_v55, %v17705_v47  ;;  %v5693_v13 = vld [vmem:[#allocation4 + $0x1a0] sm:$0xff]  ;;  %v6862_v12 = vsel %vm2672_vm8, %v6830_v39, %v17706_v29  ;;  %v17708_v49 = vld [vmem:[#allocation228_spill] sm:$0xff]  ;;  %v6459_v36 = vpop.permute.xlu1 %6458 }
 0x8ff   : > { %v6863_v41 = vsel %vm2672_vm8, %v6831_v2, %v17704_v42  ;;  %v17707_v19 = vld [vmem:[#allocation217_spill] sm:$0xff]  ;;  %v6864_v56 = vsel %vm2672_vm8, %v6832_v14, %v17708_v49  ;;  %v6957_v20 = vsel %vm6943_vm15, %v6924_v22, %v6457_v52  ;;  %v5692_v21 = vld [vmem:[#allocation4 + $0x198] sm:$0xff]  ;;  %v17709_v2 = vld [vmem:[#allocation99_spill] sm:$0xff]  ;;  %v6713_v29 = vpop.permute.xlu0 %6712 }
 0x900   : > { %v6865_v32 = vsel %vm2672_vm8, %v6833_v63, %v17707_v19  ;;  %v6867_v42 = vsel %vm2672_vm8, %v6835_v1, %v17709_v2  ;;  %v17710_v55 = vld [vmem:[#allocation130_spill] sm:$0xff]  ;;  %v17711_v47 = vld [vmem:[#allocation164_spill] sm:$0xff]  ;;  %v6990_v39 = vsel %vm6976_vm2, %v6957_v20, %v6585_v45  ;;  %v17712_v63 = vld [vmem:[#allocation83_spill] sm:$0xff] }
 0x901   : > { %v6866_v44 = vsel %vm2672_vm8, %v6834_v62, %v17710_v55  ;;  %v6869_v37 = vsel %vm2672_vm8, %v6837_v0, %v17711_v47  ;;  %v6868_v19 = vsel %vm2672_vm8, %v6836_v24, %v17712_v63  ;;  %v17713_v14 = vld [vmem:[#allocation53_spill] sm:$0xff]  ;;  %v17715_v22 = vld [vmem:[#allocation216_spill] sm:$0xff]  ;;  %v7023_v1 = vsel %vm7009_vm3, %v6990_v39, %v6713_v29  ;;  %6492 = vrot.lane.b32.xlu1 %v5693_v13, %s10026_s20  ;;  %v7559_v62 = vld [vmem:[#allocation5] sm:$0xff] }
 0x902   : > { %v15381_v52 = vsel %vm2672_vm8, %v6839_v54, %v17713_v14  ;;  %v15385_v49 = vsel %vm2672_vm8, %v6838_v31, %v17715_v22  ;;  %v7591_v0 = vld [vmem:[#allocation5 + $0x1] sm:$0xff]  ;;  %v17718_v55 = vld [vmem:[#allocation118_spill] sm:$0xff]  ;;  %6490 = vrot.lane.b32.xlu0 %v5692_v21, %s10026_s20  ;;  %9699 = vmatmul.mubr.msk.f32.gmra.mrb[60].mxu1 %vm7051_vm5, %v7023_v1  ;;  %v5724_v21 = vld [vmem:[#allocation4 + $0x199] sm:$0xff] }
 0x903   : > { %17714 = vst [vmem:[#allocation45_spill] sm:$0xff] %v15381_v52  ;;  %17716 = vst [vmem:[#allocation237_spill] sm:$0xff] %v15385_v49  ;;  %v7655_v2 = vld [vmem:[#allocation5 + $0x2] sm:$0xff]  ;;  %v6892_v54 = vsel %vm2738_vm10, %v6860_v53, %v17718_v55  ;;  %v5725_v31 = vld [vmem:[#allocation4 + $0x1a1] sm:$0xff]  ;;  %v7623_v47 = vmax.f32 %v7559_v62, %v7591_v0  ;;  %v6587_v55 = vpop.permute.xlu1 %6586 }
 0x904   : > { %v17717_v20 = vld [vmem:[#allocation104_spill] sm:$0xff]  ;;  %v7719_v39 = vld [vmem:[#allocation5 + $0x18] sm:$0xff]  ;;  %v17720_v14 = vld [vmem:[#allocation95_spill] sm:$0xff] }
 0x905   : > { %v6893_v24 = vsel %vm2738_vm10, %v6861_v9, %v17717_v20  ;;  %v7783_v29 = vld [vmem:[#allocation5 + $0x19] sm:$0xff]  ;;  %v17719_v13 = vld [vmem:[#allocation220_spill] sm:$0xff]  ;;  %v6894_v22 = vsel %vm2738_vm10, %v6862_v12, %v17720_v14  ;;  %v17723_v1 = vld [vmem:[#allocation181_spill] sm:$0xff]  ;;  %6620 = vrot.lane.b32.xlu1 %v5725_v31, %s10027_s3 }
 0x906   : > { %v6895_v63 = vsel %vm2738_vm10, %v6863_v41, %v17719_v13  ;;  %v17721_v45 = vld [vmem:[#allocation190_spill] sm:$0xff]  ;;  %v17722_v20 = vld [vmem:[#allocation200_spill] sm:$0xff]  ;;  %v15406_v62 = vsel %vm2738_vm10, %v6867_v42, %v17723_v1  ;;  %v6461_v13 = vpop.permute.xlu0 %6460  ;;  %v6925_v42 = vsel %vm6910_vm14, %v6892_v54, %v17729_v43  ;;  %v7720_v1 = vld [vmem:[#allocation5 + $0x20] sm:$0xff]  ;;  %6618 = vrot.lane.b32.xlu0 %v5724_v21, %s10027_s3 }
 0x907   : > { %v6897_v9 = vsel %vm2738_vm10, %v6865_v32, %v17721_v45  ;;  %v6896_v53 = vsel %vm2738_vm10, %v6864_v56, %v17722_v20  ;;  %v17724_v0 = vld [vmem:[#allocation206_spill] sm:$0xff]  ;;  %v7687_v32 = vmax.f32 %v7623_v47, %v7655_v2  ;;  %v7560_v45 = vld [vmem:[#allocation5 + $0x8] sm:$0xff]  ;;  %v17727_v20 = vld [vmem:[#allocation41_spill] sm:$0xff]  ;;  %v6958_v47 = vsel %vm6943_vm15, %v6925_v42, %v6459_v36 }
 0x908   : > { %v15410_v49 = vsel %vm2738_vm10, %v6866_v44, %v17724_v0  ;;  %v17725_v41 = vld [vmem:[#allocation122_spill] sm:$0xff]  ;;  %v7592_v14 = vld [vmem:[#allocation5 + $0x9] sm:$0xff]  ;;  %v15418_v52 = vsel %vm2738_vm10, %v6868_v19, %v17727_v20  ;;  %v7784_v0 = vld [vmem:[#allocation5 + $0x21] sm:$0xff]  ;;  %v6991_v31 = vsel %vm6976_vm2, %v6958_v47, %v6587_v55 }
 0x909   : > { %v15414_v12 = vsel %vm2738_vm10, %v6869_v37, %v17725_v41  ;;  %v7656_v56 = vld [vmem:[#allocation5 + $0xa] sm:$0xff]  ;;  %17728 = vst [vmem:[#allocation133_spill] sm:$0xff] %v15418_v52  ;;  %v7624_v44 = vmax.f32 %v7560_v45, %v7592_v14  ;;  %v7848_v28 = vld [vmem:[#allocation5 + $0x22] sm:$0xff]  ;;  %v7625_v37 = vmax.f32 %v7719_v39, %v7783_v29  ;;  %v17730_v41 = vld [vmem:[#allocation66_spill] sm:$0xff]  ;;  %v7751_v20 = vmax.f32 %v7687_v32, %v7719_v39  ;;  %v6715_v45 = vpop.permute.xlu1 %6714 }
 0x90a   : > { %17726 = vst [vmem:[#allocation210_spill] sm:$0xff] %v15414_v12  ;;  %v6926_v2 = vsel %vm6910_vm14, %v6893_v24, %v17730_v41  ;;  %v5757_v11 = vld [vmem:[#allocation4 + $0x1a2] sm:$0xff]  ;;  %v5756_v19 = vld [vmem:[#allocation4 + $0x19a] sm:$0xff]  ;;  %v7626_v12 = vmax.f32 %v7720_v1, %v7784_v0  ;;  %v17731_v43 = vld [vmem:[#allocation203_spill] sm:$0xff]  ;;  %v7024_v39 = vsel %vm7009_vm3, %v6991_v31, %v6715_v45  ;;  %v6589_v32 = vpop.permute.xlu0 %6588 }
 0x90b   : > { %v7912_v25 = vld [vmem:[#allocation5 + $0x30] sm:$0xff]  ;;  %v15429_v54 = vsel %vm6910_vm14, %v6895_v63, %v17731_v43  ;;  %v7688_v52 = vmax.f32 %v7624_v44, %v7656_v56  ;;  %v7913_v8 = vld [vmem:[#allocation5 + $0x38] sm:$0xff]  ;;  %v7689_v36 = vmax.f32 %v7625_v37, %v7847_v7  ;;  %v7815_v41 = vmax.f32 %v7751_v20, %v7783_v29  ;;  %v17733_v43 = vld [vmem:[#allocation155_spill] sm:$0xff]  ;;  %6748 = vrot.lane.b32.xlu1 %v5757_v11, %s10028_s26 }
 0x90c   : > { %v7976_v14 = vld [vmem:[#allocation5 + $0x31] sm:$0xff]  ;;  %v15432_v24 = vld [vmem:[#allocation5 + $0x39] sm:$0xff]  ;;  %v7690_v6 = vmax.f32 %v7626_v12, %v7848_v28  ;;  %v3193_v63 = vmax.f32 %v15169_v26, 0.0  ;;  %v15440_v55 = vsel %vm6910_vm14, %v6897_v9, %v17733_v43  ;;  %9701 = vmatprep.mubr.msk.f32.mxu1 %vm7051_vm5, %v7024_v39  ;;  %6746 = vrot.lane.b32.xlu0 %v5756_v19, %s10028_s26  ;;  %v6959_v9 = vsel %vm6943_vm15, %v6926_v2, %v6461_v13  ;;  %v7914_v43 = vld [vmem:[#allocation5 + $0x48] sm:$0xff]  ;;  %s9314_s26 = sshll.u32 %s10137_s25, 12 }
 0x90d   : > { %v17732_v42 = vld [vmem:[#allocation105_spill] sm:$0xff]  ;;  %v7752_v44 = vmax.f32 %v7688_v52, %v7720_v1  ;;  %v7753_v37 = vmax.f32 %v7689_v36, %v7912_v25  ;;  %v8041_v47 = vld [vmem:[#allocation5 + $0x3a] sm:$0xff]  ;;  %v7627_v29 = vmax.f32 %v7912_v25, %v7976_v14  ;;  %v7628_v12 = vmax.f32 %v7913_v8, %v15432_v24  ;;  %v6463_v11 = vpop.permute.xlu1 %6462  ;;  %s16493_s19 = scalar_lea.hbm %s16565_s16, %s9314_s26  ;;  %s10029_s26 = smov [#allocation6]  }
 0x90e   : > { %v6927_v21 = vsel %vm6910_vm14, %v6894_v22, %v17732_v42  ;;  %v8040_v56 = vld [vmem:[#allocation5 + $0x32] sm:$0xff]  ;;  %v7879_v22 = vmax.f32 %v7815_v41, %v7847_v7  ;;  %v7754_v31 = vmax.f32 %v7690_v6, %v7913_v8  ;;  %v6992_v52 = vsel %vm6976_vm2, %v6959_v9, %v6589_v32  ;;  %v6717_v1 = vpop.permute.xlu0 %6716  ;;  %s9953_s25 = sshll.u32 %s10029_s26, 4  ;;  %s9954_s25 = int_to_ptr.vmem [resolvable:$false] %s9953_s25 }
 0x90f   : > { %v17734_v20 = vld [vmem:[#allocation234_spill] sm:$0xff]  ;;  %v7816_v42 = vmax.f32 %v7752_v44, %v7784_v0  ;;  %v7817_v39 = vmax.f32 %v7753_v37, %v7976_v14  ;;  %v7915_v6 = vld [vmem:[#allocation5 + $0x50] sm:$0xff]  ;;  %v7691_v36 = vmax.f32 %v7627_v29, %v8040_v56  ;;  %v7025_v41 = vsel %vm7009_vm3, %v6992_v52, %v6717_v1  ;;  %s9955_s2 = scalar_lea.vmem %s9954_s25, 8192 }
 0x910   : > { %v15448_v45 = vsel %vm6910_vm14, %v6896_v53, %v17734_v20  ;;  %v7944_v19 = vmax.f32 %v7879_v22, %v7912_v25  ;;  %v7818_v7 = vmax.f32 %v7754_v31, %v15432_v24  ;;  %v17735_v53 = vmax.f32 %v15047_v50, 0.0  ;;  %9702 = vmatmul.mubr.msk.f32.gmra.mrb[62].mxu1 %vm7051_vm5, %v7025_v41  ;;  %v17737_v22 = vld [vmem:[#allocation112_spill] sm:$0xff]  ;;  %v7979_v1 = vld [vmem:[#allocation5 + $0x51] sm:$0xff] }
 0x911   : > { %v7880_v20 = vmax.f32 %v7816_v42, %v7848_v28  ;;  %v7881_v13 = vmax.f32 %v7817_v39, %v8040_v56  ;;  %v7692_v2 = vmax.f32 %v7628_v12, %v8041_v47  ;;  %v3196_v0 = vmax.f32 %v15172_v33, 0.0  ;;  %v6591_v50 = vpop.permute.xlu1 %6590  ;;  %v7978_v12 = vld [vmem:[#allocation5 + $0x49] sm:$0xff] }
 0x912   : > { %8573 = vrot.lane.b32.xlu1 %v17735_v53, %s17096_s28  ;;  %v17736_v32 = vmax.f32 %v15055_v58, 0.0  ;;  %v8008_v25 = vmax.f32 %v7944_v19, %v7976_v14  ;;  %v7882_v44 = vmax.f32 %v7818_v7, %v8041_v47  ;;  %v7755_v37 = vmax.f32 %v7691_v36, %v7914_v43  ;;  %v6465_v39 = vpop.permute.xlu0 %6464 }
 0x913   : > { %v15465_v31 = vsel %vm6910_vm14, %v15406_v62, %v17737_v22  ;;  %v7945_v28 = vmax.f32 %v7880_v20, %v7913_v8  ;;  %v7946_v29 = vmax.f32 %v7881_v13, %v7914_v43  ;;  %v7756_v9 = vmax.f32 %v7692_v2, %v7915_v6  ;;  %v8042_v8 = vld [vmem:[#allocation5 + $0x4a] sm:$0xff] }
 0x914   : > { %8571 = vrot.lane.b32.xlu0 %v17736_v32, %s17096_s28  ;;  %v6960_v42 = vsel %vm6943_vm15, %v6927_v21, %v6463_v11  ;;  %v8072_v58 = vmax.f32 %v8008_v25, %v8040_v56  ;;  %v7947_v52 = vmax.f32 %v7882_v44, %v7915_v6  ;;  %v7819_v41 = vmax.f32 %v7755_v37, %v7978_v12  ;;  %v8043_v11 = vld [vmem:[#allocation5 + $0x52] sm:$0xff]  ;;  %v7916_v25 = vld [vmem:[#allocation5 + $0x60] sm:$0xff]  ;;  %v7917_v37 = vld [vmem:[#allocation5 + $0x68] sm:$0xff] }
 0x915   : > { %v6993_v14 = vsel %vm6976_vm2, %v6960_v42, %v6591_v50  ;;  %v17738_v19 = vmax.f32 %v15058_v17, 0.0  ;;  %v8009_v62 = vmax.f32 %v7945_v28, %v15432_v24  ;;  %v8010_v7 = vmax.f32 %v7946_v29, %v7978_v12  ;;  %v6719_v2 = vpop.permute.xlu1 %6718  ;;  %v7980_v24 = vld [vmem:[#allocation5 + $0x61] sm:$0xff] }
 0x916   : > { %v7820_v36 = vmax.f32 %v7756_v9, %v7979_v1  ;;  %v3195_v53 = vmax.f32 %v15180_v3, 0.0  ;;  %v17739_v21 = vmax.f32 %v15061_v10, 0.0  ;;  %9730 = vmatprep.mubr.msk.f32.mxu0 %vm553_vm1, %v8072_v58  ;;  %v8011_v56 = vmax.f32 %v7947_v52, %v7979_v1  ;;  %v6593_v28 = vpop.permute.xlu0 %6592  ;;  %v7981_v9 = vld [vmem:[#allocation5 + $0x69] sm:$0xff]  ;;  %v7918_v58 = vld [vmem:[#allocation5 + $0x78] sm:$0xff] }
 0x917   : > { %8577 = vrot.lane.b32.xlu1 %v17738_v19, %s17096_s28  ;;  %v7883_v20 = vmax.f32 %v7819_v41, %v8042_v8  ;;  %v7629_v13 = vmax.f32 %v7914_v43, %v7978_v12  ;;  %v8073_v17 = vmax.f32 %v8009_v62, %v8041_v47  ;;  %v8074_v32 = vmax.f32 %v8010_v7, %v8042_v8  ;;  %v15481_v52 = vld [vmem:[#allocation5 + $0x79] sm:$0xff]  ;;  %v8044_v12 = vld [vmem:[#allocation5 + $0x62] sm:$0xff]  ;;  %v8045_v19 = vld [vmem:[#allocation5 + $0x6a] sm:$0xff] }
 0x918   : > { %8575 = vrot.lane.b32.xlu0 %v17739_v21, %s17096_s28  ;;  %v7884_v44 = vmax.f32 %v7820_v36, %v8043_v11  ;;  %v7630_v22 = vmax.f32 %v7915_v6, %v7979_v1  ;;  %v6961_v50 = vsel %vm6943_vm15, %v15429_v54, %v6465_v39  ;;  %v7026_v10 = vsel %vm7009_vm3, %v6993_v14, %v6719_v2  ;;  %v8046_v36 = vld [vmem:[#allocation5 + $0x7a] sm:$0xff] }
 0x919   : > { %v7948_v29 = vmax.f32 %v7883_v20, %v7916_v25  ;;  %v7693_v42 = vmax.f32 %v7629_v13, %v8042_v8  ;;  %v3198_v47 = vmax.f32 %v15183_v51, 0.0  ;;  %v17740_v43 = vmax.f32 %v15065_v35, 0.0  ;;  %9704 = vmatprep.mubr.msk.f32.mxu1 %vm7051_vm5, %v7026_v10  ;;  %9731 = vmatmul.mubr.msk.f32.vlgmr.msra.gmra.mrb[48].mxu0 %vm553_vm1, %v8073_v17  ;;  %v6467_v35 = vpop.permute.xlu1 %6466  ;;  %v7983_v17 = vld [vmem:[#allocation5 + $0x81] sm:$0xff]  ;;  %v17742_v10 = vld [vmem:[#allocation193_spill] sm:$0xff] }
 0x91a   : > { %v8075_v6 = vmax.f32 %v8011_v56, %v8043_v11  ;;  %v7949_v54 = vmax.f32 %v7884_v44, %v7917_v37  ;;  %v7694_v39 = vmax.f32 %v7630_v22, %v8043_v11  ;;  %v3197_v1 = vmax.f32 %v15190_v5, 0.0  ;;  %9733 = vmatprep.mubr.msk.f32.mxu0 %vm553_vm1, %v8074_v32  ;;  %v6721_v13 = vpop.permute.xlu0 %6720  ;;  %v7919_v44 = vld [vmem:[#allocation5 + $0x80] sm:$0xff] }
 0x91b   : > { %8581 = vrot.lane.b32.xlu1 %v17740_v43, %s17096_s28  ;;  %v17741_v41 = vmax.f32 %v15068_v59, 0.0  ;;  %v8012_v14 = vmax.f32 %v7948_v29, %v7980_v24  ;;  %v7757_v62 = vmax.f32 %v7693_v42, %v7916_v25  ;;  %v7631_v7 = vmax.f32 %v7916_v25, %v7980_v24  ;;  %v15505_v42 = vld [vmem:[#allocation5 + $0x90] sm:$0xff]  ;;  %v8047_v43 = vld [vmem:[#allocation5 + $0x82] sm:$0xff] }
 0x91c   : > { %v8013_v8 = vmax.f32 %v7949_v54, %v7981_v9  ;;  %v7758_v21 = vmax.f32 %v7694_v39, %v7917_v37  ;;  %v7632_v56 = vmax.f32 %v7917_v37, %v7981_v9  ;;  %v7633_v11 = vmax.f32 %v7918_v58, %v15481_v52 }
 0x91d   : > { %8579 = vrot.lane.b32.xlu0 %v17741_v41, %s17096_s28  ;;  %v6994_v20 = vsel %vm6976_vm2, %v6961_v50, %v6593_v28  ;;  %v8076_v59 = vmax.f32 %v8012_v14, %v8044_v12  ;;  %v7821_v2 = vmax.f32 %v7757_v62, %v7980_v24  ;;  %v7695_v22 = vmax.f32 %v7631_v7, %v8044_v12  ;;  %v6595_v41 = vpop.permute.xlu1 %6594  ;;  %v7984_v14 = vld [vmem:[#allocation5 + $0x91] sm:$0xff] }
 0x91e   : > { %v15499_v25 = vsel %vm6910_vm14, %v15410_v49, %v17742_v10  ;;  %v7027_v32 = vsel %vm7009_vm3, %v6994_v20, %v6721_v13  ;;  %v17743_v37 = vmax.f32 %v15071_v38, 0.0  ;;  %v7822_v29 = vmax.f32 %v7758_v21, %v7981_v9  ;;  %9734 = vmatmul.mubr.msk.f32.gmra.mrb[50].mxu0 %vm553_vm1, %v8075_v6  ;;  %v7921_v20 = vld [vmem:[#allocation5 + $0x98] sm:$0xff] }
 0x91f   : > { %v7696_v50 = vmax.f32 %v7632_v56, %v8045_v19  ;;  %v3200_v24 = vmax.f32 %v15193_v18, 0.0  ;;  %v17744_v28 = vmax.f32 %v15075_v34, 0.0  ;;  %9705 = vmatmul.mubr.msk.f32.gmra.mrb[64].mxu1 %vm7051_vm5, %v7027_v32  ;;  %v7885_v49 = vmax.f32 %v7821_v2, %v8044_v12  ;;  %v6469_v56 = vpop.permute.xlu0 %6468  ;;  %9736 = vmatprep.mubr.msk.f32.mxu0 %vm553_vm1, %v8076_v59  ;;  %v7985_v13 = vld [vmem:[#allocation5 + $0x99] sm:$0xff] }
 0x920   : > { %8585 = vrot.lane.b32.xlu1 %v17743_v37, %s17096_s28  ;;  %v7759_v54 = vmax.f32 %v7695_v22, %v7918_v58  ;;  %v7697_v39 = vmax.f32 %v7633_v11, %v8046_v36  ;;  %v8077_v38 = vmax.f32 %v8013_v8, %v8045_v19  ;;  %v7886_v9 = vmax.f32 %v7822_v29, %v8045_v19  ;;  %v8048_v29 = vld [vmem:[#allocation5 + $0x92] sm:$0xff] }
 0x921   : > { %8583 = vrot.lane.b32.xlu0 %v17744_v28, %s17096_s28  ;;  %v7760_v62 = vmax.f32 %v7696_v50, %v7919_v44  ;;  %v7634_v7 = vmax.f32 %v7919_v44, %v7983_v17  ;;  %v6962_v21 = vsel %vm6943_vm15, %v15448_v45, %v6467_v35  ;;  %v7950_v34 = vmax.f32 %v7885_v49, %v7918_v58  ;;  %v6723_v32 = vpop.permute.xlu1 %6722 }
 0x922   : > { %v7823_v12 = vmax.f32 %v7759_v54, %v15481_v52  ;;  %v7761_v11 = vmax.f32 %v7697_v39, %v15505_v42  ;;  %v6995_v6 = vsel %vm6976_vm2, %v6962_v21, %v6595_v41  ;;  %v17745_v19 = vmax.f32 %v15085_v16, 0.0  ;;  %9737 = vmatmul.mubr.msk.f32.gmra.mrb[52].mxu0 %vm553_vm1, %v8077_v38  ;;  %v8049_v39 = vld [vmem:[#allocation5 + $0x9a] sm:$0xff]  ;;  %v7922_v41 = vld [vmem:[#allocation5 + $0xa8] sm:$0xff] }
 0x923   : > { %v7951_v8 = vmax.f32 %v7886_v9, %v7919_v44  ;;  %v7824_v2 = vmax.f32 %v7760_v62, %v7983_v17  ;;  %v7698_v22 = vmax.f32 %v7634_v7, %v8047_v43  ;;  %v17746_v45 = vmax.f32 %v15105_v46, 0.0  ;;  %v6597_v49 = vpop.permute.xlu0 %6596  ;;  %v7986_v9 = vld [vmem:[#allocation5 + $0xa9] sm:$0xff] }
 0x924   : > { %8589 = vrot.lane.b32.xlu1 %v17745_v19, %s17096_s28  ;;  %v8014_v58 = vmax.f32 %v7950_v34, %v15481_v52  ;;  %v7887_v35 = vmax.f32 %v7823_v12, %v8046_v36  ;;  %v7825_v59 = vmax.f32 %v7761_v11, %v7984_v14  ;;  %v7635_v10 = vmax.f32 %v15505_v42, %v7984_v14 }
 0x925   : > { %8587 = vrot.lane.b32.xlu0 %v17746_v45, %s17096_s28  ;;  %v8015_v37 = vmax.f32 %v7951_v8, %v7983_v17  ;;  %v7888_v16 = vmax.f32 %v7824_v2, %v8047_v43  ;;  %v7762_v50 = vmax.f32 %v7698_v22, %v7921_v20  ;;  %v7636_v44 = vmax.f32 %v7921_v20, %v7985_v13 }
 0x926   : > { %v7028_v28 = vsel %vm7009_vm3, %v6995_v6, %v6723_v32  ;;  %v8078_v54 = vmax.f32 %v8014_v58, %v8046_v36  ;;  %v7952_v46 = vmax.f32 %v7887_v35, %v15505_v42  ;;  %v7889_v52 = vmax.f32 %v7825_v59, %v8048_v29  ;;  %v8050_v6 = vld [vmem:[#allocation5 + $0xaa] sm:$0xff]  ;;  %v7924_v35 = vld [vmem:[#allocation5 + $0xc0] sm:$0xff] }
 0x927   : > { %v3199_v62 = vmax.f32 %v15196_v15, 0.0  ;;  %v6963_v38 = vsel %vm6943_vm15, %v15440_v55, %v6469_v56  ;;  %v17747_v17 = vmax.f32 %v15118_v40, 0.0  ;;  %9707 = vmatprep.mubr.msk.f32.mxu1 %vm7051_vm5, %v7028_v28  ;;  %v8079_v7 = vmax.f32 %v8015_v37, %v8047_v43  ;;  %v7923_v55 = vld [vmem:[#allocation5 + $0xb0] sm:$0xff]  ;;  %v6471_v56 = vpop.permute.xlu1 %6470  ;;  %v6725_v2 = vpop.permute.xlu0 %6724  ;;  %v15632_v15 = vld [vmem:[#allocation5 + $0x121] sm:$0xff] }
 0x928   : > { %v7953_v21 = vmax.f32 %v7888_v16, %v7921_v20  ;;  %v3202_v36 = vmax.f32 %v15233_v30, 0.0  ;;  %v17748_v42 = vmax.f32 %v15142_v57, 0.0  ;;  %9739 = vmatprep.mubr.msk.f32.mxu0 %vm553_vm1, %v8078_v54  ;;  %v8016_v34 = vmax.f32 %v7952_v46, %v7984_v14  ;;  %v7987_v58 = vld [vmem:[#allocation5 + $0xb1] sm:$0xff]  ;;  %v15544_v14 = vld [vmem:[#allocation5 + $0xc1] sm:$0xff] }
 0x929   : > { %8593 = vrot.lane.b32.xlu1 %v17747_v17, %s17096_s28  ;;  %v7954_v12 = vmax.f32 %v7889_v52, %v7922_v41  ;;  %v7826_v11 = vmax.f32 %v7762_v50, %v7985_v13  ;;  %9740 = vmatmul.mubr.msk.f32.gmra.mrb[54].mxu0 %vm553_vm1, %v8079_v7  ;;  %v7699_v19 = vmax.f32 %v7635_v10, %v8048_v29  ;;  %v17749_v32 = vmax.f32 %v15159_v60, 0.0  ;;  %v7925_v16 = vld [vmem:[#allocation5 + $0xc8] sm:$0xff]  ;;  %v8051_v60 = vld [vmem:[#allocation5 + $0xb2] sm:$0xff] }
 0x92a   : > { %8591 = vrot.lane.b32.xlu0 %v17748_v42, %s17096_s28  ;;  %v8017_v40 = vmax.f32 %v7953_v21, %v7985_v13  ;;  %v7700_v43 = vmax.f32 %v7636_v44, %v8049_v39  ;;  %v7637_v20 = vmax.f32 %v7922_v41, %v7986_v9  ;;  %v6996_v8 = vsel %vm6976_vm2, %v6963_v38, %v6597_v49  ;;  %v15550_v50 = vld [vmem:[#allocation5 + $0xc9] sm:$0xff] }
 0x92b   : > { %v8080_v22 = vmax.f32 %v8016_v34, %v8048_v29  ;;  %v8018_v57 = vmax.f32 %v7954_v12, %v7986_v9  ;;  %v7890_v45 = vmax.f32 %v7826_v11, %v8049_v39  ;;  %v7029_v59 = vsel %vm7009_vm3, %v6996_v8, %v6725_v2  ;;  %v6599_v46 = vpop.permute.xlu1 %6598  ;;  %v8052_v52 = vld [vmem:[#allocation5 + $0xc2] sm:$0xff]  ;;  %v15562_v42 = vld [vmem:[#allocation5 + $0xca] sm:$0xff]  ;;  %v7926_v12 = vld [vmem:[#allocation5 + $0xd8] sm:$0xff] }
 0x92c   : > { %v8081_v13 = vmax.f32 %v8017_v40, %v8049_v39  ;;  %v7763_v10 = vmax.f32 %v7699_v19, %v7922_v41  ;;  %v7764_v37 = vmax.f32 %v7700_v43, %v7923_v55  ;;  %v3201_v29 = vmax.f32 %v15236_v23, 0.0  ;;  %9708 = vmatmul.mubr.msk.f32.gmra.mrb[66].mxu1 %vm7051_vm5, %v7029_v59  ;;  %v15564_v11 = vld [vmem:[#allocation5 + $0xd9] sm:$0xff] }
 0x92d   : > { %8597 = vrot.lane.b32.xlu1 %v17749_v32, %s17096_s28  ;;  %v17750_v44 = vmax.f32 %v15162_v61, 0.0  ;;  %v8082_v28 = vmax.f32 %v8018_v57, %v8050_v6  ;;  %v7955_v49 = vmax.f32 %v7890_v45, %v7923_v55  ;;  %v7701_v54 = vmax.f32 %v7637_v20, %v8050_v6  ;;  %9742 = vmatprep.mubr.msk.f32.mxu0 %vm553_vm1, %v8080_v22  ;;  %v6473_v61 = vpop.permute.xlu0 %6472 }
 0x92e   : > { %v7827_v39 = vmax.f32 %v7763_v10, %v7986_v9  ;;  %v7828_v41 = vmax.f32 %v7764_v37, %v7987_v58  ;;  %v7638_v38 = vmax.f32 %v7923_v55, %v7987_v58  ;;  %v7639_v17 = vmax.f32 %v7924_v35, %v15544_v14  ;;  %9743 = vmatmul.mubr.msk.f32.gmra.mrb[56].mxu0 %vm553_vm1, %v8081_v13  ;;  %v15581_v10 = vld [vmem:[#allocation5 + $0xe1] sm:$0xff] }
 0x92f   : > { %8595 = vrot.lane.b32.xlu0 %v17750_v44, %s17096_s28  ;;  %v6964_v7 = vsel %vm6943_vm15, %v15499_v25, %v6471_v56  ;;  %v8019_v21 = vmax.f32 %v7955_v49, %v7987_v58  ;;  %v7765_v34 = vmax.f32 %v7701_v54, %v7924_v35  ;;  %v7640_v9 = vmax.f32 %v7925_v16, %v15550_v50  ;;  %v6727_v22 = vpop.permute.xlu1 %6726  ;;  %v7927_v58 = vld [vmem:[#allocation5 + $0xe0] sm:$0xff] }
 0x930   : > { %v3204_v40 = vmax.f32 %v15243_v48, 0.0  ;;  %v6997_v55 = vsel %vm6976_vm2, %v6964_v7, %v6599_v46  ;;  %v17751_v19 = vmax.f32 %v15165_v4, 0.0  ;;  %9745 = vmatprep.mubr.msk.f32.mxu0 %vm553_vm1, %v8082_v28  ;;  %v7891_v25 = vmax.f32 %v7827_v39, %v8050_v6  ;;  %v8055_v7 = vld [vmem:[#allocation5 + $0xe2] sm:$0xff] }
 0x931   : > { %v7892_v56 = vmax.f32 %v7828_v41, %v8051_v60  ;;  %v8083_v43 = vmax.f32 %v8019_v21, %v8051_v60  ;;  %v7829_v20 = vmax.f32 %v7765_v34, %v15544_v14  ;;  %v7702_v8 = vmax.f32 %v7638_v38, %v8051_v60  ;;  %v6601_v32 = vpop.permute.xlu0 %6600  ;;  %v17752_v21 = vld [vmem:[#allocation107_spill] sm:$0xff] }
 0x932   : > { %8601 = vrot.lane.b32.xlu1 %v17751_v19, %s17096_s28  ;;  %v7703_v2 = vmax.f32 %v7639_v17, %v8052_v52  ;;  %v7956_v57 = vmax.f32 %v7891_v25, %v7924_v35  ;;  %v7704_v4 = vmax.f32 %v7640_v9, %v15562_v42  ;;  %v7641_v59 = vmax.f32 %v7926_v12, %v15564_v11  ;;  %v7929_v9 = vld [vmem:[#allocation5 + $0xf8] sm:$0xff]  ;;  %v17753_v19 = vld [vmem:[#allocation211_spill] sm:$0xff] }
 0x933   : > { %8599 = vrot.lane.b32.xlu0 %v3193_v63, %s17096_s28  ;;  %v7957_v45 = vmax.f32 %v7892_v56, %v7925_v16  ;;  %v7030_v6 = vsel %vm7009_vm3, %v6997_v55, %v6727_v22  ;;  %9746 = vmatmul.mubr.msk.f32.gmra.mrb[58].mxu0 %vm553_vm1, %v8083_v43  ;;  %v7893_v26 = vmax.f32 %v7829_v20, %v8052_v52  ;;  %v8054_v63 = vld [vmem:[#allocation5 + $0xda] sm:$0xff]  ;;  %v3203_v44 = vmax.f32 %v15246_v27, 0.0  ;;  %v6349_v39 = vpop.permute.xlu1 %6348 }
 0x934   : > { %v7766_v13 = vmax.f32 %v7702_v8, %v7925_v16  ;;  %v7767_v37 = vmax.f32 %v7703_v2, %v7926_v12  ;;  %v6965_v35 = vsel %vm6943_vm15, %v15465_v31, %v6473_v61  ;;  %9710 = vmatprep.mubr.msk.f32.mxu1 %vm7051_vm5, %v7030_v6  ;;  %v8020_v28 = vmax.f32 %v7956_v57, %v15544_v14  ;;  %v7928_v31 = vld [vmem:[#allocation5 + $0xf0] sm:$0xff]  ;;  %v7993_v55 = vld [vmem:[#allocation5 + $0xf9] sm:$0xff]  ;;  %v7930_v6 = vld [vmem:[#allocation5 + $0x108] sm:$0xff] }
 0x935   : > { %v8021_v49 = vmax.f32 %v7957_v45, %v15550_v50  ;;  %v7958_v16 = vmax.f32 %v7893_v26, %v7926_v12  ;;  %v7768_v60 = vmax.f32 %v7704_v4, %v7927_v58  ;;  %v7705_v41 = vmax.f32 %v7641_v59, %v8054_v63  ;;  %v6729_v17 = vpop.permute.xlu0 %6728  ;;  %v7992_v61 = vld [vmem:[#allocation5 + $0xf1] sm:$0xff]  ;;  %v8057_v8 = vld [vmem:[#allocation5 + $0xfa] sm:$0xff] }
 0x936   : > { %8605 = vrot.lane.b32.xlu1 %v3196_v0, %s17096_s28  ;;  %v7830_v54 = vmax.f32 %v7766_v13, %v15550_v50  ;;  %v7831_v46 = vmax.f32 %v7767_v37, %v15564_v11  ;;  %v8084_v33 = vmax.f32 %v8020_v28, %v8052_v52  ;;  %v7642_v14 = vmax.f32 %v7927_v58, %v15581_v10  ;;  %v17754_v45 = vld [vmem:[#allocation157_spill] sm:$0xff] }
 0x937   : > { %8603 = vrot.lane.b32.xlu0 %v3195_v53, %s17096_s28  ;;  %v8085_v0 = vmax.f32 %v8021_v49, %v15562_v42  ;;  %v6998_v38 = vsel %vm6976_vm2, %v6965_v35, %v6601_v32  ;;  %v8022_v3 = vmax.f32 %v7958_v16, %v15564_v11  ;;  %v3206_v34 = vmax.f32 %v17752_v21, 0.0  ;;  %v6477_v51 = vpop.permute.xlu1 %6476  ;;  %v17755_v4 = vld [vmem:[#allocation133_spill] sm:$0xff] }
 0x938   : > { %v7894_v53 = vmax.f32 %v7830_v54, %v15562_v42  ;;  %v7895_v50 = vmax.f32 %v7831_v46, %v8054_v63  ;;  %v7031_v12 = vsel %vm7009_vm3, %v6998_v38, %v6729_v17  ;;  %9748 = vmatprep.mubr.msk.f32.mxu0 %vm553_vm1, %v8084_v33  ;;  %v7832_v52 = vmax.f32 %v7768_v60, %v15581_v10  ;;  %v7994_v32 = vld [vmem:[#allocation5 + $0x109] sm:$0xff]  ;;  %v15625_v16 = vld [vmem:[#allocation5 + $0x111] sm:$0xff] }
 0x939   : > { %v7769_v11 = vmax.f32 %v7705_v41, %v7928_v31  ;;  %v3205_v42 = vmax.f32 %v17753_v19, 0.0  ;;  %9711 = vmatmul.mubr.msk.f32.gmra.mrb[68].mxu1 %vm7051_vm5, %v7031_v12  ;;  %v8086_v25 = vmax.f32 %v8022_v3, %v8054_v63  ;;  %9749 = vmatmul.mubr.msk.f32.gmra.mrb[60].mxu0 %vm553_vm1, %v8085_v0  ;;  %v7706_v22 = vmax.f32 %v7642_v14, %v8055_v7  ;;  %v6475_v5 = vpop.permute.xlu0 %6474  ;;  %v17756_v63 = vld [vmem:[#allocation210_spill] sm:$0xff]  ;;  %v7931_v49 = vld [vmem:[#allocation5 + $0x110] sm:$0xff]  ;;  %v7932_v41 = vld [vmem:[#allocation5 + $0x120] sm:$0xff] }
 0x93a   : > { %8609 = vrot.lane.b32.xlu1 %v3198_v47, %s17096_s28  ;;  %v7959_v56 = vmax.f32 %v7894_v53, %v7927_v58  ;;  %v7960_v43 = vmax.f32 %v7895_v50, %v7928_v31  ;;  %v8056_v47 = vld [vmem:[#allocation5 + $0xf2] sm:$0xff]  ;;  %v7896_v20 = vmax.f32 %v7832_v52, %v8055_v7  ;;  %v7643_v57 = vmax.f32 %v7928_v31, %v7992_v61  ;;  %v8058_v0 = vld [vmem:[#allocation5 + $0x10a] sm:$0xff] }
 0x93b   : > { %8607 = vrot.lane.b32.xlu0 %v3197_v1, %s17096_s28  ;;  %v7833_v2 = vmax.f32 %v7769_v11, %v7992_v61  ;;  %v6933_v59 = vsel %vm6910_vm14, %v17755_v4, %v17754_v45  ;;  %9751 = vmatprep.mubr.msk.f32.mxu0 %vm553_vm1, %v8086_v25  ;;  %v7644_v26 = vmax.f32 %v7929_v9, %v7993_v55  ;;  %v6605_v60 = vpop.permute.xlu1 %6604  ;;  %v7933_v53 = vld [vmem:[#allocation5 + $0x128] sm:$0xff]  ;;  %v17758_v4 = vld [vmem:[#allocation221_spill] sm:$0xff] }
 0x93c   : > { %v8023_v1 = vmax.f32 %v7959_v56, %v15581_v10  ;;  %v8024_v58 = vmax.f32 %v7960_v43, %v7992_v61  ;;  %v6934_v13 = vsel %vm6910_vm14, %v17756_v63, %v6349_v39  ;;  %v7961_v37 = vmax.f32 %v7896_v20, %v7929_v9  ;;  %v17757_v61 = vld [vmem:[#allocation166_spill] sm:$0xff]  ;;  %v8061_v45 = vld [vmem:[#allocation5 + $0x12a] sm:$0xff] }
 0x93d   : > { %v7897_v35 = vmax.f32 %v7833_v2, %v8056_v47  ;;  %v7770_v28 = vmax.f32 %v7706_v22, %v7929_v9  ;;  %v7707_v46 = vmax.f32 %v7643_v57, %v8056_v47  ;;  %v7708_v31 = vmax.f32 %v7644_v26, %v8057_v8  ;;  %v6603_v17 = vpop.permute.xlu0 %6602  ;;  %v17762_v19 = vld [vmem:[#allocation45_spill] sm:$0xff] }
 0x93e   : > { %8613 = vrot.lane.b32.xlu1 %v3200_v24, %s17096_s28  ;;  %v8087_v10 = vmax.f32 %v8023_v1, %v8055_v7  ;;  %v8088_v54 = vmax.f32 %v8024_v58, %v8056_v47  ;;  %v8025_v39 = vmax.f32 %v7961_v37, %v7993_v55  ;;  %v8059_v24 = vld [vmem:[#allocation5 + $0x112] sm:$0xff]  ;;  %v7645_v14 = vmax.f32 %v7930_v6, %v7994_v32  ;;  %v15634_v7 = vld [vmem:[#allocation5 + $0x129] sm:$0xff] }
 0x93f   : > { %8611 = vrot.lane.b32.xlu0 %v3199_v62, %s17096_s28  ;;  %v7962_v33 = vmax.f32 %v7897_v35, %v7930_v6  ;;  %v7834_v18 = vmax.f32 %v7770_v28, %v7993_v55  ;;  %v6967_v38 = vsel %vm6943_vm15, %v6934_v13, %v6477_v51  ;;  %v7771_v3 = vmax.f32 %v7707_v46, %v7930_v6  ;;  %v15647_v51 = vpop.permute.xlu1 %6350  ;;  %v17759_v6 = vld [vmem:[#allocation70_spill] sm:$0xff]  ;;  %v7935_v28 = vld [vmem:[#allocation5 + $0x140] sm:$0xff] }
 0x940   : > { %9752 = vmatmul.mubr.msk.f32.gmra.mrb[62].mxu0 %vm553_vm1, %v8087_v10  ;;  %v7772_v62 = vmax.f32 %v7708_v31, %v7931_v49  ;;  %v7646_v50 = vmax.f32 %v7931_v49, %v15625_v16  ;;  %v3208_v12 = vmax.f32 %v17757_v61, 0.0  ;;  %v6966_v52 = vsel %vm6943_vm15, %v6933_v59, %v6475_v5  ;;  %v7934_v37 = vld [vmem:[#allocation5 + $0x138] sm:$0xff] }
 0x941   : > { %9754 = vmatprep.mubr.msk.f32.mxu0 %vm553_vm1, %v8088_v54  ;;  %v8089_v9 = vmax.f32 %v8025_v39, %v8057_v8  ;;  %v8026_v55 = vmax.f32 %v7962_v33, %v7994_v32  ;;  %v7898_v11 = vmax.f32 %v7834_v18, %v8057_v8  ;;  %v7835_v25 = vmax.f32 %v7771_v3, %v7994_v32  ;;  %v6731_v22 = vpop.permute.xlu0 %6730  ;;  %v8060_v8 = vld [vmem:[#allocation5 + $0x122] sm:$0xff]  ;;  %v7998_v31 = vld [vmem:[#allocation5 + $0x139] sm:$0xff] }
 0x942   : > { %8617 = vrot.lane.b32.xlu1 %v3202_v36, %s17096_s28  ;;  %v7836_v56 = vmax.f32 %v7772_v62, %v15625_v16  ;;  %v7709_v43 = vmax.f32 %v7645_v14, %v8058_v0  ;;  %v7710_v20 = vmax.f32 %v7646_v50, %v8059_v24  ;;  %v7647_v30 = vmax.f32 %v7932_v41, %v15632_v15  ;;  %v7999_v18 = vld [vmem:[#allocation5 + $0x141] sm:$0xff]  ;;  %v7936_v14 = vld [vmem:[#allocation5 + $0x150] sm:$0xff] }
 0x943   : > { %8615 = vrot.lane.b32.xlu0 %v3201_v29, %s17096_s28  ;;  %v8090_v47 = vmax.f32 %v8026_v55, %v8058_v0  ;;  %v7648_v36 = vmax.f32 %v7933_v53, %v15634_v7  ;;  %v6999_v2 = vsel %vm6976_vm2, %v6966_v52, %v6603_v17  ;;  %v7963_v23 = vmax.f32 %v7898_v11, %v7931_v49  ;;  %v15665_v35 = vpop.permute.xlu1 %6352  ;;  %v15676_v17 = vld [vmem:[#allocation5 + $0x151] sm:$0xff]  ;;  %v8062_v62 = vld [vmem:[#allocation5 + $0x13a] sm:$0xff] }
 0x944   : > { %9755 = vmatmul.mubr.msk.f32.gmra.mrb[64].mxu0 %vm553_vm1, %v8089_v9  ;;  %v7899_v29 = vmax.f32 %v7835_v25, %v8058_v0  ;;  %v7900_v57 = vmax.f32 %v7836_v56, %v8059_v24  ;;  %v3207_v59 = vmax.f32 %v17758_v4, 0.0  ;;  %v7032_v5 = vsel %vm7009_vm3, %v6999_v2, %v6731_v22  ;;  %v15686_v52 = vld [vmem:[#allocation5 + $0x152] sm:$0xff] }
 0x945   : > { %9757 = vmatprep.mubr.msk.f32.mxu0 %vm553_vm1, %v8090_v47  ;;  %v7773_v1 = vmax.f32 %v7709_v43, %v7932_v41  ;;  %v7774_v58 = vmax.f32 %v7710_v20, %v7933_v53  ;;  %v3210_v32 = vmax.f32 %v17759_v6, 0.0  ;;  %9713 = vmatprep.mubr.msk.f32.mxu1 %vm7051_vm5, %v7032_v5  ;;  %v8027_v26 = vmax.f32 %v7963_v23, %v15625_v16  ;;  %v6733_v27 = vpop.permute.xlu0 %6732  ;;  %v17761_v55 = vld [vmem:[#allocation189_spill] sm:$0xff]  ;;  %v7937_v56 = vld [vmem:[#allocation5 + $0x158] sm:$0xff] }
 0x946   : > { %8621 = vrot.lane.b32.xlu1 %v3204_v40, %s17096_s28  ;;  %v7964_v63 = vmax.f32 %v7899_v29, %v7932_v41  ;;  %v7965_v13 = vmax.f32 %v7900_v57, %v7933_v53  ;;  %v7711_v49 = vmax.f32 %v7647_v30, %v8060_v8  ;;  %v7712_v10 = vmax.f32 %v7648_v36, %v8061_v45  ;;  %v8001_v43 = vld [vmem:[#allocation5 + $0x159] sm:$0xff]  ;;  %v17763_v30 = vld [vmem:[#allocation129_spill] sm:$0xff] }
 0x947   : > { %8619 = vrot.lane.b32.xlu0 %v3203_v44, %s17096_s28  ;;  %v7837_v48 = vmax.f32 %v7773_v1, %v15632_v15  ;;  %v7838_v40 = vmax.f32 %v7774_v58, %v15634_v7  ;;  %v7000_v54 = vsel %vm6976_vm2, %v6967_v38, %v6605_v60  ;;  %v8091_v44 = vmax.f32 %v8027_v26, %v8059_v24  ;;  %v17760_v60 = vld [vmem:[#allocation194_spill] sm:$0xff]  ;;  %v15683_v21 = vpop.permute.xlu1 %6480  ;;  %v17764_v36 = vld [vmem:[#allocation237_spill] sm:$0xff] }
 0x948   : > { %v8028_v46 = vmax.f32 %v7964_v63, %v15632_v15  ;;  %v8029_v16 = vmax.f32 %v7965_v13, %v15634_v7  ;;  %v7033_v39 = vsel %vm7009_vm3, %v7000_v54, %v6733_v27  ;;  %v7775_v41 = vmax.f32 %v7711_v49, %v7934_v37  ;;  %v8063_v7 = vld [vmem:[#allocation5 + $0x142] sm:$0xff]  ;;  %v8065_v13 = vld [vmem:[#allocation5 + $0x15a] sm:$0xff]  ;;  %v7939_v49 = vld [vmem:[#allocation5 + $0x170] sm:$0xff] }
 0x949   : > { %v7901_v33 = vmax.f32 %v7837_v48, %v8060_v8  ;;  %v7902_v0 = vmax.f32 %v7838_v40, %v8061_v45  ;;  %v3209_v24 = vmax.f32 %v17760_v60, 0.0  ;;  %9714 = vmatmul.mubr.msk.f32.gmra.mrb[70].mxu1 %vm7051_vm5, %v7033_v39  ;;  %v7776_v15 = vmax.f32 %v7712_v10, %v7935_v28  ;;  %9758 = vmatmul.mubr.msk.f32.gmra.mrb[66].mxu0 %vm553_vm1, %v8091_v44  ;;  %v6479_v11 = vpop.permute.xlu0 %6478  ;;  %v8002_v40 = vld [vmem:[#allocation5 + $0x169] sm:$0xff]  ;;  %v8003_v10 = vld [vmem:[#allocation5 + $0x171] sm:$0xff] }
 0x94a   : > { %8625 = vrot.lane.b32.xlu1 %v3206_v34, %s17096_s28  ;;  %v8092_v38 = vmax.f32 %v8028_v46, %v8060_v8  ;;  %v8093_v3 = vmax.f32 %v8029_v16, %v8061_v45  ;;  %v7839_v50 = vmax.f32 %v7775_v41, %v7998_v31  ;;  %v7649_v9 = vmax.f32 %v7934_v37, %v7998_v31  ;;  %v7938_v45 = vld [vmem:[#allocation5 + $0x168] sm:$0xff] }
 0x94b   : > { %8623 = vrot.lane.b32.xlu0 %v3205_v42, %s17096_s28  ;;  %v7966_v34 = vmax.f32 %v7901_v33, %v7934_v37  ;;  %v7967_v53 = vmax.f32 %v7902_v0, %v7935_v28  ;;  %v15691_v42 = vsel %vm2738_vm10, %v17762_v19, %v17761_v55  ;;  %v7840_v25 = vmax.f32 %v7776_v15, %v7999_v18  ;;  %v6609_v1 = vpop.permute.xlu1 %6608  ;;  %v8066_v16 = vld [vmem:[#allocation5 + $0x16a] sm:$0xff]  ;;  %v8004_v19 = vld [vmem:[#allocation5 + $0x181] sm:$0xff] }
 0x94c   : > { %9760 = vmatprep.mubr.msk.f32.mxu0 %vm553_vm1, %v8092_v38  ;;  %v7650_v47 = vmax.f32 %v7935_v28, %v7999_v18  ;;  %v7651_v20 = vmax.f32 %v7936_v14, %v15676_v17  ;;  %v6902_v2 = vsel %vm2738_vm10, %v17764_v36, %v17763_v30  ;;  %v7903_v29 = vmax.f32 %v7839_v50, %v8062_v62 }
 0x94d   : > { %v8030_v22 = vmax.f32 %v7966_v34, %v7998_v31  ;;  %v8031_v23 = vmax.f32 %v7967_v53, %v7999_v18  ;;  %v7904_v8 = vmax.f32 %v7840_v25, %v8063_v7  ;;  %v7713_v57 = vmax.f32 %v7649_v9, %v8062_v62  ;;  %9761 = vmatmul.mubr.msk.f32.gmra.mrb[68].mxu0 %vm553_vm1, %v8093_v3  ;;  %v6607_v37 = vpop.permute.xlu0 %6606  ;;  %v7940_v3 = vld [vmem:[#allocation5 + $0x180] sm:$0xff]  ;;  %v7941_v53 = vld [vmem:[#allocation5 + $0x188] sm:$0xff] }
 0x94e   : > { %8629 = vrot.lane.b32.xlu1 %v3208_v12, %s17096_s28  ;;  %v7714_v4 = vmax.f32 %v7650_v47, %v8063_v7  ;;  %v7715_v5 = vmax.f32 %v7651_v20, %v15686_v52  ;;  %v7968_v63 = vmax.f32 %v7903_v29, %v7936_v14  ;;  %v7652_v61 = vmax.f32 %v7937_v56, %v8001_v43  ;;  %v8005_v47 = vld [vmem:[#allocation5 + $0x189] sm:$0xff] }
 0x94f   : > { %8627 = vrot.lane.b32.xlu0 %v3207_v59, %s17096_s28  ;;  %v8094_v58 = vmax.f32 %v8030_v22, %v8062_v62  ;;  %v8095_v26 = vmax.f32 %v8031_v23, %v8063_v7  ;;  %v6935_v12 = vsel %vm6910_vm14, %v6902_v2, %v15647_v51  ;;  %v7969_v48 = vmax.f32 %v7904_v8, %v7937_v56  ;;  %v15714_v33 = vpop.permute.xlu1 %6354  ;;  %v8068_v2 = vld [vmem:[#allocation5 + $0x182] sm:$0xff] }
 0x950   : > { %v7777_v59 = vmax.f32 %v7713_v57, %v7936_v14  ;;  %v7778_v28 = vmax.f32 %v7714_v4, %v7937_v56  ;;  %v6968_v54 = vsel %vm6943_vm15, %v6935_v12, %v6479_v11  ;;  %v8032_v27 = vmax.f32 %v7968_v63, %v15676_v17 }
 0x951   : > { %9763 = vmatprep.mubr.msk.f32.mxu0 %vm553_vm1, %v8094_v58  ;;  %v7779_v44 = vmax.f32 %v7715_v5, %v7938_v45  ;;  %v8033_v51 = vmax.f32 %v7969_v48, %v8001_v43  ;;  %v7716_v39 = vmax.f32 %v7652_v61, %v8065_v13  ;;  %v7653_v18 = vmax.f32 %v7938_v45, %v8002_v40  ;;  %v6735_v60 = vpop.permute.xlu0 %6734  ;;  %v7942_v5 = vld [vmem:[#allocation5 + $0x198] sm:$0xff]  ;;  %v7943_v61 = vld [vmem:[#allocation5 + $0x1a0] sm:$0xff] }
 0x952   : > { %8633 = vrot.lane.b32.xlu1 %v3210_v32, %s17096_s28  ;;  %v7841_v46 = vmax.f32 %v7777_v59, %v15676_v17  ;;  %v7842_v31 = vmax.f32 %v7778_v28, %v8001_v43  ;;  %9764 = vmatmul.mubr.msk.f32.gmra.mrb[70].mxu0 %vm553_vm1, %v8095_v26  ;;  %v8096_v6 = vmax.f32 %v8032_v27, %v15686_v52  ;;  %v8067_v32 = vld [vmem:[#allocation5 + $0x172] sm:$0xff]  ;;  %v8007_v28 = vld [vmem:[#allocation5 + $0x1a1] sm:$0xff] }
 0x953   : > { %8631 = vrot.lane.b32.xlu0 %v3209_v24, %s17096_s28  ;;  %v7843_v0 = vmax.f32 %v7779_v44, %v8002_v40  ;;  %v7654_v41 = vmax.f32 %v7939_v49, %v8003_v10  ;;  %v7001_v14 = vsel %vm6976_vm2, %v6968_v54, %v6607_v37  ;;  %v8097_v24 = vmax.f32 %v8033_v51, %v8065_v13  ;;  %v15728_v25 = vpop.permute.xlu1 %6356  ;;  %v8006_v37 = vld [vmem:[#allocation5 + $0x199] sm:$0xff] }
 0x954   : > { %v7905_v38 = vmax.f32 %v7841_v46, %v15686_v52  ;;  %v7906_v17 = vmax.f32 %v7842_v31, %v8065_v13  ;;  %v7034_v15 = vsel %vm7009_vm3, %v7001_v14, %v6735_v60  ;;  %9766 = vmatprep.mubr.msk.f32.mxu0 %vm553_vm1, %v8096_v6  ;;  %v7780_v62 = vmax.f32 %v7716_v39, %v7939_v49  ;;  %v8070_v27 = vld [vmem:[#allocation5 + $0x19a] sm:$0xff]  ;;  %v8071_v6 = vld [vmem:[#allocation5 + $0x1a2] sm:$0xff] }
 0x955   : > { %v7907_v34 = vmax.f32 %v7843_v0, %v8066_v16  ;;  %v7717_v7 = vmax.f32 %v7653_v18, %v8066_v16  ;;  %v6936_v50 = vsel %vm6910_vm14, %v15691_v42, %v15665_v35  ;;  %9716 = vmatprep.mubr.msk.f32.mxu1 %vm7051_vm5, %v7034_v15  ;;  %v7718_v52 = vmax.f32 %v7654_v41, %v8067_v32  ;;  %v6737_v35 = vpop.permute.xlu0 %6736  ;;  %v17766_v51 = vld [vmem:[#allocation126_spill] sm:$0xff]  ;;  %v17768_v14 = vld [vmem:[#allocation115_spill] sm:$0xff] }
 0x956   : > { %v7970_v9 = vmax.f32 %v7905_v38, %v7938_v45  ;;  %v7971_v55 = vmax.f32 %v7906_v17, %v7939_v49  ;;  %v6969_v11 = vsel %vm6943_vm15, %v6936_v50, %v15683_v21  ;;  %9767 = vmatmul.mubr.msk.f32.gmra.mrb[72].mxu0 %vm553_vm1, %v8097_v24  ;;  %v7844_v43 = vmax.f32 %v7780_v62, %v8003_v10  ;;  %v8069_v21 = vld [vmem:[#allocation5 + $0x18a] sm:$0xff] }
 0x957   : > { %v7972_v56 = vmax.f32 %v7907_v34, %v7940_v3  ;;  %v7781_v20 = vmax.f32 %v7717_v7, %v7940_v3  ;;  %v7002_v30 = vsel %vm6976_vm2, %v6969_v11, %v6609_v1  ;;  %v7782_v22 = vmax.f32 %v7718_v52, %v7941_v53  ;;  %v6485_v26 = vpop.permute.xlu1 %6484  ;;  %v9943_v49 = vld [vmem:[#allocation4 + $0x138] sm:$0xff]  ;;  %v9944_v38 = vld [vmem:[#allocation4 + $0x140] sm:$0xff] }
 0x958   : > { %v8034_v42 = vmax.f32 %v7970_v9, %v8002_v40  ;;  %v8035_v36 = vmax.f32 %v7971_v55, %v8003_v10  ;;  %v7035_v23 = vsel %vm7009_vm3, %v7002_v30, %v6737_v35  ;;  %v7908_v8 = vmax.f32 %v7844_v43, %v8067_v32  ;;  %v17765_v10 = vld [vmem:[#allocation125_spill] sm:$0xff]  ;;  %v17769_v17 = vld [vmem:[#allocation56_spill] sm:$0xff] }
 0x959   : > { %v8036_v29 = vmax.f32 %v7972_v56, %v8004_v19  ;;  %v7845_v57 = vmax.f32 %v7781_v20, %v8004_v19  ;;  %9717 = vmatmul.mubr.msk.f32.gmra.mrb[72].mxu1 %vm7051_vm5, %v7035_v23  ;;  %v7846_v58 = vmax.f32 %v7782_v22, %v8005_v47  ;;  %v6483_v12 = vpop.permute.xlu0 %6482  ;;  %v6808_v54 = vsel %vm2540_vm4, %v9943_v49, %v17765_v10  ;;  %v17770_v62 = vld [vmem:[#allocation92_spill] sm:$0xff]  ;;  %v17771_v9 = vld [vmem:[#allocation173_spill] sm:$0xff]  ;;  %v9945_v22 = vld [vmem:[#allocation4 + $0x150] sm:$0xff] }
 0x95a   : > { %v8098_v45 = vmax.f32 %v8034_v42, %v8066_v16  ;;  %v8099_v4 = vmax.f32 %v8035_v36, %v8067_v32  ;;  %v7973_v1 = vmax.f32 %v7908_v8, %v7941_v53  ;;  %v6840_v46 = vsel %vm2606_vm6, %v6808_v54, %v17766_v51  ;;  %v17767_v32 = vld [vmem:[#allocation82_spill] sm:$0xff]  ;;  %v17772_v11 = vld [vmem:[#allocation232_spill] sm:$0xff]  ;;  %v17773_v23 = vld [vmem:[#allocation185_spill] sm:$0xff] }
 0x95b   : > { %v8100_v63 = vmax.f32 %v8036_v29, %v8068_v2  ;;  %v7909_v13 = vmax.f32 %v7845_v57, %v8068_v2  ;;  %v7910_v48 = vmax.f32 %v7846_v58, %v8069_v21  ;;  %v6613_v16 = vpop.permute.xlu1 %6612  ;;  %v6872_v0 = vsel %vm2672_vm8, %v6840_v46, %v17767_v32  ;;  %v17774_v8 = vld [vmem:[#allocation75_spill] sm:$0xff]  ;;  %v17780_v10 = vld [vmem:[#allocation142_spill] sm:$0xff] }
 0x95c   : > { %9769 = vmatprep.mubr.msk.f32.mxu0 %vm553_vm1, %v8098_v45  ;;  %v8037_v59 = vmax.f32 %v7973_v1, %v8005_v47  ;;  %v6904_v60 = vsel %vm2738_vm10, %v6872_v0, %v17768_v14  ;;  %v6809_v3 = vsel %vm2540_vm4, %v9944_v38, %v17769_v17  ;;  %v6810_v29 = vsel %vm2540_vm4, %v9945_v22, %v17773_v23  ;;  %v17775_v57 = vld [vmem:[#allocation199_spill] sm:$0xff]  ;;  %v9947_v0 = vld [vmem:[#allocation4 + $0x168] sm:$0xff]  ;;  %v17783_v38 = vld [vmem:[#allocation156_spill] sm:$0xff] }
 0x95d   : > { %9770 = vmatmul.mubr.msk.f32.gmra.mrb[74].mxu0 %vm553_vm1, %v8099_v4  ;;  %v7974_v40 = vmax.f32 %v7909_v13, %v7942_v5  ;;  %v7975_v44 = vmax.f32 %v7910_v48, %v7943_v61  ;;  %v6611_v18 = vpop.permute.xlu0 %6610  ;;  %v6937_v15 = vsel %vm6910_vm14, %v6904_v60, %v15714_v33  ;;  %v6841_v53 = vsel %vm2606_vm6, %v6809_v3, %v17770_v62  ;;  %v17776_v5 = vld [vmem:[#allocation162_spill] sm:$0xff]  ;;  %v9948_v14 = vld [vmem:[#allocation4 + $0x170] sm:$0xff]  ;;  %v17785_v62 = vld [vmem:[#allocation101_spill] sm:$0xff] }
 0x95e   : > { %9772 = vmatprep.mubr.msk.f32.mxu0 %vm553_vm1, %v8100_v63  ;;  %v8101_v31 = vmax.f32 %v8037_v59, %v8069_v21  ;;  %v6970_v7 = vsel %vm6943_vm15, %v6937_v15, %v6483_v12  ;;  %v6873_v55 = vsel %vm2672_vm8, %v6841_v53, %v17771_v9  ;;  %v17777_v63 = vld [vmem:[#allocation63_spill] sm:$0xff]  ;;  %v17778_v61 = vld [vmem:[#allocation150_spill] sm:$0xff]  ;;  %v17779_v59 = vld [vmem:[#allocation89_spill] sm:$0xff] }
 0x95f   : > { %v8038_v39 = vmax.f32 %v7974_v40, %v8006_v37  ;;  %v8039_v41 = vmax.f32 %v7975_v44, %v8007_v28  ;;  %v6359_v50 = vpop.permute.xlu1 %6358  ;;  %v7003_v19 = vsel %vm6976_vm2, %v6970_v7, %v6611_v18  ;;  %v6905_v56 = vsel %vm2738_vm10, %v6873_v55, %v17772_v11  ;;  %v17781_v18 = vld [vmem:[#allocation188_spill] sm:$0xff]  ;;  %v17782_v60 = vld [vmem:[#allocation154_spill] sm:$0xff]  ;;  %v17784_v15 = vld [vmem:[#allocation65_spill] sm:$0xff] }
 0x960   : > { %v6938_v43 = vsel %vm6910_vm14, %v6905_v56, %v15728_v25  ;;  %v6842_v25 = vsel %vm2606_vm6, %v6810_v29, %v17774_v8  ;;  %v17787_v55 = vld [vmem:[#allocation77_spill] sm:$0xff] }
 0x961   : > { %9773 = vmatmul.mubr.msk.f32.gmra.mrb[76].mxu0 %vm553_vm1, %v8101_v31  ;;  %v8102_v24 = vmax.f32 %v8038_v39, %v8070_v27  ;;  %v8103_v34 = vmax.f32 %v8039_v41, %v8071_v6  ;;  %v6739_v52 = vpop.permute.xlu0 %6738  ;;  %v6971_v47 = vsel %vm6943_vm15, %v6938_v43, %v6485_v26  ;;  %v6874_v45 = vsel %vm2672_vm8, %v6842_v25, %v17775_v57  ;;  %v9946_v26 = vld [vmem:[#allocation4 + $0x158] sm:$0xff]  ;;  %v15823_v22 = vld [vmem:[%s16560_s11] ss:$0 sm:$0xff] }
 0x962   : > { %v7036_v33 = vsel %vm7009_vm3, %v7003_v19, %v6739_v52  ;;  %v7004_v30 = vsel %vm6976_vm2, %v6971_v47, %v6613_v16  ;;  %v6906_v58 = vsel %vm2738_vm10, %v6874_v45, %v17776_v5  ;;  %v6811_v1 = vsel %vm2540_vm4, %v9946_v26, %v17777_v63  ;;  %v17788_v52 = vld [vmem:[#allocation103_spill] sm:$0xff]  ;;  %v15828_v29 = vld [vmem:[%s16561_s12] ss:$0 sm:$0xff] }
 0x963   : > { %9775 = vmatprep.mubr.msk.f32.mxu0 %vm553_vm1, %v8102_v24  ;;  %9719 = vmatprep.mubr.msk.f32.mxu1 %vm7051_vm5, %v7036_v33  ;;  %v6361_v20 = vpop.permute.xlu1 %6360  ;;  %v6939_v13 = vsel %vm6910_vm14, %v6906_v58, %v6359_v50  ;;  %v6843_v12 = vsel %vm2606_vm6, %v6811_v1, %v17778_v61  ;;  %v6812_v41 = vsel %vm2540_vm4, %v9947_v0, %v17781_v18  ;;  %v17786_v50 = vld [vmem:[#allocation233_spill] sm:$0xff] }
 0x964   : > { %v6875_v40 = vsel %vm2672_vm8, %v6843_v12, %v17779_v59  ;;  %v6813_v24 = vsel %vm2540_vm4, %v9948_v14, %v17782_v60  ;;  %v6844_v17 = vsel %vm2606_vm6, %v6812_v41, %v17783_v38 }
 0x965   : > { %9776 = vmatmul.mubr.msk.f32.gmra.mrb[78].mxu0 %vm553_vm1, %v8103_v34  ;;  %v6741_v35 = vpop.permute.xlu0 %6740  ;;  %v6907_v54 = vsel %vm2738_vm10, %v6875_v40, %v17780_v10  ;;  %v6845_v34 = vsel %vm2606_vm6, %v6813_v24, %v17784_v15  ;;  %v6876_v53 = vsel %vm2672_vm8, %v6844_v17, %v17785_v62 }
 0x966   : > { %v7037_v42 = vsel %vm7009_vm3, %v7004_v30, %v6741_v35  ;;  %v6940_v44 = vsel %vm6910_vm14, %v6907_v54, %v6361_v20  ;;  %v6877_v9 = vsel %vm2672_vm8, %v6845_v34, %v17786_v50  ;;  %v6908_v19 = vsel %vm2738_vm10, %v6876_v53, %v17787_v55 }
 0x967   : > { %9720 = vmatmul.mubr.msk.f32.gmra.mrb[74].mxu1 %vm7051_vm5, %v7037_v42  ;;  %v6489_v36 = vpop.permute.xlu1 %6488  ;;  %v6909_v11 = vsel %vm2738_vm10, %v6877_v9, %v17788_v52 }
 0x968   : > { %v6973_v51 = vsel %vm6943_vm15, %v6940_v44, %v6489_v36 }
 0x969   : > { %v6487_v2 = vpop.permute.xlu0 %6486 }
 0x96a   : > { %v6972_v37 = vsel %vm6943_vm15, %v6939_v13, %v6487_v2 }
 0x96b   : > { %v6617_v21 = vpop.permute.xlu1 %6616 }
 0x96c   : > { %v7006_v16 = vsel %vm6976_vm2, %v6973_v51, %v6617_v21 }
 0x96d   : > { %v6615_v4 = vpop.permute.xlu0 %6614 }
 0x96e   : > { %v7005_v28 = vsel %vm6976_vm2, %v6972_v37, %v6615_v4 }
 0x96f   : > { %v6363_v48 = vpop.permute.xlu1 %6362 }
 0x970   : > { %v6941_v56 = vsel %vm6910_vm14, %v6908_v19, %v6363_v48 }
 0x971   : > { %v6743_v49 = vpop.permute.xlu0 %6742 }
 0x972   : > { %v7038_v27 = vsel %vm7009_vm3, %v7005_v28, %v6743_v49 }
 0x973   : > { %9722 = vmatprep.mubr.msk.f32.mxu1 %vm7051_vm5, %v7038_v27  ;;  %v6365_v46 = vpop.permute.xlu1 %6364 }
 0x974   : > { %v6942_v33 = vsel %vm6910_vm14, %v6909_v11, %v6365_v46 }
 0x975   : > { %v6745_v31 = vpop.permute.xlu0 %6744 }
 0x976   : > { %v7039_v39 = vsel %vm7009_vm3, %v7006_v16, %v6745_v31 }
 0x977   : > { %9723 = vmatmul.mubr.msk.f32.gmra.mrb[76].mxu1 %vm7051_vm5, %v7039_v39  ;;  %v6493_v6 = vpop.permute.xlu1 %6492 }
 0x978   : > { %v6975_v20 = vsel %vm6943_vm15, %v6942_v33, %v6493_v6 }
 0x979   : > { %v6491_v32 = vpop.permute.xlu0 %6490 }
 0x97a   : > { %v6974_v43 = vsel %vm6943_vm15, %v6941_v56, %v6491_v32 }
 0x97b   : > { %v6621_v3 = vpop.permute.xlu1 %6620 }
 0x97c   : > { %v7008_v42 = vsel %vm6976_vm2, %v6975_v20, %v6621_v3 }
 0x97d   : > { %v6619_v7 = vpop.permute.xlu0 %6618 }
 0x97e   : > { %v7007_v30 = vsel %vm6976_vm2, %v6974_v43, %v6619_v7 }
 0x97f   : > { %v6749_v47 = vpop.permute.xlu1 %6748 }
 0x980   : > { %v7041_v2 = vsel %vm7009_vm3, %v7008_v42, %v6749_v47 }
 0x981   : > { %v6747_v35 = vpop.permute.xlu0 %6746 }
 0x982   : > { %v7040_v36 = vsel %vm7009_vm3, %v7007_v30, %v6747_v35 }
 0x983   : > { %9725 = vmatprep.mubr.msk.f32.mxu1 %vm7051_vm5, %v7040_v36 }
 0x984   : > { %9726 = vmatmul.mubr.msk.f32.gmra.mrb[78].mxu1 %vm7051_vm5, %v7041_v2 }
 0x98c   : > { %v9682_v23 = vpop.f32.mrb[48].mxu1 }
 0x98d   : > { %v7381_v8 = vmul.f32 %v9682_v23, %v15823_v22  ;;  %v7214_v25 = vpop.f32.mrb[49].mxu1 }
 0x98e   : > { %v7380_v21 = vmul.f32 %v15823_v22, %v7214_v25 }
 0x98f   : > { %v7420_v57 = vadd.f32 %v15828_v29, %v7381_v8 }
 0x990   : > { %v7419_v45 = vadd.f32 %v15828_v29, %v7380_v21 }
 0x991   : > { %v7452_v4 = vmax.f32 %v7420_v57, 0.0 }
 0x992   : > { %v7451_v5 = vmax.f32 %v7419_v45, 0.0 }
 0x993   : > { %8701 = vrot.lane.b32.xlu1 %v7452_v4, %s17155_s1 }
 0x994   : > { %8699 = vrot.lane.b32.xlu0 %v7451_v5, %s17155_s1 }
 0x998   : > { %v9685_v58 = vpop.f32.mrb[50].mxu1 }
 0x999   : > { %v7383_v26 = vmul.f32 %v9685_v58, %v15823_v22  ;;  %v7224_v63 = vpop.f32.mrb[51].mxu1 }
 0x99a   : > { %v7382_v1 = vmul.f32 %v15823_v22, %v7224_v63 }
 0x99b   : > { %v7422_v13 = vadd.f32 %v15828_v29, %v7383_v26 }
 0x99c   : > { %v7421_v61 = vadd.f32 %v15828_v29, %v7382_v1 }
 0x99d   : > { %v7454_v12 = vmax.f32 %v7422_v13, 0.0 }
 0x99e   : > { %v7453_v37 = vmax.f32 %v7421_v61, 0.0 }
 0x99f   : > { %8705 = vrot.lane.b32.xlu1 %v7454_v12, %s17155_s1 }
 0x9a0   : > { %8703 = vrot.lane.b32.xlu0 %v7453_v37, %s17155_s1 }
 0x9a4   : > { %v9688_v48 = vpop.f32.mrb[52].mxu1 }
 0x9a5   : > { %v7385_v59 = vmul.f32 %v9688_v48, %v15823_v22  ;;  %v7234_v40 = vpop.f32.mrb[53].mxu1 }
 0x9a6   : > { %v7384_v28 = vmul.f32 %v15823_v22, %v7234_v40 }
 0x9a7   : > { %v7424_v49 = vadd.f32 %v15828_v29, %v7385_v59 }
 0x9a8   : > { %v7423_v10 = vadd.f32 %v15828_v29, %v7384_v28 }
 0x9a9   : > { %v7456_v54 = vmax.f32 %v7424_v49, 0.0 }
 0x9aa   : > { %v7455_v27 = vmax.f32 %v7423_v10, 0.0 }
 0x9ab   : > { %8709 = vrot.lane.b32.xlu1 %v7456_v54, %s17155_s1 }
 0x9ac   : > { %8707 = vrot.lane.b32.xlu0 %v7455_v27, %s17155_s1 }
 0x9b0   : > { %v9691_v44 = vpop.f32.mrb[54].mxu1 }
 0x9b1   : > { %v7387_v51 = vmul.f32 %v9691_v44, %v15823_v22  ;;  %v7244_v46 = vpop.f32.mrb[55].mxu1 }
 0x9b2   : > { %v7386_v16 = vmul.f32 %v15823_v22, %v7244_v46 }
 0x9b3   : > { %v7426_v31 = vadd.f32 %v15828_v29, %v7387_v51 }
 0x9b4   : > { %v7425_v39 = vadd.f32 %v15828_v29, %v7386_v16 }
 0x9b5   : > { %v7458_v6 = vmax.f32 %v7426_v31, 0.0 }
 0x9b6   : > { %v7457_v32 = vmax.f32 %v7425_v39, 0.0 }
 0x9b7   : > { %8713 = vrot.lane.b32.xlu1 %v7458_v6, %s17155_s1 }
 0x9b8   : > { %8711 = vrot.lane.b32.xlu0 %v7457_v32, %s17155_s1 }
 0x9bc   : > { %v9694_v0 = vpop.f32.mrb[56].mxu1 }
 0x9bd   : > { %v7389_v18 = vmul.f32 %v9694_v0, %v15823_v22  ;;  %v7254_v41 = vpop.f32.mrb[57].mxu1 }
 0x9be   : > { %v7388_v14 = vmul.f32 %v15823_v22, %v7254_v41 }
 0x9bf   : > { %v7428_v60 = vadd.f32 %v15828_v29, %v7389_v18 }
 0x9c0   : > { %v7427_v24 = vadd.f32 %v15828_v29, %v7388_v14 }
 0x9c1   : > { %v7460_v38 = vmax.f32 %v7428_v60, 0.0 }
 0x9c2   : > { %v7459_v17 = vmax.f32 %v7427_v24, 0.0 }
 0x9c3   : > { %8717 = vrot.lane.b32.xlu1 %v7460_v38, %s17155_s1 }
 0x9c4   : > { %8715 = vrot.lane.b32.xlu0 %v7459_v17, %s17155_s1 }
 0x9c8   : > { %v9697_v3 = vpop.f32.mrb[58].mxu1 }
 0x9c9   : > { %v7391_v15 = vmul.f32 %v9697_v3, %v15823_v22  ;;  %v7264_v34 = vpop.f32.mrb[59].mxu1 }
 0x9ca   : > { %v7390_v62 = vmul.f32 %v15823_v22, %v7264_v34 }
 0x9cb   : > { %v7430_v53 = vadd.f32 %v15828_v29, %v7391_v15 }
 0x9cc   : > { %v7429_v7 = vadd.f32 %v15828_v29, %v7390_v62 }
 0x9cd   : > { %v7462_v50 = vmax.f32 %v7430_v53, 0.0 }
 0x9ce   : > { %v7461_v9 = vmax.f32 %v7429_v7, 0.0 }
 0x9cf   : > { %8721 = vrot.lane.b32.xlu1 %v7462_v50, %s17155_s1 }
 0x9d0   : > { %8719 = vrot.lane.b32.xlu0 %v7461_v9, %s17155_s1 }
 0x9d5   : > { %v9700_v55 = vpop.f32.mrb[60].mxu1 }
 0x9d6   : > { %v7393_v19 = vmul.f32 %v9700_v55, %v15823_v22  ;;  %v7274_v52 = vpop.f32.mrb[61].mxu1 }
 0x9d7   : > { %v7392_v11 = vmul.f32 %v15823_v22, %v7274_v52 }
 0x9d8   : > { %v7432_v56 = vadd.f32 %v15828_v29, %v7393_v19 }
 0x9d9   : > { %v7431_v33 = vadd.f32 %v15828_v29, %v7392_v11 }
 0x9da   : > { %v7464_v43 = vmax.f32 %v7432_v56, 0.0 }
 0x9db   : > { %v7463_v47 = vmax.f32 %v7431_v33, 0.0 }
 0x9dc   : > { %8725 = vrot.lane.b32.xlu1 %v7464_v43, %s17155_s1 }
 0x9dd   : > { %8723 = vrot.lane.b32.xlu0 %v7463_v47, %s17155_s1 }
 0x9e3   : > { %v9703_v20 = vpop.f32.mrb[62].mxu1 }
 0x9e4   : > { %v7395_v30 = vmul.f32 %v9703_v20, %v15823_v22  ;;  %v7284_v35 = vpop.f32.mrb[63].mxu1 }
 0x9e5   : > { %v7394_v42 = vmul.f32 %v15823_v22, %v7284_v35 }
 0x9e6   : > { %v7434_v36 = vadd.f32 %v15828_v29, %v7395_v30 }
 0x9e7   : > { %v7433_v2 = vadd.f32 %v15828_v29, %v7394_v42 }
 0x9e8   : > { %v7466_v23 = vmax.f32 %v7434_v36, 0.0 }
 0x9e9   : > { %v7465_v8 = vmax.f32 %v7433_v2, 0.0 }
 0x9ea   : > { %8729 = vrot.lane.b32.xlu1 %v7466_v23, %s17155_s1 }
 0x9eb   : > { %8727 = vrot.lane.b32.xlu0 %v7465_v8, %s17155_s1 }
 0x9ec   : > { %v15878_v25 = vpop.f32.mrb[48].mxu0 }
 0x9ed   : > { %v15880_v21 = vpop.f32.mrb[49].mxu0 }
 0x9f1   : > { %v15883_v5 = vpop.f32.mrb[50].mxu0 }
 0x9f2   : > { %v9706_v57 = vpop.f32.mrb[64].mxu1  ;;  %v15886_v26 = vpop.f32.mrb[51].mxu0 }
 0x9f3   : > { %v7397_v45 = vmul.f32 %v9706_v57, %v15823_v22  ;;  %v7294_v4 = vpop.f32.mrb[65].mxu1 }
 0x9f4   : > { %v7396_v58 = vmul.f32 %v15823_v22, %v7294_v4 }
 0x9f5   : > { %v7436_v63 = vadd.f32 %v15828_v29, %v7397_v45  ;;  %v15890_v61 = vpop.f32.mrb[52].mxu0 }
 0x9f6   : > { %v7435_v1 = vadd.f32 %v15828_v29, %v7396_v58  ;;  %v15892_v37 = vpop.f32.mrb[53].mxu0 }
 0x9f7   : > { %v7468_v13 = vmax.f32 %v7436_v63, 0.0 }
 0x9f8   : > { %v7467_v12 = vmax.f32 %v7435_v1, 0.0 }
 0x9f9   : > { %8733 = vrot.lane.b32.xlu1 %v7468_v13, %s17155_s1 }
 0x9fa   : > { %8731 = vrot.lane.b32.xlu0 %v7467_v12, %s17155_s1 }
 0x9fc   : > { %v15896_v48 = vpop.f32.mrb[54].mxu0 }
 0x9fd   : > { %v15898_v59 = vpop.f32.mrb[55].mxu0 }
 0x9ff   : > { %v9709_v40 = vpop.f32.mrb[66].mxu1 }
 0xa00   : > { %v7399_v28 = vmul.f32 %v9709_v40, %v15823_v22  ;;  %v7304_v49 = vpop.f32.mrb[67].mxu1 }
 0xa01   : > { %v7398_v10 = vmul.f32 %v15823_v22, %v7304_v49  ;;  %v15902_v54 = vpop.f32.mrb[56].mxu0 }
 0xa02   : > { %v7438_v27 = vadd.f32 %v15828_v29, %v7399_v28  ;;  %v15905_v44 = vpop.f32.mrb[57].mxu0  ;;  %v15970_v28 = vpop.permute.xlu1 %8573 }
 0xa03   : > { %v7437_v51 = vadd.f32 %v15828_v29, %v7398_v10  ;;  %v15974_v10 = vpop.permute.xlu0 %8571 }
 0xa04   : > { %v7470_v46 = vmax.f32 %v7438_v27, 0.0 }
 0xa05   : > { %v7469_v16 = vmax.f32 %v7437_v51, 0.0 }
 0xa06   : > { %v15908_v31 = vpop.f32.mrb[58].mxu0  ;;  %8737 = vrot.lane.b32.xlu1 %v7470_v46, %s17155_s1 }
 0xa07   : > { %v15911_v39 = vpop.f32.mrb[59].mxu0  ;;  %8735 = vrot.lane.b32.xlu0 %v7469_v16, %s17155_s1  ;;  %v15977_v16 = vpop.permute.xlu1 %8577 }
 0xa0c   : > { %v9712_v6 = vpop.f32.mrb[68].mxu1  ;;  %v15916_v41 = vpop.f32.mrb[60].mxu0 }
 0xa0d   : > { %v7401_v32 = vmul.f32 %v9712_v6, %v15823_v22  ;;  %v7314_v0 = vpop.f32.mrb[69].mxu1  ;;  %v15919_v60 = vpop.f32.mrb[61].mxu0 }
 0xa0e   : > { %v7400_v18 = vmul.f32 %v15823_v22, %v7314_v0 }
 0xa0f   : > { %v7440_v14 = vadd.f32 %v15828_v29, %v7401_v32  ;;  %v15980_v32 = vpop.permute.xlu0 %8575 }
 0xa10   : > { %v7439_v24 = vadd.f32 %v15828_v29, %v7400_v18 }
 0xa11   : > { %v7472_v38 = vmax.f32 %v7440_v14, 0.0 }
 0xa12   : > { %v7471_v17 = vmax.f32 %v7439_v24, 0.0 }
 0xa13   : > { %v15922_v3 = vpop.f32.mrb[62].mxu0  ;;  %8741 = vrot.lane.b32.xlu1 %v7472_v38, %s17155_s1  ;;  %v15985_v38 = vpop.permute.xlu1 %8581 }
 0xa14   : > { %v15925_v15 = vpop.f32.mrb[63].mxu0  ;;  %8739 = vrot.lane.b32.xlu0 %v7471_v17, %s17155_s1  ;;  %v15988_v17 = vpop.permute.xlu0 %8579 }
 0xa17   : > { %v15928_v34 = vpop.f32.mrb[64].mxu0 }
 0xa18   : > { %v15930_v62 = vpop.f32.mrb[65].mxu0 }
 0xa1c   : > { %v9715_v53 = vpop.f32.mrb[70].mxu1  ;;  %v15933_v9 = vpop.f32.mrb[66].mxu0 }
 0xa1d   : > { %v7403_v7 = vmul.f32 %v9715_v53, %v15823_v22  ;;  %v7324_v50 = vpop.f32.mrb[71].mxu1  ;;  %v15936_v19 = vpop.f32.mrb[67].mxu0 }
 0xa1e   : > { %v7402_v55 = vmul.f32 %v15823_v22, %v7324_v50  ;;  %v15990_v53 = vpop.permute.xlu1 %8585 }
 0xa1f   : > { %v7442_v52 = vadd.f32 %v15828_v29, %v7403_v7  ;;  %v15992_v7 = vpop.permute.xlu0 %8583 }
 0xa20   : > { %v7441_v11 = vadd.f32 %v15828_v29, %v7402_v55  ;;  %v15940_v33 = vpop.f32.mrb[68].mxu0 }
 0xa21   : > { %v7474_v56 = vmax.f32 %v7442_v52, 0.0  ;;  %v15942_v47 = vpop.f32.mrb[69].mxu0 }
 0xa22   : > { %v7473_v43 = vmax.f32 %v7441_v11, 0.0 }
 0xa23   : > { %8745 = vrot.lane.b32.xlu1 %v7474_v56, %s17155_s1 }
 0xa24   : > { %8743 = vrot.lane.b32.xlu0 %v7473_v43, %s17155_s1  ;;  %v15997_v43 = vpop.permute.xlu1 %8589 }
 0xa25   : > { %v15946_v20 = vpop.f32.mrb[70].mxu0 }
 0xa26   : > { %v15948_v30 = vpop.f32.mrb[71].mxu0 }
 0xa29   : > { %v15950_v35 = vpop.f32.mrb[72].mxu0 }
 0xa2a   : > { %v15952_v42 = vpop.f32.mrb[73].mxu0 }
 0xa2c   : > { %v9718_v36 = vpop.f32.mrb[72].mxu1 }
 0xa2d   : > { %v7405_v2 = vmul.f32 %v9718_v36, %v15823_v22  ;;  %v7334_v23 = vpop.f32.mrb[73].mxu1 }
 0xa2e   : > { %v7404_v8 = vmul.f32 %v15823_v22, %v7334_v23 }
 0xa2f   : > { %v7444_v57 = vadd.f32 %v15828_v29, %v7405_v2  ;;  %v16000_v2 = vpop.permute.xlu0 %8587 }
 0xa30   : > { %v15957_v45 = vpop.f32.mrb[74].mxu0  ;;  %v7443_v4 = vadd.f32 %v15828_v29, %v7404_v8 }
 0xa31   : > { %v15960_v58 = vpop.f32.mrb[75].mxu0  ;;  %v7476_v63 = vmax.f32 %v7444_v57, 0.0  ;;  %v16007_v57 = vld [vmem:[%s16563_s14] ss:$0 sm:$0xff] }
 0xa32   : > { %v7475_v1 = vmax.f32 %v7443_v4, 0.0  ;;  %v16009_v4 = vpop.permute.xlu1 %8593 }
 0xa33   : > { %8749 = vrot.lane.b32.xlu1 %v7476_v63, %s17155_s1  ;;  %v16011_v63 = vpop.permute.xlu0 %8591 }
 0xa34   : > { %v15963_v13 = vpop.f32.mrb[76].mxu0  ;;  %8747 = vrot.lane.b32.xlu0 %v7475_v1, %s17155_s1  ;;  %v8437_v1 = vmul.f32 %v15878_v25, %v16007_v57 }
 0xa35   : > { %v15966_v12 = vpop.f32.mrb[77].mxu0 }
 0xa38   : > { %v15968_v40 = vpop.f32.mrb[78].mxu0 }
 0xa39   : > { %v15972_v49 = vpop.f32.mrb[79].mxu0 }
 0xa3a   : > { %v9721_v27 = vpop.f32.mrb[74].mxu1 }
 0xa3b   : > { %v7407_v51 = vmul.f32 %v9721_v27, %v15823_v22  ;;  %v7344_v46 = vpop.f32.mrb[75].mxu1 }
 0xa3c   : > { %v7406_v6 = vmul.f32 %v15823_v22, %v7344_v46  ;;  %v8436_v46 = vmul.f32 %v16007_v57, %v15880_v21 }
 0xa3d   : > { %v7446_v0 = vadd.f32 %v15828_v29, %v7407_v51  ;;  %v16018_v51 = vld [vmem:[%s16564_s15] ss:$0 sm:$0xff] }
 0xa3e   : > { %v7445_v18 = vadd.f32 %v15828_v29, %v7406_v6  ;;  %v8476_v25 = vadd.f32 %v16018_v51, %v8437_v1  ;;  %v8475_v21 = vadd.f32 %v16018_v51, %v8436_v46 }
 0xa3f   : > { %v7478_v14 = vmax.f32 %v7446_v0, 0.0 }
 0xa40   : > { %v7477_v24 = vmax.f32 %v7445_v18, 0.0 }
 0xa41   : > { %8753 = vrot.lane.b32.xlu1 %v7478_v14, %s17155_s1  ;;  %v16024_v14 = vpop.permute.xlu1 %8597 }
 0xa42   : > { %8751 = vrot.lane.b32.xlu0 %v7477_v24, %s17155_s1 }
 0xa4a   : > { %v9724_v50 = vpop.f32.mrb[76].mxu1 }
 0xa4b   : > { %v7409_v55 = vmul.f32 %v9724_v50, %v15823_v22  ;;  %v7354_v52 = vpop.f32.mrb[77].mxu1  ;;  %v8439_v50 = vmul.f32 %v15883_v5, %v16007_v57  ;;  %v8507_v5 = vmax.f32 %v8475_v21, 0.0 }
 0xa4c   : > { %v7408_v11 = vmul.f32 %v15823_v22, %v7354_v52 }
 0xa4d   : > { %v7448_v56 = vadd.f32 %v15828_v29, %v7409_v55  ;;  %v16030_v55 = vpop.permute.xlu0 %8595 }
 0xa4e   : > { %v7447_v36 = vadd.f32 %v15828_v29, %v7408_v11  ;;  %v8438_v11 = vmul.f32 %v16007_v57, %v15886_v26 }
 0xa4f   : > { %v7480_v23 = vmax.f32 %v7448_v56, 0.0 }
 0xa50   : > { %v7479_v8 = vmax.f32 %v7447_v36, 0.0  ;;  %v8508_v36 = vmax.f32 %v8476_v25, 0.0  ;;  %v8477_v1 = vadd.f32 %v16018_v51, %v8438_v11 }
 0xa51   : > { %8757 = vrot.lane.b32.xlu1 %v7480_v23, %s17155_s1  ;;  %v8478_v23 = vadd.f32 %v16018_v51, %v8439_v50  ;;  %v16046_v26 = vpop.permute.xlu0 %8599 }
 0xa52   : > { %8755 = vrot.lane.b32.xlu0 %v7479_v8, %s17155_s1  ;;  %v8441_v8 = vmul.f32 %v15890_v61, %v16007_v57  ;;  %v8443_v61 = vmul.f32 %v15896_v48, %v16007_v57 }
 0xa53   : > { %v8510_v46 = vmax.f32 %v8478_v23, 0.0 }
 0xa54   : > { %v8482_v50 = vadd.f32 %v16018_v51, %v8443_v61 }
 0xa55   : > { %v16062_v21 = vpop.permute.xlu0 %8603 }
 0xa57   : > { %v9727_v27 = vpop.f32.mrb[78].mxu1 }
 0xa58   : > { %v7411_v6 = vmul.f32 %v9727_v27, %v15823_v22  ;;  %v7364_v0 = vpop.f32.mrb[79].mxu1  ;;  %v16044_v27 = vpop.permute.xlu1 %8601 }
 0xa59   : > { %v7410_v18 = vmul.f32 %v15823_v22, %v7364_v0  ;;  %v8509_v0 = vmax.f32 %v8477_v1, 0.0  ;;  %v16078_v1 = vpop.permute.xlu0 %8607 }
 0xa5a   : > { %v7450_v24 = vadd.f32 %v15828_v29, %v7411_v6  ;;  %v8480_v6 = vadd.f32 %v16018_v51, %v8441_v8  ;;  %v8446_v8 = vmul.f32 %v16007_v57, %v15911_v39  ;;  %v8448_v39 = vmul.f32 %v16007_v57, %v15919_v60 }
 0xa5b   : > { %v7449_v52 = vadd.f32 %v15828_v29, %v7410_v18  ;;  %v8440_v29 = vmul.f32 %v16007_v57, %v15892_v37  ;;  %v8442_v37 = vmul.f32 %v16007_v57, %v15898_v59  ;;  %v8444_v59 = vmul.f32 %v16007_v57, %v15905_v44 }
 0xa5c   : > { %v7482_v56 = vmax.f32 %v7450_v24, 0.0  ;;  %v16056_v24 = vpop.permute.xlu1 %8605  ;;  %v8512_v25 = vmax.f32 %v8480_v6, 0.0  ;;  %v8485_v6 = vadd.f32 %v16018_v51, %v8446_v8  ;;  %v8450_v60 = vmul.f32 %v16007_v57, %v15925_v15 }
 0xa5d   : > { %v7481_v22 = vmax.f32 %v7449_v52, 0.0  ;;  %v8479_v18 = vadd.f32 %v16018_v51, %v8440_v29  ;;  %v8445_v52 = vmul.f32 %v15902_v54, %v16007_v57  ;;  %v8481_v11 = vadd.f32 %v16018_v51, %v8442_v37 }
 0xa5e   : > { %8761 = vrot.lane.b32.xlu1 %v7482_v56, %s17155_s1  ;;  %v8514_v56 = vmax.f32 %v8482_v50, 0.0  ;;  %v8483_v54 = vadd.f32 %v16018_v51, %v8444_v59  ;;  %v8451_v37 = vmul.f32 %v15922_v3, %v16007_v57  ;;  %v8487_v50 = vadd.f32 %v16018_v51, %v8448_v39 }
 0xa5f   : > { %8759 = vrot.lane.b32.xlu0 %v7481_v22, %s17155_s1  ;;  %v8511_v48 = vmax.f32 %v8479_v18, 0.0  ;;  %v8484_v22 = vadd.f32 %v16018_v51, %v8445_v52  ;;  %v8513_v23 = vmax.f32 %v8481_v11, 0.0  ;;  %v8453_v11 = vmul.f32 %v15928_v34, %v16007_v57  ;;  %s512_s1 = sand.u32 1, %s10003_s22  }
 0xa60   : > { %v8519_v59 = vmax.f32 %v8487_v50, 0.0  ;;  %v8489_v3 = vadd.f32 %v16018_v51, %v8450_v60  ;;  %v8455_v34 = vmul.f32 %v15933_v9, %v16007_v57  ;;  %v8458_v50 = vmul.f32 %v16007_v57, %v15948_v30  ;;  %s16507_s20 = scalar_lea.sflag [#allocation7], %s512_s1 }
 0xa61   : > { %v8516_v44 = vmax.f32 %v8484_v22, 0.0  ;;  %v8460_v30 = vmul.f32 %v16007_v57, %v15952_v42  ;;  %v8462_v42 = vmul.f32 %v16007_v57, %v15960_v58 }
 0xa62   : > { %8829 = vrot.lane.b32.xlu1 %v8508_v36, %s17216_s29  ;;  %v8447_v36 = vmul.f32 %v15908_v31, %v16007_v57  ;;  %v8449_v31 = vmul.f32 %v15916_v41, %v16007_v57  ;;  %v8517_v41 = vmax.f32 %v8485_v6, 0.0 }
 0xa63   : > { %8827 = vrot.lane.b32.xlu0 %v8507_v5, %s17216_s29  ;;  %v16076_v5 = vpop.permute.xlu1 %8609 }
 0xa64   : > { %v8486_v29 = vadd.f32 %v16018_v51, %v8447_v36  ;;  %v8488_v18 = vadd.f32 %v16018_v51, %v8449_v31  ;;  %v8494_v31 = vadd.f32 %v16018_v51, %v8455_v34 }
 0xa66   : > { %8833 = vrot.lane.b32.xlu1 %v8510_v46, %s17216_s29  ;;  %v8515_v46 = vmax.f32 %v8483_v54, 0.0  ;;  %v8520_v52 = vmax.f32 %v8488_v18, 0.0  ;;  %v8521_v54 = vmax.f32 %v8489_v3, 0.0 }
 0xa67   : > { %8831 = vrot.lane.b32.xlu0 %v8509_v0, %s17216_s29  ;;  %v16088_v61 = vpop.permute.xlu1 %8613  ;;  %v8518_v0 = vmax.f32 %v8486_v29, 0.0 }
 0xa6a   : > { %8837 = vrot.lane.b32.xlu1 %v8512_v25, %s17216_s29  ;;  %v16094_v25 = vpop.permute.xlu0 %8611 }
 0xa6b   : > { %8835 = vrot.lane.b32.xlu0 %v8511_v48, %s17216_s29  ;;  %v8490_v48 = vadd.f32 %v16018_v51, %v8451_v37  ;;  %v16108_v22 = vpop.permute.xlu1 %8617  ;;  %v8459_v37 = vmul.f32 %v15946_v20, %v16007_v57  ;;  %v8461_v20 = vmul.f32 %v15950_v35, %v16007_v57 }
 0xa6d   : > { %v8522_v15 = vmax.f32 %v8490_v48, 0.0  ;;  %v8498_v48 = vadd.f32 %v16018_v51, %v8459_v37 }
 0xa6e   : > { %8841 = vrot.lane.b32.xlu1 %v8514_v56, %s17216_s29  ;;  %v8452_v56 = vmul.f32 %v16007_v57, %v15930_v62  ;;  %v16110_v36 = vpop.permute.xlu0 %8615  ;;  %v8454_v62 = vmul.f32 %v16007_v57, %v15936_v19  ;;  %v8456_v19 = vmul.f32 %v16007_v57, %v15942_v47 }
 0xa6f   : > { %8839 = vrot.lane.b32.xlu0 %v8513_v23, %s17216_s29  ;;  %v8492_v23 = vadd.f32 %v16018_v51, %v8453_v11 }
 0xa70   : > { %v8491_v8 = vadd.f32 %v16018_v51, %v8452_v56  ;;  %v8493_v39 = vadd.f32 %v16018_v51, %v8454_v62  ;;  %v8530_v56 = vmax.f32 %v8498_v48, 0.0 }
 0xa71   : > { %v8524_v29 = vmax.f32 %v8492_v23, 0.0  ;;  %v8463_v23 = vmul.f32 %v15957_v45, %v16007_v57  ;;  %v8501_v45 = vadd.f32 %v16018_v51, %v8462_v42 }
 0xa72   : > { %8845 = vrot.lane.b32.xlu1 %v8516_v44, %s17216_s29  ;;  %v16120_v44 = vpop.permute.xlu1 %8621  ;;  %v16126_v6 = vpop.permute.xlu0 %8619  ;;  %v8523_v9 = vmax.f32 %v8491_v8, 0.0 }
 0xa73   : > { %8843 = vrot.lane.b32.xlu0 %v8515_v46, %s17216_s29  ;;  %v8457_v46 = vmul.f32 %v15940_v33, %v16007_v57  ;;  %v8495_v33 = vadd.f32 %v16018_v51, %v8456_v19  ;;  %v8502_v62 = vadd.f32 %v16018_v51, %v8463_v23 }
 0xa75   : > { %v8496_v18 = vadd.f32 %v16018_v51, %v8457_v46  ;;  %v8527_v11 = vmax.f32 %v8495_v33, 0.0  ;;  %v8464_v46 = vmul.f32 %v16007_v57, %v15966_v12  ;;  %v8534_v58 = vmax.f32 %v8502_v62, 0.0 }
 0xa76   : > { %8849 = vrot.lane.b32.xlu1 %v8518_v0, %s17216_s29  ;;  %v8526_v0 = vmax.f32 %v8494_v31, 0.0  ;;  %v16140_v60 = vpop.permute.xlu1 %8625  ;;  %v8466_v12 = vmul.f32 %v16007_v57, %v15972_v49 }
 0xa77   : > { %8847 = vrot.lane.b32.xlu0 %v8517_v41, %s17216_s29  ;;  %v8525_v41 = vmax.f32 %v8493_v39, 0.0  ;;  %v8528_v47 = vmax.f32 %v8496_v18, 0.0  ;;  %v8503_v18 = vadd.f32 %v16018_v51, %v8464_v46 }
 0xa78   : > { %v8505_v48 = vadd.f32 %v16018_v51, %v8466_v12 }
 0xa7a   : > { %8853 = vrot.lane.b32.xlu1 %v8520_v52, %s17216_s29  ;;  %v16142_v52 = vpop.permute.xlu0 %8623  ;;  %v16152_v3 = vpop.permute.xlu1 %8629 }
 0xa7b   : > { %8851 = vrot.lane.b32.xlu0 %v8519_v59, %s17216_s29  ;;  %v8497_v59 = vadd.f32 %v16018_v51, %v8458_v50  ;;  %17789 = vst [vmem:[#allocation235_spill] sm:$0xff] %v16152_v3 }
 0xa7d   : > { %v8529_v35 = vmax.f32 %v8497_v59, 0.0  ;;  %v8537_v59 = vmax.f32 %v8505_v48, 0.0 }
 0xa7e   : > { %8857 = vrot.lane.b32.xlu1 %v8522_v15, %s17216_s29  ;;  %v8500_v15 = vadd.f32 %v16018_v51, %v8461_v20  ;;  %v16158_v34 = vpop.permute.xlu0 %8627 }
 0xa7f   : > { %8855 = vrot.lane.b32.xlu0 %v8521_v54, %s17216_s29  ;;  %17790 = vst [vmem:[#allocation132_spill] sm:$0xff] %v16158_v34  ;;  %v8499_v54 = vadd.f32 %v16018_v51, %v8460_v30  ;;  %v17799_v34 = vld [vmem:[#allocation11_spill] sm:$0xff] }
 0xa80   : > { %v8532_v8 = vmax.f32 %v8500_v15, 0.0  ;;  %v8923_v3 = vsel %vm2540_vm4, %v17799_v34, %v15974_v10  ;;  %v17800_v10 = vld [vmem:[#allocation12_spill] sm:$0xff] }
 0xa81   : > { %v8531_v31 = vmax.f32 %v8499_v54, 0.0  ;;  %v8926_v34 = vsel %vm2540_vm4, %v17800_v10, %v15977_v16 }
 0xa82   : > { %8861 = vrot.lane.b32.xlu1 %v8524_v29, %s17216_s29  ;;  %v8465_v29 = vmul.f32 %v15963_v13, %v16007_v57  ;;  %v16174_v39 = vpop.permute.xlu0 %8631  ;;  %v8467_v13 = vmul.f32 %v15968_v40, %v16007_v57 }
 0xa83   : > { %8859 = vrot.lane.b32.xlu0 %v8523_v9, %s17216_s29  ;;  %v16172_v9 = vpop.permute.xlu1 %8633  ;;  %17792 = vst [vmem:[#allocation170_spill] sm:$0xff] %v16174_v39  ;;  %v17798_v39 = vld [vmem:[#allocation9_spill] sm:$0xff] }
 0xa84   : > { %17791 = vst [vmem:[#allocation146_spill] sm:$0xff] %v16172_v9  ;;  %v8504_v19 = vadd.f32 %v16018_v51, %v8465_v29  ;;  %v8506_v50 = vadd.f32 %v16018_v51, %v8467_v13  ;;  %v8924_v9 = vsel %vm2540_vm4, %v17798_v39, %v15970_v28 }
 0xa86   : > { %8865 = vrot.lane.b32.xlu1 %v8526_v0, %s17216_s29  ;;  %v8533_v0 = vmax.f32 %v8501_v45, 0.0  ;;  %v8536_v33 = vmax.f32 %v8504_v19, 0.0 }
 0xa87   : > { %8863 = vrot.lane.b32.xlu0 %v8525_v41, %s17216_s29  ;;  %v8702_v37 = vpop.permute.xlu1 %8701  ;;  %v8700_v41 = vpop.permute.xlu0 %8699 }
 0xa8a   : > { %8869 = vrot.lane.b32.xlu1 %v8528_v47, %s17216_s29  ;;  %v8535_v47 = vmax.f32 %v8503_v18, 0.0 }
 0xa8b   : > { %8867 = vrot.lane.b32.xlu0 %v8527_v11, %s17216_s29  ;;  %v8706_v40 = vpop.permute.xlu1 %8705  ;;  %v8704_v20 = vpop.permute.xlu0 %8703  ;;  %v8538_v11 = vmax.f32 %v8506_v50, 0.0 }
 0xa8c   : > { %v8958_v39 = vsel %vm2606_vm6, %v8926_v34, %v8706_v40 }
 0xa8e   : > { %8873 = vrot.lane.b32.xlu1 %v8530_v56, %s17216_s29 }
 0xa8f   : > { %8871 = vrot.lane.b32.xlu0 %v8529_v35, %s17216_s29  ;;  %v8710_v49 = vpop.permute.xlu1 %8709  ;;  %v8708_v57 = vpop.permute.xlu0 %8707 }
 0xa92   : > { %8877 = vrot.lane.b32.xlu1 %v8532_v8, %s17216_s29 }
 0xa93   : > { %8875 = vrot.lane.b32.xlu0 %v8531_v31, %s17216_s29  ;;  %v8714_v30 = vpop.permute.xlu1 %8713  ;;  %v16192_v56 = vpop.permute.xlu0 %8711 }
 0xa96   : > { %8881 = vrot.lane.b32.xlu1 %v8534_v58, %s17216_s29 }
 0xa97   : > { %8879 = vrot.lane.b32.xlu0 %v8533_v0, %s17216_s29  ;;  %v16194_v51 = vpop.permute.xlu1 %8717  ;;  %v16196_v15 = vpop.permute.xlu0 %8715 }
 0xa9a   : > { %8885 = vrot.lane.b32.xlu1 %v8536_v33, %s17216_s29 }
 0xa9b   : > { %8883 = vrot.lane.b32.xlu0 %v8535_v47, %s17216_s29  ;;  %v16198_v23 = vpop.permute.xlu1 %8721  ;;  %v16200_v35 = vpop.permute.xlu0 %8719 }
 0xa9e   : > { %8889 = vrot.lane.b32.xlu1 %v8538_v11, %s17216_s29 }
 0xa9f   : > { %8887 = vrot.lane.b32.xlu0 %v8537_v59, %s17216_s29  ;;  %v16202_v54 = vpop.permute.xlu1 %8725  ;;  %v16204_v42 = vpop.permute.xlu0 %8723  ;;  %s9131_s29 = sshll.u32 %s512_s1, 8 }
 0xaa0   : > { %s16254_s3 = scalar_lea.vmem [#allocation6], %s9131_s29 }
 0xaa1   : > { %s9065_s18 = sshll.u32 %s16254_s3, 4  ;;  %s16498_s18 = int_to_ptr.vmem [resolvable:$true] %s9065_s18 }
 0xaa2   : > { %s9949_s29 = scalar_lea.vmem %s16498_s18, 4096  ;;  %p9956_p0 = scmp.lt.s32.totalorder %s16498_s18, %s9954_s25 }
 0xaa3   : > { %v16206_v8 = vpop.permute.xlu1 %8729  ;;  %v16208_v62 = vpop.permute.xlu0 %8727  ;;  %p9950_p11 = scmp.ne.s32.totalorder %s16498_s18, %s9949_s29  ;;  %p9957_p1 = scmp.lt.s32.totalorder %s9955_s2, %s9949_s29 }
 0xaa5   : > { %p9951_p12 = pnand %p9950_p11, %p10154_p5  ;;  %p9958_p2 = por %p9957_p1, %p9956_p0 }
 0xaa7   : > { %v16210_v29 = vpop.permute.xlu1 %8733  ;;  %v16212_v31 = vpop.permute.xlu0 %8731  ;;  %p9952_p13 = pneg %p9951_p12 }
 0xaa9   : > { %p9959_p3 = pnand %p9958_p2, %p9952_p13 }
 0xaab   : > { %v16214_v45 = vpop.permute.xlu1 %8737  ;;  %v16216_v46 = vpop.permute.xlu0 %8735 }
 0xaaf   : > { %v16218_v58 = vpop.permute.xlu1 %8741  ;;  %v16220_v19 = vpop.permute.xlu0 %8739 }
 0xab3   : > { %v16222_v13 = vpop.permute.xlu1 %8745  ;;  %v16224_v0 = vpop.permute.xlu0 %8743 }
 0xab7   : > { %v16226_v18 = vpop.permute.xlu1 %8749  ;;  %v16228_v12 = vpop.permute.xlu0 %8747 }
 0xabb   : > { %v16230_v33 = vpop.permute.xlu1 %8753  ;;  %v16232_v50 = vpop.permute.xlu0 %8751 }
 0xabc   : > { %17793 = vst [vmem:[#allocation111_spill] sm:$0xff] %v16230_v33  ;;  %17794 = vst [vmem:[#allocation74_spill] sm:$0xff] %v16232_v50  ;;  %v8956_v50 = vsel %vm2606_vm6, %v8924_v9, %v8702_v37 }
 0xac3   : > { %v16234_v47 = vpop.permute.xlu1 %8757 }
 0xac4   : > { %17795 = vst [vmem:[#allocation197_spill] sm:$0xff] %v16234_v47  ;;  %v16236_v48 = vpop.permute.xlu0 %8755 }
 0xac5   : > { %17796 = vst [vmem:[#allocation223_spill] sm:$0xff] %v16236_v48  ;;  %v8955_v48 = vsel %vm2606_vm6, %v8923_v3, %v8700_v41  ;;  %v17801_v3 = vld [vmem:[#allocation15_spill] sm:$0xff] }
 0xac6   : > { %v8925_v9 = vsel %vm2540_vm4, %v17801_v3, %v15980_v32  ;;  %v17803_v32 = vld [vmem:[#allocation18_spill] sm:$0xff]  ;;  %v17804_v3 = vld [vmem:[#allocation21_spill] sm:$0xff] }
 0xac7   : > { %v8957_v41 = vsel %vm2606_vm6, %v8925_v9, %v8704_v20  ;;  %v8927_v40 = vsel %vm2540_vm4, %v17803_v32, %v15988_v17  ;;  %v8930_v9 = vsel %vm2540_vm4, %v17804_v3, %v15990_v53  ;;  %v17805_v17 = vld [vmem:[#allocation22_spill] sm:$0xff]  ;;  %v17810_v3 = vld [vmem:[#allocation33_spill] sm:$0xff] }
 0xad0   : > { %v16239_v11 = vpop.permute.xlu1 %8761 }
 0xad1   : > { %17797 = vst [vmem:[#allocation58_spill] sm:$0xff] %v16239_v11  ;;  %v16243_v59 = vpop.permute.xlu0 %8759 }
 0xad4   : > { %v8830_v47 = vpop.permute.xlu1 %8829 }
 0xad5   : > { %v8988_v33 = vsel %vm2672_vm8, %v8956_v50, %v8830_v47  ;;  %v8828_v11 = vpop.permute.xlu0 %8827  ;;  %v17802_v47 = vld [vmem:[#allocation17_spill] sm:$0xff] }
 0xad6   : > { %9020 = vst.msk [vmem:[%s16254_s3 + $0x8] sm:$0xff] %vm2738_vm10, %v8988_v33  ;;  %v8987_v28 = vsel %vm2672_vm8, %v8955_v48, %v8828_v11  ;;  %v8928_v48 = vsel %vm2540_vm4, %v17802_v47, %v15985_v38 }
 0xad7   : > { %9019 = vst.msk [vmem:[%s16254_s3] sm:$0xff] %vm2738_vm10, %v8987_v28  ;;  %v8960_v20 = vsel %vm2606_vm6, %v8928_v48, %v8710_v49  ;;  %v8959_v28 = vsel %vm2606_vm6, %v8927_v40, %v8708_v57  ;;  %v8929_v49 = vsel %vm2540_vm4, %v17805_v17, %v15992_v7  ;;  %v8962_v57 = vsel %vm2606_vm6, %v8930_v9, %v8714_v30  ;;  %v17807_v7 = vld [vmem:[#allocation26_spill] sm:$0xff] }
 0xad8   : > { %v8834_v37 = vpop.permute.xlu1 %8833  ;;  %v8931_v30 = vsel %vm2540_vm4, %v17807_v7, %v16000_v2  ;;  %v17814_v7 = vld [vmem:[#allocation10_spill] sm:$0xff] }
 0xad9   : > { %v8990_v33 = vsel %vm2672_vm8, %v8958_v39, %v8834_v37  ;;  %v8832_v50 = vpop.permute.xlu0 %8831  ;;  %v8961_v37 = vsel %vm2606_vm6, %v8929_v49, %v16192_v56  ;;  %v8963_v48 = vsel %vm2606_vm6, %v8931_v30, %v16196_v15 }
 0xada   : > { %9022 = vst.msk [vmem:[%s16254_s3 + $0x18] sm:$0xff] %vm2738_vm10, %v8990_v33  ;;  %v8989_v16 = vsel %vm2672_vm8, %v8957_v41, %v8832_v50  ;;  %v17806_v50 = vld [vmem:[#allocation25_spill] sm:$0xff] }
 0xadb   : > { %9021 = vst.msk [vmem:[%s16254_s3 + $0x10] sm:$0xff] %vm2738_vm10, %v8989_v16  ;;  %v8932_v16 = vsel %vm2540_vm4, %v17806_v50, %v15997_v43 }
 0xadc   : > { %v8838_v11 = vpop.permute.xlu1 %8837  ;;  %v8964_v56 = vsel %vm2606_vm6, %v8932_v16, %v16194_v51  ;;  %v17809_v51 = vld [vmem:[#allocation30_spill] sm:$0xff] }
 0xadd   : > { %v8992_v10 = vsel %vm2672_vm8, %v8960_v20, %v8838_v11  ;;  %v8836_v34 = vpop.permute.xlu0 %8835  ;;  %v17808_v20 = vld [vmem:[#allocation29_spill] sm:$0xff]  ;;  %v8933_v11 = vsel %vm2540_vm4, %v17809_v51, %v16011_v63  ;;  %v8936_v63 = vsel %vm2540_vm4, %v17810_v3, %v16024_v14  ;;  %v17820_v3 = vld [vmem:[#allocation23_spill] sm:$0xff] }
 0xade   : > { %9024 = vst.msk [vmem:[%s16254_s3 + $0x28] sm:$0xff] %vm2738_vm10, %v8992_v10  ;;  %v8991_v38 = vsel %vm2672_vm8, %v8959_v28, %v8836_v34  ;;  %v8934_v2 = vsel %vm2540_vm4, %v17808_v20, %v16009_v4  ;;  %v8965_v10 = vsel %vm2606_vm6, %v8933_v11, %v16200_v35  ;;  %v8968_v35 = vsel %vm2606_vm6, %v8936_v63, %v16202_v54  ;;  %v17813_v54 = vld [vmem:[#allocation38_spill] sm:$0xff] }
 0xadf   : > { %9023 = vst.msk [vmem:[%s16254_s3 + $0x20] sm:$0xff] %vm2738_vm10, %v8991_v38  ;;  %v8966_v15 = vsel %vm2606_vm6, %v8934_v2, %v16198_v23  ;;  %v17811_v23 = vld [vmem:[#allocation34_spill] sm:$0xff] }
 0xae0   : > { %v8842_v39 = vpop.permute.xlu1 %8841  ;;  %v8935_v9 = vsel %vm2540_vm4, %v17811_v23, %v16030_v55 }
 0xae1   : > { %v8994_v41 = vsel %vm2672_vm8, %v8962_v57, %v8842_v39  ;;  %v8840_v33 = vpop.permute.xlu0 %8839  ;;  %v8967_v49 = vsel %vm2606_vm6, %v8935_v9, %v16204_v42 }
 0xae2   : > { %9026 = vst.msk [vmem:[%s16254_s3 + $0x38] sm:$0xff] %vm2738_vm10, %v8994_v41  ;;  %v8993_v53 = vsel %vm2672_vm8, %v8961_v37, %v8840_v33  ;;  %v17812_v37 = vld [vmem:[#allocation37_spill] sm:$0xff]  ;;  %v8937_v41 = vsel %vm2540_vm4, %v17813_v54, %v16046_v26  ;;  %v8940_v26 = vsel %vm2540_vm4, %v17814_v7, %v16056_v24  ;;  %v17824_v54 = vld [vmem:[#allocation31_spill] sm:$0xff] }
 0xae3   : > { %9025 = vst.msk [vmem:[%s16254_s3 + $0x30] sm:$0xff] %vm2738_vm10, %v8993_v53  ;;  %v8938_v55 = vsel %vm2540_vm4, %v17812_v37, %v16044_v27  ;;  %v8969_v53 = vsel %vm2606_vm6, %v8937_v41, %v16208_v62  ;;  %v8972_v62 = vsel %vm2606_vm6, %v8940_v26, %v16210_v29  ;;  %v17817_v29 = vld [vmem:[#allocation16_spill] sm:$0xff]  ;;  %v17828_v7 = vld [vmem:[#allocation235_spill] sm:$0xff] }
 0xae4   : > { %v8846_v47 = vpop.permute.xlu1 %8845  ;;  %v8970_v42 = vsel %vm2606_vm6, %v8938_v55, %v16206_v8  ;;  %v17815_v8 = vld [vmem:[#allocation13_spill] sm:$0xff] }
 0xae5   : > { %v8996_v32 = vsel %vm2672_vm8, %v8964_v56, %v8846_v47  ;;  %v8844_v40 = vpop.permute.xlu0 %8843  ;;  %v8939_v30 = vsel %vm2540_vm4, %v17815_v8, %v16062_v21  ;;  %v17830_v8 = vld [vmem:[#allocation132_spill] sm:$0xff] }
 0xae6   : > { %9028 = vst.msk [vmem:[%s16254_s3 + $0x48] sm:$0xff] %vm2738_vm10, %v8996_v32  ;;  %v8995_v43 = vsel %vm2672_vm8, %v8963_v48, %v8844_v40  ;;  %v8971_v47 = vsel %vm2606_vm6, %v8939_v30, %v16212_v31  ;;  %v17816_v40 = vld [vmem:[#allocation14_spill] sm:$0xff]  ;;  %v17831_v30 = vld [vmem:[#allocation36_spill] sm:$0xff] }
 0xae7   : > { %9027 = vst.msk [vmem:[%s16254_s3 + $0x40] sm:$0xff] %vm2738_vm10, %v8995_v43  ;;  %v8942_v21 = vsel %vm2540_vm4, %v17816_v40, %v16076_v5  ;;  %v8941_v43 = vsel %vm2540_vm4, %v17817_v29, %v16078_v1 }
 0xae8   : > { %v8850_v28 = vpop.permute.xlu1 %8849  ;;  %v8974_v31 = vsel %vm2606_vm6, %v8942_v21, %v16214_v45  ;;  %v8973_v2 = vsel %vm2606_vm6, %v8941_v43, %v16216_v46  ;;  %v17819_v45 = vld [vmem:[#allocation20_spill] sm:$0xff]  ;;  %v17834_v43 = vld [vmem:[#allocation146_spill] sm:$0xff] }
 0xae9   : > { %v8998_v34 = vsel %vm2672_vm8, %v8966_v15, %v8850_v28  ;;  %v8848_v38 = vpop.permute.xlu0 %8847  ;;  %v17818_v15 = vld [vmem:[#allocation19_spill] sm:$0xff]  ;;  %v8943_v28 = vsel %vm2540_vm4, %v17819_v45, %v16094_v25  ;;  %v8946_v25 = vsel %vm2540_vm4, %v17820_v3, %v16108_v22 }
 0xaea   : > { %9030 = vst.msk [vmem:[%s16254_s3 + $0x58] sm:$0xff] %vm2738_vm10, %v8998_v34  ;;  %v8997_v4 = vsel %vm2672_vm8, %v8965_v10, %v8848_v38  ;;  %v8944_v1 = vsel %vm2540_vm4, %v17818_v15, %v16088_v61  ;;  %v8975_v34 = vsel %vm2606_vm6, %v8943_v28, %v16220_v19  ;;  %v8978_v19 = vsel %vm2606_vm6, %v8946_v25, %v16222_v13  ;;  %v17823_v13 = vld [vmem:[#allocation28_spill] sm:$0xff] }
 0xaeb   : > { %9029 = vst.msk [vmem:[%s16254_s3 + $0x50] sm:$0xff] %vm2738_vm10, %v8997_v4  ;;  %v8976_v46 = vsel %vm2606_vm6, %v8944_v1, %v16218_v58  ;;  %v17821_v58 = vld [vmem:[#allocation24_spill] sm:$0xff] }
 0xaec   : > { %v8854_v17 = vpop.permute.xlu1 %8853  ;;  %v8945_v63 = vsel %vm2540_vm4, %v17821_v58, %v16110_v36 }
 0xaed   : > { %v9000_v57 = vsel %vm2672_vm8, %v8968_v35, %v8854_v17  ;;  %v8852_v39 = vpop.permute.xlu0 %8851  ;;  %v8977_v9 = vsel %vm2606_vm6, %v8945_v63, %v16224_v0 }
 0xaee   : > { %9032 = vst.msk [vmem:[%s16254_s3 + $0x68] sm:$0xff] %vm2738_vm10, %v9000_v57  ;;  %v8999_v14 = vsel %vm2672_vm8, %v8967_v49, %v8852_v39  ;;  %v17822_v49 = vld [vmem:[#allocation27_spill] sm:$0xff]  ;;  %v8947_v57 = vsel %vm2540_vm4, %v17823_v13, %v16126_v6  ;;  %v8950_v6 = vsel %vm2540_vm4, %v17824_v54, %v16140_v60 }
 0xaef   : > { %9031 = vst.msk [vmem:[%s16254_s3 + $0x60] sm:$0xff] %vm2738_vm10, %v8999_v14  ;;  %v8948_v36 = vsel %vm2540_vm4, %v17822_v49, %v16120_v44  ;;  %v8979_v14 = vsel %vm2606_vm6, %v8947_v57, %v16228_v12 }
 0xaf0   : > { %v8858_v33 = vpop.permute.xlu1 %8857  ;;  %v8980_v0 = vsel %vm2606_vm6, %v8948_v36, %v16226_v18  ;;  %v17825_v18 = vld [vmem:[#allocation32_spill] sm:$0xff] }
 0xaf1   : > { %v9002_v50 = vsel %vm2672_vm8, %v8970_v42, %v8858_v33  ;;  %v8856_v16 = vpop.permute.xlu0 %8855  ;;  %v8949_v41 = vsel %vm2540_vm4, %v17825_v18, %v16142_v52  ;;  %v17826_v42 = vld [vmem:[#allocation111_spill] sm:$0xff] }
 0xaf2   : > { %9034 = vst.msk [vmem:[%s16254_s3 + $0x78] sm:$0xff] %vm2738_vm10, %v9002_v50  ;;  %v9001_v27 = vsel %vm2672_vm8, %v8969_v53, %v8856_v16  ;;  %v8982_v12 = vsel %vm2606_vm6, %v8950_v6, %v17826_v42  ;;  %v17827_v53 = vld [vmem:[#allocation74_spill] sm:$0xff]  ;;  %v17829_v52 = vld [vmem:[#allocation35_spill] sm:$0xff] }
 0xaf3   : > { %9033 = vst.msk [vmem:[%s16254_s3 + $0x70] sm:$0xff] %vm2738_vm10, %v9001_v27  ;;  %v8981_v50 = vsel %vm2606_vm6, %v8949_v41, %v17827_v53  ;;  %v8952_v26 = vsel %vm2540_vm4, %v17829_v52, %v17828_v7 }
 0xaf4   : > { %v8862_v56 = vpop.permute.xlu1 %8861 }
 0xaf5   : > { %v9004_v48 = vsel %vm2672_vm8, %v8972_v62, %v8862_v56  ;;  %v8860_v32 = vpop.permute.xlu0 %8859  ;;  %v8951_v62 = vsel %vm2540_vm4, %v17831_v30, %v17830_v8  ;;  %v17832_v56 = vld [vmem:[#allocation197_spill] sm:$0xff] }
 0xaf6   : > { %9036 = vst.msk [vmem:[%s16254_s3 + $0x88] sm:$0xff] %vm2738_vm10, %v9004_v48  ;;  %v9003_v24 = vsel %vm2672_vm8, %v8971_v47, %v8860_v32  ;;  %v8984_v47 = vsel %vm2606_vm6, %v8952_v26, %v17832_v56  ;;  %v17833_v32 = vld [vmem:[#allocation223_spill] sm:$0xff] }
 0xaf7   : > { %9035 = vst.msk [vmem:[%s16254_s3 + $0x80] sm:$0xff] %vm2738_vm10, %v9003_v24  ;;  %v8983_v24 = vsel %vm2606_vm6, %v8951_v62, %v17833_v32 }
 0xaf8   : > { %v8866_v20 = vpop.permute.xlu1 %8865 }
 0xaf9   : > { %v9006_v51 = vsel %vm2672_vm8, %v8974_v31, %v8866_v20  ;;  %v8864_v11 = vpop.permute.xlu0 %8863  ;;  %v17835_v31 = vld [vmem:[#allocation39_spill] sm:$0xff] }
 0xafa   : > { %9038 = vst.msk [vmem:[%s16254_s3 + $0x98] sm:$0xff] %vm2738_vm10, %v9006_v51  ;;  %v9005_v5 = vsel %vm2672_vm8, %v8973_v2, %v8864_v11  ;;  %v8954_v20 = vsel %vm2540_vm4, %v17835_v31, %v17834_v43  ;;  %v17836_v2 = vld [vmem:[#allocation170_spill] sm:$0xff]  ;;  %v17837_v51 = vld [vmem:[#allocation40_spill] sm:$0xff] }
 0xafb   : > { %9037 = vst.msk [vmem:[%s16254_s3 + $0x90] sm:$0xff] %vm2738_vm10, %v9005_v5  ;;  %v8953_v11 = vsel %vm2540_vm4, %v17837_v51, %v17836_v2  ;;  %v17838_v5 = vld [vmem:[#allocation58_spill] sm:$0xff] }
 0xafc   : > { %v8870_v10 = vpop.permute.xlu1 %8869  ;;  %v8986_v15 = vsel %vm2606_vm6, %v8954_v20, %v17838_v5  ;;  %v8985_v45 = vsel %vm2606_vm6, %v8953_v11, %v16243_v59 }
 0xafd   : > { %v9008_v38 = vsel %vm2672_vm8, %v8976_v46, %v8870_v10  ;;  %v8868_v4 = vpop.permute.xlu0 %8867 }
 0xafe   : > { %9040 = vst.msk [vmem:[%s16254_s3 + $0xa8] sm:$0xff] %vm2738_vm10, %v9008_v38  ;;  %v9007_v61 = vsel %vm2672_vm8, %v8975_v34, %v8868_v4 }
 0xaff   : > { %9039 = vst.msk [vmem:[%s16254_s3 + $0xa0] sm:$0xff] %vm2738_vm10, %v9007_v61 }
 0xb00   : > { %v8874_v23 = vpop.permute.xlu1 %8873 }
 0xb01   : > { %v9010_v35 = vsel %vm2672_vm8, %v8978_v19, %v8874_v23  ;;  %v8872_v17 = vpop.permute.xlu0 %8871 }
 0xb02   : > { %9042 = vst.msk [vmem:[%s16254_s3 + $0xb8] sm:$0xff] %vm2738_vm10, %v9010_v35  ;;  %v9009_v22 = vsel %vm2672_vm8, %v8977_v9, %v8872_v17 }
 0xb03   : > { %9041 = vst.msk [vmem:[%s16254_s3 + $0xb0] sm:$0xff] %vm2738_vm10, %v9009_v22 }
 0xb04   : > { %v8878_v39 = vpop.permute.xlu1 %8877 }
 0xb05   : > { %v9012_v37 = vsel %vm2672_vm8, %v8980_v0, %v8878_v39  ;;  %v8876_v55 = vpop.permute.xlu0 %8875 }
 0xb06   : > { %9044 = vst.msk [vmem:[%s16254_s3 + $0xc8] sm:$0xff] %vm2738_vm10, %v9012_v37  ;;  %v9011_v44 = vsel %vm2672_vm8, %v8979_v14, %v8876_v55 }
 0xb07   : > { %9043 = vst.msk [vmem:[%s16254_s3 + $0xc0] sm:$0xff] %vm2738_vm10, %v9011_v44 }
 0xb08   : > { %v8882_v33 = vpop.permute.xlu1 %8881 }
 0xb09   : > { %v9014_v16 = vsel %vm2672_vm8, %v8982_v12, %v8882_v33  ;;  %v8880_v27 = vpop.permute.xlu0 %8879 }
 0xb0a   : > { %9046 = vst.msk [vmem:[%s16254_s3 + $0xd8] sm:$0xff] %vm2738_vm10, %v9014_v16  ;;  %v9013_v60 = vsel %vm2672_vm8, %v8981_v50, %v8880_v27 }
 0xb0b   : > { %9045 = vst.msk [vmem:[%s16254_s3 + $0xd0] sm:$0xff] %vm2738_vm10, %v9013_v60 }
 0xb0c   : > { %v8886_v48 = vpop.permute.xlu1 %8885 }
 0xb0d   : > { %v9016_v40 = vsel %vm2672_vm8, %v8984_v47, %v8886_v48  ;;  %v8884_v21 = vpop.permute.xlu0 %8883 }
 0xb0e   : > { %9048 = vst.msk [vmem:[%s16254_s3 + $0xe8] sm:$0xff] %vm2738_vm10, %v9016_v40  ;;  %v9015_v29 = vsel %vm2672_vm8, %v8983_v24, %v8884_v21 }
 0xb0f   : > { %9047 = vst.msk [vmem:[%s16254_s3 + $0xe0] sm:$0xff] %vm2738_vm10, %v9015_v29 }
 0xb10   : > { %v8890_v1 = vpop.permute.xlu1 %8889 }
 0xb11   : > { %v9018_v28 = vsel %vm2672_vm8, %v8986_v15, %v8890_v1  ;;  %v8888_v46 = vpop.permute.xlu0 %8887 }
 0xb12   : > { %9050 = vst.msk [vmem:[%s16254_s3 + $0xf8] sm:$0xff] %vm2738_vm10, %v9018_v28  ;;  %v9017_v10 = vsel %vm2672_vm8, %v8985_v45, %v8888_v46 }
 0xb13   : > { %9049 = vst.msk [vmem:[%s16254_s3 + $0xf0] sm:$0xff] %vm2738_vm10, %v9017_v10 }
 0xb14   : > { %9962 = shalt.err (!%p9959_p3)
}
 0xb15   : > { %s9963_s1 = scalar_lea.hbm %s16493_s19, 4096  ;;  %s9967_s26 = scalar_lea.hbm %s16565_s16, 8192 }
 0xb16   : > { %p9964_p4 = scmp.ne.s32.totalorder %s16493_s19, %s9963_s1  ;;  %p9968_p9 = scmp.lt.u32.totalorder %s16493_s19, %s16565_s16 }
 0xb17   : > { %p9969_p10 = scmp.lt.u32.totalorder %s9967_s26, %s9963_s1  ;;  %p9971_p12 = scmp.lt.u32.totalorder %s9963_s1, %s16493_s19 }
 0xb18   : > { %p9965_p7 = pnand %p9964_p4, %p10154_p5 }
 0xb19   : > { %p9970_p11 = por %p9969_p10, %p9968_p9 }
 0xb1a   : > { %p9966_p8 = pneg %p9965_p7 }
 0xb1b   : > { %p9972_p13 = por %p9971_p12, %p9970_p11 }
 0xb1d   : > { %p9973_p0 = pnand %p9972_p13, %p9966_p8 }
 0xb1f   : > { %9976 = shalt.err (!%p9973_p0)
}
 0xb20   : > { %s10030_s29 = smov 128  }
 0xb21   : > { %9812 = dma.vmem_to_hbm [thread:$0]  (%p10154_p5), %s16498_s18, 4096, %s16493_s19, %s16507_s20, %s10030_s29, %s10030_s29, %s17096_s28  }
 0xb22 PF: > { %p9818_p1 = scmp.ge.s32.totalorder %s10011_s24, 2  ;;  %s9080_s4 = sand.u32 1, %s9999_s21  }
 0xb23   : > { %s9081_s5 = scalar_lea.sflag [#allocation7], %s9080_s4 }
 0xb24   : > { %p9815_p2 = pnand %p9818_p1, %p10158_p6 }
 0xb26   : > { %9994 = dma.done.wait (!%p9815_p2), %s9081_s5, 4096  }
 0xb27   : > { %9996 = vsyncadd (!%p9815_p2), %s9081_s5, 4294963200  ;;  %p26_p3 = scmp.ge.s32.totalorder %s10141_s27, 4   ;;  %s17839_s21 = smov %s10003_s22 }
 0xb28   : > { %s17840_s22 = smov %s10007_s23  ;;  %s17841_s23 = smov %s10152_s30 }
 0xb29   : > { %s17842_s24 = smov %s10141_s27  ;;  %28 = sbr.rel (!%p26_p3) target bundleno = 10 (0xa), region = 131 }
 0xb30   :  { %9086 = vsyncpa [#allocation7], 1 }
 0xb31   :  { %9088 = vsyncpa [#allocation7 + $0x1], 1 }

</bundles_post_ra>
